<compile_context>
chip_gen: v6e
topology: v6e:2x2x1
jax: 0.10.0
libtpu: 0.0.40
codegen_flags: <defaults>
</compile_context>

<pallas_src>
import functools

import jax
import jax.numpy as jnp
from jax import lax
from jax.experimental import pallas as pl
from jax.experimental.pallas import tpu as pltpu


# ---------------------------------------------------------------------------
# Helpers
# ---------------------------------------------------------------------------
def _vmem_limit_bytes():
    """Device-aware scoped-VMEM budget (~48MiB on v7x, up to 96MiB on v5e/v6e)."""
    try:
        cap = int(pltpu.get_tpu_info().vmem_capacity_bytes)
        return int(max(32 * 1024 * 1024,
                       min(cap - 16 * 1024 * 1024, 96 * 1024 * 1024)))
    except Exception:
        return 48 * 1024 * 1024


def _pick_seq_tile(n):
    for t in (512, 256, 128):
        if n % t == 0:
            return t
    return n


def _pick_row_tile(height, width):
    # Largest TH dividing H with TH*W a lane-dense multiple of 128 and <= 512.
    best = None
    for th in range(1, height + 1):
        if height % th == 0 and (th * width) % 128 == 0 and th * width <= 512:
            best = th
    return best if best is not None else height


def _pad_rows(w, rows):
    pad = rows - w.shape[0]
    if pad <= 0:
        return w
    return jnp.concatenate(
        [w, jnp.zeros((pad,) + w.shape[1:], w.dtype)], axis=0)


# ---------------------------------------------------------------------------
# Kernel 1: fused q/k/v 1x1 projection.  Each pixel is projected exactly once.
#   qkv = [Wq_pad; Wk_pad; Wv] @ x + [bq_pad; bk_pad; bv]
# Outputs are tile-blocked so the flash kernel can index key tiles directly.
# ---------------------------------------------------------------------------
def _qkv_proj_kernel(x_ref, w_ref, b_ref, q_ref, kv_ref, *, c8p):
    x = x_ref[...]                                                    # (C, T) bf16
    qkv = jnp.dot(w_ref[...], x,
                  preferred_element_type=jnp.float32) + b_ref[...]   # (2*C8p+C, T)
    qkv = qkv.astype(jnp.bfloat16)
    q_ref[...] = qkv[:c8p, :]                                         # (C8p, T)
    kv_ref[...] = qkv[c8p:, :]                                        # (C8p+C, T)


# ---------------------------------------------------------------------------
# Kernel 2: flash attention + residual.
# Layout per batch element: channels on sublanes, pixels on lanes.
#   q tile (C8p, TQ); kv resident (NT, C8p+C, TK); energy^T tile (TK, TQ);
#   running m, l (1, TQ); accumulator (C, TQ) -> output written in (C, N).
# ---------------------------------------------------------------------------
def _flash_attention_kernel(q_ref, kv_ref, xres_ref, o_ref,
                            m_scr, l_scr, acc_scr, *, c8p):
    ki = pl.program_id(2)
    nk = pl.num_programs(2)

    @pl.when(ki == 0)
    def _init():
        m_scr[...] = jnp.full(m_scr.shape, -jnp.inf, m_scr.dtype)
        l_scr[...] = jnp.zeros_like(l_scr)
        acc_scr[...] = jnp.zeros_like(acc_scr)

    q = q_ref[...]                       # (C8p, TQ) bf16 (fetched once per qi)
    kv = kv_ref[ki]                      # (C8p+C, TK) bf16, from resident VMEM
    k = kv[:c8p, :]                      # (C8p, TK)
    v = kv[c8p:, :]                      # (C,   TK)

    # energy^T tile: e[j, i] = sum_c k[c, j] q[c, i]  -> (TK, TQ), f32 acc.
    e = lax.dot_general(k, q, (((0,), (0,)), ((), ())),
                        preferred_element_type=jnp.float32)

    # Online softmax update (f32 elementwise; v5e-safe).
    m_prev = m_scr[...]
    m_new = jnp.maximum(m_prev, jnp.max(e, axis=0, keepdims=True))
    alpha = jnp.exp(m_prev - m_new)
    p = jnp.exp(e - m_new)
    l_scr[...] = alpha * l_scr[...] + jnp.sum(p, axis=0, keepdims=True)
    acc_scr[...] = alpha * acc_scr[...] + jnp.dot(
        v, p.astype(jnp.bfloat16), preferred_element_type=jnp.float32)
    m_scr[...] = m_new

    @pl.when(ki == nk - 1)
    def _finalize():
        inv_l = pl.reciprocal(l_scr[...], approx=True)
        att = acc_scr[...] * inv_l + xres_ref[...].astype(jnp.float32)
        o_ref[...] = att.astype(o_ref.dtype)


# ---------------------------------------------------------------------------
# Kernel 3: row-tiled 3x3 conv (padding=1) as 9 accumulating shifted matmuls.
# Input window per tile: (C, (TH+2)*W + 2) bf16 — TH output rows plus one halo
# row above/below (zero-padded at image top/bottom) plus one guard lane per
# side so every tap is a static in-range slice.  Column edges are masked.
# ---------------------------------------------------------------------------
def _conv3x3_kernel(win_ref, w_ref, b_ref, o_ref, *, width, th):
    n_out = th * width
    cout = o_ref.shape[0]
    a = win_ref[...]                                                  # bf16
    col = lax.broadcasted_iota(jnp.int32, (1, n_out), 1) % width

    acc = jnp.zeros((cout, n_out), jnp.float32)
    for kh in range(3):
        for kw in range(3):
            dh, dw = kh - 1, kw - 1
            start = (dh + 1) * width + dw + 1      # +1 for the left guard lane
            tap = a[:, start:start + n_out]        # (C, n_out) bf16
            if dw != 0:
                valid = (col + dw >= 0) & (col + dw < width)
                tap = jnp.where(valid, tap, jnp.zeros_like(tap))
            acc = acc + jnp.dot(w_ref[kh * 3 + kw], tap,
                                preferred_element_type=jnp.float32)

    o_ref[...] = (acc + b_ref[...]).astype(o_ref.dtype)


# ---------------------------------------------------------------------------
# Wrapper
# ---------------------------------------------------------------------------
def attention_decoder_forward(x, params):
    B, C, H, W = x.shape
    N = H * W
    C8 = params["wq"].shape[0]
    Cout = params["w_conv"].shape[0]
    C8p = ((C8 + 7) // 8) * 8

    T = _pick_seq_tile(N)
    NT = N // T
    vmem_limit = _vmem_limit_bytes()

    x_bf = x.reshape(B, C, N).astype(jnp.bfloat16)

    # Fused projection weights: [Wq_pad; Wk_pad; Wv] and matching biases.
    wq_p = _pad_rows(params["wq"], C8p)
    wk_p = _pad_rows(params["wk"], C8p)
    bq_p = _pad_rows(params["bq"].reshape(-1, 1), C8p)
    bk_p = _pad_rows(params["bk"].reshape(-1, 1), C8p)
    w_all = jnp.concatenate([wq_p, wk_p, params["wv"]],
                            axis=0).astype(jnp.bfloat16)              # (2*C8p+C, C)
    b_all = jnp.concatenate([bq_p, bk_p, params["bv"].reshape(-1, 1)],
                            axis=0).astype(jnp.float32)               # (2*C8p+C, 1)

    # ---- kernel 1: q/k/v projection ---------------------------------------
    proj = functools.partial(_qkv_proj_kernel, c8p=C8p)
    q_all, kv_all = pl.pallas_call(
        proj,
        out_shape=(jax.ShapeDtypeStruct((B, NT, C8p, T), jnp.bfloat16),
                   jax.ShapeDtypeStruct((B, NT, C8p + C, T), jnp.bfloat16)),
        grid_spec=pltpu.PrefetchScalarGridSpec(
            num_scalar_prefetch=0,
            grid=(B, NT),
            in_specs=[
                pl.BlockSpec((None, C, T), lambda b, t: (b, 0, t)),
                pl.BlockSpec((2 * C8p + C, C), lambda b, t: (0, 0)),
                pl.BlockSpec((2 * C8p + C, 1), lambda b, t: (0, 0)),
            ],
            out_specs=[
                pl.BlockSpec((None, None, C8p, T), lambda b, t: (b, t, 0, 0)),
                pl.BlockSpec((None, None, C8p + C, T), lambda b, t: (b, t, 0, 0)),
            ],
        ),
        compiler_params=pltpu.CompilerParams(
            dimension_semantics=("parallel", "parallel"),
            vmem_limit_bytes=vmem_limit,
        ),
    )(x_bf, w_all, b_all)

    # ---- kernel 2: flash attention + residual ------------------------------
    flash = functools.partial(_flash_attention_kernel, c8p=C8p)
    att = pl.pallas_call(
        flash,
        out_shape=jax.ShapeDtypeStruct((B, C, N), jnp.bfloat16),
        grid_spec=pltpu.PrefetchScalarGridSpec(
            num_scalar_prefetch=0,
            grid=(B, NT, NT),
            in_specs=[
                pl.BlockSpec((None, None, C8p, T),
                             lambda b, qi, ki: (b, qi, 0, 0)),          # q tile
                pl.BlockSpec((None, NT, C8p + C, T),
                             lambda b, qi, ki: (b, 0, 0, 0)),           # kv resident
                pl.BlockSpec((None, C, T),
                             lambda b, qi, ki: (b, 0, qi)),             # residual x
            ],
            out_specs=pl.BlockSpec((None, C, T), lambda b, qi, ki: (b, 0, qi)),
            scratch_shapes=[
                pltpu.VMEM((1, T), jnp.float32),     # running max
                pltpu.VMEM((1, T), jnp.float32),     # running denom
                pltpu.VMEM((C, T), jnp.float32),     # output accumulator
            ],
        ),
        compiler_params=pltpu.CompilerParams(
            dimension_semantics=("parallel", "parallel", "arbitrary"),
            vmem_limit_bytes=vmem_limit,
        ),
    )(q_all, kv_all, x_bf)

    # ---- kernel 3: row-tiled 3x3 conv --------------------------------------
    TH = _pick_row_tile(H, W)
    nt = H // TH
    lwin = (TH + 2) * W + 2

    att_rows = jnp.pad(att.reshape(B, C, H, W),
                       ((0, 0), (0, 0), (1, 1), (0, 0)))              # zero halo rows
    win = jnp.stack([att_rows[:, :, t * TH:t * TH + TH + 2, :]
                     for t in range(nt)], axis=1)                     # (B,nt,C,TH+2,W)
    win = win.reshape(B, nt, C, (TH + 2) * W)
    win = jnp.pad(win, ((0, 0), (0, 0), (0, 0), (1, 1)))              # guard lanes

    w_taps = jnp.transpose(params["w_conv"], (2, 3, 0, 1)).reshape(9, Cout, C)
    w_taps = w_taps.astype(jnp.bfloat16)
    b_conv = params["b_conv"].reshape(Cout, 1).astype(jnp.float32)

    conv = functools.partial(_conv3x3_kernel, width=W, th=TH)
    out = pl.pallas_call(
        conv,
        out_shape=jax.ShapeDtypeStruct((B, Cout, N), jnp.float32),
        grid_spec=pltpu.PrefetchScalarGridSpec(
            num_scalar_prefetch=0,
            grid=(B, nt),
            in_specs=[
                pl.BlockSpec((None, None, C, lwin), lambda b, t: (b, t, 0, 0)),
                pl.BlockSpec((9, Cout, C), lambda b, t: (0, 0, 0)),
                pl.BlockSpec((Cout, 1), lambda b, t: (0, 0)),
            ],
            out_specs=pl.BlockSpec((None, Cout, TH * W), lambda b, t: (b, 0, t)),
        ),
        compiler_params=pltpu.CompilerParams(
            dimension_semantics=("parallel", "parallel"),
            vmem_limit_bytes=vmem_limit,
        ),
    )(win, w_taps, b_conv)

    return out.reshape(B, Cout, H, W)


# ---------------------------------------------------------------------------
# Pure-JAX f32 reference (mirrors the PyTorch forward).
# ---------------------------------------------------------------------------
def reference_forward(x, params):
    B, C, H, W = x.shape
    N = H * W
    xf = x.reshape(B, C, N)
    q = jnp.einsum("oc,bcn->bon", params["wq"], xf) + params["bq"][None, :, None]
    k = jnp.einsum("oc,bcn->bon", params["wk"], xf) + params["bk"][None, :, None]
    v = jnp.einsum("oc,bcn->bon", params["wv"], xf) + params["bv"][None, :, None]
    energy = jnp.einsum("bci,bcj->bij", q, k)
    attn = jax.nn.softmax(energy, axis=-1)
    out = jnp.einsum("bcj,bij->bci", v, attn) + xf
    out = out.reshape(B, C, H, W)
    conv = lax.conv_general_dilated(
        out, params["w_conv"], window_strides=(1, 1), padding="SAME",
        dimension_numbers=("NCHW", "OIHW", "NCHW"))
    return conv + params["b_conv"][None, :, None, None]


def make_params(key, in_channels, out_channels):
    C = in_channels
    C8 = in_channels // 8
    ks = jax.random.split(key, 8)
    return {
        "wq": 0.1 * jax.random.normal(ks[0], (C8, C), jnp.float32),
        "bq": 0.05 * jax.random.normal(ks[1], (C8,), jnp.float32),
        "wk": 0.1 * jax.random.normal(ks[2], (C8, C), jnp.float32),
        "bk": 0.05 * jax.random.normal(ks[3], (C8,), jnp.float32),
        "wv": 0.1 * jax.random.normal(ks[4], (C, C), jnp.float32),
        "bv": 0.05 * jax.random.normal(ks[5], (C,), jnp.float32),
        "w_conv": 0.1 * jax.random.normal(ks[6], (out_channels, C, 3, 3), jnp.float32),
        "b_conv": 0.05 * jax.random.normal(ks[7], (out_channels,), jnp.float32),
    }


if __name__ == "__main__":
    # N = 1024 -> T = 512: two query tiles x two key tiles (exercises the online
    # softmax and the resident-kv dynamic tile index); conv runs two row tiles.
    B, C_in, C_out, H, W = 2, 16, 8, 32, 32

    key = jax.random.PRNGKey(0)
    k_x, k_p = jax.random.split(key)
    x = jax.random.normal(k_x, (B, C_in, H, W), jnp.float32)
    params = make_params(k_p, C_in, C_out)

    fwd = jax.jit(attention_decoder_forward)
    out = jax.block_until_ready(fwd(x, params))

    ref = reference_forward(x, params)
    assert out.shape == (B, C_out, H, W)
    max_err = jnp.max(jnp.abs(out - ref))
    # bf16 MXU operands / bf16 intermediate (f32 accumulation) -> loosened tol.
    assert jnp.allclose(out, ref, atol=5e-2, rtol=5e-2), f"max abs err = {max_err}"

    print("KERNEL_OK")
</pallas_src>

<mosaic_0001>
module attributes {stable_mosaic.version = 11 : i64} {
  func.func @_qkv_proj_kernel(%arg0: i32, %arg1: i32, %arg2: memref<1x16x512xbf16, #tpu.memory_space<vmem>>, %arg3: memref<32x16xbf16, #tpu.memory_space<vmem>>, %arg4: memref<32x1xf32, #tpu.memory_space<vmem>>, %arg5: memref<1x1x8x512xbf16, #tpu.memory_space<vmem>>, %arg6: memref<1x1x24x512xbf16, #tpu.memory_space<vmem>>) attributes {dimension_semantics = [#tpu.dimension_semantics<parallel>, #tpu.dimension_semantics<parallel>], iteration_bounds = array<i64: 2, 2>, scalar_prefetch = 0 : i64, scratch_operands = 0 : i64, tpu.core_type = #tpu.core_type<tc>, window_params = [{transform_indices = @transform_0, window_bounds = array<i64: 1, 16, 512>}, {pipeline_mode = #tpu.pipeline_mode<synchronous>, transform_indices = @transform_1, window_bounds = array<i64: 32, 16>}, {pipeline_mode = #tpu.pipeline_mode<synchronous>, transform_indices = @transform_2, window_bounds = array<i64: 32, 1>}, {transform_indices = @transform_3, window_bounds = array<i64: 1, 1, 8, 512>}, {transform_indices = @transform_4, window_bounds = array<i64: 1, 1, 24, 512>}]} {
    %c0 = arith.constant 0 : index
    %c0_0 = arith.constant 0 : index
    %c0_1 = arith.constant 0 : index
    %0 = vector.load %arg2[%c0, %c0_0, %c0_1] : memref<1x16x512xbf16, #tpu.memory_space<vmem>>, vector<1x16x512xbf16>
    %1 = vector.shape_cast %0 : vector<1x16x512xbf16> to vector<16x512xbf16>
    %c0_2 = arith.constant 0 : index
    %c0_3 = arith.constant 0 : index
    %2 = vector.load %arg3[%c0_2, %c0_3] : memref<32x16xbf16, #tpu.memory_space<vmem>>, vector<32x16xbf16>
    %cst = arith.constant dense<0.000000e+00> : vector<32x512xf32>
    %3 = tpu.matmul %2, %1, %cst {dimension_numbers = #tpu.dot_dimension_numbers<[1], [0], [0], [1], [0, 0, 1, 1], [], []>} : vector<32x16xbf16>, vector<16x512xbf16>, vector<32x512xf32> -> vector<32x512xf32>
    %c0_4 = arith.constant 0 : index
    %c0_5 = arith.constant 0 : index
    %4 = vector.load %arg4[%c0_4, %c0_5] : memref<32x1xf32, #tpu.memory_space<vmem>>, vector<32x1xf32>
    %5 = vector.broadcast %4 : vector<32x1xf32> to vector<32x512xf32>
    %6 = arith.addf %3, %5 : vector<32x512xf32>
    %7 = arith.truncf %6 : vector<32x512xf32> to vector<32x512xbf16>
    %8 = vector.extract_strided_slice %7 {offsets = [0, 0], sizes = [8, 512], strides = [1, 1]} : vector<32x512xbf16> to vector<8x512xbf16>
    %c0_6 = arith.constant 0 : index
    %c0_7 = arith.constant 0 : index
    %c0_8 = arith.constant 0 : index
    %c0_9 = arith.constant 0 : index
    %9 = vector.load %arg5[%c0_6, %c0_7, %c0_8, %c0_9] : memref<1x1x8x512xbf16, #tpu.memory_space<vmem>>, vector<1x1x8x512xbf16>
    %10 = vector.shape_cast %9 : vector<1x1x8x512xbf16> to vector<8x512xbf16>
    %11 = vector.shape_cast %8 : vector<8x512xbf16> to vector<1x1x8x512xbf16>
    tpu.vector_store %arg5[%c0_6, %c0_7, %c0_8, %c0_9], %11 {strides = array<i32>} : memref<1x1x8x512xbf16, #tpu.memory_space<vmem>>, vector<1x1x8x512xbf16>,
    %12 = vector.extract_strided_slice %7 {offsets = [8, 0], sizes = [24, 512], strides = [1, 1]} : vector<32x512xbf16> to vector<24x512xbf16>
    %c0_10 = arith.constant 0 : index
    %c0_11 = arith.constant 0 : index
    %c0_12 = arith.constant 0 : index
    %c0_13 = arith.constant 0 : index
    %13 = vector.load %arg6[%c0_10, %c0_11, %c0_12, %c0_13] : memref<1x1x24x512xbf16, #tpu.memory_space<vmem>>, vector<1x1x24x512xbf16>
    %14 = vector.shape_cast %13 : vector<1x1x24x512xbf16> to vector<24x512xbf16>
    %15 = vector.shape_cast %12 : vector<24x512xbf16> to vector<1x1x24x512xbf16>
    tpu.vector_store %arg6[%c0_10, %c0_11, %c0_12, %c0_13], %15 {strides = array<i32>} : memref<1x1x24x512xbf16, #tpu.memory_space<vmem>>, vector<1x1x24x512xbf16>,
    return
  }
  func.func @transform_0(%arg0: i32, %arg1: i32) -> (i32, i32, i32) {
    %c0_i32 = arith.constant 0 : i32
    %c0_i32_0 = arith.constant 0 : i32
    return %arg0, %c0_i32, %arg1 : i32, i32, i32
  }
  func.func @transform_1(%arg0: i32, %arg1: i32) -> (i32, i32) {
    %c0_i32 = arith.constant 0 : i32
    %c0_i32_0 = arith.constant 0 : i32
    %c0_i32_1 = arith.constant 0 : i32
    return %c0_i32, %c0_i32_0 : i32, i32
  }
  func.func @transform_2(%arg0: i32, %arg1: i32) -> (i32, i32) {
    %c0_i32 = arith.constant 0 : i32
    %c0_i32_0 = arith.constant 0 : i32
    %c0_i32_1 = arith.constant 0 : i32
    return %c0_i32, %c0_i32_0 : i32, i32
  }
  func.func @transform_3(%arg0: i32, %arg1: i32) -> (i32, i32, i32, i32) {
    %c0_i32 = arith.constant 0 : i32
    %c0_i32_0 = arith.constant 0 : i32
    %c0_i32_1 = arith.constant 0 : i32
    return %arg0, %arg1, %c0_i32, %c0_i32_0 : i32, i32, i32, i32
  }
  func.func @transform_4(%arg0: i32, %arg1: i32) -> (i32, i32, i32, i32) {
    %c0_i32 = arith.constant 0 : i32
    %c0_i32_0 = arith.constant 0 : i32
    %c0_i32_1 = arith.constant 0 : i32
    return %arg0, %arg1, %c0_i32, %c0_i32_0 : i32, i32, i32, i32
  }
}

module attributes {stable_mosaic.version = 11 : i64} {
  func.func @_flash_attention_kernel(%arg0: i32, %arg1: i32, %arg2: i32, %arg3: memref<1x1x8x512xbf16, #tpu.memory_space<vmem>>, %arg4: memref<1x2x24x512xbf16, #tpu.memory_space<vmem>>, %arg5: memref<1x16x512xbf16, #tpu.memory_space<vmem>>, %arg6: memref<1x16x512xbf16, #tpu.memory_space<vmem>>, %arg7: memref<1x512xf32, #tpu.memory_space<vmem>>, %arg8: memref<1x512xf32, #tpu.memory_space<vmem>>, %arg9: memref<16x512xf32, #tpu.memory_space<vmem>>) attributes {dimension_semantics = [#tpu.dimension_semantics<parallel>, #tpu.dimension_semantics<parallel>, #tpu.dimension_semantics<arbitrary>], iteration_bounds = array<i64: 2, 2, 2>, scalar_prefetch = 0 : i64, scratch_operands = 3 : i64, tpu.core_type = #tpu.core_type<tc>, window_params = [{transform_indices = @transform_0, window_bounds = array<i64: 1, 1, 8, 512>}, {transform_indices = @transform_1, window_bounds = array<i64: 1, 2, 24, 512>}, {transform_indices = @transform_2, window_bounds = array<i64: 1, 16, 512>}, {transform_indices = @transform_3, window_bounds = array<i64: 1, 16, 512>}]} {
    %c0_i32 = arith.constant 0 : i32
    %0 = arith.cmpi eq, %arg2, %c0_i32 : i32
    %1 = arith.extui %0 : i1 to i32
    %c0_i32_0 = arith.constant 0 : i32
    %2 = arith.cmpi ne, %1, %c0_i32_0 : i32
    scf.if %2 {
      %cst_23 = arith.constant 0xFF800000 : f32
      %37 = vector.broadcast %cst_23 : f32 to vector<1x512xf32>
      %c0_24 = arith.constant 0 : index
      %c0_25 = arith.constant 0 : index
      %38 = vector.load %arg7[%c0_24, %c0_25] : memref<1x512xf32, #tpu.memory_space<vmem>>, vector<1x512xf32>
      tpu.vector_store %arg7[%c0_24, %c0_25], %37 {strides = array<i32>} : memref<1x512xf32, #tpu.memory_space<vmem>>, vector<1x512xf32>,
      %cst_26 = arith.constant 0.000000e+00 : f32
      %39 = vector.broadcast %cst_26 : f32 to vector<1x512xf32>
      %c0_27 = arith.constant 0 : index
      %c0_28 = arith.constant 0 : index
      %40 = vector.load %arg8[%c0_27, %c0_28] : memref<1x512xf32, #tpu.memory_space<vmem>>, vector<1x512xf32>
      tpu.vector_store %arg8[%c0_27, %c0_28], %39 {strides = array<i32>} : memref<1x512xf32, #tpu.memory_space<vmem>>, vector<1x512xf32>,
      %cst_29 = arith.constant 0.000000e+00 : f32
      %41 = vector.broadcast %cst_29 : f32 to vector<16x512xf32>
      %c0_30 = arith.constant 0 : index
      %c0_31 = arith.constant 0 : index
      %42 = vector.load %arg9[%c0_30, %c0_31] : memref<16x512xf32, #tpu.memory_space<vmem>>, vector<16x512xf32>
      tpu.vector_store %arg9[%c0_30, %c0_31], %41 {strides = array<i32>} : memref<16x512xf32, #tpu.memory_space<vmem>>, vector<16x512xf32>,
    } else {
    }
    %c0 = arith.constant 0 : index
    %c0_1 = arith.constant 0 : index
    %c0_2 = arith.constant 0 : index
    %c0_3 = arith.constant 0 : index
    %3 = vector.load %arg3[%c0, %c0_1, %c0_2, %c0_3] : memref<1x1x8x512xbf16, #tpu.memory_space<vmem>>, vector<1x1x8x512xbf16>
    %4 = vector.shape_cast %3 : vector<1x1x8x512xbf16> to vector<8x512xbf16>
    %c0_4 = arith.constant 0 : index
    %5 = arith.index_cast %arg2 : i32 to index
    %c0_5 = arith.constant 0 : index
    %c0_6 = arith.constant 0 : index
    %6 = vector.load %arg4[%c0_4, %5, %c0_5, %c0_6] : memref<1x2x24x512xbf16, #tpu.memory_space<vmem>>, vector<1x1x24x512xbf16>
    %7 = vector.shape_cast %6 : vector<1x1x24x512xbf16> to vector<24x512xbf16>
    %8 = vector.extract_strided_slice %7 {offsets = [0, 0], sizes = [8, 512], strides = [1, 1]} : vector<24x512xbf16> to vector<8x512xbf16>
    %9 = vector.extract_strided_slice %7 {offsets = [8, 0], sizes = [16, 512], strides = [1, 1]} : vector<24x512xbf16> to vector<16x512xbf16>
    %cst = arith.constant dense<0.000000e+00> : vector<512x512xf32>
    %10 = tpu.matmul %8, %4, %cst {dimension_numbers = #tpu.dot_dimension_numbers<[0], [0], [1], [1], [0, 1, 1, 1], [], []>} : vector<8x512xbf16>, vector<8x512xbf16>, vector<512x512xf32> -> vector<512x512xf32>
    %c0_7 = arith.constant 0 : index
    %c0_8 = arith.constant 0 : index
    %11 = vector.load %arg7[%c0_7, %c0_8] : memref<1x512xf32, #tpu.memory_space<vmem>>, vector<1x512xf32>
    %cst_9 = arith.constant dense<0xFF800000> : vector<512xf32>
    %12 = vector.multi_reduction <maximumf>, %10, %cst_9 [0] : vector<512x512xf32> to vector<512xf32>
    %13 = vector.shape_cast %12 : vector<512xf32> to vector<1x512xf32>
    %14 = arith.maximumf %11, %13 : vector<1x512xf32>
    %15 = arith.subf %11, %14 : vector<1x512xf32>
    %16 = math.exp %15 : vector<1x512xf32>
    %17 = vector.broadcast %14 : vector<1x512xf32> to vector<512x512xf32>
    %18 = arith.subf %10, %17 : vector<512x512xf32>
    %19 = math.exp %18 : vector<512x512xf32>
    %c0_10 = arith.constant 0 : index
    %c0_11 = arith.constant 0 : index
    %20 = vector.load %arg8[%c0_10, %c0_11] : memref<1x512xf32, #tpu.memory_space<vmem>>, vector<1x512xf32>
    %21 = arith.mulf %16, %20 : vector<1x512xf32>
    %cst_12 = arith.constant dense<0.000000e+00> : vector<512xf32>
    %22 = vector.multi_reduction <add>, %19, %cst_12 [0] : vector<512x512xf32> to vector<512xf32>
    %23 = vector.shape_cast %22 : vector<512xf32> to vector<1x512xf32>
    %24 = arith.addf %21, %23 : vector<1x512xf32>
    %c0_13 = arith.constant 0 : index
    %c0_14 = arith.constant 0 : index
    %25 = vector.load %arg8[%c0_13, %c0_14] : memref<1x512xf32, #tpu.memory_space<vmem>>, vector<1x512xf32>
    tpu.vector_store %arg8[%c0_13, %c0_14], %24 {strides = array<i32>} : memref<1x512xf32, #tpu.memory_space<vmem>>, vector<1x512xf32>,
    %c0_15 = arith.constant 0 : index
    %c0_16 = arith.constant 0 : index
    %26 = vector.load %arg9[%c0_15, %c0_16] : memref<16x512xf32, #tpu.memory_space<vmem>>, vector<16x512xf32>
    %27 = vector.broadcast %16 : vector<1x512xf32> to vector<16x512xf32>
    %28 = arith.mulf %27, %26 : vector<16x512xf32>
    %29 = arith.truncf %19 : vector<512x512xf32> to vector<512x512xbf16>
    %cst_17 = arith.constant dense<0.000000e+00> : vector<16x512xf32>
    %30 = tpu.matmul %9, %29, %cst_17 {dimension_numbers = #tpu.dot_dimension_numbers<[1], [0], [0], [1], [0, 0, 1, 1], [], []>} : vector<16x512xbf16>, vector<512x512xbf16>, vector<16x512xf32> -> vector<16x512xf32>
    %31 = arith.addf %28, %30 : vector<16x512xf32>
    %c0_18 = arith.constant 0 : index
    %c0_19 = arith.constant 0 : index
    %32 = vector.load %arg9[%c0_18, %c0_19] : memref<16x512xf32, #tpu.memory_space<vmem>>, vector<16x512xf32>
    tpu.vector_store %arg9[%c0_18, %c0_19], %31 {strides = array<i32>} : memref<16x512xf32, #tpu.memory_space<vmem>>, vector<16x512xf32>,
    %c0_20 = arith.constant 0 : index
    %c0_21 = arith.constant 0 : index
    %33 = vector.load %arg7[%c0_20, %c0_21] : memref<1x512xf32, #tpu.memory_space<vmem>>, vector<1x512xf32>
    tpu.vector_store %arg7[%c0_20, %c0_21], %14 {strides = array<i32>} : memref<1x512xf32, #tpu.memory_space<vmem>>, vector<1x512xf32>,
    %c1_i32 = arith.constant 1 : i32
    %34 = arith.cmpi eq, %arg2, %c1_i32 : i32
    %35 = arith.extui %34 : i1 to i32
    %c0_i32_22 = arith.constant 0 : i32
    %36 = arith.cmpi ne, %35, %c0_i32_22 : i32
    scf.if %36 {
      %c0_23 = arith.constant 0 : index
      %c0_24 = arith.constant 0 : index
      %37 = vector.load %arg8[%c0_23, %c0_24] : memref<1x512xf32, #tpu.memory_space<vmem>>, vector<1x512xf32>
      %38 = tpu.reciprocal %37 {approx = true} : vector<1x512xf32> -> vector<1x512xf32>
      %c0_25 = arith.constant 0 : index
      %c0_26 = arith.constant 0 : index
      %39 = vector.load %arg9[%c0_25, %c0_26] : memref<16x512xf32, #tpu.memory_space<vmem>>, vector<16x512xf32>
      %40 = vector.broadcast %38 : vector<1x512xf32> to vector<16x512xf32>
      %41 = arith.mulf %39, %40 : vector<16x512xf32>
      %c0_27 = arith.constant 0 : index
      %c0_28 = arith.constant 0 : index
      %c0_29 = arith.constant 0 : index
      %42 = vector.load %arg5[%c0_27, %c0_28, %c0_29] : memref<1x16x512xbf16, #tpu.memory_space<vmem>>, vector<1x16x512xbf16>
      %43 = vector.shape_cast %42 : vector<1x16x512xbf16> to vector<16x512xbf16>
      %44 = arith.extf %43 : vector<16x512xbf16> to vector<16x512xf32>
      %45 = arith.addf %41, %44 : vector<16x512xf32>
      %46 = arith.truncf %45 : vector<16x512xf32> to vector<16x512xbf16>
      %c0_30 = arith.constant 0 : index
      %c0_31 = arith.constant 0 : index
      %c0_32 = arith.constant 0 : index
      %47 = vector.load %arg6[%c0_30, %c0_31, %c0_32] : memref<1x16x512xbf16, #tpu.memory_space<vmem>>, vector<1x16x512xbf16>
      %48 = vector.shape_cast %47 : vector<1x16x512xbf16> to vector<16x512xbf16>
      %49 = vector.shape_cast %46 : vector<16x512xbf16> to vector<1x16x512xbf16>
      tpu.vector_store %arg6[%c0_30, %c0_31, %c0_32], %49 {strides = array<i32>} : memref<1x16x512xbf16, #tpu.memory_space<vmem>>, vector<1x16x512xbf16>,
    } else {
    }
    return
  }
  func.func @transform_0(%arg0: i32, %arg1: i32, %arg2: i32) -> (i32, i32, i32, i32) {
    %c0_i32 = arith.constant 0 : i32
    %c0_i32_0 = arith.constant 0 : i32
    %c0_i32_1 = arith.constant 0 : i32
    return %arg0, %arg1, %c0_i32, %c0_i32_0 : i32, i32, i32, i32
  }
  func.func @transform_1(%arg0: i32, %arg1: i32, %arg2: i32) -> (i32, i32, i32, i32) {
    %c0_i32 = arith.constant 0 : i32
    %c0_i32_0 = arith.constant 0 : i32
    %c0_i32_1 = arith.constant 0 : i32
    %c0_i32_2 = arith.constant 0 : i32
    return %arg0, %c0_i32, %c0_i32_0, %c0_i32_1 : i32, i32, i32, i32
  }
  func.func @transform_2(%arg0: i32, %arg1: i32, %arg2: i32) -> (i32, i32, i32) {
    %c0_i32 = arith.constant 0 : i32
    %c0_i32_0 = arith.constant 0 : i32
    return %arg0, %c0_i32, %arg1 : i32, i32, i32
  }
  func.func @transform_3(%arg0: i32, %arg1: i32, %arg2: i32) -> (i32, i32, i32) {
    %c0_i32 = arith.constant 0 : i32
    %c0_i32_0 = arith.constant 0 : i32
    return %arg0, %c0_i32, %arg1 : i32, i32, i32
  }
}

module attributes {stable_mosaic.version = 11 : i64} {
  func.func @_conv3x3_kernel(%arg0: i32, %arg1: i32, %arg2: memref<1x1x16x578xbf16, #tpu.memory_space<vmem>>, %arg3: memref<9x8x16xbf16, #tpu.memory_space<vmem>>, %arg4: memref<8x1xf32, #tpu.memory_space<vmem>>, %arg5: memref<1x8x512xf32, #tpu.memory_space<vmem>>) attributes {dimension_semantics = [#tpu.dimension_semantics<parallel>, #tpu.dimension_semantics<parallel>], iteration_bounds = array<i64: 2, 2>, scalar_prefetch = 0 : i64, scratch_operands = 0 : i64, tpu.core_type = #tpu.core_type<tc>, window_params = [{transform_indices = @transform_0, window_bounds = array<i64: 1, 1, 16, 578>}, {pipeline_mode = #tpu.pipeline_mode<synchronous>, transform_indices = @transform_1, window_bounds = array<i64: 9, 8, 16>}, {pipeline_mode = #tpu.pipeline_mode<synchronous>, transform_indices = @transform_2, window_bounds = array<i64: 8, 1>}, {transform_indices = @transform_3, window_bounds = array<i64: 1, 8, 512>}]} {
    %c0 = arith.constant 0 : index
    %c0_0 = arith.constant 0 : index
    %c0_1 = arith.constant 0 : index
    %c0_2 = arith.constant 0 : index
    %0 = vector.load %arg2[%c0, %c0_0, %c0_1, %c0_2] : memref<1x1x16x578xbf16, #tpu.memory_space<vmem>>, vector<1x1x16x578xbf16>
    %1 = vector.shape_cast %0 : vector<1x1x16x578xbf16> to vector<16x578xbf16>
    %2 = tpu.iota {dimensions = array<i32: 1>} : vector<1x512xi32>
    %c32_i32 = arith.constant 32 : i32
    %c0_i32 = arith.constant 0 : i32
    %3 = arith.cmpi eq, %c32_i32, %c0_i32 : i32
    %c1_i32 = arith.constant 1 : i32
    %4 = arith.select %3, %c1_i32, %c32_i32 : i32
    %5 = vector.broadcast %4 : i32 to vector<1x512xi32>
    %6 = arith.remsi %2, %5 : vector<1x512xi32>
    %c0_i32_3 = arith.constant 0 : i32
    %7 = vector.broadcast %c0_i32_3 : i32 to vector<1x512xi32>
    %8 = arith.cmpi ne, %6, %7 : vector<1x512xi32>
    %c0_i32_4 = arith.constant 0 : i32
    %9 = vector.broadcast %c0_i32_4 : i32 to vector<1x512xi32>
    %10 = arith.cmpi slt, %6, %9 : vector<1x512xi32>
    %c0_i32_5 = arith.constant 0 : i32
    %11 = arith.cmpi slt, %4, %c0_i32_5 : i32
    %12 = vector.broadcast %11 : i1 to vector<1x512xi1>
    %13 = vector.broadcast %12 : vector<1x512xi1> to vector<1x512xi1>
    %14 = arith.xori %10, %13 : vector<1x512xi1>
    %15 = arith.andi %14, %8 : vector<1x512xi1>
    %16 = vector.broadcast %4 : i32 to vector<1x512xi32>
    %17 = arith.addi %6, %16 : vector<1x512xi32>
    %18 = arith.select %15, %17, %6 : vector<1x512xi1>, vector<1x512xi32>
    %cst = arith.constant 0.000000e+00 : f32
    %19 = vector.broadcast %cst : f32 to vector<8x512xf32>
    %20 = vector.extract_strided_slice %1 {offsets = [0, 0], sizes = [16, 512], strides = [1, 1]} : vector<16x578xbf16> to vector<16x512xbf16>
    %c-1_i32 = arith.constant -1 : i32
    %21 = vector.broadcast %c-1_i32 : i32 to vector<1x512xi32>
    %22 = arith.addi %18, %21 : vector<1x512xi32>
    %c0_i32_6 = arith.constant 0 : i32
    %23 = vector.broadcast %c0_i32_6 : i32 to vector<1x512xi32>
    %24 = arith.cmpi sge, %22, %23 : vector<1x512xi32>
    %c-1_i32_7 = arith.constant -1 : i32
    %25 = vector.broadcast %c-1_i32_7 : i32 to vector<1x512xi32>
    %26 = arith.addi %18, %25 : vector<1x512xi32>
    %c32_i32_8 = arith.constant 32 : i32
    %27 = vector.broadcast %c32_i32_8 : i32 to vector<1x512xi32>
    %28 = arith.cmpi slt, %26, %27 : vector<1x512xi32>
    %29 = arith.andi %24, %28 : vector<1x512xi1>
    %cst_9 = arith.constant 0.000000e+00 : bf16
    %30 = vector.broadcast %cst_9 : bf16 to vector<16x512xbf16>
    %31 = vector.shape_cast %29 : vector<1x512xi1> to vector<1x512xi1>
    %32 = vector.broadcast %31 : vector<1x512xi1> to vector<16x512xi1>
    %33 = arith.select %32, %20, %30 : vector<16x512xi1>, vector<16x512xbf16>
    %c0_10 = arith.constant 0 : index
    %c0_11 = arith.constant 0 : index
    %c0_12 = arith.constant 0 : index
    %34 = vector.load %arg3[%c0_10, %c0_11, %c0_12] : memref<9x8x16xbf16, #tpu.memory_space<vmem>>, vector<1x8x16xbf16>
    %35 = vector.shape_cast %34 : vector<1x8x16xbf16> to vector<8x16xbf16>
    %cst_13 = arith.constant dense<0.000000e+00> : vector<8x512xf32>
    %36 = tpu.matmul %35, %33, %cst_13 {dimension_numbers = #tpu.dot_dimension_numbers<[1], [0], [0], [1], [0, 0, 1, 1], [], []>} : vector<8x16xbf16>, vector<16x512xbf16>, vector<8x512xf32> -> vector<8x512xf32>
    %37 = arith.addf %19, %36 : vector<8x512xf32>
    %38 = vector.extract_strided_slice %1 {offsets = [0, 1], sizes = [16, 512], strides = [1, 1]} : vector<16x578xbf16> to vector<16x512xbf16>
    %c1 = arith.constant 1 : index
    %c0_14 = arith.constant 0 : index
    %c0_15 = arith.constant 0 : index
    %39 = vector.load %arg3[%c1, %c0_14, %c0_15] : memref<9x8x16xbf16, #tpu.memory_space<vmem>>, vector<1x8x16xbf16>
    %40 = vector.shape_cast %39 : vector<1x8x16xbf16> to vector<8x16xbf16>
    %cst_16 = arith.constant dense<0.000000e+00> : vector<8x512xf32>
    %41 = tpu.matmul %40, %38, %cst_16 {dimension_numbers = #tpu.dot_dimension_numbers<[1], [0], [0], [1], [0, 0, 1, 1], [], []>} : vector<8x16xbf16>, vector<16x512xbf16>, vector<8x512xf32> -> vector<8x512xf32>
    %42 = arith.addf %37, %41 : vector<8x512xf32>
    %43 = vector.extract_strided_slice %1 {offsets = [0, 2], sizes = [16, 512], strides = [1, 1]} : vector<16x578xbf16> to vector<16x512xbf16>
    %c1_i32_17 = arith.constant 1 : i32
    %44 = vector.broadcast %c1_i32_17 : i32 to vector<1x512xi32>
    %45 = arith.addi %18, %44 : vector<1x512xi32>
    %c0_i32_18 = arith.constant 0 : i32
    %46 = vector.broadcast %c0_i32_18 : i32 to vector<1x512xi32>
    %47 = arith.cmpi sge, %45, %46 : vector<1x512xi32>
    %c1_i32_19 = arith.constant 1 : i32
    %48 = vector.broadcast %c1_i32_19 : i32 to vector<1x512xi32>
    %49 = arith.addi %18, %48 : vector<1x512xi32>
    %c32_i32_20 = arith.constant 32 : i32
    %50 = vector.broadcast %c32_i32_20 : i32 to vector<1x512xi32>
    %51 = arith.cmpi slt, %49, %50 : vector<1x512xi32>
    %52 = arith.andi %47, %51 : vector<1x512xi1>
    %cst_21 = arith.constant 0.000000e+00 : bf16
    %53 = vector.broadcast %cst_21 : bf16 to vector<16x512xbf16>
    %54 = vector.shape_cast %52 : vector<1x512xi1> to vector<1x512xi1>
    %55 = vector.broadcast %54 : vector<1x512xi1> to vector<16x512xi1>
    %56 = arith.select %55, %43, %53 : vector<16x512xi1>, vector<16x512xbf16>
    %c2 = arith.constant 2 : index
    %c0_22 = arith.constant 0 : index
    %c0_23 = arith.constant 0 : index
    %57 = vector.load %arg3[%c2, %c0_22, %c0_23] : memref<9x8x16xbf16, #tpu.memory_space<vmem>>, vector<1x8x16xbf16>
    %58 = vector.shape_cast %57 : vector<1x8x16xbf16> to vector<8x16xbf16>
    %cst_24 = arith.constant dense<0.000000e+00> : vector<8x512xf32>
    %59 = tpu.matmul %58, %56, %cst_24 {dimension_numbers = #tpu.dot_dimension_numbers<[1], [0], [0], [1], [0, 0, 1, 1], [], []>} : vector<8x16xbf16>, vector<16x512xbf16>, vector<8x512xf32> -> vector<8x512xf32>
    %60 = arith.addf %42, %59 : vector<8x512xf32>
    %61 = vector.extract_strided_slice %1 {offsets = [0, 32], sizes = [16, 512], strides = [1, 1]} : vector<16x578xbf16> to vector<16x512xbf16>
    %c-1_i32_25 = arith.constant -1 : i32
    %62 = vector.broadcast %c-1_i32_25 : i32 to vector<1x512xi32>
    %63 = arith.addi %18, %62 : vector<1x512xi32>
    %c0_i32_26 = arith.constant 0 : i32
    %64 = vector.broadcast %c0_i32_26 : i32 to vector<1x512xi32>
    %65 = arith.cmpi sge, %63, %64 : vector<1x512xi32>
    %c-1_i32_27 = arith.constant -1 : i32
    %66 = vector.broadcast %c-1_i32_27 : i32 to vector<1x512xi32>
    %67 = arith.addi %18, %66 : vector<1x512xi32>
    %c32_i32_28 = arith.constant 32 : i32
    %68 = vector.broadcast %c32_i32_28 : i32 to vector<1x512xi32>
    %69 = arith.cmpi slt, %67, %68 : vector<1x512xi32>
    %70 = arith.andi %65, %69 : vector<1x512xi1>
    %cst_29 = arith.constant 0.000000e+00 : bf16
    %71 = vector.broadcast %cst_29 : bf16 to vector<16x512xbf16>
    %72 = vector.shape_cast %70 : vector<1x512xi1> to vector<1x512xi1>
    %73 = vector.broadcast %72 : vector<1x512xi1> to vector<16x512xi1>
    %74 = arith.select %73, %61, %71 : vector<16x512xi1>, vector<16x512xbf16>
    %c3 = arith.constant 3 : index
    %c0_30 = arith.constant 0 : index
    %c0_31 = arith.constant 0 : index
    %75 = vector.load %arg3[%c3, %c0_30, %c0_31] : memref<9x8x16xbf16, #tpu.memory_space<vmem>>, vector<1x8x16xbf16>
    %76 = vector.shape_cast %75 : vector<1x8x16xbf16> to vector<8x16xbf16>
    %cst_32 = arith.constant dense<0.000000e+00> : vector<8x512xf32>
    %77 = tpu.matmul %76, %74, %cst_32 {dimension_numbers = #tpu.dot_dimension_numbers<[1], [0], [0], [1], [0, 0, 1, 1], [], []>} : vector<8x16xbf16>, vector<16x512xbf16>, vector<8x512xf32> -> vector<8x512xf32>
    %78 = arith.addf %60, %77 : vector<8x512xf32>
    %79 = vector.extract_strided_slice %1 {offsets = [0, 33], sizes = [16, 512], strides = [1, 1]} : vector<16x578xbf16> to vector<16x512xbf16>
    %c4 = arith.constant 4 : index
    %c0_33 = arith.constant 0 : index
    %c0_34 = arith.constant 0 : index
    %80 = vector.load %arg3[%c4, %c0_33, %c0_34] : memref<9x8x16xbf16, #tpu.memory_space<vmem>>, vector<1x8x16xbf16>
    %81 = vector.shape_cast %80 : vector<1x8x16xbf16> to vector<8x16xbf16>
    %cst_35 = arith.constant dense<0.000000e+00> : vector<8x512xf32>
    %82 = tpu.matmul %81, %79, %cst_35 {dimension_numbers = #tpu.dot_dimension_numbers<[1], [0], [0], [1], [0, 0, 1, 1], [], []>} : vector<8x16xbf16>, vector<16x512xbf16>, vector<8x512xf32> -> vector<8x512xf32>
    %83 = arith.addf %78, %82 : vector<8x512xf32>
    %84 = vector.extract_strided_slice %1 {offsets = [0, 34], sizes = [16, 512], strides = [1, 1]} : vector<16x578xbf16> to vector<16x512xbf16>
    %c1_i32_36 = arith.constant 1 : i32
    %85 = vector.broadcast %c1_i32_36 : i32 to vector<1x512xi32>
    %86 = arith.addi %18, %85 : vector<1x512xi32>
    %c0_i32_37 = arith.constant 0 : i32
    %87 = vector.broadcast %c0_i32_37 : i32 to vector<1x512xi32>
    %88 = arith.cmpi sge, %86, %87 : vector<1x512xi32>
    %c1_i32_38 = arith.constant 1 : i32
    %89 = vector.broadcast %c1_i32_38 : i32 to vector<1x512xi32>
    %90 = arith.addi %18, %89 : vector<1x512xi32>
    %c32_i32_39 = arith.constant 32 : i32
    %91 = vector.broadcast %c32_i32_39 : i32 to vector<1x512xi32>
    %92 = arith.cmpi slt, %90, %91 : vector<1x512xi32>
    %93 = arith.andi %88, %92 : vector<1x512xi1>
    %cst_40 = arith.constant 0.000000e+00 : bf16
    %94 = vector.broadcast %cst_40 : bf16 to vector<16x512xbf16>
    %95 = vector.shape_cast %93 : vector<1x512xi1> to vector<1x512xi1>
    %96 = vector.broadcast %95 : vector<1x512xi1> to vector<16x512xi1>
    %97 = arith.select %96, %84, %94 : vector<16x512xi1>, vector<16x512xbf16>
    %c5 = arith.constant 5 : index
    %c0_41 = arith.constant 0 : index
    %c0_42 = arith.constant 0 : index
    %98 = vector.load %arg3[%c5, %c0_41, %c0_42] : memref<9x8x16xbf16, #tpu.memory_space<vmem>>, vector<1x8x16xbf16>
    %99 = vector.shape_cast %98 : vector<1x8x16xbf16> to vector<8x16xbf16>
    %cst_43 = arith.constant dense<0.000000e+00> : vector<8x512xf32>
    %100 = tpu.matmul %99, %97, %cst_43 {dimension_numbers = #tpu.dot_dimension_numbers<[1], [0], [0], [1], [0, 0, 1, 1], [], []>} : vector<8x16xbf16>, vector<16x512xbf16>, vector<8x512xf32> -> vector<8x512xf32>
    %101 = arith.addf %83, %100 : vector<8x512xf32>
    %102 = vector.extract_strided_slice %1 {offsets = [0, 64], sizes = [16, 512], strides = [1, 1]} : vector<16x578xbf16> to vector<16x512xbf16>
    %c-1_i32_44 = arith.constant -1 : i32
    %103 = vector.broadcast %c-1_i32_44 : i32 to vector<1x512xi32>
    %104 = arith.addi %18, %103 : vector<1x512xi32>
    %c0_i32_45 = arith.constant 0 : i32
    %105 = vector.broadcast %c0_i32_45 : i32 to vector<1x512xi32>
    %106 = arith.cmpi sge, %104, %105 : vector<1x512xi32>
    %c-1_i32_46 = arith.constant -1 : i32
    %107 = vector.broadcast %c-1_i32_46 : i32 to vector<1x512xi32>
    %108 = arith.addi %18, %107 : vector<1x512xi32>
    %c32_i32_47 = arith.constant 32 : i32
    %109 = vector.broadcast %c32_i32_47 : i32 to vector<1x512xi32>
    %110 = arith.cmpi slt, %108, %109 : vector<1x512xi32>
    %111 = arith.andi %106, %110 : vector<1x512xi1>
    %cst_48 = arith.constant 0.000000e+00 : bf16
    %112 = vector.broadcast %cst_48 : bf16 to vector<16x512xbf16>
    %113 = vector.shape_cast %111 : vector<1x512xi1> to vector<1x512xi1>
    %114 = vector.broadcast %113 : vector<1x512xi1> to vector<16x512xi1>
    %115 = arith.select %114, %102, %112 : vector<16x512xi1>, vector<16x512xbf16>
    %c6 = arith.constant 6 : index
    %c0_49 = arith.constant 0 : index
    %c0_50 = arith.constant 0 : index
    %116 = vector.load %arg3[%c6, %c0_49, %c0_50] : memref<9x8x16xbf16, #tpu.memory_space<vmem>>, vector<1x8x16xbf16>
    %117 = vector.shape_cast %116 : vector<1x8x16xbf16> to vector<8x16xbf16>
    %cst_51 = arith.constant dense<0.000000e+00> : vector<8x512xf32>
    %118 = tpu.matmul %117, %115, %cst_51 {dimension_numbers = #tpu.dot_dimension_numbers<[1], [0], [0], [1], [0, 0, 1, 1], [], []>} : vector<8x16xbf16>, vector<16x512xbf16>, vector<8x512xf32> -> vector<8x512xf32>
    %119 = arith.addf %101, %118 : vector<8x512xf32>
    %120 = vector.extract_strided_slice %1 {offsets = [0, 65], sizes = [16, 512], strides = [1, 1]} : vector<16x578xbf16> to vector<16x512xbf16>
    %c7 = arith.constant 7 : index
    %c0_52 = arith.constant 0 : index
    %c0_53 = arith.constant 0 : index
    %121 = vector.load %arg3[%c7, %c0_52, %c0_53] : memref<9x8x16xbf16, #tpu.memory_space<vmem>>, vector<1x8x16xbf16>
    %122 = vector.shape_cast %121 : vector<1x8x16xbf16> to vector<8x16xbf16>
    %cst_54 = arith.constant dense<0.000000e+00> : vector<8x512xf32>
    %123 = tpu.matmul %122, %120, %cst_54 {dimension_numbers = #tpu.dot_dimension_numbers<[1], [0], [0], [1], [0, 0, 1, 1], [], []>} : vector<8x16xbf16>, vector<16x512xbf16>, vector<8x512xf32> -> vector<8x512xf32>
    %124 = arith.addf %119, %123 : vector<8x512xf32>
    %125 = vector.extract_strided_slice %1 {offsets = [0, 66], sizes = [16, 512], strides = [1, 1]} : vector<16x578xbf16> to vector<16x512xbf16>
    %c1_i32_55 = arith.constant 1 : i32
    %126 = vector.broadcast %c1_i32_55 : i32 to vector<1x512xi32>
    %127 = arith.addi %18, %126 : vector<1x512xi32>
    %c0_i32_56 = arith.constant 0 : i32
    %128 = vector.broadcast %c0_i32_56 : i32 to vector<1x512xi32>
    %129 = arith.cmpi sge, %127, %128 : vector<1x512xi32>
    %c1_i32_57 = arith.constant 1 : i32
    %130 = vector.broadcast %c1_i32_57 : i32 to vector<1x512xi32>
    %131 = arith.addi %18, %130 : vector<1x512xi32>
    %c32_i32_58 = arith.constant 32 : i32
    %132 = vector.broadcast %c32_i32_58 : i32 to vector<1x512xi32>
    %133 = arith.cmpi slt, %131, %132 : vector<1x512xi32>
    %134 = arith.andi %129, %133 : vector<1x512xi1>
    %cst_59 = arith.constant 0.000000e+00 : bf16
    %135 = vector.broadcast %cst_59 : bf16 to vector<16x512xbf16>
    %136 = vector.shape_cast %134 : vector<1x512xi1> to vector<1x512xi1>
    %137 = vector.broadcast %136 : vector<1x512xi1> to vector<16x512xi1>
    %138 = arith.select %137, %125, %135 : vector<16x512xi1>, vector<16x512xbf16>
    %c8 = arith.constant 8 : index
    %c0_60 = arith.constant 0 : index
    %c0_61 = arith.constant 0 : index
    %139 = vector.load %arg3[%c8, %c0_60, %c0_61] : memref<9x8x16xbf16, #tpu.memory_space<vmem>>, vector<1x8x16xbf16>
    %140 = vector.shape_cast %139 : vector<1x8x16xbf16> to vector<8x16xbf16>
    %cst_62 = arith.constant dense<0.000000e+00> : vector<8x512xf32>
    %141 = tpu.matmul %140, %138, %cst_62 {dimension_numbers = #tpu.dot_dimension_numbers<[1], [0], [0], [1], [0, 0, 1, 1], [], []>} : vector<8x16xbf16>, vector<16x512xbf16>, vector<8x512xf32> -> vector<8x512xf32>
    %142 = arith.addf %124, %141 : vector<8x512xf32>
    %c0_63 = arith.constant 0 : index
    %c0_64 = arith.constant 0 : index
    %143 = vector.load %arg4[%c0_63, %c0_64] : memref<8x1xf32, #tpu.memory_space<vmem>>, vector<8x1xf32>
    %144 = vector.broadcast %143 : vector<8x1xf32> to vector<8x512xf32>
    %145 = arith.addf %142, %144 : vector<8x512xf32>
    %c0_65 = arith.constant 0 : index
    %c0_66 = arith.constant 0 : index
    %c0_67 = arith.constant 0 : index
    %146 = vector.load %arg5[%c0_65, %c0_66, %c0_67] : memref<1x8x512xf32, #tpu.memory_space<vmem>>, vector<1x8x512xf32>
    %147 = vector.shape_cast %146 : vector<1x8x512xf32> to vector<8x512xf32>
    %148 = vector.shape_cast %145 : vector<8x512xf32> to vector<1x8x512xf32>
    tpu.vector_store %arg5[%c0_65, %c0_66, %c0_67], %148 {strides = array<i32>} : memref<1x8x512xf32, #tpu.memory_space<vmem>>, vector<1x8x512xf32>,
    return
  }
  func.func @transform_0(%arg0: i32, %arg1: i32) -> (i32, i32, i32, i32) {
    %c0_i32 = arith.constant 0 : i32
    %c0_i32_0 = arith.constant 0 : i32
    %c0_i32_1 = arith.constant 0 : i32
    return %arg0, %arg1, %c0_i32, %c0_i32_0 : i32, i32, i32, i32
  }
  func.func @transform_1(%arg0: i32, %arg1: i32) -> (i32, i32, i32) {
    %c0_i32 = arith.constant 0 : i32
    %c0_i32_0 = arith.constant 0 : i32
    %c0_i32_1 = arith.constant 0 : i32
    %c0_i32_2 = arith.constant 0 : i32
    return %c0_i32, %c0_i32_0, %c0_i32_1 : i32, i32, i32
  }
  func.func @transform_2(%arg0: i32, %arg1: i32) -> (i32, i32) {
    %c0_i32 = arith.constant 0 : i32
    %c0_i32_0 = arith.constant 0 : i32
    %c0_i32_1 = arith.constant 0 : i32
    return %c0_i32, %c0_i32_0 : i32, i32
  }
  func.func @transform_3(%arg0: i32, %arg1: i32) -> (i32, i32, i32) {
    %c0_i32 = arith.constant 0 : i32
    %c0_i32_0 = arith.constant 0 : i32
    return %arg0, %c0_i32, %arg1 : i32, i32, i32
  }
}

</mosaic_0001>

<bundles_post_ra>
// kernel: attention_decoder_forward.3
= control target key start
LH: loop header
LB: loop body
LE: loop exit
PB: predicated region body
PF: predicated region fallthrough
CT: control target
= control target key end

     0   :  { %s847_s15 = smov 0   ;;  %s849_s16 = smov 0   ;;  %s959_s0 = inlined_call_operand.vmem [shape: bf16[2,16,1024], index: 0, kind: input, shape index: {}]   ;;  %s960_s1 = inlined_call_operand.vmem [shape: bf16[32,16], index: 1, kind: input, shape index: {}]   ;;  %s961_s2 = inlined_call_operand.vmem [shape: f32[32,1], index: 2, kind: input, shape index: {}]   ;;  %s962_s3 = inlined_call_operand.vmem [shape: bf16[2,2,8,512], index: 3, kind: output, shape index: {0}]   ;;  %s963_s4 = inlined_call_operand.vmem [shape: bf16[2,2,24,512], index: 4, kind: output, shape index: {1}]  }
   0x1   :  { %s851_s17 = smov 0   ;;  %s853_s18 = smov 0  }
   0x2   :  { %s855_s19 = smov 0   ;;  %s857_s20 = smov 0  }
   0x3   :  { %s859_s21 = smov 0  }
   0x4 LB: > { %s24_s22 = sadd.s32 1, %s811_s19  ;;  %s27_s23 = sadd.s32 1, %s815_s20  ;;  %s819_s21 = sphi %s859_s21, %s15_s21   ;;  %s815_s20 = sphi %s857_s20, %s969_s20   ;;  %s811_s19 = sphi %s855_s19, %s968_s19   ;;  %s807_s18 = sphi %s853_s18, %s967_s18   ;;  %s803_s17 = sphi %s851_s17, %s966_s17   ;;  %s799_s16 = sphi %s849_s16, %s965_s16   ;;  %s795_s15 = sphi %s847_s15, %s964_s15  }
   0x5   : > { %p25_p0 = scmp.ge.s32.totalorder %s24_s22, 2  ;;  %p43_p1 = scmp.ne.s32.totalorder %s799_s16, %s795_s15 }
   0x6   : > { %p44_p2 = scmp.eq.s32.totalorder %s819_s21, 0  ;;  %s36_s27 = sadd.s32 1, %s799_s16 }
   0x7   : > { %s971_s22 = smov (%p25_p0, %s24_s22), 0  ;;  %s973_s23 = smov (!%p25_p0, %s27_s23), %s815_s20 }
   0x8   : > { %p45_p3 = por %p44_p2, %p43_p1  ;;  %p29_p4 = scmp.ge.s32.totalorder %s973_s23, 2 }
   0x9   : > { %s32_s24 = ssub.s32 %s811_s19, %s971_s22  ;;  %p657_p6 = scmp.ge.s32.totalorder %s819_s21, 4 }
   0xa   : > { %s975_s23 = smov (%p29_p4, %s973_s23), 0 }
   0xb   : > { %s31_s25 = ssub.s32 %s815_s20, %s975_s23  ;;  %173 = sbr.rel (%p657_p6) target bundleno = 25 (0x19), region = 24 }
   0xc   : > { %s33_s26 = sor.u32 %s32_s24, %s31_s25 }
   0xd   : > { %p34_p5 = scmp.eq.s32.totalorder %s33_s26, 0 }
   0xf   : > { %s898_s28 = scalar_select %p34_p5, %s799_s16, %s36_s27  }
  0x10   : > { %176 = sbr.rel (!%p45_p3) target bundleno = 25 (0x19), region = 28  ;;  %s178_s29 = sand.u32 (%p45_p3), 1, %s799_s16  }
  0x11   : > { %s659_s30 = sshll.u32 (%p45_p3), %s811_s19, 2  ;;  %s658_s5 = sshll.u32 (%p45_p3), %s178_s29, 5 }
  0x12   : > { %s660_s6 = sshll.u32 (%p45_p3), %s815_s20, 4  ;;  %s180_s12 = scalar_lea.vmem (%p45_p3), [#allocation2], %s658_s5 }
  0x13   : > { %s183_s7 = sadd.s32 (%p45_p3), %s660_s6, %s659_s30 }
  0x14   : > { %s661_s8 = sshll.u32 (%p45_p3), %s183_s7, 2 }
  0x15   : > { %s185_s11 = scalar_lea.vmem %s959_s0, %s661_s8 }
  0x16   : > { %v198_v0 = vld [vmem:[%s185_s11] sm:$0xff]  ;;  %v200_v1 = vld [vmem:[%s185_s11 + $0x8] sm:$0xff] }
  0x17   : > { %v202_v2 = vld [vmem:[%s185_s11 + $0x20] sm:$0xff]  ;;  %199 = vst [vmem:[%s180_s12] sm:$0xff] %v198_v0  ;;  %201 = vst [vmem:[%s180_s12 + $0x8] sm:$0xff] %v200_v1  ;;  %v204_v3 = vld [vmem:[%s185_s11 + $0x28] sm:$0xff] }
  0x18   : > { %203 = vst [vmem:[%s180_s12 + $0x10] sm:$0xff] %v202_v2  ;;  %205 = vst [vmem:[%s180_s12 + $0x18] sm:$0xff] %v204_v3 }
  0x19 PF: > { %p662_p7 = scmp.ge.s32.totalorder %s819_s21, 1  ;;  %p210_p8 = scmp.lt.s32.totalorder %s819_s21, 5 }
  0x1b   : > { %p211_p9 = pnand %p662_p7, %p210_p8 }
  0x1c   : > { %s217_s13 = sand.u32 (!%p211_p9), 1, %s795_s15   ;;  %p256_p10 = scmp.lt.s32.totalorder (!%p211_p9), %s807_s18, 1 }
  0x1d   : > { %214 = sbr.rel (%p211_p9) target bundleno = 254 (0xfe), region = 51  ;;  %s663_s14 = sshll.u32 (!%p211_p9), %s217_s13, 5 }
  0x1e   : > { %s219_s26 = scalar_lea.vmem (!%p211_p9), [#allocation2], %s663_s14  ;;  %p258_p11 = scmp.lt.s32.totalorder (!%p211_p9), %s803_s17, 1 }
  0x22   : > { %v821_v4 = vmov 0   ;;  %v283_v5 = vld [vmem:[%s961_s2] sm:$0xff]  ;;  %v284_v7 = vld [vmem:[%s961_s2 + $0x8] sm:$0xff]  ;;  %v285_v11 = vld [vmem:[%s961_s2 + $0x10] sm:$0xff]  ;;  %vm337_vm0 = vcmask 130048   ;;  %s977_s18 = smov (!%p256_p10, %s807_s18), 1 }
  0x23   : > { %376 = vmatprep.mubr.bf16.mxu0 %v821_v4  ;;  %429 = vmatprep.mubr.bf16.mxu1 %v821_v4  ;;  %v757_v6 = vld [vmem:[%s219_s26 + $0x4] ss:$16 sps:$4 sm:$0xff]   ;;  %v759_v8 = vld [vmem:[%s219_s26 + $0xc] ss:$16 sps:$4 sm:$0xff]   ;;  %v761_v9 = vld [vmem:[%s219_s26] ss:$16 sps:$4 sm:$0xff]  }
  0x24   : > { %755 = vset.pattern.permute.xlu0 %v821_v4  ;;  %756 = vset.pattern.permute.xlu1 %v821_v4  ;;  %v762_v10 = vld [vmem:[%s219_s26 + $0x8] ss:$16 sps:$4 sm:$0xff]   ;;  %v763_v12 = vld [vmem:[%s960_s1] sm:$0xff]   ;;  %s979_s17 = smov (!%p258_p11, %s803_s17), 1  ;;  %s665_s12 = sshll.u32 %s977_s18, 3 }
  0x25   : > { %289 = vperm.xlu0 %755, %v283_v5   ;;  %358 = vmatprep.subr.bf16.mxu0 %v757_v6  ;;  %v286_v13 = vld [vmem:[%s961_s2 + $0x18] sm:$0xff]  ;;  %v764_v14 = vld [vmem:[%s960_s1 + $0x8] sm:$0xff]   ;;  %s664_s11 = sshll.u32 %s979_s17, 2  ;;  %s697_s13 = smul.u32 24, %s977_s18 }
  0x26   : > { %411 = vmatprep.subr.bf16.mxu1 %v759_v8  ;;  %299 = vperm.xlu1 %756, %v285_v11   ;;  %s262_s14 = sadd.s32 %s665_s12, %s664_s11  ;;  %s696_s24 = smul.u32 12, %s979_s17 }
  0x27   : > { %359 = vmatpush1.bf16.msra.mxu0 %v761_v9  ;;  %412 = vmatpush1.bf16.msra.mxu1 %v762_v10  ;;  %s666_s25 = sshll.u32 %s262_s14, 2 }
  0x28   : > { %s271_s26 = sadd.s32 %s697_s13, %s696_s24  ;;  %s264_s15 = scalar_lea.vmem %s962_s3, %s666_s25 }
  0x29   : > { %294 = vperm.xlu0 %755, %v284_v7   ;;  %s667_s18 = sshll.u32 %s271_s26, 2 }
  0x2a   : > { %674 = vmatmul.mubr.msk.bf16.vlgmr.msra.gmra.mxu0 %vm337_vm0, %v763_v12  ;;  %676 = vmatmul.mubr.msk.bf16.vlgmr.msra.gmra.mxu1 %vm337_vm0, %v763_v12  ;;  %s273_s5 = scalar_lea.vmem %s963_s4, %s667_s18 }
  0x2b   : > { %386 = vmatprep.mubr.bf16.mxu0 %v821_v4  ;;  %439 = vmatprep.mubr.bf16.mxu1 %v821_v4 }
  0x2c   : > { %304 = vperm.xlu1 %756, %v286_v13  }
  0x32   : > { %675 = vmatmul.mubr.msk.bf16.gmra.mxu0 %vm337_vm0, %v764_v14  ;;  %677 = vmatmul.mubr.msk.bf16.gmra.mxu1 %vm337_vm0, %v764_v14 }
  0xa0   : > { %v290_v15 = vpop.permute.xlu0 %289 }
  0xa1   : > { %v300_v33 = vpop.permute.xlu1 %299 }
  0xa4   : > { %v295_v24 = vpop.permute.xlu0 %294 }
  0xa7   : > { %v305_v48 = vpop.permute.xlu1 %304 }
  0xea   : > { %v378_v16 = vpop.f32.mrf.mxu0  ;;  %v431_v17 = vpop.f32.mrf.mxu1 }
  0xeb   : > { %v379_v20 = vadd.f32 %v378_v16, %v290_v15  ;;  %v432_v21 = vadd.f32 %v431_v17, %v290_v15 }
  0xec   : > { %v380_v18 = vpop.f32.mrf.mxu0  ;;  %v433_v19 = vpop.f32.mrf.mxu1 }
  0xed   : > { %v381_v22 = vadd.f32 %v380_v18, %v290_v15  ;;  %v434_v23 = vadd.f32 %v433_v19, %v290_v15 }
  0xee   : > { %v382_v25 = vpop.f32.mrf.mxu0  ;;  %v435_v26 = vpop.f32.mrf.mxu1 }
  0xef   : > { %v688_v27 = vpack.c.bf16 %v381_v22, %v379_v20  ;;  %v689_v28 = vpack.c.bf16 %v434_v23, %v432_v21  ;;  %v383_v31 = vadd.f32 %v382_v25, %v295_v24  ;;  %v436_v32 = vadd.f32 %v435_v26, %v295_v24 }
  0xf0   : > { %v384_v29 = vpop.f32.mrf.mxu0  ;;  %v437_v30 = vpop.f32.mrf.mxu1 }
  0xf1   : > { %470 = vst [vmem:[%s264_s15] sm:$0xff] %v688_v27  ;;  %471 = vst [vmem:[%s264_s15 + $0x8] sm:$0xff] %v689_v28  ;;  %v385_v34 = vadd.f32 %v384_v29, %v295_v24  ;;  %v438_v35 = vadd.f32 %v437_v30, %v295_v24 }
  0xf2   : > { %v388_v36 = vpop.f32.mrf.mxu0  ;;  %v441_v37 = vpop.f32.mrf.mxu1 }
  0xf3   : > { %v690_v38 = vpack.c.bf16 %v385_v34, %v383_v31  ;;  %v691_v39 = vpack.c.bf16 %v438_v35, %v436_v32  ;;  %v389_v42 = vadd.f32 %v388_v36, %v300_v33  ;;  %v442_v43 = vadd.f32 %v441_v37, %v300_v33 }
  0xf4   : > { %v390_v40 = vpop.f32.mrf.mxu0  ;;  %v443_v41 = vpop.f32.mrf.mxu1 }
  0xf5   : > { %500 = vst [vmem:[%s273_s5] sm:$0xff] %v690_v38  ;;  %501 = vst [vmem:[%s273_s5 + $0x8] sm:$0xff] %v691_v39  ;;  %v391_v44 = vadd.f32 %v390_v40, %v300_v33  ;;  %v444_v45 = vadd.f32 %v443_v41, %v300_v33 }
  0xf6   : > { %v392_v46 = vpop.f32.mrf.mxu0  ;;  %v445_v47 = vpop.f32.mrf.mxu1 }
  0xf7   : > { %v692_v49 = vpack.c.bf16 %v391_v44, %v389_v42  ;;  %v693_v50 = vpack.c.bf16 %v444_v45, %v442_v43  ;;  %v393_v53 = vadd.f32 %v392_v46, %v305_v48  ;;  %v446_v54 = vadd.f32 %v445_v47, %v305_v48 }
  0xf8   : > { %v394_v51 = vpop.f32.mrf.mxu0  ;;  %v447_v52 = vpop.f32.mrf.mxu1 }
  0xf9   : > { %502 = vst [vmem:[%s273_s5 + $0x10] sm:$0xff] %v692_v49  ;;  %503 = vst [vmem:[%s273_s5 + $0x18] sm:$0xff] %v693_v50  ;;  %v395_v55 = vadd.f32 %v394_v51, %v305_v48  ;;  %v448_v56 = vadd.f32 %v447_v52, %v305_v48 }
  0xfb   : > { %v694_v57 = vpack.c.bf16 %v395_v55, %v393_v53  ;;  %v695_v58 = vpack.c.bf16 %v448_v56, %v446_v54 }
  0xfd   : > { %504 = vst [vmem:[%s273_s5 + $0x20] sm:$0xff] %v694_v57  ;;  %505 = vst [vmem:[%s273_s5 + $0x28] sm:$0xff] %v695_v58 }
  0xfe PF: > { %s15_s21 = sadd.s32 1, %s819_s21   ;;  %s964_s15 = smov %s799_s16 }
  0xff   : > { %p12_p12 = scmp.ge.s32.totalorder %s15_s21, 6   ;;  %s965_s16 = smov %s898_s28 }
 0x100   : > { %s966_s17 = smov %s811_s19  ;;  %s967_s18 = smov %s815_s20 }
 0x101   : > { %s968_s19 = smov %s971_s22  ;;  %s969_s20 = smov %s975_s23 }
 0x102   :  { %14 = sbr.rel (!%p12_p12) target bundleno = 4 (0x4), region = 102 }

// kernel: attention_decoder_forward.4
= control target key start
LH: loop header
LB: loop body
LE: loop exit
PB: predicated region body
PF: predicated region fallthrough
CT: control target
= control target key end

     0   :  { %s8106_s0 = inlined_call_operand.vmem [shape: bf16[2,2,8,512], index: 0, kind: input, shape index: {}]   ;;  %s8107_s1 = inlined_call_operand.vmem [shape: bf16[2,2,24,512], index: 1, kind: input, shape index: {}]   ;;  %s8108_s2 = inlined_call_operand.vmem [shape: bf16[2,16,1024], index: 2, kind: input, shape index: {}]   ;;  %s8109_s3 = inlined_call_operand.vmem [shape: bf16[2,16,1024], index: 3, kind: output, shape index: {}]  }
   0x1   :  { %8747 = sst [smem:[#allocation271_spill]] %s8108_s2 }
   0x2   :  { %s4048_s12 = smov 0   ;;  %s4050_s13 = smov 0  }
   0x3   :  { %s4052_s14 = smov 0   ;;  %s4054_s15 = smov 0  }
   0x4   :  { %s4056_s16 = smov 0   ;;  %s4058_s17 = smov 0  }
   0x5   :  { %s4060_s18 = smov 0   ;;  %s4062_s19 = smov 0  }
   0x6   :  { %s4064_s20 = smov 0  }
   0x7 LB: > { %s25_s21 = sadd.s32 1, %s4010_s17  ;;  %s28_s22 = sadd.s32 1, %s4014_s18  ;;  %s4022_s20 = sphi %s4064_s20, %s13_s20   ;;  %s4018_s19 = sphi %s4062_s19, %s10593_s19   ;;  %s4014_s18 = sphi %s4060_s18, %s10592_s18   ;;  %s4010_s17 = sphi %s4058_s17, %s10591_s17   ;;  %s4006_s16 = sphi %s4056_s16, %s10590_s16   ;;  %s4002_s15 = sphi %s4054_s15, %s10589_s15   ;;  %s3998_s14 = sphi %s4052_s14, %s10588_s14   ;;  %s3994_s13 = sphi %s4050_s13, %s10587_s13   ;;  %s3990_s12 = sphi %s4048_s12, %s10586_s12  }
   0x8   : > { %p26_p0 = scmp.ge.s32.totalorder %s25_s21, 2  ;;  %s3233_s23 = sadd.s32 4294967295, %s4022_s20  }
   0x9   : > { %s32_s24 = sadd.s32 1, %s4018_s19  ;;  %p102_p1 = scmp.ne.s32.totalorder %s3994_s13, %s3990_s12 }
   0xa   : > { %s10595_s21 = smov (%p26_p0, %s25_s21), 0  ;;  %s10597_s22 = smov (!%p26_p0, %s28_s22), %s4014_s18 }
   0xb   : > { %p103_p2 = scmp.eq.s32.totalorder %s4022_s20, 0  ;;  %p30_p3 = scmp.ge.s32.totalorder %s10597_s22, 2 }
   0xc   : > { %p134_p4 = scmp.eq.s32.totalorder %s3233_s23, 7  ;;  %s95_s30 = sadd.s32 1, %s3994_s13 }
   0xd   : > { %p4103_p5 = por %p103_p2, %p102_p1  ;;  %s10599_s22 = smov (%p30_p3, %s10597_s22), 0 }
   0xe   : > { %s10601_s24 = smov (!%p30_p3, %s32_s24), %s4018_s19  ;;  %p4110_p6 = por %p134_p4, %p102_p1 }
   0xf   : > { %p34_p7 = scmp.ge.s32.totalorder %s10601_s24, 2  ;;  %s91_s27 = ssub.s32 %s4014_s18, %s10599_s22 }
  0x10   : > { %p3236_p9 = scmp.ge.s32.totalorder %s4022_s20, 8 }
  0x11   : > { %s10603_s24 = smov (%p34_p7, %s10601_s24), 0 }
  0x12   : > { %8750 = sst [smem:[#allocation7_spill]] %s10603_s24  ;;  %s90_s28 = ssub.s32 %s4018_s19, %s10603_s24 }
  0x13   : > { %s92_s29 = sor.u32 %s91_s27, %s90_s28  ;;  %156 = sbr.rel (%p3236_p9) target bundleno = 36 (0x24), region = 16 }
  0x14   : > { %p93_p8 = scmp.eq.s32.totalorder %s92_s29, 0 }
  0x16   : > { %s4122_s4 = scalar_select %p93_p8, %s3994_s13, %s95_s30  }
  0x18   : > { %179 = sbr.rel (!%p4103_p5) target bundleno = 36 (0x24), region = 28  ;;  %s181_s5 = sand.u32 (%p4103_p5), 1, %s3994_s13  }
  0x19   : > { %s3238_s6 = sshll.u32 (%p4103_p5), %s4014_s18, 2  ;;  %s3237_s7 = sshll.u32 (%p4103_p5), %s181_s5, 5 }
  0x1a   : > { %s3239_s8 = sshll.u32 (%p4103_p5), %s4018_s19, 4  ;;  %s8751_s2 = sld [smem:[#allocation271_spill]] (%p4103_p5) }
  0x1b   : > { %s186_s9 = sadd.s32 (%p4103_p5), %s3239_s8, %s3238_s6  ;;  %s183_s28 = scalar_lea.vmem (%p4103_p5), [#allocation5], %s3237_s7 }
  0x1c   : > { %s3240_s10 = sshll.u32 (%p4103_p5), %s186_s9, 2 }
  0x20   : > { %s188_s27 = scalar_lea.vmem %s8751_s2, %s3240_s10 }
  0x21   : > { %v201_v0 = vld [vmem:[%s188_s27] sm:$0xff]  ;;  %v203_v1 = vld [vmem:[%s188_s27 + $0x8] sm:$0xff] }
  0x22   : > { %v205_v2 = vld [vmem:[%s188_s27 + $0x20] sm:$0xff]  ;;  %202 = vst [vmem:[%s183_s28] sm:$0xff] %v201_v0  ;;  %204 = vst [vmem:[%s183_s28 + $0x8] sm:$0xff] %v203_v1  ;;  %v207_v3 = vld [vmem:[%s188_s27 + $0x28] sm:$0xff] }
  0x23   : > { %206 = vst [vmem:[%s183_s28 + $0x10] sm:$0xff] %v205_v2  ;;  %208 = vst [vmem:[%s183_s28 + $0x18] sm:$0xff] %v207_v3 }
  0x24 PF: > { %p3241_p10 = scmp.ge.s32.totalorder %s4022_s20, 1  ;;  %p213_p11 = scmp.lt.s32.totalorder %s4022_s20, 9 }
  0x26   : > { %p214_p12 = pnand %p3241_p10, %p213_p11 }
  0x28   : > { %217 = sbr.rel (%p214_p12) target bundleno = 1348 (0x544), region = 51 }
  0x2d   : > { %s220_s25 = sand.u32 1, %s3990_s12   ;;  %p256_p13 = scmp.lt.s32.totalorder %s4006_s16, 1 }
  0x2e   : > { %s3242_s29 = sshll.u32 %s220_s25, 5  ;;  %p258_p0 = scmp.lt.s32.totalorder %s4002_s15, 1 }
  0x2f   : > { %s257_s30 = scalar_select %p256_p13, %s4006_s16, 1 }
  0x30   : > { %s259_s5 = scalar_select %p258_p0, %s4002_s15, 1 }
  0x31   : > { %s3245_s6 = sshll.u32 %s257_s30, 3  ;;  %s3344_s7 = smul.u32 96, %s257_s30 }
  0x32   : > { %s3244_s8 = sshll.u32 %s259_s5, 2  ;;  %s4148_s12 = scalar_lea.vmem [#allocation5], %s3242_s29 }
  0x33   : > { %s262_s9 = sadd.s32 %s3245_s6, %s3244_s8  ;;  %s4143_s23 = scalar_lea.vmem %s8107_s1, %s3344_s7 }
  0x34   : > { %s3246_s27 = sshll.u32 %s262_s9, 2  ;;  %s4150_s25 = scalar_lea.vmem [#allocation6], %s3242_s29 }
  0x35   : > { %s264_s24 = scalar_lea.vmem %s8106_s0, %s3246_s27  ;;  %p3248_p1 = scmp.ne.s32.totalorder %s3998_s14, 0 }
  0x37   : > { %276 = sbr.rel (%p3248_p1) target bundleno = 66 (0x42), region = 59 }
  0x3c   : > { %v277_v4 = vlaneseq  ;;  %v4024_v5 = vmov 0.0   ;;  %v4025_v6 = vmov -inf  }
  0x3d   : > { %283 = vst [vmem:[#allocation4 + $0x30] sm:$0xff] %v4024_v5  ;;  %284 = vst [vmem:[#allocation4] sm:$0xff] %v4024_v5 }
  0x3e   : > { %285 = vst [vmem:[#allocation4 + $0x18] sm:$0xff] %v4024_v5  ;;  %286 = vst [vmem:[#allocation4 + $0x10] sm:$0xff] %v4024_v5  ;;  %vm279_vm0 = vcmp.lt.s32.totalorder %v277_v4, 512 }
  0x3f   : > { %287 = vst [vmem:[#allocation4 + $0x8] sm:$0xff] %v4024_v5  ;;  %288 = vst [vmem:[#allocation4 + $0x20] sm:$0xff] %v4024_v5 }
  0x40   : > { %289 = vst [vmem:[#allocation4 + $0x28] sm:$0xff] %v4024_v5  ;;  %290 = vst [vmem:[#allocation4 + $0x38] sm:$0xff] %v4024_v5 }
  0x41   : > { %281 = vst.msk [vmem:[#allocation2] sm:$0xf] %vm279_vm0, %v4025_v6  ;;  %282 = vst.msk [vmem:[#allocation3] sm:$0xf] %vm279_vm0, %v4024_v5 }
  0x42 PF: > { %s3339_s2 = smul.u32 48, %s3998_s14  ;;  %v291_v7 = vld [vmem:[%s264_s24] sm:$0xff]  ;;  %vm487_vm1 = vcmask 1043456   ;;  %v292_v8 = vld [vmem:[%s264_s24 + $0x8] sm:$0xff]  ;;  %v4026_v13 = vmov 0   ;;  %vm390_vm2 = vcmask 64512  }
  0x43   : > { %v3255_v9 = vcombine.high %v291_v7, %v291_v7  ;;  %v3257_v10 = vcombine.high %v292_v8, %v292_v8  ;;  %v3254_v11 = vcombine.low %v291_v7, %v291_v7  ;;  %v3256_v12 = vcombine.low %v292_v8, %v292_v8  ;;  %532 = vmatprep.mubr.bf16.mxu0 %v4026_v13  ;;  %p3328_p2 = scmp.ne.s32.totalorder %s3998_s14, 1 }
  0x44   : > { %s4156_s29 = scalar_lea.vmem %s4143_s23, %s3339_s2  ;;  %885 = vmatprep.mubr.bf16.mxu1 %v4026_v13 }
  0x45   : > { %v296_v14 = vld [vmem:[%s4156_s29] sm:$0xff]  ;;  %3258 = vmatprep.subr.msk.bf16.mxu0 %vm487_vm1, %v3255_v9  ;;  %3291 = vmatprep.subr.msk.bf16.mxu1 %vm487_vm1, %v3257_v10  ;;  %v489_v15 = vsel %vm487_vm1, %v3254_v11, 0  ;;  %v495_v16 = vsel %vm487_vm1, %v3256_v12, 0  ;;  %v297_v17 = vld [vmem:[%s4156_s29 + $0x8] sm:$0xff] }
  0x46   : > { %v3250_v18 = vcombine.low %v296_v14, %v296_v14  ;;  %515 = vmatpush1.bf16.msra.mxu0 %v489_v15  ;;  %868 = vmatpush1.bf16.msra.mxu1 %v495_v16  ;;  %v3252_v19 = vcombine.low %v297_v17, %v297_v17  ;;  %v3251_v20 = vcombine.high %v296_v14, %v296_v14 }
  0x47   : > { %v3253_v21 = vcombine.high %v297_v17, %v297_v17 }
  0x48   : > { %316 = vxpose.xlu0.c.b16.start.end [1/1] (short) %v3250_v18, 128  ;;  %348 = vxpose.xlu1.c.b16.start.end [1/1] (short) %v3252_v19, 128 }
  0x65   : > { %332 = vxpose.xlu0.c.b16.start.end [1/1] (short) %v3251_v20, 128  ;;  %364 = vxpose.xlu1.c.b16.start.end [1/1] (short) %v3253_v21, 128 }
  0xaa   : > { %v324_v22 = vpop.trf.xlu0  ;;  %v356_v38 = vpop.trf.xlu1 }
  0xab   : > { %3259 = vmatmul.mubr.msk.bf16.vlgmr.msra.gmra.mxu0 %vm390_vm2, %v324_v22  ;;  %3292 = vmatmul.mubr.msk.bf16.vlgmr.msra.gmra.mxu1 %vm390_vm2, %v324_v22 }
  0xac   : > { %542 = vmatprep.mubr.bf16.mxu0 %v4026_v13  ;;  %895 = vmatprep.mubr.bf16.mxu1 %v4026_v13 }
  0xae   : > { %v325_v23 = vpop.trf.xlu0  ;;  %v357_v39 = vpop.trf.xlu1 }
  0xb2   : > { %v326_v24 = vpop.trf.xlu0  ;;  %v358_v40 = vpop.trf.xlu1 }
  0xb3   : > { %3260 = vmatmul.mubr.msk.bf16.gmra.mxu0 %vm390_vm2, %v325_v23  ;;  %3293 = vmatmul.mubr.msk.bf16.gmra.mxu1 %vm390_vm2, %v325_v23 }
  0xb4   : > { %552 = vmatprep.mubr.bf16.mxu0 %v4026_v13  ;;  %905 = vmatprep.mubr.bf16.mxu1 %v4026_v13 }
  0xb6   : > { %v327_v25 = vpop.trf.xlu0  ;;  %v359_v41 = vpop.trf.xlu1 }
  0xba   : > { %v328_v26 = vpop.trf.xlu0  ;;  %v360_v42 = vpop.trf.xlu1 }
  0xbb   : > { %3261 = vmatmul.mubr.msk.bf16.gmra.mxu0 %vm390_vm2, %v326_v24  ;;  %3294 = vmatmul.mubr.msk.bf16.gmra.mxu1 %vm390_vm2, %v326_v24 }
  0xbc   : > { %562 = vmatprep.mubr.bf16.mxu0 %v4026_v13  ;;  %915 = vmatprep.mubr.bf16.mxu1 %v4026_v13 }
  0xbe   : > { %v329_v27 = vpop.trf.xlu0  ;;  %v361_v43 = vpop.trf.xlu1 }
  0xc2   : > { %v330_v28 = vpop.trf.xlu0  ;;  %v362_v44 = vpop.trf.xlu1 }
  0xc3   : > { %3262 = vmatmul.mubr.msk.bf16.gmra.mxu0 %vm390_vm2, %v327_v25  ;;  %3295 = vmatmul.mubr.msk.bf16.gmra.mxu1 %vm390_vm2, %v327_v25 }
  0xc4   : > { %572 = vmatprep.mubr.bf16.mxu0 %v4026_v13  ;;  %925 = vmatprep.mubr.bf16.mxu1 %v4026_v13 }
  0xc6   : > { %v331_v29 = vpop.trf.xlu0  ;;  %v363_v45 = vpop.trf.xlu1 }
  0xca   : > { %v340_v30 = vpop.trf.xlu0  ;;  %v372_v46 = vpop.trf.xlu1 }
  0xcb   : > { %3263 = vmatmul.mubr.msk.bf16.gmra.mxu0 %vm390_vm2, %v328_v26  ;;  %3296 = vmatmul.mubr.msk.bf16.gmra.mxu1 %vm390_vm2, %v328_v26 }
  0xcc   : > { %582 = vmatprep.mubr.bf16.mxu0 %v4026_v13  ;;  %935 = vmatprep.mubr.bf16.mxu1 %v4026_v13 }
  0xce   : > { %v341_v31 = vpop.trf.xlu0  ;;  %v373_v53 = vpop.trf.xlu1 }
  0xd2   : > { %v342_v32 = vpop.trf.xlu0  ;;  %v374_v62 = vpop.trf.xlu1 }
  0xd3   : > { %3264 = vmatmul.mubr.msk.bf16.gmra.mxu0 %vm390_vm2, %v329_v27  ;;  %3297 = vmatmul.mubr.msk.bf16.gmra.mxu1 %vm390_vm2, %v329_v27 }
  0xd4   : > { %592 = vmatprep.mubr.bf16.mxu0 %v4026_v13  ;;  %945 = vmatprep.mubr.bf16.mxu1 %v4026_v13 }
  0xd6   : > { %v343_v33 = vpop.trf.xlu0  ;;  %v375_v7 = vpop.trf.xlu1 }
  0xda   : > { %v344_v34 = vpop.trf.xlu0  ;;  %v376_v17 = vpop.trf.xlu1 }
  0xdb   : > { %3265 = vmatmul.mubr.msk.bf16.gmra.mxu0 %vm390_vm2, %v330_v28  ;;  %3298 = vmatmul.mubr.msk.bf16.gmra.mxu1 %vm390_vm2, %v330_v28 }
  0xdc   : > { %602 = vmatprep.mubr.bf16.mxu0 %v4026_v13  ;;  %955 = vmatprep.mubr.bf16.mxu1 %v4026_v13 }
  0xde   : > { %v345_v35 = vpop.trf.xlu0  ;;  %v377_v26 = vpop.trf.xlu1 }
  0xe2   : > { %v346_v36 = vpop.trf.xlu0 }
  0xe3   : > { %3266 = vmatmul.mubr.msk.bf16.gmra.mxu0 %vm390_vm2, %v331_v29  ;;  %3299 = vmatmul.mubr.msk.bf16.gmra.mxu1 %vm390_vm2, %v331_v29 }
  0xe4   : > { %612 = vmatprep.mubr.bf16.mxu0 %v4026_v13  ;;  %965 = vmatprep.mubr.bf16.mxu1 %v4026_v13 }
  0xe6   : > { %v347_v37 = vpop.trf.xlu0 }
  0xeb   : > { %3267 = vmatmul.mubr.msk.bf16.gmra.mxu0 %vm390_vm2, %v340_v30  ;;  %3300 = vmatmul.mubr.msk.bf16.gmra.mxu1 %vm390_vm2, %v340_v30 }
  0xec   : > { %622 = vmatprep.mubr.bf16.mxu0 %v4026_v13  ;;  %975 = vmatprep.mubr.bf16.mxu1 %v4026_v13 }
  0xf3   : > { %3268 = vmatmul.mubr.msk.bf16.gmra.mxu0 %vm390_vm2, %v341_v31  ;;  %3301 = vmatmul.mubr.msk.bf16.gmra.mxu1 %vm390_vm2, %v341_v31 }
  0xf4   : > { %632 = vmatprep.mubr.bf16.mxu0 %v4026_v13  ;;  %985 = vmatprep.mubr.bf16.mxu1 %v4026_v13 }
  0xfb   : > { %3269 = vmatmul.mubr.msk.bf16.gmra.mxu0 %vm390_vm2, %v342_v32  ;;  %3302 = vmatmul.mubr.msk.bf16.gmra.mxu1 %vm390_vm2, %v342_v32 }
  0xfc   : > { %642 = vmatprep.mubr.bf16.mxu0 %v4026_v13  ;;  %995 = vmatprep.mubr.bf16.mxu1 %v4026_v13 }
 0x103   : > { %3270 = vmatmul.mubr.msk.bf16.gmra.mxu0 %vm390_vm2, %v343_v33  ;;  %3303 = vmatmul.mubr.msk.bf16.gmra.mxu1 %vm390_vm2, %v343_v33 }
 0x104   : > { %652 = vmatprep.mubr.bf16.mxu0 %v4026_v13  ;;  %1005 = vmatprep.mubr.bf16.mxu1 %v4026_v13 }
 0x10b   : > { %3271 = vmatmul.mubr.msk.bf16.gmra.mxu0 %vm390_vm2, %v344_v34  ;;  %3304 = vmatmul.mubr.msk.bf16.gmra.mxu1 %vm390_vm2, %v344_v34 }
 0x10c   : > { %662 = vmatprep.mubr.bf16.mxu0 %v4026_v13  ;;  %1015 = vmatprep.mubr.bf16.mxu1 %v4026_v13 }
 0x113   : > { %3272 = vmatmul.mubr.msk.bf16.gmra.mxu0 %vm390_vm2, %v345_v35  ;;  %3305 = vmatmul.mubr.msk.bf16.gmra.mxu1 %vm390_vm2, %v345_v35  ;;  %v378_v35 = vpop.trf.xlu1 }
 0x114   : > { %672 = vmatprep.mubr.bf16.mxu0 %v4026_v13  ;;  %1025 = vmatprep.mubr.bf16.mxu1 %v4026_v13 }
 0x11b   : > { %3273 = vmatmul.mubr.msk.bf16.gmra.mxu0 %vm390_vm2, %v346_v36  ;;  %3306 = vmatmul.mubr.msk.bf16.gmra.mxu1 %vm390_vm2, %v346_v36 }
 0x11c   : > { %682 = vmatprep.mubr.bf16.mxu0 %v4026_v13  ;;  %1035 = vmatprep.mubr.bf16.mxu1 %v4026_v13 }
 0x123   : > { %3274 = vmatmul.mubr.msk.bf16.gmra.mxu0 %vm390_vm2, %v347_v37  ;;  %3307 = vmatmul.mubr.msk.bf16.gmra.mxu1 %vm390_vm2, %v347_v37 }
 0x124   : > { %692 = vmatprep.mubr.bf16.mxu0 %v4026_v13  ;;  %1045 = vmatprep.mubr.bf16.mxu1 %v4026_v13 }
 0x12b   : > { %3275 = vmatmul.mubr.msk.bf16.gmra.mxu0 %vm390_vm2, %v356_v38  ;;  %3308 = vmatmul.mubr.msk.bf16.gmra.mxu1 %vm390_vm2, %v356_v38 }
 0x12c   : > { %702 = vmatprep.mubr.bf16.mxu0 %v4026_v13  ;;  %1055 = vmatprep.mubr.bf16.mxu1 %v4026_v13 }
 0x133   : > { %3276 = vmatmul.mubr.msk.bf16.gmra.mxu0 %vm390_vm2, %v357_v39  ;;  %3309 = vmatmul.mubr.msk.bf16.gmra.mxu1 %vm390_vm2, %v357_v39 }
 0x134   : > { %712 = vmatprep.mubr.bf16.mxu0 %v4026_v13  ;;  %1065 = vmatprep.mubr.bf16.mxu1 %v4026_v13 }
 0x13b   : > { %3277 = vmatmul.mubr.msk.bf16.gmra.mxu0 %vm390_vm2, %v358_v40  ;;  %3310 = vmatmul.mubr.msk.bf16.gmra.mxu1 %vm390_vm2, %v358_v40 }
 0x13c   : > { %722 = vmatprep.mubr.bf16.mxu0 %v4026_v13  ;;  %1075 = vmatprep.mubr.bf16.mxu1 %v4026_v13 }
 0x143   : > { %3278 = vmatmul.mubr.msk.bf16.gmra.mxu0 %vm390_vm2, %v359_v41  ;;  %3311 = vmatmul.mubr.msk.bf16.gmra.mxu1 %vm390_vm2, %v359_v41 }
 0x144   : > { %732 = vmatprep.mubr.bf16.mxu0 %v4026_v13  ;;  %1085 = vmatprep.mubr.bf16.mxu1 %v4026_v13 }
 0x14b   : > { %3279 = vmatmul.mubr.msk.bf16.gmra.mxu0 %vm390_vm2, %v360_v42  ;;  %3312 = vmatmul.mubr.msk.bf16.gmra.mxu1 %vm390_vm2, %v360_v42 }
 0x14c   : > { %742 = vmatprep.mubr.bf16.mxu0 %v4026_v13  ;;  %1095 = vmatprep.mubr.bf16.mxu1 %v4026_v13 }
 0x153   : > { %3280 = vmatmul.mubr.msk.bf16.gmra.mxu0 %vm390_vm2, %v361_v43  ;;  %3313 = vmatmul.mubr.msk.bf16.gmra.mxu1 %vm390_vm2, %v361_v43 }
 0x154   : > { %752 = vmatprep.mubr.bf16.mxu0 %v4026_v13  ;;  %1105 = vmatprep.mubr.bf16.mxu1 %v4026_v13 }
 0x15b   : > { %3281 = vmatmul.mubr.msk.bf16.gmra.mxu0 %vm390_vm2, %v362_v44  ;;  %3314 = vmatmul.mubr.msk.bf16.gmra.mxu1 %vm390_vm2, %v362_v44  ;;  %v379_v44 = vpop.trf.xlu1 }
 0x15c   : > { %762 = vmatprep.mubr.bf16.mxu0 %v4026_v13  ;;  %1115 = vmatprep.mubr.bf16.mxu1 %v4026_v13 }
 0x163   : > { %3282 = vmatmul.mubr.msk.bf16.gmra.mxu0 %vm390_vm2, %v363_v45  ;;  %3315 = vmatmul.mubr.msk.bf16.gmra.mxu1 %vm390_vm2, %v363_v45 }
 0x164   : > { %772 = vmatprep.mubr.bf16.mxu0 %v4026_v13  ;;  %1125 = vmatprep.mubr.bf16.mxu1 %v4026_v13 }
 0x16b   : > { %v4257_v47 = vpop.f32.mrf.mxu0  ;;  %3283 = vmatmul.mubr.msk.bf16.gmra.mxu0 %vm390_vm2, %v372_v46  ;;  %v4260_v48 = vpop.f32.mrf.mxu1  ;;  %3316 = vmatmul.mubr.msk.bf16.gmra.mxu1 %vm390_vm2, %v372_v46 }
 0x16c   : > { %8752 = vst [vmem:[#allocation8_spill] sm:$0xff] %v4257_v47  ;;  %8753 = vst [vmem:[#allocation9_spill] sm:$0xff] %v4260_v48  ;;  %782 = vmatprep.mubr.bf16.mxu0 %v4026_v13  ;;  %1135 = vmatprep.mubr.bf16.mxu1 %v4026_v13 }
 0x16d   : > { %v4265_v49 = vpop.f32.mrf.mxu0  ;;  %v4267_v50 = vpop.f32.mrf.mxu1 }
 0x16e   : > { %8754 = vst [vmem:[#allocation10_spill] sm:$0xff] %v4265_v49  ;;  %8755 = vst [vmem:[#allocation11_spill] sm:$0xff] %v4267_v50 }
 0x16f   : > { %v4269_v51 = vpop.f32.mrf.mxu0  ;;  %v4271_v52 = vpop.f32.mrf.mxu1 }
 0x170   : > { %8756 = vst [vmem:[#allocation12_spill] sm:$0xff] %v4269_v51  ;;  %8757 = vst [vmem:[#allocation13_spill] sm:$0xff] %v4271_v52 }
 0x171   : > { %v4273_v54 = vpop.f32.mrf.mxu0  ;;  %v4275_v55 = vpop.f32.mrf.mxu1 }
 0x172   : > { %8758 = vst [vmem:[#allocation14_spill] sm:$0xff] %v4273_v54  ;;  %8759 = vst [vmem:[#allocation15_spill] sm:$0xff] %v4275_v55 }
 0x173   : > { %v4277_v56 = vpop.f32.mrf.mxu0  ;;  %3284 = vmatmul.mubr.msk.bf16.gmra.mxu0 %vm390_vm2, %v373_v53  ;;  %v4280_v57 = vpop.f32.mrf.mxu1  ;;  %3317 = vmatmul.mubr.msk.bf16.gmra.mxu1 %vm390_vm2, %v373_v53 }
 0x174   : > { %8760 = vst [vmem:[#allocation16_spill] sm:$0xff] %v4277_v56  ;;  %8761 = vst [vmem:[#allocation17_spill] sm:$0xff] %v4280_v57  ;;  %792 = vmatprep.mubr.bf16.mxu0 %v4026_v13  ;;  %1145 = vmatprep.mubr.bf16.mxu1 %v4026_v13 }
 0x175   : > { %v4285_v58 = vpop.f32.mrf.mxu0  ;;  %v4287_v59 = vpop.f32.mrf.mxu1 }
 0x176   : > { %8762 = vst [vmem:[#allocation18_spill] sm:$0xff] %v4285_v58  ;;  %8763 = vst [vmem:[#allocation19_spill] sm:$0xff] %v4287_v59 }
 0x177   : > { %v4289_v60 = vpop.f32.mrf.mxu0  ;;  %v4291_v61 = vpop.f32.mrf.mxu1 }
 0x178   : > { %8764 = vst [vmem:[#allocation20_spill] sm:$0xff] %v4289_v60  ;;  %8765 = vst [vmem:[#allocation21_spill] sm:$0xff] %v4291_v61 }
 0x179   : > { %v4293_v63 = vpop.f32.mrf.mxu0  ;;  %v4295_v0 = vpop.f32.mrf.mxu1 }
 0x17a   : > { %8766 = vst [vmem:[#allocation22_spill] sm:$0xff] %v4293_v63  ;;  %8767 = vst [vmem:[#allocation23_spill] sm:$0xff] %v4295_v0 }
 0x17b   : > { %v4297_v1 = vpop.f32.mrf.mxu0  ;;  %3285 = vmatmul.mubr.msk.bf16.gmra.mxu0 %vm390_vm2, %v374_v62  ;;  %v4300_v2 = vpop.f32.mrf.mxu1  ;;  %3318 = vmatmul.mubr.msk.bf16.gmra.mxu1 %vm390_vm2, %v374_v62 }
 0x17c   : > { %8768 = vst [vmem:[#allocation24_spill] sm:$0xff] %v4297_v1  ;;  %8769 = vst [vmem:[#allocation25_spill] sm:$0xff] %v4300_v2  ;;  %802 = vmatprep.mubr.bf16.mxu0 %v4026_v13  ;;  %1155 = vmatprep.mubr.bf16.mxu1 %v4026_v13 }
 0x17d   : > { %v4305_v3 = vpop.f32.mrf.mxu0  ;;  %v4307_v4 = vpop.f32.mrf.mxu1 }
 0x17e   : > { %8770 = vst [vmem:[#allocation26_spill] sm:$0xff] %v4305_v3  ;;  %8771 = vst [vmem:[#allocation27_spill] sm:$0xff] %v4307_v4 }
 0x17f   : > { %v4309_v5 = vpop.f32.mrf.mxu0  ;;  %v4311_v6 = vpop.f32.mrf.mxu1 }
 0x180   : > { %8772 = vst [vmem:[#allocation28_spill] sm:$0xff] %v4309_v5  ;;  %8773 = vst [vmem:[#allocation29_spill] sm:$0xff] %v4311_v6 }
 0x181   : > { %v4313_v8 = vpop.f32.mrf.mxu0  ;;  %v4315_v9 = vpop.f32.mrf.mxu1 }
 0x182   : > { %8774 = vst [vmem:[#allocation30_spill] sm:$0xff] %v4313_v8  ;;  %8775 = vst [vmem:[#allocation31_spill] sm:$0xff] %v4315_v9 }
 0x183   : > { %v4317_v10 = vpop.f32.mrf.mxu0  ;;  %3286 = vmatmul.mubr.msk.bf16.gmra.mxu0 %vm390_vm2, %v375_v7  ;;  %v4320_v11 = vpop.f32.mrf.mxu1  ;;  %3319 = vmatmul.mubr.msk.bf16.gmra.mxu1 %vm390_vm2, %v375_v7 }
 0x184   : > { %8776 = vst [vmem:[#allocation32_spill] sm:$0xff] %v4317_v10  ;;  %8777 = vst [vmem:[#allocation33_spill] sm:$0xff] %v4320_v11  ;;  %812 = vmatprep.mubr.bf16.mxu0 %v4026_v13  ;;  %1165 = vmatprep.mubr.bf16.mxu1 %v4026_v13 }
 0x185   : > { %v4325_v12 = vpop.f32.mrf.mxu0  ;;  %v4327_v14 = vpop.f32.mrf.mxu1 }
 0x186   : > { %8778 = vst [vmem:[#allocation34_spill] sm:$0xff] %v4325_v12  ;;  %8779 = vst [vmem:[#allocation35_spill] sm:$0xff] %v4327_v14 }
 0x187   : > { %v4329_v15 = vpop.f32.mrf.mxu0  ;;  %v4331_v16 = vpop.f32.mrf.mxu1 }
 0x188   : > { %8780 = vst [vmem:[#allocation36_spill] sm:$0xff] %v4329_v15  ;;  %8781 = vst [vmem:[#allocation37_spill] sm:$0xff] %v4331_v16 }
 0x189   : > { %v4333_v18 = vpop.f32.mrf.mxu0  ;;  %v4335_v19 = vpop.f32.mrf.mxu1 }
 0x18a   : > { %8782 = vst [vmem:[#allocation38_spill] sm:$0xff] %v4333_v18  ;;  %8783 = vst [vmem:[#allocation39_spill] sm:$0xff] %v4335_v19 }
 0x18b   : > { %v4337_v20 = vpop.f32.mrf.mxu0  ;;  %3287 = vmatmul.mubr.msk.bf16.gmra.mxu0 %vm390_vm2, %v376_v17  ;;  %v4340_v21 = vpop.f32.mrf.mxu1  ;;  %3320 = vmatmul.mubr.msk.bf16.gmra.mxu1 %vm390_vm2, %v376_v17 }
 0x18c   : > { %8784 = vst [vmem:[#allocation40_spill] sm:$0xff] %v4337_v20  ;;  %8785 = vst [vmem:[#allocation41_spill] sm:$0xff] %v4340_v21  ;;  %822 = vmatprep.mubr.bf16.mxu0 %v4026_v13  ;;  %1175 = vmatprep.mubr.bf16.mxu1 %v4026_v13 }
 0x18d   : > { %v4345_v22 = vpop.f32.mrf.mxu0  ;;  %v4347_v23 = vpop.f32.mrf.mxu1 }
 0x18e   : > { %8786 = vst [vmem:[#allocation42_spill] sm:$0xff] %v4345_v22  ;;  %8787 = vst [vmem:[#allocation43_spill] sm:$0xff] %v4347_v23 }
 0x18f   : > { %v4349_v24 = vpop.f32.mrf.mxu0  ;;  %v4351_v25 = vpop.f32.mrf.mxu1 }
 0x190   : > { %8788 = vst [vmem:[#allocation44_spill] sm:$0xff] %v4349_v24  ;;  %8789 = vst [vmem:[#allocation45_spill] sm:$0xff] %v4351_v25 }
 0x191   : > { %v4353_v27 = vpop.f32.mrf.mxu0  ;;  %v4355_v28 = vpop.f32.mrf.mxu1 }
 0x192   : > { %8790 = vst [vmem:[#allocation46_spill] sm:$0xff] %v4353_v27  ;;  %8791 = vst [vmem:[#allocation47_spill] sm:$0xff] %v4355_v28 }
 0x193   : > { %v4357_v29 = vpop.f32.mrf.mxu0  ;;  %3288 = vmatmul.mubr.msk.bf16.gmra.mxu0 %vm390_vm2, %v377_v26  ;;  %v4360_v30 = vpop.f32.mrf.mxu1  ;;  %3321 = vmatmul.mubr.msk.bf16.gmra.mxu1 %vm390_vm2, %v377_v26 }
 0x194   : > { %8792 = vst [vmem:[#allocation48_spill] sm:$0xff] %v4357_v29  ;;  %8793 = vst [vmem:[#allocation49_spill] sm:$0xff] %v4360_v30  ;;  %832 = vmatprep.mubr.bf16.mxu0 %v4026_v13  ;;  %1185 = vmatprep.mubr.bf16.mxu1 %v4026_v13 }
 0x195   : > { %v4365_v31 = vpop.f32.mrf.mxu0  ;;  %v4367_v32 = vpop.f32.mrf.mxu1 }
 0x196   : > { %8794 = vst [vmem:[#allocation50_spill] sm:$0xff] %v4365_v31  ;;  %8795 = vst [vmem:[#allocation51_spill] sm:$0xff] %v4367_v32 }
 0x197   : > { %v4369_v33 = vpop.f32.mrf.mxu0  ;;  %v4371_v34 = vpop.f32.mrf.mxu1 }
 0x198   : > { %8796 = vst [vmem:[#allocation52_spill] sm:$0xff] %v4369_v33  ;;  %8797 = vst [vmem:[#allocation53_spill] sm:$0xff] %v4371_v34 }
 0x199   : > { %v4373_v36 = vpop.f32.mrf.mxu0  ;;  %v4375_v37 = vpop.f32.mrf.mxu1 }
 0x19a   : > { %8798 = vst [vmem:[#allocation54_spill] sm:$0xff] %v4373_v36  ;;  %8799 = vst [vmem:[#allocation55_spill] sm:$0xff] %v4375_v37 }
 0x19b   : > { %v4377_v38 = vpop.f32.mrf.mxu0  ;;  %3289 = vmatmul.mubr.msk.bf16.gmra.mxu0 %vm390_vm2, %v378_v35  ;;  %v4380_v39 = vpop.f32.mrf.mxu1  ;;  %3322 = vmatmul.mubr.msk.bf16.gmra.mxu1 %vm390_vm2, %v378_v35 }
 0x19c   : > { %8800 = vst [vmem:[#allocation56_spill] sm:$0xff] %v4377_v38  ;;  %8801 = vst [vmem:[#allocation57_spill] sm:$0xff] %v4380_v39  ;;  %842 = vmatprep.mubr.bf16.mxu0 %v4026_v13  ;;  %1195 = vmatprep.mubr.bf16.mxu1 %v4026_v13 }
 0x19d   : > { %v4385_v40 = vpop.f32.mrf.mxu0  ;;  %v4387_v41 = vpop.f32.mrf.mxu1 }
 0x19e   : > { %8802 = vst [vmem:[#allocation58_spill] sm:$0xff] %v4385_v40  ;;  %8803 = vst [vmem:[#allocation59_spill] sm:$0xff] %v4387_v41 }
 0x19f   : > { %v4389_v42 = vpop.f32.mrf.mxu0  ;;  %v4391_v43 = vpop.f32.mrf.mxu1 }
 0x1a0   : > { %8804 = vst [vmem:[#allocation60_spill] sm:$0xff] %v4389_v42  ;;  %8805 = vst [vmem:[#allocation61_spill] sm:$0xff] %v4391_v43 }
 0x1a1   : > { %v4393_v45 = vpop.f32.mrf.mxu0  ;;  %v4395_v46 = vpop.f32.mrf.mxu1 }
 0x1a2   : > { %8806 = vst [vmem:[#allocation62_spill] sm:$0xff] %v4393_v45  ;;  %8807 = vst [vmem:[#allocation63_spill] sm:$0xff] %v4395_v46 }
 0x1a3   : > { %v4397_v53 = vpop.f32.mrf.mxu0  ;;  %3290 = vmatmul.mubr.msk.bf16.gmra.mxu0 %vm390_vm2, %v379_v44  ;;  %v4400_v62 = vpop.f32.mrf.mxu1  ;;  %3323 = vmatmul.mubr.msk.bf16.gmra.mxu1 %vm390_vm2, %v379_v44 }
 0x1a4   : > { %8808 = vst [vmem:[#allocation64_spill] sm:$0xff] %v4397_v53  ;;  %8809 = vst [vmem:[#allocation65_spill] sm:$0xff] %v4400_v62 }
 0x1a5   : > { %v4403_v13 = vpop.f32.mrf.mxu0  ;;  %v4405_v7 = vpop.f32.mrf.mxu1 }
 0x1a6   : > { %8810 = vst [vmem:[#allocation66_spill] sm:$0xff] %v4403_v13  ;;  %8811 = vst [vmem:[#allocation67_spill] sm:$0xff] %v4405_v7 }
 0x1a7   : > { %v4407_v17 = vpop.f32.mrf.mxu0  ;;  %v4409_v26 = vpop.f32.mrf.mxu1 }
 0x1a8   : > { %8812 = vst [vmem:[#allocation68_spill] sm:$0xff] %v4407_v17  ;;  %8813 = vst [vmem:[#allocation69_spill] sm:$0xff] %v4409_v26 }
 0x1a9   : > { %v4411_v35 = vpop.f32.mrf.mxu0  ;;  %v4413_v43 = vpop.f32.mrf.mxu1 }
 0x1aa   : > { %8814 = vst [vmem:[#allocation70_spill] sm:$0xff] %v4411_v35  ;;  %8815 = vst [vmem:[#allocation71_spill] sm:$0xff] %v4413_v43 }
 0x1ab   : > { %v4415_v42 = vpop.f32.mrf.mxu0  ;;  %v4417_v53 = vpop.f32.mrf.mxu1 }
 0x1ac   : > { %8816 = vst [vmem:[#allocation72_spill] sm:$0xff] %v4415_v42  ;;  %8817 = vst [vmem:[#allocation73_spill] sm:$0xff] %v4417_v53 }
 0x1ad   : > { %v4419_v46 = vpop.f32.mrf.mxu0  ;;  %v4421_v62 = vpop.f32.mrf.mxu1 }
 0x1ae   : > { %8818 = vst [vmem:[#allocation74_spill] sm:$0xff] %v4419_v46  ;;  %8819 = vst [vmem:[#allocation75_spill] sm:$0xff] %v4421_v62 }
 0x1af   : > { %v4423_v44 = vpop.f32.mrf.mxu0  ;;  %v4425_v13 = vpop.f32.mrf.mxu1 }
 0x1b0   : > { %8820 = vst [vmem:[#allocation76_spill] sm:$0xff] %v4423_v44  ;;  %8821 = vst [vmem:[#allocation77_spill] sm:$0xff] %v4425_v13 }
 0x1b1   : > { %v4427_v7 = vpop.f32.mrf.mxu0  ;;  %v4429_v17 = vpop.f32.mrf.mxu1 }
 0x1b2   : > { %8822 = vst [vmem:[#allocation78_spill] sm:$0xff] %v4427_v7  ;;  %8823 = vst [vmem:[#allocation79_spill] sm:$0xff] %v4429_v17 }
 0x1b3   : > { %v4431_v26 = vpop.f32.mrf.mxu0  ;;  %v4433_v35 = vpop.f32.mrf.mxu1 }
 0x1b4   : > { %8824 = vst [vmem:[#allocation80_spill] sm:$0xff] %v4431_v26  ;;  %8825 = vst [vmem:[#allocation81_spill] sm:$0xff] %v4433_v35 }
 0x1b5   : > { %v4435_v43 = vpop.f32.mrf.mxu0  ;;  %v4437_v42 = vpop.f32.mrf.mxu1 }
 0x1b6   : > { %8826 = vst [vmem:[#allocation82_spill] sm:$0xff] %v4435_v43  ;;  %8827 = vst [vmem:[#allocation83_spill] sm:$0xff] %v4437_v42 }
 0x1b7   : > { %v4439_v53 = vpop.f32.mrf.mxu0  ;;  %v4441_v46 = vpop.f32.mrf.mxu1 }
 0x1b8   : > { %8828 = vst [vmem:[#allocation84_spill] sm:$0xff] %v4439_v53  ;;  %8829 = vst [vmem:[#allocation85_spill] sm:$0xff] %v4441_v46 }
 0x1b9   : > { %v4443_v62 = vpop.f32.mrf.mxu0  ;;  %v4445_v44 = vpop.f32.mrf.mxu1 }
 0x1ba   : > { %8830 = vst [vmem:[#allocation86_spill] sm:$0xff] %v4443_v62  ;;  %8831 = vst [vmem:[#allocation87_spill] sm:$0xff] %v4445_v44 }
 0x1bb   : > { %v4447_v13 = vpop.f32.mrf.mxu0  ;;  %v4449_v7 = vpop.f32.mrf.mxu1 }
 0x1bc   : > { %8832 = vst [vmem:[#allocation88_spill] sm:$0xff] %v4447_v13  ;;  %8833 = vst [vmem:[#allocation89_spill] sm:$0xff] %v4449_v7 }
 0x1bd   : > { %v4451_v17 = vpop.f32.mrf.mxu0  ;;  %v4453_v26 = vpop.f32.mrf.mxu1 }
 0x1be   : > { %8834 = vst [vmem:[#allocation90_spill] sm:$0xff] %v4451_v17  ;;  %8835 = vst [vmem:[#allocation91_spill] sm:$0xff] %v4453_v26 }
 0x1bf   : > { %v4455_v35 = vpop.f32.mrf.mxu0  ;;  %v4457_v43 = vpop.f32.mrf.mxu1 }
 0x1c0   : > { %8836 = vst [vmem:[#allocation92_spill] sm:$0xff] %v4455_v35  ;;  %8837 = vst [vmem:[#allocation93_spill] sm:$0xff] %v4457_v43 }
 0x1c1   : > { %v4459_v42 = vpop.f32.mrf.mxu0  ;;  %v4461_v53 = vpop.f32.mrf.mxu1 }
 0x1c2   : > { %8838 = vst [vmem:[#allocation94_spill] sm:$0xff] %v4459_v42  ;;  %8839 = vst [vmem:[#allocation95_spill] sm:$0xff] %v4461_v53 }
 0x1c3   : > { %v4463_v46 = vpop.f32.mrf.mxu0  ;;  %v4465_v62 = vpop.f32.mrf.mxu1 }
 0x1c4   : > { %8840 = vst [vmem:[#allocation96_spill] sm:$0xff] %v4463_v46  ;;  %8841 = vst [vmem:[#allocation97_spill] sm:$0xff] %v4465_v62 }
 0x1c5   : > { %v4467_v44 = vpop.f32.mrf.mxu0  ;;  %v4469_v13 = vpop.f32.mrf.mxu1 }
 0x1c6   : > { %8842 = vst [vmem:[#allocation98_spill] sm:$0xff] %v4467_v44  ;;  %8843 = vst [vmem:[#allocation99_spill] sm:$0xff] %v4469_v13 }
 0x1c7   : > { %v4471_v7 = vpop.f32.mrf.mxu0  ;;  %v4473_v17 = vpop.f32.mrf.mxu1 }
 0x1c8   : > { %8844 = vst [vmem:[#allocation100_spill] sm:$0xff] %v4471_v7  ;;  %8845 = vst [vmem:[#allocation101_spill] sm:$0xff] %v4473_v17 }
 0x1c9   : > { %v4475_v26 = vpop.f32.mrf.mxu0  ;;  %v4477_v35 = vpop.f32.mrf.mxu1 }
 0x1ca   : > { %8846 = vst [vmem:[#allocation102_spill] sm:$0xff] %v4475_v26  ;;  %8847 = vst [vmem:[#allocation103_spill] sm:$0xff] %v4477_v35 }
 0x1cb   : > { %v4479_v43 = vpop.f32.mrf.mxu0  ;;  %v4481_v42 = vpop.f32.mrf.mxu1 }
 0x1cc   : > { %8848 = vst [vmem:[#allocation104_spill] sm:$0xff] %v4479_v43  ;;  %8849 = vst [vmem:[#allocation105_spill] sm:$0xff] %v4481_v42 }
 0x1cd   : > { %v4483_v53 = vpop.f32.mrf.mxu0  ;;  %v4485_v46 = vpop.f32.mrf.mxu1 }
 0x1ce   : > { %8850 = vst [vmem:[#allocation106_spill] sm:$0xff] %v4483_v53  ;;  %8851 = vst [vmem:[#allocation107_spill] sm:$0xff] %v4485_v46 }
 0x1cf   : > { %v4487_v62 = vpop.f32.mrf.mxu0  ;;  %v4489_v44 = vpop.f32.mrf.mxu1 }
 0x1d0   : > { %8852 = vst [vmem:[#allocation108_spill] sm:$0xff] %v4487_v62  ;;  %8853 = vst [vmem:[#allocation109_spill] sm:$0xff] %v4489_v44 }
 0x1d1   : > { %v4491_v13 = vpop.f32.mrf.mxu0  ;;  %v4493_v7 = vpop.f32.mrf.mxu1 }
 0x1d2   : > { %8854 = vst [vmem:[#allocation110_spill] sm:$0xff] %v4491_v13  ;;  %8855 = vst [vmem:[#allocation111_spill] sm:$0xff] %v4493_v7 }
 0x1d3   : > { %v4495_v17 = vpop.f32.mrf.mxu0  ;;  %v4497_v26 = vpop.f32.mrf.mxu1 }
 0x1d4   : > { %8856 = vst [vmem:[#allocation112_spill] sm:$0xff] %v4495_v17  ;;  %8857 = vst [vmem:[#allocation113_spill] sm:$0xff] %v4497_v26 }
 0x1d5   : > { %v4499_v35 = vpop.f32.mrf.mxu0  ;;  %v4501_v43 = vpop.f32.mrf.mxu1 }
 0x1d6   : > { %8858 = vst [vmem:[#allocation114_spill] sm:$0xff] %v4499_v35  ;;  %8859 = vst [vmem:[#allocation115_spill] sm:$0xff] %v4501_v43 }
 0x1d7   : > { %v4503_v42 = vpop.f32.mrf.mxu0  ;;  %v4505_v53 = vpop.f32.mrf.mxu1 }
 0x1d8   : > { %8860 = vst [vmem:[#allocation116_spill] sm:$0xff] %v4503_v42  ;;  %8861 = vst [vmem:[#allocation117_spill] sm:$0xff] %v4505_v53 }
 0x1d9   : > { %v4507_v46 = vpop.f32.mrf.mxu0  ;;  %v4509_v62 = vpop.f32.mrf.mxu1 }
 0x1da   : > { %8862 = vst [vmem:[#allocation118_spill] sm:$0xff] %v4507_v46  ;;  %8863 = vst [vmem:[#allocation119_spill] sm:$0xff] %v4509_v62 }
 0x1db   : > { %v4511_v44 = vpop.f32.mrf.mxu0  ;;  %v4513_v13 = vpop.f32.mrf.mxu1 }
 0x1dc   : > { %8864 = vst [vmem:[#allocation120_spill] sm:$0xff] %v4511_v44  ;;  %8865 = vst [vmem:[#allocation121_spill] sm:$0xff] %v4513_v13 }
 0x1dd   : > { %v4515_v7 = vpop.f32.mrf.mxu0  ;;  %v4517_v17 = vpop.f32.mrf.mxu1 }
 0x1de   : > { %8866 = vst [vmem:[#allocation122_spill] sm:$0xff] %v4515_v7  ;;  %8867 = vst [vmem:[#allocation123_spill] sm:$0xff] %v4517_v17 }
 0x1df   : > { %v4519_v26 = vpop.f32.mrf.mxu0  ;;  %v4521_v35 = vpop.f32.mrf.mxu1 }
 0x1e0   : > { %8868 = vst [vmem:[#allocation124_spill] sm:$0xff] %v4519_v26  ;;  %8869 = vst [vmem:[#allocation125_spill] sm:$0xff] %v4521_v35 }
 0x1e1   : > { %v4523_v43 = vpop.f32.mrf.mxu0  ;;  %v4525_v42 = vpop.f32.mrf.mxu1 }
 0x1e2   : > { %8870 = vst [vmem:[#allocation126_spill] sm:$0xff] %v4523_v43  ;;  %8871 = vst [vmem:[#allocation127_spill] sm:$0xff] %v4525_v42 }
 0x1e3   : > { %v4527_v53 = vpop.f32.mrf.mxu0  ;;  %v4529_v46 = vpop.f32.mrf.mxu1 }
 0x1e4   : > { %8872 = vst [vmem:[#allocation128_spill] sm:$0xff] %v4527_v53  ;;  %8873 = vst [vmem:[#allocation129_spill] sm:$0xff] %v4529_v46 }
 0x1e5   : > { %v4531_v62 = vpop.f32.mrf.mxu0  ;;  %v4533_v44 = vpop.f32.mrf.mxu1 }
 0x1e6   : > { %8874 = vst [vmem:[#allocation130_spill] sm:$0xff] %v4531_v62  ;;  %8875 = vst [vmem:[#allocation131_spill] sm:$0xff] %v4533_v44 }
 0x1e7   : > { %v4535_v13 = vpop.f32.mrf.mxu0  ;;  %v4537_v7 = vpop.f32.mrf.mxu1 }
 0x1e8   : > { %8876 = vst [vmem:[#allocation132_spill] sm:$0xff] %v4535_v13  ;;  %8877 = vst [vmem:[#allocation133_spill] sm:$0xff] %v4537_v7 }
 0x1e9   : > { %v4539_v17 = vpop.f32.mrf.mxu0  ;;  %v4541_v26 = vpop.f32.mrf.mxu1 }
 0x1ea   : > { %8878 = vst [vmem:[#allocation134_spill] sm:$0xff] %v4539_v17  ;;  %8879 = vst [vmem:[#allocation135_spill] sm:$0xff] %v4541_v26 }
 0x1eb   : > { %v4543_v35 = vpop.f32.mrf.mxu0  ;;  %v4545_v43 = vpop.f32.mrf.mxu1 }
 0x1ec   : > { %8880 = vst [vmem:[#allocation136_spill] sm:$0xff] %v4543_v35  ;;  %8881 = vst [vmem:[#allocation137_spill] sm:$0xff] %v4545_v43 }
 0x1ed   : > { %v4547_v42 = vpop.f32.mrf.mxu0  ;;  %v4549_v53 = vpop.f32.mrf.mxu1 }
 0x1ee   : > { %8882 = vst [vmem:[#allocation138_spill] sm:$0xff] %v4547_v42  ;;  %8883 = vst [vmem:[#allocation139_spill] sm:$0xff] %v4549_v53 }
 0x1ef   : > { %v4551_v46 = vpop.f32.mrf.mxu0  ;;  %v4553_v62 = vpop.f32.mrf.mxu1 }
 0x1f0   : > { %8884 = vst [vmem:[#allocation140_spill] sm:$0xff] %v4551_v46  ;;  %8885 = vst [vmem:[#allocation141_spill] sm:$0xff] %v4553_v62 }
 0x1f1   : > { %v4555_v44 = vpop.f32.mrf.mxu0  ;;  %v4557_v13 = vpop.f32.mrf.mxu1 }
 0x1f2   : > { %8886 = vst [vmem:[#allocation142_spill] sm:$0xff] %v4555_v44  ;;  %8887 = vst [vmem:[#allocation143_spill] sm:$0xff] %v4557_v13 }
 0x1f3   : > { %v4559_v7 = vpop.f32.mrf.mxu0  ;;  %v4561_v17 = vpop.f32.mrf.mxu1 }
 0x1f4   : > { %8888 = vst [vmem:[#allocation144_spill] sm:$0xff] %v4559_v7  ;;  %8889 = vst [vmem:[#allocation145_spill] sm:$0xff] %v4561_v17 }
 0x1f5   : > { %v4563_v26 = vpop.f32.mrf.mxu0  ;;  %v4565_v35 = vpop.f32.mrf.mxu1 }
 0x1f6   : > { %8890 = vst [vmem:[#allocation146_spill] sm:$0xff] %v4563_v26  ;;  %8891 = vst [vmem:[#allocation147_spill] sm:$0xff] %v4565_v35 }
 0x1f7   : > { %v4567_v43 = vpop.f32.mrf.mxu0  ;;  %v4569_v42 = vpop.f32.mrf.mxu1 }
 0x1f8   : > { %8892 = vst [vmem:[#allocation148_spill] sm:$0xff] %v4567_v43  ;;  %8893 = vst [vmem:[#allocation149_spill] sm:$0xff] %v4569_v42  ;;  %v1276_v43 = vmax.f32 %v4265_v49, %v4273_v54  ;;  %v1414_v42 = vmax.f32 %v4267_v50, %v4275_v55 }
 0x1f9   : > { %v4571_v53 = vpop.f32.mrf.mxu0  ;;  %v4573_v46 = vpop.f32.mrf.mxu1 }
 0x1fa   : > { %8894 = vst [vmem:[#allocation150_spill] sm:$0xff] %v4571_v53  ;;  %8895 = vst [vmem:[#allocation151_spill] sm:$0xff] %v4573_v46 }
 0x1fb   : > { %v4575_v62 = vpop.f32.mrf.mxu0  ;;  %v4577_v44 = vpop.f32.mrf.mxu1 }
 0x1fc   : > { %8896 = vst [vmem:[#allocation152_spill] sm:$0xff] %v4575_v62  ;;  %8897 = vst [vmem:[#allocation153_spill] sm:$0xff] %v4577_v44  ;;  %v1207_v44 = vmax.f32 %v4257_v47, %v4269_v51  ;;  %v1345_v62 = vmax.f32 %v4260_v48, %v4271_v52 }
 0x1fd   : > { %v4579_v13 = vpop.f32.mrf.mxu0  ;;  %v4581_v7 = vpop.f32.mrf.mxu1 }
 0x1fe   : > { %8898 = vst [vmem:[#allocation154_spill] sm:$0xff] %v4579_v13  ;;  %8899 = vst [vmem:[#allocation155_spill] sm:$0xff] %v4581_v7  ;;  %v1208_v55 = vmax.f32 %v1207_v44, %v4277_v56  ;;  %v1346_v50 = vmax.f32 %v1345_v62, %v4280_v57 }
 0x1ff   : > { %v4583_v17 = vpop.f32.mrf.mxu0  ;;  %v4585_v26 = vpop.f32.mrf.mxu1 }
 0x200   : > { %8900 = vst [vmem:[#allocation156_spill] sm:$0xff] %v4583_v17  ;;  %8901 = vst [vmem:[#allocation157_spill] sm:$0xff] %v4585_v26  ;;  %v1277_v17 = vmax.f32 %v1276_v43, %v4285_v58  ;;  %v1415_v26 = vmax.f32 %v1414_v42, %v4287_v59  ;;  %v1209_v43 = vmax.f32 %v1208_v55, %v4289_v60 }
 0x201   : > { %v4591_v53 = vpop.f32.mrf.mxu0  ;;  %v4593_v46 = vpop.f32.mrf.mxu1  ;;  %v1347_v42 = vmax.f32 %v1346_v50, %v4291_v61 }
 0x202   : > { %8902 = vst [vmem:[#allocation158_spill] sm:$0xff] %v4591_v53  ;;  %8903 = vst [vmem:[#allocation159_spill] sm:$0xff] %v4593_v46  ;;  %v1278_v49 = vmax.f32 %v1277_v17, %v4293_v63  ;;  %v1416_v46 = vmax.f32 %v1415_v26, %v4295_v0  ;;  %v1210_v62 = vmax.f32 %v1209_v43, %v4297_v1 }
 0x203   : > { %v4601_v7 = vpop.f32.mrf.mxu0  ;;  %v4603_v54 = vpop.f32.mrf.mxu1  ;;  %v1348_v17 = vmax.f32 %v1347_v42, %v4300_v2 }
 0x204   : > { %8904 = vst [vmem:[#allocation160_spill] sm:$0xff] %v4601_v7  ;;  %8905 = vst [vmem:[#allocation161_spill] sm:$0xff] %v4603_v54  ;;  %v1279_v59 = vmax.f32 %v1278_v49, %v4305_v3  ;;  %v1417_v58 = vmax.f32 %v1416_v46, %v4307_v4  ;;  %v1211_v49 = vmax.f32 %v1210_v62, %v4309_v5 }
 0x205   : > { %v4609_v51 = vpop.f32.mrf.mxu0  ;;  %v4611_v47 = vpop.f32.mrf.mxu1  ;;  %v1349_v50 = vmax.f32 %v1348_v17, %v4311_v6 }
 0x206   : > { %8906 = vst [vmem:[#allocation162_spill] sm:$0xff] %v4609_v51  ;;  %8907 = vst [vmem:[#allocation163_spill] sm:$0xff] %v4611_v47  ;;  %v1280_v26 = vmax.f32 %v1279_v59, %v4313_v8  ;;  %v1418_v0 = vmax.f32 %v1417_v58, %v4315_v9  ;;  %v1212_v59 = vmax.f32 %v1211_v49, %v4317_v10 }
 0x207   : > { %v4617_v52 = vpop.f32.mrf.mxu0  ;;  %v4619_v44 = vpop.f32.mrf.mxu1  ;;  %v1350_v58 = vmax.f32 %v1349_v50, %v4320_v11 }
 0x208   : > { %8908 = vst [vmem:[#allocation164_spill] sm:$0xff] %v4617_v52  ;;  %8909 = vst [vmem:[#allocation165_spill] sm:$0xff] %v4619_v44  ;;  %v1281_v46 = vmax.f32 %v1280_v26, %v4325_v12  ;;  %v1419_v4 = vmax.f32 %v1418_v0, %v4327_v14  ;;  %v1213_v17 = vmax.f32 %v1212_v59, %v4329_v15 }
 0x209   : > { %v4625_v63 = vpop.f32.mrf.mxu0  ;;  %v4627_v55 = vpop.f32.mrf.mxu1  ;;  %v1351_v0 = vmax.f32 %v1350_v58, %v4331_v16 }
 0x20a   : > { %8910 = vst [vmem:[#allocation166_spill] sm:$0xff] %v4625_v63  ;;  %8911 = vst [vmem:[#allocation167_spill] sm:$0xff] %v4627_v55  ;;  %v1282_v42 = vmax.f32 %v1281_v46, %v4333_v18  ;;  %v1420_v9 = vmax.f32 %v1419_v4, %v4335_v19  ;;  %v1214_v50 = vmax.f32 %v1213_v17, %v4337_v20 }
 0x20b   : > { %v4633_v3 = vpop.f32.mrf.mxu0  ;;  %v4635_v43 = vpop.f32.mrf.mxu1  ;;  %v1352_v4 = vmax.f32 %v1351_v0, %v4340_v21 }
 0x20c   : > { %8912 = vst [vmem:[#allocation168_spill] sm:$0xff] %v4633_v3  ;;  %8913 = vst [vmem:[#allocation169_spill] sm:$0xff] %v4635_v43  ;;  %v1283_v26 = vmax.f32 %v1282_v42, %v4345_v22  ;;  %v1421_v14 = vmax.f32 %v1420_v9, %v4347_v23  ;;  %v1215_v58 = vmax.f32 %v1214_v50, %v4349_v24 }
 0x20d   : > { %v4641_v8 = vpop.f32.mrf.mxu0  ;;  %v4643_v62 = vpop.f32.mrf.mxu1  ;;  %v1353_v9 = vmax.f32 %v1352_v4, %v4351_v25 }
 0x20e   : > { %8914 = vst [vmem:[#allocation170_spill] sm:$0xff] %v4641_v8  ;;  %8915 = vst [vmem:[#allocation171_spill] sm:$0xff] %v4643_v62  ;;  %v1284_v46 = vmax.f32 %v1283_v26, %v4353_v27  ;;  %v1422_v19 = vmax.f32 %v1421_v14, %v4355_v28  ;;  %v1216_v0 = vmax.f32 %v1215_v58, %v4357_v29 }
 0x20f   : > { %v4649_v12 = vpop.f32.mrf.mxu0  ;;  %v4651_v49 = vpop.f32.mrf.mxu1  ;;  %v1354_v14 = vmax.f32 %v1353_v9, %v4360_v30 }
 0x210   : > { %8916 = vst [vmem:[#allocation172_spill] sm:$0xff] %v4649_v12  ;;  %8917 = vst [vmem:[#allocation173_spill] sm:$0xff] %v4651_v49  ;;  %v1285_v42 = vmax.f32 %v1284_v46, %v4365_v31  ;;  %v1423_v23 = vmax.f32 %v1422_v19, %v4367_v32  ;;  %v1217_v4 = vmax.f32 %v1216_v0, %v4369_v33  ;;  %v8932_v33 = vld [vmem:[#allocation67_spill] sm:$0xff] }
 0x211   : > { %v4657_v18 = vpop.f32.mrf.mxu0  ;;  %v4659_v59 = vpop.f32.mrf.mxu1  ;;  %v1355_v19 = vmax.f32 %v1354_v14, %v4371_v34  ;;  %v8929_v14 = vld [vmem:[#allocation60_spill] sm:$0xff] }
 0x212   : > { %8918 = vst [vmem:[#allocation174_spill] sm:$0xff] %v4657_v18  ;;  %8919 = vst [vmem:[#allocation175_spill] sm:$0xff] %v4659_v59  ;;  %v1286_v26 = vmax.f32 %v1285_v42, %v4373_v36  ;;  %v1424_v28 = vmax.f32 %v1423_v23, %v4375_v37  ;;  %v1218_v9 = vmax.f32 %v1217_v4, %v4377_v38  ;;  %v8926_v37 = vld [vmem:[#allocation63_spill] sm:$0xff] }
 0x213   : > { %v4665_v22 = vpop.f32.mrf.mxu0  ;;  %v4667_v17 = vpop.f32.mrf.mxu1  ;;  %v1356_v23 = vmax.f32 %v1355_v19, %v4380_v39  ;;  %v8935_v19 = vld [vmem:[#allocation64_spill] sm:$0xff]  ;;  %v8938_v38 = vld [vmem:[#allocation71_spill] sm:$0xff] }
 0x214   : > { %8920 = vst [vmem:[#allocation176_spill] sm:$0xff] %v4665_v22  ;;  %8921 = vst [vmem:[#allocation177_spill] sm:$0xff] %v4667_v17  ;;  %v1287_v46 = vmax.f32 %v1286_v26, %v4385_v40  ;;  %v1425_v32 = vmax.f32 %v1424_v28, %v4387_v41  ;;  %v1219_v26 = vmax.f32 %v1218_v9, %v8929_v14  ;;  %v8930_v40 = vld [vmem:[#allocation61_spill] sm:$0xff]  ;;  %v8931_v41 = vld [vmem:[#allocation66_spill] sm:$0xff] }
 0x215   : > { %v4673_v27 = vpop.f32.mrf.mxu0  ;;  %v4675_v50 = vpop.f32.mrf.mxu1  ;;  %v1357_v28 = vmax.f32 %v1356_v23, %v8930_v40  ;;  %v8941_v23 = vld [vmem:[#allocation68_spill] sm:$0xff]  ;;  %v8944_v14 = vld [vmem:[#allocation75_spill] sm:$0xff] }
 0x216   : > { %8922 = vst [vmem:[#allocation178_spill] sm:$0xff] %v4673_v27  ;;  %8923 = vst [vmem:[#allocation179_spill] sm:$0xff] %v4675_v50  ;;  %v1288_v42 = vmax.f32 %v1287_v46, %v4393_v45  ;;  %v1426_v36 = vmax.f32 %v1425_v32, %v8926_v37  ;;  %v1220_v46 = vmax.f32 %v1219_v26, %v8935_v19  ;;  %v8936_v45 = vld [vmem:[#allocation65_spill] sm:$0xff]  ;;  %v8937_v37 = vld [vmem:[#allocation70_spill] sm:$0xff] }
 0x217   : > { %v4681_v31 = vpop.f32.mrf.mxu0  ;;  %v4683_v58 = vpop.f32.mrf.mxu1  ;;  %v1358_v32 = vmax.f32 %v1357_v28, %v8936_v45  ;;  %v8947_v28 = vld [vmem:[#allocation72_spill] sm:$0xff]  ;;  %v8950_v19 = vld [vmem:[#allocation79_spill] sm:$0xff] }
 0x218   : > { %8924 = vst [vmem:[#allocation180_spill] sm:$0xff] %v4681_v31  ;;  %8925 = vst [vmem:[#allocation181_spill] sm:$0xff] %v4683_v58  ;;  %v1289_v34 = vmax.f32 %v1288_v42, %v8931_v41  ;;  %v1427_v29 = vmax.f32 %v1426_v36, %v8932_v33  ;;  %v1221_v42 = vmax.f32 %v1220_v46, %v8941_v23  ;;  %v8942_v41 = vld [vmem:[#allocation69_spill] sm:$0xff]  ;;  %v8943_v33 = vld [vmem:[#allocation74_spill] sm:$0xff] }
 0x219   : > { %v4689_v30 = vpop.f32.mrf.mxu0  ;;  %v4691_v0 = vpop.f32.mrf.mxu1  ;;  %v1359_v36 = vmax.f32 %v1358_v32, %v8942_v41  ;;  %v8953_v32 = vld [vmem:[#allocation76_spill] sm:$0xff]  ;;  %v8956_v23 = vld [vmem:[#allocation83_spill] sm:$0xff] }
 0x21a   : > { %8927 = vst [vmem:[#allocation182_spill] sm:$0xff] %v4689_v30  ;;  %8928 = vst [vmem:[#allocation183_spill] sm:$0xff] %v4691_v0  ;;  %v1290_v39 = vmax.f32 %v1289_v34, %v8937_v37  ;;  %v1428_v24 = vmax.f32 %v1427_v29, %v8938_v38  ;;  %v1222_v34 = vmax.f32 %v1221_v42, %v8947_v28  ;;  %v8948_v37 = vld [vmem:[#allocation73_spill] sm:$0xff]  ;;  %v8949_v38 = vld [vmem:[#allocation78_spill] sm:$0xff] }
 0x21b   : > { %v4697_v25 = vpop.f32.mrf.mxu0  ;;  %v4699_v4 = vpop.f32.mrf.mxu1  ;;  %v1360_v29 = vmax.f32 %v1359_v36, %v8948_v37  ;;  %v8959_v36 = vld [vmem:[#allocation80_spill] sm:$0xff]  ;;  %v8962_v28 = vld [vmem:[#allocation87_spill] sm:$0xff] }
 0x21c   : > { %8933 = vst [vmem:[#allocation184_spill] sm:$0xff] %v4697_v25  ;;  %8934 = vst [vmem:[#allocation185_spill] sm:$0xff] %v4699_v4  ;;  %v1291_v40 = vmax.f32 %v1290_v39, %v8943_v33  ;;  %v1429_v20 = vmax.f32 %v1428_v24, %v8944_v14  ;;  %v1223_v39 = vmax.f32 %v1222_v34, %v8953_v32  ;;  %v8954_v33 = vld [vmem:[#allocation77_spill] sm:$0xff]  ;;  %v8955_v14 = vld [vmem:[#allocation82_spill] sm:$0xff] }
 0x21d   : > { %v4705_v21 = vpop.f32.mrf.mxu0  ;;  %v4707_v9 = vpop.f32.mrf.mxu1  ;;  %v1361_v24 = vmax.f32 %v1360_v29, %v8954_v33  ;;  %v8965_v29 = vld [vmem:[#allocation84_spill] sm:$0xff]  ;;  %v8968_v32 = vld [vmem:[#allocation91_spill] sm:$0xff] }
 0x21e   : > { %8939 = vst [vmem:[#allocation186_spill] sm:$0xff] %v4705_v21  ;;  %8940 = vst [vmem:[#allocation187_spill] sm:$0xff] %v4707_v9  ;;  %v1292_v45 = vmax.f32 %v1291_v40, %v8949_v38  ;;  %v1430_v15 = vmax.f32 %v1429_v20, %v8950_v19  ;;  %v1224_v40 = vmax.f32 %v1223_v39, %v8959_v36  ;;  %v8960_v38 = vld [vmem:[#allocation81_spill] sm:$0xff]  ;;  %v8961_v19 = vld [vmem:[#allocation86_spill] sm:$0xff] }
 0x21f   : > { %v4713_v16 = vpop.f32.mrf.mxu0  ;;  %v4715_v26 = vpop.f32.mrf.mxu1  ;;  %v1362_v20 = vmax.f32 %v1361_v24, %v8960_v38  ;;  %v8971_v24 = vld [vmem:[#allocation88_spill] sm:$0xff]  ;;  %v8974_v36 = vld [vmem:[#allocation95_spill] sm:$0xff] }
 0x220   : > { %8945 = vst [vmem:[#allocation188_spill] sm:$0xff] %v4713_v16  ;;  %8946 = vst [vmem:[#allocation189_spill] sm:$0xff] %v4715_v26  ;;  %v1293_v41 = vmax.f32 %v1292_v45, %v8955_v14  ;;  %v1431_v10 = vmax.f32 %v1430_v15, %v8956_v23  ;;  %v1225_v45 = vmax.f32 %v1224_v40, %v8965_v29  ;;  %v8966_v14 = vld [vmem:[#allocation85_spill] sm:$0xff]  ;;  %v8967_v23 = vld [vmem:[#allocation90_spill] sm:$0xff] }
 0x221   : > { %v4721_v11 = vpop.f32.mrf.mxu0  ;;  %v4723_v46 = vpop.f32.mrf.mxu1  ;;  %v1363_v15 = vmax.f32 %v1362_v20, %v8966_v14  ;;  %v8977_v20 = vld [vmem:[#allocation92_spill] sm:$0xff]  ;;  %v8980_v29 = vld [vmem:[#allocation99_spill] sm:$0xff] }
 0x222   : > { %8951 = vst [vmem:[#allocation190_spill] sm:$0xff] %v4721_v11  ;;  %8952 = vst [vmem:[#allocation191_spill] sm:$0xff] %v4723_v46  ;;  %v1294_v37 = vmax.f32 %v1293_v41, %v8961_v19  ;;  %v1432_v5 = vmax.f32 %v1431_v10, %v8962_v28  ;;  %v1226_v41 = vmax.f32 %v1225_v45, %v8971_v24  ;;  %v8972_v19 = vld [vmem:[#allocation89_spill] sm:$0xff]  ;;  %v8973_v28 = vld [vmem:[#allocation94_spill] sm:$0xff] }
 0x223   : > { %v4729_v6 = vpop.f32.mrf.mxu0  ;;  %v4731_v42 = vpop.f32.mrf.mxu1  ;;  %v1364_v10 = vmax.f32 %v1363_v15, %v8972_v19  ;;  %v8983_v15 = vld [vmem:[#allocation96_spill] sm:$0xff]  ;;  %v8986_v24 = vld [vmem:[#allocation103_spill] sm:$0xff] }
 0x224   : > { %8957 = vst [vmem:[#allocation192_spill] sm:$0xff] %v4729_v6  ;;  %8958 = vst [vmem:[#allocation193_spill] sm:$0xff] %v4731_v42  ;;  %v1295_v33 = vmax.f32 %v1294_v37, %v8967_v23  ;;  %v1433_v1 = vmax.f32 %v1432_v5, %v8968_v32  ;;  %v1227_v37 = vmax.f32 %v1226_v41, %v8977_v20  ;;  %v8978_v23 = vld [vmem:[#allocation93_spill] sm:$0xff]  ;;  %v8979_v32 = vld [vmem:[#allocation98_spill] sm:$0xff] }
 0x225   : > { %v4737_v2 = vpop.f32.mrf.mxu0  ;;  %v4739_v34 = vpop.f32.mrf.mxu1  ;;  %v1365_v5 = vmax.f32 %v1364_v10, %v8978_v23  ;;  %v8989_v10 = vld [vmem:[#allocation100_spill] sm:$0xff]  ;;  %v8992_v20 = vld [vmem:[#allocation107_spill] sm:$0xff] }
 0x226   : > { %8963 = vst [vmem:[#allocation194_spill] sm:$0xff] %v4737_v2  ;;  %8964 = vst [vmem:[#allocation195_spill] sm:$0xff] %v4739_v34  ;;  %v1296_v38 = vmax.f32 %v1295_v33, %v8973_v28  ;;  %v1434_v60 = vmax.f32 %v1433_v1, %v8974_v36  ;;  %v1228_v33 = vmax.f32 %v1227_v37, %v8983_v15  ;;  %v8984_v28 = vld [vmem:[#allocation97_spill] sm:$0xff]  ;;  %v8985_v36 = vld [vmem:[#allocation102_spill] sm:$0xff] }
 0x227   : > { %v4745_v61 = vpop.f32.mrf.mxu0  ;;  %v4747_v39 = vpop.f32.mrf.mxu1  ;;  %v1366_v1 = vmax.f32 %v1365_v5, %v8984_v28  ;;  %v8995_v5 = vld [vmem:[#allocation104_spill] sm:$0xff]  ;;  %v8998_v15 = vld [vmem:[#allocation111_spill] sm:$0xff] }
 0x228   : > { %8969 = vst [vmem:[#allocation196_spill] sm:$0xff] %v4745_v61  ;;  %8970 = vst [vmem:[#allocation197_spill] sm:$0xff] %v4747_v39  ;;  %v1297_v14 = vmax.f32 %v1296_v38, %v8979_v32  ;;  %v1435_v56 = vmax.f32 %v1434_v60, %v8980_v29  ;;  %v1229_v38 = vmax.f32 %v1228_v33, %v8989_v10  ;;  %v8990_v32 = vld [vmem:[#allocation101_spill] sm:$0xff]  ;;  %v8991_v29 = vld [vmem:[#allocation106_spill] sm:$0xff] }
 0x229   : > { %v4753_v57 = vpop.f32.mrf.mxu0  ;;  %v4755_v40 = vpop.f32.mrf.mxu1  ;;  %v1367_v60 = vmax.f32 %v1366_v1, %v8990_v32  ;;  %v9001_v1 = vld [vmem:[#allocation108_spill] sm:$0xff]  ;;  %v9004_v10 = vld [vmem:[#allocation115_spill] sm:$0xff] }
 0x22a   : > { %8975 = vst [vmem:[#allocation198_spill] sm:$0xff] %v4753_v57  ;;  %8976 = vst [vmem:[#allocation199_spill] sm:$0xff] %v4755_v40  ;;  %v1298_v19 = vmax.f32 %v1297_v14, %v8985_v36  ;;  %v1436_v39 = vmax.f32 %v1435_v56, %v8986_v24  ;;  %v1230_v14 = vmax.f32 %v1229_v38, %v8995_v5  ;;  %v8996_v36 = vld [vmem:[#allocation105_spill] sm:$0xff]  ;;  %v8997_v24 = vld [vmem:[#allocation110_spill] sm:$0xff] }
 0x22b   : > { %v4761_v48 = vpop.f32.mrf.mxu0  ;;  %v4763_v45 = vpop.f32.mrf.mxu1  ;;  %v1368_v56 = vmax.f32 %v1367_v60, %v8996_v36  ;;  %v9007_v60 = vld [vmem:[#allocation112_spill] sm:$0xff]  ;;  %v9010_v5 = vld [vmem:[#allocation119_spill] sm:$0xff] }
 0x22c   : > { %8981 = vst [vmem:[#allocation200_spill] sm:$0xff] %v4761_v48  ;;  %8982 = vst [vmem:[#allocation201_spill] sm:$0xff] %v4763_v45  ;;  %v1299_v23 = vmax.f32 %v1298_v19, %v8991_v29  ;;  %v1437_v45 = vmax.f32 %v1436_v39, %v8992_v20  ;;  %v1231_v19 = vmax.f32 %v1230_v14, %v9001_v1  ;;  %v9002_v29 = vld [vmem:[#allocation109_spill] sm:$0xff]  ;;  %v9003_v20 = vld [vmem:[#allocation114_spill] sm:$0xff] }
 0x22d   : > { %v4769_v61 = vpop.f32.mrf.mxu0  ;;  %v4771_v41 = vpop.f32.mrf.mxu1  ;;  %v1369_v39 = vmax.f32 %v1368_v56, %v9002_v29  ;;  %v9013_v56 = vld [vmem:[#allocation116_spill] sm:$0xff]  ;;  %v9016_v1 = vld [vmem:[#allocation123_spill] sm:$0xff] }
 0x22e   : > { %8987 = vst [vmem:[#allocation202_spill] sm:$0xff] %v4769_v61  ;;  %8988 = vst [vmem:[#allocation203_spill] sm:$0xff] %v4771_v41  ;;  %v1300_v28 = vmax.f32 %v1299_v23, %v8997_v24  ;;  %v1438_v41 = vmax.f32 %v1437_v45, %v8998_v15  ;;  %v1232_v23 = vmax.f32 %v1231_v19, %v9007_v60  ;;  %v9008_v24 = vld [vmem:[#allocation113_spill] sm:$0xff]  ;;  %v9009_v15 = vld [vmem:[#allocation118_spill] sm:$0xff] }
 0x22f   : > { %v4777_v48 = vpop.f32.mrf.mxu0  ;;  %v4779_v37 = vpop.f32.mrf.mxu1  ;;  %v1370_v45 = vmax.f32 %v1369_v39, %v9008_v24  ;;  %v9019_v39 = vld [vmem:[#allocation120_spill] sm:$0xff]  ;;  %v9022_v60 = vld [vmem:[#allocation127_spill] sm:$0xff] }
 0x230   : > { %8993 = vst [vmem:[#allocation204_spill] sm:$0xff] %v4777_v48  ;;  %8994 = vst [vmem:[#allocation205_spill] sm:$0xff] %v4779_v37  ;;  %v1301_v32 = vmax.f32 %v1300_v28, %v9003_v20  ;;  %v1439_v37 = vmax.f32 %v1438_v41, %v9004_v10  ;;  %v1233_v28 = vmax.f32 %v1232_v23, %v9013_v56  ;;  %v9014_v20 = vld [vmem:[#allocation117_spill] sm:$0xff]  ;;  %v9015_v10 = vld [vmem:[#allocation122_spill] sm:$0xff] }
 0x231   : > { %v4785_v61 = vpop.f32.mrf.mxu0  ;;  %v4787_v33 = vpop.f32.mrf.mxu1  ;;  %v1371_v41 = vmax.f32 %v1370_v45, %v9014_v20  ;;  %v9025_v45 = vld [vmem:[#allocation124_spill] sm:$0xff]  ;;  %v9028_v56 = vld [vmem:[#allocation131_spill] sm:$0xff] }
 0x232   : > { %8999 = vst [vmem:[#allocation206_spill] sm:$0xff] %v4785_v61  ;;  %9000 = vst [vmem:[#allocation207_spill] sm:$0xff] %v4787_v33  ;;  %v1302_v36 = vmax.f32 %v1301_v32, %v9009_v15  ;;  %v1440_v33 = vmax.f32 %v1439_v37, %v9010_v5  ;;  %v1234_v32 = vmax.f32 %v1233_v28, %v9019_v39  ;;  %v9020_v15 = vld [vmem:[#allocation121_spill] sm:$0xff]  ;;  %v9021_v5 = vld [vmem:[#allocation126_spill] sm:$0xff] }
 0x233   : > { %v4793_v48 = vpop.f32.mrf.mxu0  ;;  %v4795_v38 = vpop.f32.mrf.mxu1  ;;  %v1372_v37 = vmax.f32 %v1371_v41, %v9020_v15  ;;  %v9031_v41 = vld [vmem:[#allocation128_spill] sm:$0xff]  ;;  %v9034_v39 = vld [vmem:[#allocation135_spill] sm:$0xff] }
 0x234   : > { %9005 = vst [vmem:[#allocation208_spill] sm:$0xff] %v4793_v48  ;;  %9006 = vst [vmem:[#allocation209_spill] sm:$0xff] %v4795_v38  ;;  %v1303_v29 = vmax.f32 %v1302_v36, %v9015_v10  ;;  %v1441_v38 = vmax.f32 %v1440_v33, %v9016_v1  ;;  %v1235_v36 = vmax.f32 %v1234_v32, %v9025_v45  ;;  %v9026_v10 = vld [vmem:[#allocation125_spill] sm:$0xff]  ;;  %v9027_v1 = vld [vmem:[#allocation130_spill] sm:$0xff] }
 0x235   : > { %v4801_v61 = vpop.f32.mrf.mxu0  ;;  %v4803_v14 = vpop.f32.mrf.mxu1  ;;  %v1373_v33 = vmax.f32 %v1372_v37, %v9026_v10  ;;  %v9037_v37 = vld [vmem:[#allocation132_spill] sm:$0xff]  ;;  %v9040_v45 = vld [vmem:[#allocation139_spill] sm:$0xff] }
 0x236   : > { %9011 = vst [vmem:[#allocation210_spill] sm:$0xff] %v4801_v61  ;;  %9012 = vst [vmem:[#allocation211_spill] sm:$0xff] %v4803_v14  ;;  %v1304_v24 = vmax.f32 %v1303_v29, %v9021_v5  ;;  %v1442_v14 = vmax.f32 %v1441_v38, %v9022_v60  ;;  %v1236_v29 = vmax.f32 %v1235_v36, %v9031_v41  ;;  %v9032_v5 = vld [vmem:[#allocation129_spill] sm:$0xff]  ;;  %v9033_v60 = vld [vmem:[#allocation134_spill] sm:$0xff] }
 0x237   : > { %v4809_v48 = vpop.f32.mrf.mxu0  ;;  %v4811_v19 = vpop.f32.mrf.mxu1  ;;  %v1374_v38 = vmax.f32 %v1373_v33, %v9032_v5  ;;  %v9043_v33 = vld [vmem:[#allocation136_spill] sm:$0xff]  ;;  %v9046_v41 = vld [vmem:[#allocation143_spill] sm:$0xff] }
 0x238   : > { %9017 = vst [vmem:[#allocation212_spill] sm:$0xff] %v4809_v48  ;;  %9018 = vst [vmem:[#allocation213_spill] sm:$0xff] %v4811_v19  ;;  %v1305_v20 = vmax.f32 %v1304_v24, %v9027_v1  ;;  %v1443_v19 = vmax.f32 %v1442_v14, %v9028_v56  ;;  %v1237_v24 = vmax.f32 %v1236_v29, %v9037_v37  ;;  %v9038_v1 = vld [vmem:[#allocation133_spill] sm:$0xff]  ;;  %v9039_v56 = vld [vmem:[#allocation138_spill] sm:$0xff] }
 0x239   : > { %v4817_v61 = vpop.f32.mrf.mxu0  ;;  %v4819_v23 = vpop.f32.mrf.mxu1  ;;  %v1375_v14 = vmax.f32 %v1374_v38, %v9038_v1  ;;  %v9049_v38 = vld [vmem:[#allocation140_spill] sm:$0xff] }
 0x23a   : > { %9023 = vst [vmem:[#allocation214_spill] sm:$0xff] %v4817_v61  ;;  %9024 = vst [vmem:[#allocation215_spill] sm:$0xff] %v4819_v23  ;;  %v1306_v15 = vmax.f32 %v1305_v20, %v9033_v60  ;;  %v1444_v23 = vmax.f32 %v1443_v19, %v9034_v39  ;;  %v1238_v20 = vmax.f32 %v1237_v24, %v9043_v33  ;;  %v9044_v60 = vld [vmem:[#allocation137_spill] sm:$0xff]  ;;  %v9045_v39 = vld [vmem:[#allocation142_spill] sm:$0xff] }
 0x23b   : > { %v4825_v48 = vpop.f32.mrf.mxu0  ;;  %v4827_v28 = vpop.f32.mrf.mxu1  ;;  %v1376_v19 = vmax.f32 %v1375_v14, %v9044_v60  ;;  %v9054_v14 = vld [vmem:[#allocation144_spill] sm:$0xff]  ;;  %v9057_v33 = vld [vmem:[#allocation151_spill] sm:$0xff] }
 0x23c   : > { %9029 = vst [vmem:[#allocation216_spill] sm:$0xff] %v4825_v48  ;;  %9030 = vst [vmem:[#allocation217_spill] sm:$0xff] %v4827_v28  ;;  %v1307_v10 = vmax.f32 %v1306_v15, %v9039_v56  ;;  %v1445_v28 = vmax.f32 %v1444_v23, %v9040_v45  ;;  %v1239_v15 = vmax.f32 %v1238_v20, %v9049_v38  ;;  %v9050_v56 = vld [vmem:[#allocation141_spill] sm:$0xff]  ;;  %v9051_v45 = vld [vmem:[#allocation146_spill] sm:$0xff] }
 0x23d   : > { %v4833_v61 = vpop.f32.mrf.mxu0  ;;  %v4835_v32 = vpop.f32.mrf.mxu1  ;;  %v1377_v23 = vmax.f32 %v1376_v19, %v9050_v56  ;;  %v9060_v19 = vld [vmem:[#allocation148_spill] sm:$0xff]  ;;  %v9062_v56 = vld [vmem:[#allocation155_spill] sm:$0xff] }
 0x23e   : > { %9035 = vst [vmem:[#allocation218_spill] sm:$0xff] %v4833_v61  ;;  %9036 = vst [vmem:[#allocation219_spill] sm:$0xff] %v4835_v32  ;;  %v1308_v5 = vmax.f32 %v1307_v10, %v9045_v39  ;;  %v1446_v32 = vmax.f32 %v1445_v28, %v9046_v41  ;;  %v1240_v10 = vmax.f32 %v1239_v15, %v9054_v14  ;;  %v9055_v39 = vld [vmem:[#allocation145_spill] sm:$0xff]  ;;  %v9056_v41 = vld [vmem:[#allocation150_spill] sm:$0xff] }
 0x23f   : > { %v4841_v48 = vpop.f32.mrf.mxu0  ;;  %v4843_v36 = vpop.f32.mrf.mxu1  ;;  %v1378_v28 = vmax.f32 %v1377_v23, %v9055_v39  ;;  %v9065_v23 = vld [vmem:[#allocation152_spill] sm:$0xff]  ;;  %v9067_v39 = vld [vmem:[#allocation159_spill] sm:$0xff] }
 0x240   : > { %9041 = vst [vmem:[#allocation220_spill] sm:$0xff] %v4841_v48  ;;  %9042 = vst [vmem:[#allocation221_spill] sm:$0xff] %v4843_v36  ;;  %v1309_v1 = vmax.f32 %v1308_v5, %v9051_v45  ;;  %v1447_v37 = vmax.f32 %v1446_v32, %v4565_v35  ;;  %v1241_v5 = vmax.f32 %v1240_v10, %v9060_v19  ;;  %v9061_v45 = vld [vmem:[#allocation149_spill] sm:$0xff] }
 0x241   : > { %v4849_v61 = vpop.f32.mrf.mxu0  ;;  %v4851_v29 = vpop.f32.mrf.mxu1  ;;  %v1379_v32 = vmax.f32 %v1378_v28, %v9061_v45  ;;  %v9070_v28 = vld [vmem:[#allocation156_spill] sm:$0xff] }
 0x242   : > { %9047 = vst [vmem:[#allocation222_spill] sm:$0xff] %v4849_v61  ;;  %9048 = vst [vmem:[#allocation223_spill] sm:$0xff] %v4851_v29  ;;  %v1310_v60 = vmax.f32 %v1309_v1, %v9056_v41  ;;  %v1448_v48 = vmax.f32 %v1447_v37, %v9057_v33  ;;  %v1242_v1 = vmax.f32 %v1241_v5, %v9065_v23  ;;  %v9066_v41 = vld [vmem:[#allocation153_spill] sm:$0xff] }
 0x243   : > { %v4857_v36 = vpop.f32.mrf.mxu0  ;;  %v4859_v24 = vpop.f32.mrf.mxu1  ;;  %v1380_v37 = vmax.f32 %v1379_v32, %v9066_v41 }
 0x244   : > { %9052 = vst [vmem:[#allocation224_spill] sm:$0xff] %v4857_v36  ;;  %9053 = vst [vmem:[#allocation225_spill] sm:$0xff] %v4859_v24  ;;  %v1311_v35 = vmax.f32 %v1310_v60, %v4579_v13  ;;  %v1449_v38 = vmax.f32 %v1448_v48, %v9062_v56  ;;  %v1243_v60 = vmax.f32 %v1242_v1, %v9070_v28  ;;  %v9071_v13 = vld [vmem:[#allocation157_spill] sm:$0xff] }
 0x245   : > { %v4865_v29 = vpop.f32.mrf.mxu0  ;;  %v4867_v20 = vpop.f32.mrf.mxu1  ;;  %v1381_v48 = vmax.f32 %v1380_v37, %v9071_v13 }
 0x246   : > { %9058 = vst [vmem:[#allocation226_spill] sm:$0xff] %v4865_v29  ;;  %9059 = vst [vmem:[#allocation227_spill] sm:$0xff] %v4867_v20  ;;  %v1312_v33 = vmax.f32 %v1311_v35, %v4591_v53  ;;  %v1450_v14 = vmax.f32 %v1449_v38, %v9067_v39  ;;  %v1244_v35 = vmax.f32 %v1243_v60, %v4601_v7 }
 0x247   : > { %v4873_v24 = vpop.f32.mrf.mxu0  ;;  %v4875_v15 = vpop.f32.mrf.mxu1  ;;  %v1382_v38 = vmax.f32 %v1381_v48, %v4603_v54 }
 0x248   : > { %9063 = vst [vmem:[#allocation228_spill] sm:$0xff] %v4873_v24  ;;  %9064 = vst [vmem:[#allocation229_spill] sm:$0xff] %v4875_v15  ;;  %v1313_v56 = vmax.f32 %v1312_v33, %v4609_v51  ;;  %v1451_v45 = vmax.f32 %v1450_v14, %v4611_v47  ;;  %v1245_v33 = vmax.f32 %v1244_v35, %v4617_v52 }
 0x249   : > { %v4881_v36 = vpop.f32.mrf.mxu0  ;;  %v4883_v10 = vpop.f32.mrf.mxu1  ;;  %v1383_v14 = vmax.f32 %v1382_v38, %v4619_v44 }
 0x24a   : > { %9068 = vst [vmem:[#allocation152_spill] sm:$0xff] %v4881_v36  ;;  %9069 = vst [vmem:[#allocation153_spill] sm:$0xff] %v4883_v10  ;;  %v1314_v32 = vmax.f32 %v1313_v56, %v4625_v63  ;;  %v1452_v39 = vmax.f32 %v1451_v45, %v4627_v55  ;;  %v1246_v56 = vmax.f32 %v1245_v33, %v4633_v3 }
 0x24b   : > { %v4889_v19 = vpop.f32.mrf.mxu0  ;;  %v4891_v5 = vpop.f32.mrf.mxu1  ;;  %v1384_v45 = vmax.f32 %v1383_v14, %v4635_v43 }
 0x24c   : > { %9072 = vst [vmem:[#allocation156_spill] sm:$0xff] %v4889_v19  ;;  %9073 = vst [vmem:[#allocation157_spill] sm:$0xff] %v4891_v5  ;;  %v1315_v37 = vmax.f32 %v1314_v32, %v4641_v8  ;;  %v1453_v47 = vmax.f32 %v1452_v39, %v4643_v62  ;;  %v1247_v38 = vmax.f32 %v1246_v56, %v4649_v12 }
 0x24d   : > { %v4897_v53 = vpop.f32.mrf.mxu0  ;;  %v4899_v1 = vpop.f32.mrf.mxu1  ;;  %v1385_v39 = vmax.f32 %v1384_v45, %v4651_v49 }
 0x24e   : > { %9074 = vst [vmem:[#allocation230_spill] sm:$0xff] %v4897_v53  ;;  %9075 = vst [vmem:[#allocation231_spill] sm:$0xff] %v4899_v1  ;;  %v1316_v48 = vmax.f32 %v1315_v37, %v4657_v18  ;;  %v1454_v55 = vmax.f32 %v1453_v47, %v4659_v59  ;;  %v1248_v14 = vmax.f32 %v1247_v38, %v4665_v22  ;;  %v9217_v22 = vld [vmem:[#allocation83_spill] sm:$0xff] }
 0x24f   : > { %v4905_v51 = vpop.f32.mrf.mxu0  ;;  %v4907_v60 = vpop.f32.mrf.mxu1  ;;  %v1386_v47 = vmax.f32 %v1385_v39, %v4667_v17  ;;  %v9119_v17 = vld [vmem:[#allocation220_spill] sm:$0xff] }
 0x250   : > { %9076 = vst [vmem:[#allocation232_spill] sm:$0xff] %v4905_v51  ;;  %9077 = vst [vmem:[#allocation233_spill] sm:$0xff] %v4907_v60  ;;  %v1317_v32 = vmax.f32 %v1316_v48, %v4673_v27  ;;  %v1455_v62 = vmax.f32 %v1454_v55, %v4675_v50  ;;  %v1249_v45 = vmax.f32 %v1248_v14, %v4681_v31  ;;  %v9110_v31 = vld [vmem:[#allocation212_spill] sm:$0xff] }
 0x251   : > { %v4913_v63 = vpop.f32.mrf.mxu0  ;;  %v4915_v35 = vpop.f32.mrf.mxu1  ;;  %v1387_v55 = vmax.f32 %v1386_v47, %v4683_v58 }
 0x252   : > { %9078 = vst [vmem:[#allocation234_spill] sm:$0xff] %v4913_v63  ;;  %9079 = vst [vmem:[#allocation235_spill] sm:$0xff] %v4915_v35  ;;  %v1318_v37 = vmax.f32 %v1317_v32, %v4689_v30  ;;  %v1456_v59 = vmax.f32 %v1455_v62, %v4691_v0  ;;  %v1250_v39 = vmax.f32 %v1249_v45, %v4697_v25  ;;  %v9100_v25 = vld [vmem:[#allocation204_spill] sm:$0xff] }
 0x253   : > { %v4921_v8 = vpop.f32.mrf.mxu0  ;;  %v4923_v33 = vpop.f32.mrf.mxu1  ;;  %v1388_v62 = vmax.f32 %v1387_v55, %v4699_v4  ;;  %v9090_v4 = vld [vmem:[#allocation196_spill] sm:$0xff] }
 0x254   : > { %9080 = vst [vmem:[#allocation236_spill] sm:$0xff] %v4921_v8  ;;  %9081 = vst [vmem:[#allocation237_spill] sm:$0xff] %v4923_v33  ;;  %v1319_v48 = vmax.f32 %v1318_v37, %v4705_v21  ;;  %v1457_v50 = vmax.f32 %v1456_v59, %v4707_v9  ;;  %v1251_v47 = vmax.f32 %v1250_v39, %v4713_v16  ;;  %v9091_v16 = vld [vmem:[#allocation197_spill] sm:$0xff] }
 0x255   : > { %v4929_v18 = vpop.f32.mrf.mxu0  ;;  %v4931_v56 = vpop.f32.mrf.mxu1  ;;  %v1389_v59 = vmax.f32 %v1388_v62, %v4715_v26  ;;  %v9092_v26 = vld [vmem:[#allocation202_spill] sm:$0xff] }
 0x256   : > { %9082 = vst [vmem:[#allocation238_spill] sm:$0xff] %v4929_v18  ;;  %9083 = vst [vmem:[#allocation239_spill] sm:$0xff] %v4931_v56  ;;  %v1320_v32 = vmax.f32 %v1319_v48, %v4721_v11  ;;  %v1458_v0 = vmax.f32 %v1457_v50, %v4723_v46  ;;  %v1252_v45 = vmax.f32 %v1251_v47, %v4729_v6  ;;  %v9095_v6 = vld [vmem:[#allocation201_spill] sm:$0xff] }
 0x257   : > { %v4937_v27 = vpop.f32.mrf.mxu0  ;;  %v4939_v38 = vpop.f32.mrf.mxu1  ;;  %v1390_v55 = vmax.f32 %v1389_v59, %v4731_v42  ;;  %v9096_v42 = vld [vmem:[#allocation206_spill] sm:$0xff] }
 0x258   : > { %9084 = vst [vmem:[#allocation240_spill] sm:$0xff] %v4937_v27  ;;  %9085 = vst [vmem:[#allocation241_spill] sm:$0xff] %v4939_v38  ;;  %v1321_v37 = vmax.f32 %v1320_v32, %v4737_v2  ;;  %v1459_v9 = vmax.f32 %v1458_v0, %v4739_v34  ;;  %v1253_v39 = vmax.f32 %v1252_v45, %v9090_v4  ;;  %v9093_v2 = vld [vmem:[#allocation203_spill] sm:$0xff]  ;;  %v9094_v34 = vld [vmem:[#allocation200_spill] sm:$0xff] }
 0x259   : > { %v4945_v30 = vpop.f32.mrf.mxu0  ;;  %v4947_v14 = vpop.f32.mrf.mxu1  ;;  %v1391_v62 = vmax.f32 %v1390_v55, %v9091_v16  ;;  %v9101_v4 = vld [vmem:[#allocation205_spill] sm:$0xff]  ;;  %v9102_v16 = vld [vmem:[#allocation210_spill] sm:$0xff] }
 0x25a   : > { %9086 = vst [vmem:[#allocation242_spill] sm:$0xff] %v4945_v30  ;;  %9087 = vst [vmem:[#allocation243_spill] sm:$0xff] %v4947_v14  ;;  %v1322_v48 = vmax.f32 %v1321_v37, %v4753_v57  ;;  %v1460_v50 = vmax.f32 %v1459_v9, %v4755_v40  ;;  %v1254_v47 = vmax.f32 %v1253_v39, %v9094_v34  ;;  %v9097_v57 = vld [vmem:[#allocation207_spill] sm:$0xff]  ;;  %v9105_v34 = vld [vmem:[#allocation209_spill] sm:$0xff] }
 0x25b   : > { %v4957_v46 = vpop.f32.mrf.mxu0  ;;  %v4959_v11 = vpop.f32.mrf.mxu1  ;;  %v1392_v59 = vmax.f32 %v1391_v62, %v9095_v6  ;;  %v9106_v6 = vld [vmem:[#allocation214_spill] sm:$0xff] }
 0x25c   : > { %9088 = vst [vmem:[#allocation244_spill] sm:$0xff] %v4957_v46  ;;  %9089 = vst [vmem:[#allocation245_spill] sm:$0xff] %v4959_v11  ;;  %v1323_v32 = vmax.f32 %v1322_v48, %v9092_v26  ;;  %v1461_v0 = vmax.f32 %v1460_v50, %v9093_v2  ;;  %v1255_v45 = vmax.f32 %v1254_v47, %v9100_v25  ;;  %v9103_v26 = vld [vmem:[#allocation211_spill] sm:$0xff]  ;;  %v9104_v2 = vld [vmem:[#allocation208_spill] sm:$0xff] }
 0x25d   : > { %v4969_v40 = vpop.f32.mrf.mxu0  ;;  %v4971_v21 = vpop.f32.mrf.mxu1  ;;  %v1393_v55 = vmax.f32 %v1392_v59, %v9101_v4  ;;  %v9111_v25 = vld [vmem:[#allocation213_spill] sm:$0xff]  ;;  %v9112_v4 = vld [vmem:[#allocation218_spill] sm:$0xff] }
 0x25e   : > { %v1324_v37 = vmax.f32 %v1323_v32, %v9096_v42  ;;  %v1462_v9 = vmax.f32 %v1461_v0, %v9097_v57  ;;  %9098 = vst [vmem:[#allocation246_spill] sm:$0xff] %v4969_v40  ;;  %9099 = vst [vmem:[#allocation247_spill] sm:$0xff] %v4971_v21  ;;  %v1256_v39 = vmax.f32 %v1255_v45, %v9104_v2  ;;  %v9107_v42 = vld [vmem:[#allocation215_spill] sm:$0xff]  ;;  %v9115_v2 = vld [vmem:[#allocation217_spill] sm:$0xff] }
 0x25f   : > { %v1394_v62 = vmax.f32 %v1393_v55, %v9105_v34  ;;  %v4981_v57 = vpop.f32.mrf.mxu0  ;;  %v4983_v58 = vpop.f32.mrf.mxu1 }
 0x260   : > { %v1325_v48 = vmax.f32 %v1324_v37, %v9102_v16  ;;  %v1463_v50 = vmax.f32 %v1462_v9, %v9103_v26  ;;  %9108 = vst [vmem:[#allocation248_spill] sm:$0xff] %v4981_v57  ;;  %9109 = vst [vmem:[#allocation249_spill] sm:$0xff] %v4983_v58  ;;  %v1257_v47 = vmax.f32 %v1256_v39, %v9110_v31  ;;  %v9113_v16 = vld [vmem:[#allocation219_spill] sm:$0xff]  ;;  %v9114_v26 = vld [vmem:[#allocation216_spill] sm:$0xff] }
 0x261   : > { %v1395_v59 = vmax.f32 %v1394_v62, %v9111_v25  ;;  %v4995_v34 = vpop.f32.mrf.mxu1  ;;  %v9120_v31 = vld [vmem:[#allocation221_spill] sm:$0xff] }
 0x262   : > { %v1326_v32 = vmax.f32 %v1325_v48, %v9106_v6  ;;  %v1464_v0 = vmax.f32 %v1463_v50, %v9107_v42  ;;  %v1258_v45 = vmax.f32 %v1257_v47, %v9114_v26  ;;  %v9116_v6 = vld [vmem:[#allocation223_spill] sm:$0xff]  ;;  %v4993_v42 = vpop.f32.mrf.mxu0  ;;  %9118 = vst [vmem:[#allocation251_spill] sm:$0xff] %v4995_v34  ;;  %v9259_v25 = vld [vmem:[#allocation109_spill] sm:$0xff] }
 0x263   : > { %v1396_v55 = vmax.f32 %v1395_v59, %v9115_v2  ;;  %9117 = vst [vmem:[#allocation250_spill] sm:$0xff] %v4993_v42  ;;  %v9214_v2 = vld [vmem:[#allocation80_spill] sm:$0xff] }
 0x264   : > { %v1327_v37 = vmax.f32 %v1326_v32, %v9112_v4  ;;  %v1465_v9 = vmax.f32 %v1464_v0, %v9113_v16  ;;  %v1259_v39 = vmax.f32 %v1258_v45, %v9119_v17  ;;  %v9121_v16 = vld [vmem:[#allocation224_spill] sm:$0xff]  ;;  %v9122_v4 = vld [vmem:[#allocation225_spill] sm:$0xff] }
 0x265   : > { %v1397_v62 = vmax.f32 %v1396_v55, %v9120_v31 }
 0x266   : > { %v1328_v48 = vmax.f32 %v1327_v37, %v4849_v61  ;;  %v1466_v50 = vmax.f32 %v1465_v9, %v9116_v6  ;;  %v1260_v47 = vmax.f32 %v1259_v39, %v9121_v16  ;;  %v5005_v6 = vpop.f32.mrf.mxu0  ;;  %v5007_v61 = vpop.f32.mrf.mxu1 }
 0x267   : > { %v1398_v59 = vmax.f32 %v1397_v62, %v9122_v4  ;;  %9123 = vst [vmem:[#allocation252_spill] sm:$0xff] %v5005_v6  ;;  %9124 = vst [vmem:[#allocation253_spill] sm:$0xff] %v5007_v61  ;;  %v9181_v4 = vld [vmem:[#allocation47_spill] sm:$0xff] }
 0x268   : > { %v1329_v32 = vmax.f32 %v1328_v48, %v4865_v29  ;;  %v1467_v0 = vmax.f32 %v1466_v50, %v4867_v20  ;;  %v1261_v45 = vmax.f32 %v1260_v47, %v4873_v24  ;;  %v9179_v24 = vld [vmem:[#allocation46_spill] sm:$0xff]  ;;  %v9180_v20 = vld [vmem:[#allocation45_spill] sm:$0xff]  ;;  %v9182_v29 = vld [vmem:[#allocation48_spill] sm:$0xff] }
 0x269   : > { %v1399_v55 = vmax.f32 %v1398_v59, %v4875_v15  ;;  %v9178_v15 = vld [vmem:[#allocation44_spill] sm:$0xff] }
 0x26a   : > { %v1330_v37 = vmax.f32 %v1329_v32, %v4881_v36  ;;  %v1468_v9 = vmax.f32 %v1467_v0, %v4883_v10  ;;  %v1262_v39 = vmax.f32 %v1261_v45, %v4889_v19  ;;  %v5017_v10 = vpop.f32.mrf.mxu0  ;;  %v5019_v36 = vpop.f32.mrf.mxu1  ;;  %v9177_v19 = vld [vmem:[#allocation43_spill] sm:$0xff] }
 0x26b   : > { %v1400_v62 = vmax.f32 %v1399_v55, %v4891_v5  ;;  %9125 = vst [vmem:[#allocation254_spill] sm:$0xff] %v5017_v10  ;;  %9126 = vst [vmem:[#allocation255_spill] sm:$0xff] %v5019_v36  ;;  %v9175_v5 = vld [vmem:[#allocation42_spill] sm:$0xff] }
 0x26c   : > { %v1331_v48 = vmax.f32 %v1330_v37, %v4897_v53  ;;  %v1469_v50 = vmax.f32 %v1468_v9, %v4899_v1  ;;  %v1263_v47 = vmax.f32 %v1262_v39, %v4905_v51  ;;  %v9173_v51 = vld [vmem:[#allocation39_spill] sm:$0xff]  ;;  %v9174_v1 = vld [vmem:[#allocation40_spill] sm:$0xff]  ;;  %v9176_v53 = vld [vmem:[#allocation41_spill] sm:$0xff] }
 0x26d   : > { %v1401_v59 = vmax.f32 %v1400_v62, %v4907_v60  ;;  %v9172_v60 = vld [vmem:[#allocation37_spill] sm:$0xff] }
 0x26e   : > { %v1332_v32 = vmax.f32 %v1331_v48, %v4913_v63  ;;  %v1470_v0 = vmax.f32 %v1469_v50, %v4915_v35  ;;  %v1264_v45 = vmax.f32 %v1263_v47, %v4921_v8  ;;  %v5029_v35 = vpop.f32.mrf.mxu0  ;;  %v5031_v63 = vpop.f32.mrf.mxu1  ;;  %v9171_v8 = vld [vmem:[#allocation38_spill] sm:$0xff] }
 0x26f   : > { %v1402_v55 = vmax.f32 %v1401_v59, %v4923_v33  ;;  %9127 = vst [vmem:[#allocation256_spill] sm:$0xff] %v5029_v35  ;;  %9128 = vst [vmem:[#allocation257_spill] sm:$0xff] %v5031_v63  ;;  %v9169_v33 = vld [vmem:[#allocation35_spill] sm:$0xff] }
 0x270   : > { %v1333_v37 = vmax.f32 %v1332_v32, %v4929_v18  ;;  %v1471_v9 = vmax.f32 %v1470_v0, %v4931_v56  ;;  %v1265_v39 = vmax.f32 %v1264_v45, %v4937_v27  ;;  %v9167_v27 = vld [vmem:[#allocation34_spill] sm:$0xff]  ;;  %v9168_v56 = vld [vmem:[#allocation33_spill] sm:$0xff]  ;;  %v9170_v18 = vld [vmem:[#allocation36_spill] sm:$0xff] }
 0x271   : > { %v1403_v62 = vmax.f32 %v1402_v55, %v4939_v38  ;;  %v9166_v38 = vld [vmem:[#allocation32_spill] sm:$0xff] }
 0x272   : > { %v1334_v48 = vmax.f32 %v1333_v37, %v4945_v30  ;;  %v1472_v50 = vmax.f32 %v1471_v9, %v4947_v14  ;;  %v1266_v47 = vmax.f32 %v1265_v39, %v4957_v46  ;;  %v5041_v14 = vpop.f32.mrf.mxu0  ;;  %v5043_v30 = vpop.f32.mrf.mxu1 }
 0x273   : > { %v1404_v59 = vmax.f32 %v1403_v62, %v4959_v11  ;;  %9129 = vst [vmem:[#allocation258_spill] sm:$0xff] %v5041_v14  ;;  %9130 = vst [vmem:[#allocation259_spill] sm:$0xff] %v5043_v30 }
 0x274   : > { %v1335_v32 = vmax.f32 %v1334_v48, %v4969_v40  ;;  %v1473_v0 = vmax.f32 %v1472_v50, %v4971_v21  ;;  %v1267_v45 = vmax.f32 %v1266_v47, %v4981_v57 }
 0x275   : > { %v1405_v55 = vmax.f32 %v1404_v59, %v4983_v58 }
 0x276   : > { %v1336_v37 = vmax.f32 %v1335_v32, %v4993_v42  ;;  %v1474_v9 = vmax.f32 %v1473_v0, %v4995_v34  ;;  %v1268_v39 = vmax.f32 %v1267_v45, %v5005_v6 }
 0x277   : > { %v1406_v62 = vmax.f32 %v1405_v55, %v5007_v61 }
 0x278   : > { %v1337_v48 = vmax.f32 %v1336_v37, %v5017_v10  ;;  %v1475_v50 = vmax.f32 %v1474_v9, %v5019_v36  ;;  %v1269_v34 = vmax.f32 %v1268_v39, %v5029_v35  ;;  %v4027_v39 = vmov 1966171168  }
 0x279   : > { %v1407_v42 = vmax.f32 %v1406_v62, %v5031_v63  ;;  %v1490_v35 = vunpack.c.l.s4 %v4027_v39  ;;  %v8450_v62 = vlaneseq  ;;  %v9144_v39 = vld [vmem:[#allocation9_spill] sm:$0xff] }
 0x27a   : > { %v1338_v32 = vmax.f32 %v1337_v48, %v5041_v14  ;;  %v1476_v0 = vmax.f32 %v1475_v50, %v5043_v30  ;;  %v1270_v57 = vrot.slane %v1269_v34, 4 }
 0x27b   : > { %v1408_v59 = vrot.slane %v1407_v42, 4 }
 0x27c   : > { %v1339_v21 = vrot.slane %v1338_v32, 4  ;;  %v1477_v47 = vrot.slane %v1476_v0, 4  ;;  %v1271_v10 = vmax.f32 %v1269_v34, %v1270_v57  ;;  %v1493_v57 = vshrl.u32 %v8450_v62, 7  ;;  %v9150_v62 = vld [vmem:[#allocation16_spill] sm:$0xff] }
 0x27d   : > { %v1409_v9 = vmax.f32 %v1407_v42, %v1408_v59 }
 0x27e   : > { %v1340_v58 = vmax.f32 %v1338_v32, %v1339_v21  ;;  %v1478_v37 = vmax.f32 %v1476_v0, %v1477_v47  ;;  %v1272_v6 = vrot.slane %v1271_v10, 2  ;;  %v1491_v21 = vunpack.c.0.s8 %v1490_v35 }
 0x27f   : > { %v1410_v55 = vrot.slane %v1409_v9, 2 }
 0x280   : > { %v1341_v36 = vrot.slane %v1340_v58, 2  ;;  %v1479_v45 = vrot.slane %v1478_v37, 2  ;;  %v1273_v14 = vmax.f32 %v1271_v10, %v1272_v6  ;;  %v5056_v47 = vsub.s32 %v1491_v21, %v1493_v57  ;;  %v9151_v21 = vld [vmem:[#allocation18_spill] sm:$0xff] }
 0x281   : > { %v1411_v50 = vmax.f32 %v1409_v9, %v1410_v55  ;;  %v9158_v55 = vld [vmem:[#allocation24_spill] sm:$0xff] }
 0x282   : > { %v1342_v61 = vmax.f32 %v1340_v58, %v1341_v36  ;;  %v1480_v48 = vmax.f32 %v1478_v37, %v1479_v45  ;;  %v1274_v11 = vrot.slane %v1273_v14, 1  ;;  %9131 = vst [vmem:[#allocation260_spill] sm:$0xff] %v5056_v47  ;;  %v5061_v37 = vld [vmem:[#allocation2] sm:$0xf]  ;;  %v9142_v45 = vld [vmem:[#allocation8_spill] sm:$0xff] }
 0x283   : > { %v1412_v40 = vrot.slane %v1411_v50, 1  ;;  %9132 = vst [vmem:[#allocation261_spill] sm:$0xff] %v5061_v37 }
 0x284   : > { %v1343_v30 = vrot.slane %v1342_v61, 1  ;;  %v1481_v63 = vrot.slane %v1480_v48, 1  ;;  %v1275_v34 = vmax.f32 %v1273_v14, %v1274_v11  ;;  %v5069_v11 = vsub.s32 3, %v1493_v57 }
 0x285   : > { %v1413_v32 = vmax.f32 %v1411_v50, %v1412_v40  ;;  %v9157_v50 = vld [vmem:[#allocation23_spill] sm:$0xff] }
 0x286   : > { %v1344_v46 = vmax.f32 %v1342_v61, %v1343_v30  ;;  %v1482_v42 = vmax.f32 %v1480_v48, %v1481_v63  ;;  %v5063_v61 = vsub.s32 0, %v1493_v57  ;;  %v5065_v30 = vsub.s32 1, %v1493_v57  ;;  %9136 = vst [vmem:[#allocation265_spill] sm:$0xff] %v5069_v11  ;;  %v9143_v48 = vld [vmem:[#allocation10_spill] sm:$0xff] }
 0x287   : > { %v5067_v63 = vsub.s32 2, %v1493_v57  ;;  %v9145_v57 = vld [vmem:[#allocation11_spill] sm:$0xff] }
 0x288   : > { %v1487_v0 = vcombine.low %v1275_v34, %v1344_v46  ;;  %v1488_v58 = vcombine.low %v1413_v32, %v1482_v42  ;;  %9133 = vst [vmem:[#allocation262_spill] sm:$0xff] %v5063_v61  ;;  %9134 = vst [vmem:[#allocation263_spill] sm:$0xff] %v5065_v30  ;;  %v9146_v34 = vld [vmem:[#allocation12_spill] sm:$0xff]  ;;  %v9152_v42 = vld [vmem:[#allocation17_spill] sm:$0xff] }
 0x289   : > { %9135 = vst [vmem:[#allocation264_spill] sm:$0xff] %v5067_v63  ;;  %v9153_v32 = vld [vmem:[#allocation19_spill] sm:$0xff] }
 0x28a   : > { %v1495_v6 = vrot.slane %v1487_v0, %v5056_v47  ;;  %v1502_v36 = vrot.slane %v1488_v58, %v5056_v47  ;;  %v9147_v0 = vld [vmem:[#allocation14_spill] sm:$0xff]  ;;  %v9154_v58 = vld [vmem:[#allocation20_spill] sm:$0xff] }
 0x28c   : > { %v1503_v10 = vcombine.low %v1495_v6, %v1502_v36  ;;  %v9148_v6 = vld [vmem:[#allocation13_spill] sm:$0xff]  ;;  %v9155_v36 = vld [vmem:[#allocation22_spill] sm:$0xff] }
 0x28e   : > { %v1510_v59 = vrot.slane %v1503_v10, %v5056_v47  ;;  %v9149_v10 = vld [vmem:[#allocation15_spill] sm:$0xff]  ;;  %v9163_v47 = vld [vmem:[#allocation30_spill] sm:$0xff] }
 0x290   : > { %v5072_v46 = vmax.f32 %v5061_v37, %v1510_v59  ;;  %v9156_v59 = vld [vmem:[#allocation21_spill] sm:$0xff] }
 0x291   : > { %v9164_v37 = vld [vmem:[#allocation29_spill] sm:$0xff] }
 0x292   : > { %9137 = vst [vmem:[#allocation266_spill] sm:$0xff] %v5072_v46  ;;  %v5076_v40 = vrot.slane %v5072_v46, %v5063_v61  ;;  %v5080_v35 = vrot.slane %v5072_v46, %v5065_v30  ;;  %v5084_v14 = vrot.slane %v5072_v46, %v5067_v63  ;;  %v5088_v9 = vrot.slane %v5072_v46, %v5069_v11  ;;  %v9159_v11 = vld [vmem:[#allocation26_spill] sm:$0xff]  ;;  %v9160_v63 = vld [vmem:[#allocation25_spill] sm:$0xff]  ;;  %v9161_v30 = vld [vmem:[#allocation27_spill] sm:$0xff] }
 0x293   : > { %v9162_v61 = vld [vmem:[#allocation28_spill] sm:$0xff]  ;;  %v9165_v46 = vld [vmem:[#allocation31_spill] sm:$0xff] }
 0x294   : > { %9138 = vst [vmem:[#allocation267_spill] sm:$0xff] %v5076_v40  ;;  %9139 = vst [vmem:[#allocation268_spill] sm:$0xff] %v5080_v35  ;;  %v9220_v43 = vsub.f32 %v9142_v45, %v5076_v40  ;;  %v9221_v3 = vsub.f32 %v9143_v48, %v5080_v35  ;;  %v9224_v16 = vsub.f32 %v9144_v39, %v5084_v14  ;;  %v9227_v48 = vld [vmem:[#allocation90_spill] sm:$0xff] }
 0x295   : > { %9140 = vst [vmem:[#allocation269_spill] sm:$0xff] %v5084_v14  ;;  %9141 = vst [vmem:[#allocation270_spill] sm:$0xff] %v5088_v9  ;;  %v9225_v31 = vsub.f32 %v9145_v57, %v5088_v9  ;;  %v9228_v52 = vsub.f32 %v9146_v34, %v5076_v40 }
 0x296   : > { %v1793_v17 = vmul.f32 1.442695, %v9220_v43  ;;  %v1795_v44 = vmul.f32 1.442695, %v9221_v3  ;;  %v1797_v49 = vmul.f32 1.442695, %v9224_v16  ;;  %v9276_v3 = vsub.f32 %v9161_v30, %v5088_v9 }
 0x297   : > { %v1799_v12 = vmul.f32 1.442695, %v9225_v31  ;;  %v1801_v26 = vmul.f32 1.442695, %v9228_v52  ;;  %v9230_v16 = vld [vmem:[#allocation91_spill] sm:$0xff]  ;;  %v9231_v31 = vsub.f32 %v9147_v0, %v5080_v35  ;;  %v9234_v52 = vsub.f32 %v9148_v6, %v5084_v14 }
 0x298   : > { %3435 = vpow2.f32 %v1793_v17  ;;  %v9233_v17 = vld [vmem:[#allocation94_spill] sm:$0xff]  ;;  %v9237_v0 = vsub.f32 %v9149_v10, %v5088_v9  ;;  %v9240_v6 = vsub.f32 %v9150_v62, %v5076_v40  ;;  %v9243_v10 = vsub.f32 %v9151_v21, %v5080_v35  ;;  %v9283_v30 = vld [vmem:[#allocation123_spill] sm:$0xff] }
 0x299   : > { %3437 = vpow2.f32 %v1795_v44  ;;  %v1803_v57 = vmul.f32 1.442695, %v9231_v31  ;;  %v1805_v34 = vmul.f32 1.442695, %v9234_v52  ;;  %v9236_v44 = vld [vmem:[#allocation95_spill] sm:$0xff]  ;;  %v9246_v62 = vsub.f32 %v9152_v42, %v5084_v14 }
 0x29a   : > { %3439 = vpow2.f32 %v1797_v49  ;;  %v1807_v31 = vmul.f32 1.442695, %v9237_v0  ;;  %v9239_v49 = vld [vmem:[#allocation98_spill] sm:$0xff]  ;;  %v1809_v52 = vmul.f32 1.442695, %v9240_v6  ;;  %v9249_v21 = vsub.f32 %v9153_v32, %v5088_v9 }
 0x29b   : > { %3441 = vpow2.f32 %v1799_v12  ;;  %v9242_v12 = vld [vmem:[#allocation99_spill] sm:$0xff]  ;;  %v1811_v0 = vmul.f32 1.442695, %v9243_v10  ;;  %v1813_v6 = vmul.f32 1.442695, %v9246_v62  ;;  %v9252_v42 = vsub.f32 %v9154_v58, %v5076_v40 }
 0x29c   : > { %3443 = vpow2.f32 %v1801_v26  ;;  %v9245_v26 = vld [vmem:[#allocation102_spill] sm:$0xff]  ;;  %v1815_v10 = vmul.f32 1.442695, %v9249_v21  ;;  %v9255_v32 = vsub.f32 %v9155_v36, %v5080_v35  ;;  %v9258_v58 = vsub.f32 %v9156_v59, %v5084_v14 }
 0x29d   : > { %3445 = vpow2.f32 %v1803_v57  ;;  %v9248_v57 = vld [vmem:[#allocation103_spill] sm:$0xff]  ;;  %v1817_v62 = vmul.f32 1.442695, %v9252_v42  ;;  %v9261_v36 = vsub.f32 %v9157_v50, %v5088_v9  ;;  %v9264_v59 = vsub.f32 %v9158_v55, %v5076_v40  ;;  %v9271_v55 = vld [vmem:[#allocation118_spill] sm:$0xff] }
 0x29e   : > { %3447 = vpow2.f32 %v1805_v34  ;;  %v9251_v34 = vld [vmem:[#allocation106_spill] sm:$0xff]  ;;  %v1819_v21 = vmul.f32 1.442695, %v9255_v32  ;;  %v1821_v42 = vmul.f32 1.442695, %v9258_v58  ;;  %v9280_v50 = vsub.f32 %v9162_v61, %v5076_v40 }
 0x29f   : > { %3449 = vpow2.f32 %v1807_v31  ;;  %v9254_v31 = vld [vmem:[#allocation107_spill] sm:$0xff]  ;;  %v1823_v32 = vmul.f32 1.442695, %v9261_v36  ;;  %v1825_v58 = vmul.f32 1.442695, %v9264_v59  ;;  %v9268_v36 = vsub.f32 %v9159_v11, %v5080_v35  ;;  %v9287_v61 = vld [vmem:[#allocation126_spill] sm:$0xff] }
 0x2a0   : > { %3451 = vpow2.f32 %v1809_v52  ;;  %v9257_v52 = vld [vmem:[#allocation110_spill] sm:$0xff]  ;;  %v9275_v11 = vld [vmem:[#allocation119_spill] sm:$0xff]  ;;  %v9284_v59 = vsub.f32 %v9163_v47, %v5080_v35 }
 0x2a1   : > { %3453 = vpow2.f32 %v1811_v0  ;;  %v9267_v0 = vld [vmem:[#allocation115_spill] sm:$0xff]  ;;  %v1827_v45 = vmul.f32 1.442695, %v9268_v36  ;;  %v9288_v36 = vsub.f32 %v9164_v37, %v5084_v14  ;;  %v9295_v37 = vld [vmem:[#allocation130_spill] sm:$0xff] }
 0x2a2   : > { %3455 = vpow2.f32 %v1813_v6  ;;  %v9263_v6 = vld [vmem:[#allocation114_spill] sm:$0xff]  ;;  %v9291_v47 = vld [vmem:[#allocation127_spill] sm:$0xff] }
 0x2a3   : > { %3457 = vpow2.f32 %v1815_v10  ;;  %v9272_v10 = vsub.f32 %v9160_v63, %v5084_v14  ;;  %v9279_v63 = vld [vmem:[#allocation122_spill] sm:$0xff] }
 0x2a4   : > { %3459 = vpow2.f32 %v1817_v62 }
 0x2a5   : > { %v5353_v54 = vpop.eup %3435  ;;  %3461 = vpow2.f32 %v1819_v21 }
 0x2a6   : > { %9265 = vst [vmem:[#allocation8_spill] sm:$0xff] %v5353_v54  ;;  %v5362_v43 = vpop.eup %3437  ;;  %3463 = vpow2.f32 %v1821_v42  ;;  %v1829_v54 = vmul.f32 1.442695, %v9272_v10  ;;  %v9292_v10 = vsub.f32 %v9165_v46, %v5088_v9  ;;  %v9299_v46 = vld [vmem:[#allocation131_spill] sm:$0xff] }
 0x2a7   : > { %9269 = vst [vmem:[#allocation10_spill] sm:$0xff] %v5362_v43  ;;  %v5371_v39 = vpop.eup %3439  ;;  %3465 = vpow2.f32 %v1823_v32  ;;  %v1831_v43 = vmul.f32 1.442695, %v9276_v3  ;;  %v9296_v3 = vsub.f32 %v9166_v38, %v5076_v40  ;;  %v9303_v38 = vld [vmem:[#allocation134_spill] sm:$0xff] }
 0x2a8   : > { %9273 = vst [vmem:[#allocation9_spill] sm:$0xff] %v5371_v39  ;;  %v5380_v62 = vpop.eup %3441  ;;  %3467 = vpow2.f32 %v1825_v58  ;;  %v1833_v39 = vmul.f32 1.442695, %v9280_v50  ;;  %v9300_v50 = vsub.f32 %v9167_v27, %v5080_v35  ;;  %v9307_v27 = vld [vmem:[#allocation135_spill] sm:$0xff] }
 0x2a9   : > { %9277 = vst [vmem:[#allocation11_spill] sm:$0xff] %v5380_v62  ;;  %v5389_v21 = vpop.eup %3443  ;;  %3469 = vpow2.f32 %v1827_v45  ;;  %v1835_v62 = vmul.f32 1.442695, %v9284_v59  ;;  %v9304_v59 = vsub.f32 %v9168_v56, %v5084_v14  ;;  %v9311_v56 = vld [vmem:[#allocation138_spill] sm:$0xff] }
 0x2aa   : > { %9281 = vst [vmem:[#allocation12_spill] sm:$0xff] %v5389_v21  ;;  %v5398_v42 = vpop.eup %3445  ;;  %3471 = vpow2.f32 %v1829_v54  ;;  %v1837_v21 = vmul.f32 1.442695, %v9288_v36  ;;  %v9308_v36 = vsub.f32 %v9169_v33, %v5088_v9  ;;  %v9315_v33 = vld [vmem:[#allocation139_spill] sm:$0xff] }
 0x2ab   : > { %9285 = vst [vmem:[#allocation14_spill] sm:$0xff] %v5398_v42  ;;  %v5407_v32 = vpop.eup %3447  ;;  %3473 = vpow2.f32 %v1831_v43  ;;  %v1839_v42 = vmul.f32 1.442695, %v9292_v10  ;;  %v9312_v10 = vsub.f32 %v9170_v18, %v5076_v40  ;;  %v9319_v18 = vld [vmem:[#allocation142_spill] sm:$0xff] }
 0x2ac   : > { %9289 = vst [vmem:[#allocation13_spill] sm:$0xff] %v5407_v32  ;;  %v5416_v58 = vpop.eup %3449  ;;  %3475 = vpow2.f32 %v1833_v39  ;;  %v1841_v32 = vmul.f32 1.442695, %v9296_v3  ;;  %v9316_v3 = vsub.f32 %v9171_v8, %v5080_v35  ;;  %v9323_v8 = vld [vmem:[#allocation143_spill] sm:$0xff] }
 0x2ad   : > { %9293 = vst [vmem:[#allocation15_spill] sm:$0xff] %v5416_v58  ;;  %v5425_v45 = vpop.eup %3451  ;;  %3477 = vpow2.f32 %v1835_v62  ;;  %v1843_v58 = vmul.f32 1.442695, %v9300_v50  ;;  %v9320_v50 = vsub.f32 %v9172_v60, %v5084_v14  ;;  %v9327_v60 = vld [vmem:[#allocation146_spill] sm:$0xff] }
 0x2ae   : > { %9297 = vst [vmem:[#allocation16_spill] sm:$0xff] %v5425_v45  ;;  %v5434_v54 = vpop.eup %3453  ;;  %3479 = vpow2.f32 %v1837_v21  ;;  %v1845_v45 = vmul.f32 1.442695, %v9304_v59  ;;  %v9324_v59 = vsub.f32 %v9173_v51, %v5088_v9  ;;  %v9331_v51 = vld [vmem:[#allocation147_spill] sm:$0xff] }
 0x2af   : > { %9301 = vst [vmem:[#allocation18_spill] sm:$0xff] %v5434_v54  ;;  %v5443_v43 = vpop.eup %3455  ;;  %3481 = vpow2.f32 %v1839_v42  ;;  %v1847_v54 = vmul.f32 1.442695, %v9308_v36  ;;  %v9328_v36 = vsub.f32 %v9174_v1, %v5076_v40  ;;  %v9335_v1 = vld [vmem:[#allocation150_spill] sm:$0xff] }
 0x2b0   : > { %9305 = vst [vmem:[#allocation17_spill] sm:$0xff] %v5443_v43  ;;  %v5452_v39 = vpop.eup %3457  ;;  %3483 = vpow2.f32 %v1841_v32  ;;  %v1849_v43 = vmul.f32 1.442695, %v9312_v10  ;;  %v9332_v10 = vsub.f32 %v9175_v5, %v5080_v35  ;;  %v9339_v5 = vld [vmem:[#allocation151_spill] sm:$0xff] }
 0x2b1   : > { %9309 = vst [vmem:[#allocation19_spill] sm:$0xff] %v5452_v39  ;;  %v5461_v62 = vpop.eup %3459  ;;  %3485 = vpow2.f32 %v1843_v58  ;;  %v1851_v39 = vmul.f32 1.442695, %v9316_v3  ;;  %v9336_v3 = vsub.f32 %v9176_v53, %v5084_v14  ;;  %v9342_v53 = vld [vmem:[#allocation154_spill] sm:$0xff] }
 0x2b2   : > { %9313 = vst [vmem:[#allocation20_spill] sm:$0xff] %v5461_v62  ;;  %v5470_v21 = vpop.eup %3461  ;;  %3487 = vpow2.f32 %v1845_v45  ;;  %v1853_v62 = vmul.f32 1.442695, %v9320_v50  ;;  %v9340_v50 = vsub.f32 %v9177_v19, %v5088_v9  ;;  %v9345_v19 = vld [vmem:[#allocation155_spill] sm:$0xff] }
 0x2b3   : > { %9317 = vst [vmem:[#allocation22_spill] sm:$0xff] %v5470_v21  ;;  %v5479_v42 = vpop.eup %3463  ;;  %3489 = vpow2.f32 %v1847_v54  ;;  %v1855_v21 = vmul.f32 1.442695, %v9324_v59  ;;  %v9343_v59 = vsub.f32 %v9178_v15, %v5076_v40  ;;  %v9348_v15 = vld [vmem:[#allocation158_spill] sm:$0xff] }
 0x2b4   : > { %9321 = vst [vmem:[#allocation21_spill] sm:$0xff] %v5479_v42  ;;  %v5488_v32 = vpop.eup %3465  ;;  %3491 = vpow2.f32 %v1849_v43  ;;  %v1857_v42 = vmul.f32 1.442695, %v9328_v36 }
 0x2b5   : > { %9325 = vst [vmem:[#allocation23_spill] sm:$0xff] %v5488_v32  ;;  %v5497_v58 = vpop.eup %3467  ;;  %3493 = vpow2.f32 %v1851_v39  ;;  %v1859_v32 = vmul.f32 1.442695, %v9332_v10  ;;  %v9338_v39 = vld [vmem:[#allocation149_spill] sm:$0xff]  ;;  %v1865_v36 = vmul.f32 1.442695, %v9343_v59 }
 0x2b6   : > { %9329 = vst [vmem:[#allocation24_spill] sm:$0xff] %v5497_v58  ;;  %v5506_v45 = vpop.eup %3469  ;;  %3495 = vpow2.f32 %v1853_v62  ;;  %v1861_v58 = vmul.f32 1.442695, %v9336_v3  ;;  %v9346_v62 = vsub.f32 %v9179_v24, %v5080_v35 }
 0x2b7   : > { %9333 = vst [vmem:[#allocation26_spill] sm:$0xff] %v5506_v45  ;;  %v5515_v54 = vpop.eup %3471  ;;  %3497 = vpow2.f32 %v1855_v21  ;;  %v1863_v45 = vmul.f32 1.442695, %v9340_v50  ;;  %v9349_v21 = vsub.f32 %v9180_v20, %v5084_v14 }
 0x2b8   : > { %9337 = vst [vmem:[#allocation25_spill] sm:$0xff] %v5515_v54  ;;  %v5524_v43 = vpop.eup %3473  ;;  %3499 = vpow2.f32 %v1857_v42  ;;  %v1867_v10 = vmul.f32 1.442695, %v9346_v62  ;;  %v9352_v42 = vsub.f32 %v9181_v4, %v5088_v9 }
 0x2b9   : > { %9341 = vst [vmem:[#allocation27_spill] sm:$0xff] %v5524_v43  ;;  %v5533_v54 = vpop.eup %3475  ;;  %3501 = vpow2.f32 %v1859_v32  ;;  %v1869_v3 = vmul.f32 1.442695, %v9349_v21  ;;  %v9355_v32 = vsub.f32 %v9182_v29, %v5076_v40 }
 0x2ba   : > { %9344 = vst [vmem:[#allocation28_spill] sm:$0xff] %v5533_v54  ;;  %v5542_v43 = vpop.eup %3477  ;;  %3503 = vpow2.f32 %v1861_v58  ;;  %v1871_v50 = vmul.f32 1.442695, %v9352_v42 }
 0x2bb   : > { %9347 = vst [vmem:[#allocation30_spill] sm:$0xff] %v5542_v43  ;;  %v5551_v54 = vpop.eup %3479  ;;  %3505 = vpow2.f32 %v1863_v45  ;;  %v1873_v59 = vmul.f32 1.442695, %v9355_v32 }
 0x2bc   : > { %9350 = vst [vmem:[#allocation29_spill] sm:$0xff] %v5551_v54  ;;  %v5560_v43 = vpop.eup %3481  ;;  %3507 = vpow2.f32 %v1865_v36 }
 0x2bd   : > { %9353 = vst [vmem:[#allocation31_spill] sm:$0xff] %v5560_v43  ;;  %v5569_v54 = vpop.eup %3483  ;;  %3509 = vpow2.f32 %v1867_v10  ;;  %v9359_v43 = vld [vmem:[#allocation50_spill] sm:$0xff] }
 0x2be   : > { %9356 = vst [vmem:[#allocation32_spill] sm:$0xff] %v5569_v54  ;;  %v9360_v58 = vsub.f32 %v9359_v43, %v5080_v35  ;;  %v5578_v24 = vpop.eup %3485  ;;  %3511 = vpow2.f32 %v1869_v3  ;;  %v9364_v54 = vld [vmem:[#allocation49_spill] sm:$0xff] }
 0x2bf   : > { %9361 = vst [vmem:[#allocation34_spill] sm:$0xff] %v5578_v24  ;;  %v9365_v62 = vsub.f32 %v9364_v54, %v5084_v14  ;;  %v5587_v20 = vpop.eup %3487  ;;  %3513 = vpow2.f32 %v1871_v50  ;;  %v9369_v24 = vld [vmem:[#allocation51_spill] sm:$0xff] }
 0x2c0   : > { %v1875_v7 = vmul.f32 1.442695, %v9360_v58  ;;  %9366 = vst [vmem:[#allocation33_spill] sm:$0xff] %v5587_v20  ;;  %v9370_v21 = vsub.f32 %v9369_v24, %v5088_v9  ;;  %v5596_v4 = vpop.eup %3489  ;;  %3515 = vpow2.f32 %v1873_v59  ;;  %v9374_v20 = vld [vmem:[#allocation52_spill] sm:$0xff] }
 0x2c1   : > { %v1877_v45 = vmul.f32 1.442695, %v9365_v62  ;;  %9371 = vst [vmem:[#allocation35_spill] sm:$0xff] %v5596_v4  ;;  %v9375_v42 = vsub.f32 %v9374_v20, %v5076_v40  ;;  %v5605_v29 = vpop.eup %3491  ;;  %v9379_v4 = vld [vmem:[#allocation54_spill] sm:$0xff] }
 0x2c2   : > { %v1879_v36 = vmul.f32 1.442695, %v9370_v21  ;;  %9376 = vst [vmem:[#allocation36_spill] sm:$0xff] %v5605_v29  ;;  %3517 = vpow2.f32 %v1875_v7  ;;  %v9380_v32 = vsub.f32 %v9379_v4, %v5080_v35  ;;  %v5614_v43 = vpop.eup %3493  ;;  %v9384_v29 = vld [vmem:[#allocation53_spill] sm:$0xff] }
 0x2c3   : > { %v1881_v10 = vmul.f32 1.442695, %v9375_v42  ;;  %9381 = vst [vmem:[#allocation38_spill] sm:$0xff] %v5614_v43  ;;  %3519 = vpow2.f32 %v1877_v45  ;;  %v9385_v58 = vsub.f32 %v9384_v29, %v5084_v14  ;;  %v5623_v54 = vpop.eup %3495  ;;  %v9389_v43 = vld [vmem:[#allocation55_spill] sm:$0xff] }
 0x2c4   : > { %v1883_v3 = vmul.f32 1.442695, %v9380_v32  ;;  %9386 = vst [vmem:[#allocation37_spill] sm:$0xff] %v5623_v54  ;;  %3521 = vpow2.f32 %v1879_v36  ;;  %v9390_v62 = vsub.f32 %v9389_v43, %v5088_v9  ;;  %v5632_v24 = vpop.eup %3497  ;;  %v9394_v54 = vld [vmem:[#allocation56_spill] sm:$0xff] }
 0x2c5   : > { %v1885_v50 = vmul.f32 1.442695, %v9385_v58  ;;  %9391 = vst [vmem:[#allocation39_spill] sm:$0xff] %v5632_v24  ;;  %3523 = vpow2.f32 %v1881_v10  ;;  %v9395_v21 = vsub.f32 %v9394_v54, %v5076_v40  ;;  %v5641_v20 = vpop.eup %3499  ;;  %v9399_v24 = vld [vmem:[#allocation58_spill] sm:$0xff] }
 0x2c6   : > { %v1887_v59 = vmul.f32 1.442695, %v9390_v62  ;;  %9396 = vst [vmem:[#allocation40_spill] sm:$0xff] %v5641_v20  ;;  %3525 = vpow2.f32 %v1883_v3  ;;  %v9400_v42 = vsub.f32 %v9399_v24, %v5080_v35  ;;  %v5650_v4 = vpop.eup %3501  ;;  %v9404_v20 = vld [vmem:[#allocation57_spill] sm:$0xff] }
 0x2c7   : > { %v1889_v7 = vmul.f32 1.442695, %v9395_v21  ;;  %9401 = vst [vmem:[#allocation42_spill] sm:$0xff] %v5650_v4  ;;  %3527 = vpow2.f32 %v1885_v50  ;;  %v9405_v32 = vsub.f32 %v9404_v20, %v5084_v14  ;;  %v5659_v29 = vpop.eup %3503  ;;  %v9409_v4 = vld [vmem:[#allocation59_spill] sm:$0xff] }
 0x2c8   : > { %v1891_v45 = vmul.f32 1.442695, %v9400_v42  ;;  %9406 = vst [vmem:[#allocation41_spill] sm:$0xff] %v5659_v29  ;;  %3529 = vpow2.f32 %v1887_v59  ;;  %v9410_v58 = vsub.f32 %v9409_v4, %v5088_v9  ;;  %v5668_v43 = vpop.eup %3505  ;;  %v9414_v29 = vld [vmem:[#allocation60_spill] sm:$0xff] }
 0x2c9   : > { %v1893_v36 = vmul.f32 1.442695, %v9405_v32  ;;  %9411 = vst [vmem:[#allocation43_spill] sm:$0xff] %v5668_v43  ;;  %3531 = vpow2.f32 %v1889_v7  ;;  %v9415_v62 = vsub.f32 %v9414_v29, %v5076_v40  ;;  %v5677_v54 = vpop.eup %3507  ;;  %v9419_v43 = vld [vmem:[#allocation62_spill] sm:$0xff] }
 0x2ca   : > { %v1895_v10 = vmul.f32 1.442695, %v9410_v58  ;;  %9416 = vst [vmem:[#allocation44_spill] sm:$0xff] %v5677_v54  ;;  %3533 = vpow2.f32 %v1891_v45  ;;  %v9420_v21 = vsub.f32 %v9419_v43, %v5080_v35  ;;  %v5686_v24 = vpop.eup %3509  ;;  %v9424_v54 = vld [vmem:[#allocation61_spill] sm:$0xff] }
 0x2cb   : > { %v1897_v3 = vmul.f32 1.442695, %v9415_v62  ;;  %9421 = vst [vmem:[#allocation46_spill] sm:$0xff] %v5686_v24  ;;  %3535 = vpow2.f32 %v1893_v36  ;;  %v9425_v42 = vsub.f32 %v9424_v54, %v5084_v14  ;;  %v5695_v20 = vpop.eup %3511  ;;  %v9429_v24 = vld [vmem:[#allocation63_spill] sm:$0xff] }
 0x2cc   : > { %v1899_v50 = vmul.f32 1.442695, %v9420_v21  ;;  %9426 = vst [vmem:[#allocation45_spill] sm:$0xff] %v5695_v20  ;;  %3537 = vpow2.f32 %v1895_v10  ;;  %v9430_v32 = vsub.f32 %v9429_v24, %v5088_v9  ;;  %v5704_v4 = vpop.eup %3513  ;;  %v9434_v20 = vld [vmem:[#allocation64_spill] sm:$0xff] }
 0x2cd   : > { %v1901_v59 = vmul.f32 1.442695, %v9425_v42  ;;  %9431 = vst [vmem:[#allocation47_spill] sm:$0xff] %v5704_v4  ;;  %3539 = vpow2.f32 %v1897_v3  ;;  %v9435_v58 = vsub.f32 %v9434_v20, %v5076_v40  ;;  %v5713_v29 = vpop.eup %3515  ;;  %v9439_v4 = vld [vmem:[#allocation66_spill] sm:$0xff] }
 0x2ce   : > { %v1903_v7 = vmul.f32 1.442695, %v9430_v32  ;;  %9436 = vst [vmem:[#allocation48_spill] sm:$0xff] %v5713_v29  ;;  %3541 = vpow2.f32 %v1899_v50  ;;  %v9440_v62 = vsub.f32 %v9439_v4, %v5080_v35  ;;  %v9444_v29 = vld [vmem:[#allocation65_spill] sm:$0xff] }
 0x2cf   : > { %v1905_v45 = vmul.f32 1.442695, %v9435_v58  ;;  %v5722_v43 = vpop.eup %3517  ;;  %3543 = vpow2.f32 %v1901_v59  ;;  %v9445_v21 = vsub.f32 %v9444_v29, %v5084_v14 }
 0x2d0   : > { %v1907_v36 = vmul.f32 1.442695, %v9440_v62  ;;  %9441 = vst [vmem:[#allocation80_spill] sm:$0xff] %v5722_v43  ;;  %v5731_v54 = vpop.eup %3519  ;;  %3545 = vpow2.f32 %v1903_v7  ;;  %v9449_v43 = vld [vmem:[#allocation67_spill] sm:$0xff] }
 0x2d1   : > { %v1909_v10 = vmul.f32 1.442695, %v9445_v21  ;;  %9446 = vst [vmem:[#allocation83_spill] sm:$0xff] %v5731_v54  ;;  %v9450_v42 = vsub.f32 %v9449_v43, %v5088_v9  ;;  %v5740_v24 = vpop.eup %3521  ;;  %3547 = vpow2.f32 %v1905_v45  ;;  %v9454_v54 = vld [vmem:[#allocation68_spill] sm:$0xff] }
 0x2d2   : > { %9451 = vst [vmem:[#allocation90_spill] sm:$0xff] %v5740_v24  ;;  %v9455_v32 = vsub.f32 %v9454_v54, %v5076_v40  ;;  %v5749_v20 = vpop.eup %3523  ;;  %3549 = vpow2.f32 %v1907_v36  ;;  %v9459_v24 = vld [vmem:[#allocation70_spill] sm:$0xff] }
 0x2d3   : > { %v1911_v3 = vmul.f32 1.442695, %v9450_v42  ;;  %9456 = vst [vmem:[#allocation91_spill] sm:$0xff] %v5749_v20  ;;  %v9460_v58 = vsub.f32 %v9459_v24, %v5080_v35  ;;  %v5758_v4 = vpop.eup %3525  ;;  %3551 = vpow2.f32 %v1909_v10  ;;  %v9464_v20 = vld [vmem:[#allocation69_spill] sm:$0xff] }
 0x2d4   : > { %v1913_v50 = vmul.f32 1.442695, %v9455_v32  ;;  %9461 = vst [vmem:[#allocation94_spill] sm:$0xff] %v5758_v4  ;;  %v9465_v62 = vsub.f32 %v9464_v20, %v5084_v14  ;;  %v5767_v29 = vpop.eup %3527  ;;  %v9469_v4 = vld [vmem:[#allocation71_spill] sm:$0xff] }
 0x2d5   : > { %v1915_v59 = vmul.f32 1.442695, %v9460_v58  ;;  %9466 = vst [vmem:[#allocation95_spill] sm:$0xff] %v5767_v29  ;;  %3553 = vpow2.f32 %v1911_v3  ;;  %v9470_v21 = vsub.f32 %v9469_v4, %v5088_v9  ;;  %v5776_v43 = vpop.eup %3529  ;;  %v9474_v29 = vld [vmem:[#allocation72_spill] sm:$0xff] }
 0x2d6   : > { %v1917_v7 = vmul.f32 1.442695, %v9465_v62  ;;  %9471 = vst [vmem:[#allocation98_spill] sm:$0xff] %v5776_v43  ;;  %3555 = vpow2.f32 %v1913_v50  ;;  %v9475_v42 = vsub.f32 %v9474_v29, %v5076_v40  ;;  %v5785_v54 = vpop.eup %3531  ;;  %v9479_v43 = vld [vmem:[#allocation74_spill] sm:$0xff] }
 0x2d7   : > { %v1919_v45 = vmul.f32 1.442695, %v9470_v21  ;;  %9476 = vst [vmem:[#allocation99_spill] sm:$0xff] %v5785_v54  ;;  %3557 = vpow2.f32 %v1915_v59  ;;  %v9480_v32 = vsub.f32 %v9479_v43, %v5080_v35  ;;  %v5794_v24 = vpop.eup %3533  ;;  %v9484_v54 = vld [vmem:[#allocation73_spill] sm:$0xff] }
 0x2d8   : > { %v1921_v36 = vmul.f32 1.442695, %v9475_v42  ;;  %9481 = vst [vmem:[#allocation102_spill] sm:$0xff] %v5794_v24  ;;  %3559 = vpow2.f32 %v1917_v7  ;;  %v9485_v58 = vsub.f32 %v9484_v54, %v5084_v14  ;;  %v5803_v20 = vpop.eup %3535  ;;  %v9489_v24 = vld [vmem:[#allocation75_spill] sm:$0xff] }
 0x2d9   : > { %v1923_v10 = vmul.f32 1.442695, %v9480_v32  ;;  %9486 = vst [vmem:[#allocation103_spill] sm:$0xff] %v5803_v20  ;;  %3561 = vpow2.f32 %v1919_v45  ;;  %v9490_v62 = vsub.f32 %v9489_v24, %v5088_v9  ;;  %v5812_v4 = vpop.eup %3537  ;;  %v9494_v20 = vld [vmem:[#allocation76_spill] sm:$0xff] }
 0x2da   : > { %v1925_v3 = vmul.f32 1.442695, %v9485_v58  ;;  %9491 = vst [vmem:[#allocation106_spill] sm:$0xff] %v5812_v4  ;;  %3563 = vpow2.f32 %v1921_v36  ;;  %v9495_v21 = vsub.f32 %v9494_v20, %v5076_v40  ;;  %v5821_v29 = vpop.eup %3539  ;;  %v9499_v4 = vld [vmem:[#allocation78_spill] sm:$0xff] }
 0x2db   : > { %v1927_v50 = vmul.f32 1.442695, %v9490_v62  ;;  %9496 = vst [vmem:[#allocation107_spill] sm:$0xff] %v5821_v29  ;;  %3565 = vpow2.f32 %v1923_v10  ;;  %v9500_v42 = vsub.f32 %v9499_v4, %v5080_v35  ;;  %v5830_v43 = vpop.eup %3541  ;;  %v9503_v20 = vld [vmem:[#allocation222_spill] sm:$0xff]  ;;  %v9504_v29 = vld [vmem:[#allocation77_spill] sm:$0xff]  ;;  %v9514_v62 = vsub.f32 %v9214_v2, %v5076_v40 }
 0x2dc   : > { %v1929_v59 = vmul.f32 1.442695, %v9495_v21  ;;  %9501 = vst [vmem:[#allocation110_spill] sm:$0xff] %v5830_v43  ;;  %3567 = vpow2.f32 %v1925_v3  ;;  %v9505_v32 = vsub.f32 %v9504_v29, %v5084_v14  ;;  %v5839_v54 = vpop.eup %3543  ;;  %v9509_v43 = vld [vmem:[#allocation79_spill] sm:$0xff] }
 0x2dd   : > { %v1931_v7 = vmul.f32 1.442695, %v9500_v42  ;;  %9506 = vst [vmem:[#allocation109_spill] sm:$0xff] %v5839_v54  ;;  %3569 = vpow2.f32 %v1927_v50  ;;  %v9510_v58 = vsub.f32 %v9509_v43, %v5088_v9  ;;  %v5848_v24 = vpop.eup %3545  ;;  %v1937_v54 = vmul.f32 1.442695, %v9514_v62  ;;  %v9517_v43 = vld [vmem:[#allocation227_spill] sm:$0xff] }
 0x2de   : > { %v1933_v45 = vmul.f32 1.442695, %v9505_v32  ;;  %9511 = vst [vmem:[#allocation114_spill] sm:$0xff] %v5848_v24  ;;  %3571 = vpow2.f32 %v1929_v59  ;;  %v5857_v10 = vpop.eup %3547  ;;  %v9518_v24 = vld [vmem:[#allocation82_spill] sm:$0xff]  ;;  %v9528_v32 = vsub.f32 %v9217_v22, %v5088_v9 }
 0x2df   : > { %v1935_v36 = vmul.f32 1.442695, %v9510_v58  ;;  %9515 = vst [vmem:[#allocation115_spill] sm:$0xff] %v5857_v10  ;;  %3573 = vpow2.f32 %v1931_v7  ;;  %v9519_v21 = vsub.f32 %v9518_v24, %v5080_v35  ;;  %v5866_v4 = vpop.eup %3549  ;;  %v9523_v10 = vld [vmem:[#allocation81_spill] sm:$0xff] }
 0x2e0   : > { %9520 = vst [vmem:[#allocation118_spill] sm:$0xff] %v5866_v4  ;;  %3575 = vpow2.f32 %v1933_v45  ;;  %v9524_v42 = vsub.f32 %v9523_v10, %v5084_v14  ;;  %v5875_v29 = vpop.eup %3551  ;;  %v1943_v4 = vmul.f32 1.442695, %v9528_v32 }
 0x2e1   : > { %v1939_v3 = vmul.f32 1.442695, %v9519_v21  ;;  %9525 = vst [vmem:[#allocation119_spill] sm:$0xff] %v5875_v29  ;;  %3577 = vpow2.f32 %v1935_v36  ;;  %v9532_v29 = vld [vmem:[#allocation84_spill] sm:$0xff] }
 0x2e2   : > { %v1941_v50 = vmul.f32 1.442695, %v9524_v42  ;;  %v5884_v59 = vpop.eup %3553  ;;  %3579 = vpow2.f32 %v1937_v54  ;;  %v9533_v58 = vsub.f32 %v9532_v29, %v5076_v40 }
 0x2e3   : > { %9529 = vst [vmem:[#allocation122_spill] sm:$0xff] %v5884_v59  ;;  %v5893_v2 = vpop.eup %3555  ;;  %3581 = vpow2.f32 %v1939_v3  ;;  %v9537_v59 = vld [vmem:[#allocation86_spill] sm:$0xff] }
 0x2e4   : > { %v1945_v7 = vmul.f32 1.442695, %v9533_v58  ;;  %9534 = vst [vmem:[#allocation123_spill] sm:$0xff] %v5893_v2  ;;  %v9538_v62 = vsub.f32 %v9537_v59, %v5080_v35  ;;  %v5902_v24 = vpop.eup %3557  ;;  %3583 = vpow2.f32 %v1941_v50  ;;  %v9542_v2 = vld [vmem:[#allocation85_spill] sm:$0xff]  ;;  %v9546_v59 = vld [vmem:[#allocation235_spill] sm:$0xff]  ;;  %v9557_v58 = vsub.f32 %v9227_v48, %v5080_v35 }
 0x2e5   : > { %9539 = vst [vmem:[#allocation126_spill] sm:$0xff] %v5902_v24  ;;  %v9543_v21 = vsub.f32 %v9542_v2, %v5084_v14  ;;  %v5911_v10 = vpop.eup %3559  ;;  %3585 = vpow2.f32 %v1943_v4  ;;  %v9547_v24 = vld [vmem:[#allocation87_spill] sm:$0xff] }
 0x2e6   : > { %v1947_v45 = vmul.f32 1.442695, %v9538_v62  ;;  %9544 = vst [vmem:[#allocation127_spill] sm:$0xff] %v5911_v10  ;;  %v9548_v42 = vsub.f32 %v9547_v24, %v5088_v9  ;;  %v5920_v22 = vpop.eup %3561  ;;  %3587 = vpow2.f32 %v1945_v7  ;;  %v9552_v10 = vld [vmem:[#allocation88_spill] sm:$0xff]  ;;  %v9556_v24 = vld [vmem:[#allocation239_spill] sm:$0xff] }
 0x2e7   : > { %v1949_v36 = vmul.f32 1.442695, %v9543_v21  ;;  %9549 = vst [vmem:[#allocation130_spill] sm:$0xff] %v5920_v22  ;;  %v9553_v32 = vsub.f32 %v9552_v10, %v5076_v40  ;;  %v5929_v29 = vpop.eup %3563  ;;  %v1955_v22 = vmul.f32 1.442695, %v9557_v58  ;;  %v9566_v21 = vsub.f32 %v9230_v16, %v5088_v9 }
 0x2e8   : > { %v1951_v54 = vmul.f32 1.442695, %v9548_v42  ;;  %9554 = vst [vmem:[#allocation131_spill] sm:$0xff] %v5929_v29  ;;  %3589 = vpow2.f32 %v1947_v45  ;;  %v5938_v50 = vpop.eup %3565  ;;  %v9561_v29 = vld [vmem:[#allocation89_spill] sm:$0xff] }
 0x2e9   : > { %v1953_v3 = vmul.f32 1.442695, %v9553_v32  ;;  %9558 = vst [vmem:[#allocation134_spill] sm:$0xff] %v5938_v50  ;;  %3591 = vpow2.f32 %v1949_v36  ;;  %v9562_v62 = vsub.f32 %v9561_v29, %v5084_v14  ;;  %v5947_v2 = vpop.eup %3567  ;;  %v1959_v50 = vmul.f32 1.442695, %v9566_v21 }
 0x2ea   : > { %9563 = vst [vmem:[#allocation135_spill] sm:$0xff] %v5947_v2  ;;  %3593 = vpow2.f32 %v1951_v54  ;;  %v5956_v7 = vpop.eup %3569  ;;  %v9570_v2 = vld [vmem:[#allocation92_spill] sm:$0xff]  ;;  %v9575_v32 = vsub.f32 %v9233_v17, %v5080_v35 }
 0x2eb   : > { %v1957_v4 = vmul.f32 1.442695, %v9562_v62  ;;  %9567 = vst [vmem:[#allocation138_spill] sm:$0xff] %v5956_v7  ;;  %3595 = vpow2.f32 %v1953_v3  ;;  %v9571_v42 = vsub.f32 %v9570_v2, %v5076_v40  ;;  %v5965_v10 = vpop.eup %3571  ;;  %v9584_v62 = vsub.f32 %v9236_v44, %v5088_v9 }
 0x2ec   : > { %9572 = vst [vmem:[#allocation139_spill] sm:$0xff] %v5965_v10  ;;  %3597 = vpow2.f32 %v1955_v22  ;;  %v1963_v7 = vmul.f32 1.442695, %v9575_v32  ;;  %v5974_v36 = vpop.eup %3573  ;;  %v9579_v10 = vld [vmem:[#allocation93_spill] sm:$0xff] }
 0x2ed   : > { %v1961_v45 = vmul.f32 1.442695, %v9571_v42  ;;  %9576 = vst [vmem:[#allocation142_spill] sm:$0xff] %v5974_v36  ;;  %3599 = vpow2.f32 %v1957_v4  ;;  %v9580_v58 = vsub.f32 %v9579_v10, %v5084_v14  ;;  %v5983_v29 = vpop.eup %3575  ;;  %v1967_v36 = vmul.f32 1.442695, %v9584_v62  ;;  %v9607_v62 = vld [vmem:[#allocation101_spill] sm:$0xff] }
 0x2ee   : > { %9581 = vst [vmem:[#allocation143_spill] sm:$0xff] %v5983_v29  ;;  %3601 = vpow2.f32 %v1959_v50  ;;  %v5992_v3 = vpop.eup %3577  ;;  %v9588_v29 = vld [vmem:[#allocation96_spill] sm:$0xff]  ;;  %v9593_v42 = vsub.f32 %v9239_v49, %v5080_v35 }
 0x2ef   : > { %v1965_v54 = vmul.f32 1.442695, %v9580_v58  ;;  %9585 = vst [vmem:[#allocation146_spill] sm:$0xff] %v5992_v3  ;;  %3603 = vpow2.f32 %v1961_v45  ;;  %v9589_v21 = vsub.f32 %v9588_v29, %v5076_v40  ;;  %v6001_v2 = vpop.eup %3579  ;;  %v9602_v58 = vsub.f32 %v9242_v12, %v5088_v9 }
 0x2f0   : > { %9590 = vst [vmem:[#allocation147_spill] sm:$0xff] %v6001_v2  ;;  %3605 = vpow2.f32 %v1963_v7  ;;  %v1971_v3 = vmul.f32 1.442695, %v9593_v42  ;;  %v6010_v4 = vpop.eup %3581  ;;  %v9597_v2 = vld [vmem:[#allocation97_spill] sm:$0xff]  ;;  %v9608_v7 = vsub.f32 %v9607_v62, %v5084_v14  ;;  %v9610_v12 = vsub.f32 %v9248_v57, %v5088_v9 }
 0x2f1   : > { %v1969_v22 = vmul.f32 1.442695, %v9589_v21  ;;  %9594 = vst [vmem:[#allocation150_spill] sm:$0xff] %v6010_v4  ;;  %3607 = vpow2.f32 %v1965_v54  ;;  %v9598_v32 = vsub.f32 %v9597_v2, %v5084_v14  ;;  %v6019_v10 = vpop.eup %3583  ;;  %v1975_v45 = vmul.f32 1.442695, %v9602_v58  ;;  %v9604_v54 = vld [vmem:[#allocation100_spill] sm:$0xff] }
 0x2f2   : > { %9599 = vst [vmem:[#allocation149_spill] sm:$0xff] %v6019_v10  ;;  %3609 = vpow2.f32 %v1967_v36  ;;  %v6028_v4 = vpop.eup %3585  ;;  %v9605_v2 = vsub.f32 %v9604_v54, %v5076_v40  ;;  %v9606_v21 = vsub.f32 %v9245_v26, %v5080_v35  ;;  %v1981_v42 = vmul.f32 1.442695, %v9608_v7  ;;  %v9615_v62 = vld [vmem:[#allocation105_spill] sm:$0xff] }
 0x2f3   : > { %v1973_v50 = vmul.f32 1.442695, %v9598_v32  ;;  %9603 = vst [vmem:[#allocation151_spill] sm:$0xff] %v6028_v4  ;;  %3611 = vpow2.f32 %v1969_v22  ;;  %v6039_v36 = vpop.eup %3587  ;;  %v1983_v58 = vmul.f32 1.442695, %v9610_v12  ;;  %v9611_v22 = vld [vmem:[#allocation104_spill] sm:$0xff]  ;;  %v9616_v7 = vsub.f32 %v9615_v62, %v5084_v14 }
 0x2f4   : > { %v1977_v32 = vmul.f32 1.442695, %v9605_v2  ;;  %v1979_v29 = vmul.f32 1.442695, %v9606_v21  ;;  %9609 = vst [vmem:[#allocation154_spill] sm:$0xff] %v6039_v36  ;;  %3613 = vpow2.f32 %v1971_v3  ;;  %v9612_v49 = vsub.f32 %v9611_v22, %v5076_v40  ;;  %v9618_v12 = vld [vmem:[#allocation108_spill] sm:$0xff] }
 0x2f5   : > { %v9613_v2 = vsub.f32 %v9251_v34, %v5080_v35  ;;  %v6050_v21 = vpop.eup %3589  ;;  %3615 = vpow2.f32 %v1973_v50  ;;  %v1989_v4 = vmul.f32 1.442695, %v9616_v7  ;;  %v9617_v3 = vsub.f32 %v9254_v31, %v5088_v9  ;;  %v9623_v7 = vld [vmem:[#allocation111_spill] sm:$0xff] }
 0x2f6   : > { %v1985_v54 = vmul.f32 1.442695, %v9612_v49  ;;  %9614 = vst [vmem:[#allocation155_spill] sm:$0xff] %v6050_v21  ;;  %v9619_v10 = vsub.f32 %v9618_v12, %v5076_v40  ;;  %v6061_v49 = vpop.eup %3591  ;;  %3617 = vpow2.f32 %v1975_v45  ;;  %v9621_v34 = vsub.f32 %v9257_v52, %v5080_v35  ;;  %v9626_v12 = vld [vmem:[#allocation112_spill] sm:$0xff] }
 0x2f7   : > { %v1987_v26 = vmul.f32 1.442695, %v9613_v2  ;;  %v1991_v57 = vmul.f32 1.442695, %v9617_v3  ;;  %9620 = vst [vmem:[#allocation158_spill] sm:$0xff] %v6061_v49  ;;  %v9622_v50 = vsub.f32 %v9259_v25, %v5084_v14  ;;  %v9624_v21 = vsub.f32 %v9623_v7, %v5088_v9  ;;  %v6072_v3 = vpop.eup %3593  ;;  %v9633_v7 = vld [vmem:[#allocation116_spill] sm:$0xff] }
 0x2f8   : > { %v1993_v22 = vmul.f32 1.442695, %v9619_v10  ;;  %v1995_v2 = vmul.f32 1.442695, %v9621_v34  ;;  %9625 = vst [vmem:[#allocation50_spill] sm:$0xff] %v6072_v3  ;;  %3619 = vpow2.f32 %v1977_v32  ;;  %v9627_v10 = vsub.f32 %v9626_v12, %v5076_v40  ;;  %v9629_v34 = vld [vmem:[#allocation113_spill] sm:$0xff] }
 0x2f9   : > { %v1997_v62 = vmul.f32 1.442695, %v9622_v50  ;;  %v1999_v31 = vmul.f32 1.442695, %v9624_v21  ;;  %v9628_v45 = vsub.f32 %v9263_v6, %v5080_v35  ;;  %v9630_v36 = vsub.f32 %v9629_v34, %v5084_v14  ;;  %v6085_v50 = vpop.eup %3595  ;;  %v9637_v34 = vld [vmem:[#allocation117_spill] sm:$0xff] }
 0x2fa   : > { %v2001_v49 = vmul.f32 1.442695, %v9627_v10  ;;  %9631 = vst [vmem:[#allocation49_spill] sm:$0xff] %v6085_v50  ;;  %3621 = vpow2.f32 %v1979_v29  ;;  %v9632_v21 = vsub.f32 %v9267_v0, %v5088_v9  ;;  %v9634_v12 = vsub.f32 %v9633_v7, %v5076_v40  ;;  %v9640_v7 = vld [vmem:[#allocation120_spill] sm:$0xff] }
 0x2fb   : > { %v2003_v52 = vmul.f32 1.442695, %v9628_v45  ;;  %v6083_v25 = vmul.f32 1.442695, %v9630_v36  ;;  %v9635_v6 = vsub.f32 %v9271_v55, %v5080_v35  ;;  %v6102_v36 = vpop.eup %3597  ;;  %3623 = vpow2.f32 %v1981_v42 }
 0x2fc   : > { %v6090_v32 = vmul.f32 1.442695, %v9632_v21  ;;  %v6095_v10 = vmul.f32 1.442695, %v9634_v12  ;;  %9636 = vst [vmem:[#allocation51_spill] sm:$0xff] %v6102_v36  ;;  %v9638_v29 = vsub.f32 %v9637_v34, %v5084_v14  ;;  %v9639_v0 = vsub.f32 %v9275_v11, %v5088_v9  ;;  %v6119_v55 = vpop.eup %3599  ;;  %v9644_v34 = vld [vmem:[#allocation121_spill] sm:$0xff] }
 0x2fd   : > { %v6100_v45 = vmul.f32 1.442695, %v9635_v6  ;;  %v9641_v12 = vsub.f32 %v9640_v7, %v5076_v40  ;;  %9642 = vst [vmem:[#allocation52_spill] sm:$0xff] %v6119_v55  ;;  %3625 = vpow2.f32 %v1983_v58  ;;  %v9643_v42 = vsub.f32 %v9279_v63, %v5080_v35  ;;  %v6136_v7 = vpop.eup %3601 }
 0x2fe   : > { %v6107_v3 = vmul.f32 1.442695, %v9638_v29  ;;  %v6112_v21 = vmul.f32 1.442695, %v9639_v0  ;;  %v9645_v29 = vsub.f32 %v9644_v34, %v5084_v14  ;;  %v9646_v11 = vsub.f32 %v9283_v30, %v5088_v9  ;;  %9647 = vst [vmem:[#allocation54_spill] sm:$0xff] %v6136_v7  ;;  %v9651_v34 = vld [vmem:[#allocation125_spill] sm:$0xff]  ;;  %v6153_v30 = vpop.eup %3603 }
 0x2ff   : > { %v6117_v50 = vmul.f32 1.442695, %v9641_v12  ;;  %v6124_v6 = vmul.f32 1.442695, %v9643_v42  ;;  %3627 = vpow2.f32 %v1985_v54  ;;  %v9648_v12 = vld [vmem:[#allocation124_spill] sm:$0xff]  ;;  %v9650_v63 = vsub.f32 %v9287_v61, %v5080_v35  ;;  %9653 = vst [vmem:[#allocation53_spill] sm:$0xff] %v6153_v30 }
 0x300   : > { %v6129_v36 = vmul.f32 1.442695, %v9645_v29  ;;  %v6134_v0 = vmul.f32 1.442695, %v9646_v11  ;;  %v9649_v58 = vsub.f32 %v9648_v12, %v5076_v40  ;;  %v9652_v29 = vsub.f32 %v9651_v34, %v5084_v14  ;;  %v9655_v12 = vld [vmem:[#allocation128_spill] sm:$0xff]  ;;  %v6170_v34 = vpop.eup %3605 }
 0x301   : > { %v6146_v42 = vmul.f32 1.442695, %v9650_v63  ;;  %3629 = vpow2.f32 %v1987_v26  ;;  %v9654_v54 = vsub.f32 %v9291_v47, %v5088_v9  ;;  %v9657_v61 = vsub.f32 %v9295_v37, %v5080_v35  ;;  %9658 = vst [vmem:[#allocation55_spill] sm:$0xff] %v6170_v34  ;;  %v6187_v37 = vpop.eup %3607 }
 0x302   : > { %v6141_v55 = vmul.f32 1.442695, %v9649_v58  ;;  %v6151_v44 = vmul.f32 1.442695, %v9652_v29  ;;  %v9656_v58 = vsub.f32 %v9655_v12, %v5076_v40  ;;  %3631 = vpow2.f32 %v1989_v4  ;;  %v9659_v29 = vld [vmem:[#allocation129_spill] sm:$0xff]  ;;  %v9662_v12 = vld [vmem:[#allocation132_spill] sm:$0xff] }
 0x303   : > { %v6158_v11 = vmul.f32 1.442695, %v9654_v54  ;;  %v6168_v63 = vmul.f32 1.442695, %v9657_v61  ;;  %v9660_v26 = vsub.f32 %v9659_v29, %v5084_v14  ;;  %v9661_v47 = vsub.f32 %v9299_v46, %v5088_v9  ;;  %9664 = vst [vmem:[#allocation56_spill] sm:$0xff] %v6187_v37  ;;  %v9666_v29 = vld [vmem:[#allocation133_spill] sm:$0xff] }
 0x304   : > { %v6163_v7 = vmul.f32 1.442695, %v9656_v58  ;;  %v9663_v58 = vsub.f32 %v9662_v12, %v5076_v40  ;;  %3633 = vpow2.f32 %v1991_v57  ;;  %v9665_v4 = vsub.f32 %v9303_v38, %v5080_v35  ;;  %v6204_v12 = vpop.eup %3609 }
 0x305   : > { %v6175_v30 = vmul.f32 1.442695, %v9660_v26  ;;  %v6180_v54 = vmul.f32 1.442695, %v9661_v47  ;;  %v9667_v26 = vsub.f32 %v9666_v29, %v5084_v14  ;;  %v9668_v46 = vsub.f32 %v9307_v27, %v5088_v9  ;;  %9669 = vst [vmem:[#allocation58_spill] sm:$0xff] %v6204_v12  ;;  %v9673_v29 = vld [vmem:[#allocation137_spill] sm:$0xff]  ;;  %v6221_v27 = vpop.eup %3611 }
 0x306   : > { %v6185_v17 = vmul.f32 1.442695, %v9663_v58  ;;  %v6192_v61 = vmul.f32 1.442695, %v9665_v4  ;;  %3635 = vpow2.f32 %v1993_v22  ;;  %v9670_v58 = vld [vmem:[#allocation136_spill] sm:$0xff]  ;;  %v9672_v38 = vsub.f32 %v9311_v56, %v5080_v35  ;;  %9675 = vst [vmem:[#allocation57_spill] sm:$0xff] %v6221_v27 }
 0x307   : > { %v6197_v34 = vmul.f32 1.442695, %v9667_v26  ;;  %v6202_v47 = vmul.f32 1.442695, %v9668_v46  ;;  %v9671_v57 = vsub.f32 %v9670_v58, %v5076_v40  ;;  %v9674_v26 = vsub.f32 %v9673_v29, %v5084_v14  ;;  %v9677_v58 = vld [vmem:[#allocation140_spill] sm:$0xff]  ;;  %v6238_v29 = vpop.eup %3613 }
 0x308   : > { %v6214_v4 = vmul.f32 1.442695, %v9672_v38  ;;  %3637 = vpow2.f32 %v1995_v2  ;;  %v9676_v22 = vsub.f32 %v9315_v33, %v5088_v9  ;;  %v9679_v56 = vsub.f32 %v9319_v18, %v5080_v35  ;;  %9680 = vst [vmem:[#allocation59_spill] sm:$0xff] %v6238_v29  ;;  %v6255_v18 = vpop.eup %3615 }
 0x309   : > { %v6209_v37 = vmul.f32 1.442695, %v9671_v57  ;;  %v6219_v16 = vmul.f32 1.442695, %v9674_v26  ;;  %v9678_v57 = vsub.f32 %v9677_v58, %v5076_v40  ;;  %3639 = vpow2.f32 %v1997_v62  ;;  %v9681_v26 = vld [vmem:[#allocation141_spill] sm:$0xff]  ;;  %v9684_v58 = vld [vmem:[#allocation144_spill] sm:$0xff] }
 0x30a   : > { %v6226_v46 = vmul.f32 1.442695, %v9676_v22  ;;  %v6236_v38 = vmul.f32 1.442695, %v9679_v56  ;;  %v9682_v2 = vsub.f32 %v9681_v26, %v5084_v14  ;;  %v9683_v33 = vsub.f32 %v9323_v8, %v5088_v9  ;;  %9686 = vst [vmem:[#allocation60_spill] sm:$0xff] %v6255_v18  ;;  %v9688_v26 = vld [vmem:[#allocation145_spill] sm:$0xff] }
 0x30b   : > { %v6231_v12 = vmul.f32 1.442695, %v9678_v57  ;;  %v9685_v57 = vsub.f32 %v9684_v58, %v5076_v40  ;;  %3641 = vpow2.f32 %v1999_v31  ;;  %v9687_v62 = vsub.f32 %v9327_v60, %v5080_v35  ;;  %v6272_v58 = vpop.eup %3617 }
 0x30c   : > { %v6243_v27 = vmul.f32 1.442695, %v9682_v2  ;;  %v6248_v22 = vmul.f32 1.442695, %v9683_v33  ;;  %v9689_v2 = vsub.f32 %v9688_v26, %v5084_v14  ;;  %v9690_v8 = vsub.f32 %v9331_v51, %v5088_v9  ;;  %9691 = vst [vmem:[#allocation62_spill] sm:$0xff] %v6272_v58  ;;  %v6289_v51 = vpop.eup %3619 }
 0x30d   : > { %v6253_v48 = vmul.f32 1.442695, %v9685_v57  ;;  %v6260_v56 = vmul.f32 1.442695, %v9687_v62  ;;  %3643 = vpow2.f32 %v2001_v49  ;;  %v9692_v57 = vld [vmem:[#allocation148_spill] sm:$0xff]  ;;  %v9694_v60 = vsub.f32 %v9335_v1, %v5080_v35  ;;  %9696 = vst [vmem:[#allocation61_spill] sm:$0xff] %v6289_v51 }
 0x30e   : > { %v6265_v29 = vmul.f32 1.442695, %v9689_v2  ;;  %v6270_v33 = vmul.f32 1.442695, %v9690_v8  ;;  %v9693_v31 = vsub.f32 %v9692_v57, %v5076_v40  ;;  %v9695_v26 = vsub.f32 %v9338_v39, %v5084_v14  ;;  %v6306_v39 = vpop.eup %3621 }
 0x30f   : > { %v6282_v62 = vmul.f32 1.442695, %v9694_v60  ;;  %3645 = vpow2.f32 %v2003_v52  ;;  %v9697_v49 = vsub.f32 %v9339_v5, %v5088_v9  ;;  %v9698_v57 = vsub.f32 %v9065_v23, %v5076_v40  ;;  %9700 = vst [vmem:[#allocation63_spill] sm:$0xff] %v6306_v39 }
 0x310   : > { %v6277_v18 = vmul.f32 1.442695, %v9693_v31  ;;  %v6287_v2 = vmul.f32 1.442695, %v9695_v26  ;;  %v9699_v1 = vsub.f32 %v9342_v53, %v5080_v35  ;;  %3647 = vpow2.f32 %v6083_v25 }
 0x311   : > { %v6294_v8 = vmul.f32 1.442695, %v9697_v49  ;;  %v6299_v31 = vmul.f32 1.442695, %v9698_v57  ;;  %v9701_v52 = vsub.f32 %v9066_v41, %v5084_v14  ;;  %v9702_v26 = vsub.f32 %v9345_v19, %v5088_v9  ;;  %v6324_v57 = vpop.eup %3623 }
 0x312   : > { %v6304_v60 = vmul.f32 1.442695, %v9699_v1  ;;  %v9703_v49 = vsub.f32 %v9070_v28, %v5076_v40  ;;  %9704 = vst [vmem:[#allocation64_spill] sm:$0xff] %v6324_v57  ;;  %3649 = vpow2.f32 %v6090_v32  ;;  %v9705_v25 = vsub.f32 %v9348_v15, %v5080_v35  ;;  %v9710_v32 = vld [vmem:[#allocation160_spill] sm:$0xff] }
 0x313   : > { %v6312_v5 = vmul.f32 1.442695, %v9701_v52  ;;  %v6317_v23 = vmul.f32 1.442695, %v9702_v26  ;;  %v9706_v1 = vsub.f32 %v9071_v13, %v5084_v14  ;;  %v9707_v52 = vld [vmem:[#allocation159_spill] sm:$0xff]  ;;  %3651 = vpow2.f32 %v6095_v10 }
 0x314   : > { %v6322_v53 = vmul.f32 1.442695, %v9703_v49  ;;  %v6330_v41 = vmul.f32 1.442695, %v9705_v25  ;;  %v9708_v26 = vsub.f32 %v9707_v52, %v5088_v9  ;;  %v6342_v49 = vpop.eup %3625  ;;  %v9711_v57 = vsub.f32 %v9710_v32, %v5076_v40  ;;  %v9712_v25 = vld [vmem:[#allocation162_spill] sm:$0xff]  ;;  %v9718_v10 = vld [vmem:[#allocation163_spill] sm:$0xff] }
 0x315   : > { %v6335_v19 = vmul.f32 1.442695, %v9706_v1  ;;  %9709 = vst [vmem:[#allocation66_spill] sm:$0xff] %v6342_v49  ;;  %v9713_v58 = vsub.f32 %v9712_v25, %v5080_v35  ;;  %v9715_v1 = vld [vmem:[#allocation161_spill] sm:$0xff]  ;;  %3653 = vpow2.f32 %v6100_v45  ;;  %v9719_v49 = vsub.f32 %v9718_v10, %v5088_v9 }
 0x316   : > { %v6340_v28 = vmul.f32 1.442695, %v9708_v26  ;;  %v6348_v15 = vmul.f32 1.442695, %v9711_v57  ;;  %v9716_v39 = vsub.f32 %v9715_v1, %v5084_v14  ;;  %v6360_v26 = vpop.eup %3627  ;;  %v9721_v57 = vld [vmem:[#allocation164_spill] sm:$0xff]  ;;  %3655 = vpow2.f32 %v6107_v3  ;;  %v9727_v45 = vld [vmem:[#allocation165_spill] sm:$0xff] }
 0x317   : > { %v6353_v13 = vmul.f32 1.442695, %v9713_v58  ;;  %9717 = vst [vmem:[#allocation67_spill] sm:$0xff] %v6360_v26  ;;  %v6366_v32 = vmul.f32 1.442695, %v9719_v49  ;;  %v9722_v51 = vsub.f32 %v9721_v57, %v5076_v40  ;;  %v9724_v58 = vld [vmem:[#allocation166_spill] sm:$0xff]  ;;  %v9728_v26 = vsub.f32 %v9727_v45, %v5084_v14 }
 0x318   : > { %v6358_v52 = vmul.f32 1.442695, %v9716_v39  ;;  %v6378_v39 = vpop.eup %3629  ;;  %v9730_v49 = vld [vmem:[#allocation167_spill] sm:$0xff]  ;;  %3657 = vpow2.f32 %v6112_v21  ;;  %v9736_v3 = vld [vmem:[#allocation170_spill] sm:$0xff]  ;;  %v9745_v21 = vld [vmem:[#allocation172_spill] sm:$0xff] }
 0x319   : > { %9714 = vst [vmem:[#allocation65_spill] sm:$0xff] %v6353_v13  ;;  %9720 = vst [vmem:[#allocation68_spill] sm:$0xff] %v6366_v32  ;;  %v6371_v25 = vmul.f32 1.442695, %v9722_v51  ;;  %v9725_v13 = vsub.f32 %v9724_v58, %v5080_v35  ;;  %v6384_v10 = vmul.f32 1.442695, %v9728_v26  ;;  %v9731_v32 = vsub.f32 %v9730_v49, %v5088_v9 }
 0x31a   : > { %9726 = vst [vmem:[#allocation69_spill] sm:$0xff] %v6378_v39  ;;  %v9733_v51 = vld [vmem:[#allocation168_spill] sm:$0xff]  ;;  %v9737_v39 = vsub.f32 %v9736_v3, %v5080_v35  ;;  %v9739_v26 = vld [vmem:[#allocation169_spill] sm:$0xff]  ;;  %3659 = vpow2.f32 %v6117_v50  ;;  %v9754_v50 = vld [vmem:[#allocation175_spill] sm:$0xff] }
 0x31b   : > { %9723 = vst [vmem:[#allocation70_spill] sm:$0xff] %v6371_v25  ;;  %v6376_v1 = vmul.f32 1.442695, %v9725_v13  ;;  %9729 = vst [vmem:[#allocation71_spill] sm:$0xff] %v6384_v10  ;;  %v6389_v57 = vmul.f32 1.442695, %v9731_v32  ;;  %v9734_v25 = vsub.f32 %v9733_v51, %v5076_v40  ;;  %v6396_v13 = vpop.eup %3631  ;;  %v9740_v10 = vsub.f32 %v9739_v26, %v5084_v14 }
 0x31c   : > { %9735 = vst [vmem:[#allocation74_spill] sm:$0xff] %v6396_v13  ;;  %v6402_v45 = vmul.f32 1.442695, %v9737_v39  ;;  %v9742_v32 = vld [vmem:[#allocation171_spill] sm:$0xff]  ;;  %v9746_v13 = vsub.f32 %v9745_v21, %v5076_v40  ;;  %v9748_v39 = vld [vmem:[#allocation174_spill] sm:$0xff]  ;;  %3661 = vpow2.f32 %v6124_v6  ;;  %v9763_v6 = vld [vmem:[#allocation177_spill] sm:$0xff] }
 0x31d   : > { %9732 = vst [vmem:[#allocation72_spill] sm:$0xff] %v6389_v57  ;;  %v6394_v58 = vmul.f32 1.442695, %v9734_v25  ;;  %v6407_v49 = vmul.f32 1.442695, %v9740_v10  ;;  %v9743_v57 = vsub.f32 %v9742_v32, %v5088_v9  ;;  %v6414_v25 = vpop.eup %3633  ;;  %v9751_v10 = vld [vmem:[#allocation173_spill] sm:$0xff]  ;;  %3663 = vpow2.f32 %v6129_v36 }
 0x31e   : > { %9738 = vst [vmem:[#allocation73_spill] sm:$0xff] %v6402_v45  ;;  %9744 = vst [vmem:[#allocation76_spill] sm:$0xff] %v6414_v25  ;;  %v6420_v3 = vmul.f32 1.442695, %v9746_v13  ;;  %v9749_v45 = vsub.f32 %v9748_v39, %v5080_v35  ;;  %v9755_v25 = vsub.f32 %v9754_v50, %v5088_v9  ;;  %v9757_v13 = vld [vmem:[#allocation176_spill] sm:$0xff]  ;;  %3665 = vpow2.f32 %v6134_v0  ;;  %v9773_v36 = vld [vmem:[#allocation182_spill] sm:$0xff] }
 0x31f   : > { %9741 = vst [vmem:[#allocation75_spill] sm:$0xff] %v6407_v49  ;;  %v6412_v51 = vmul.f32 1.442695, %v9743_v57  ;;  %v9752_v49 = vsub.f32 %v9751_v10, %v5084_v14  ;;  %v6432_v57 = vpop.eup %3635  ;;  %3667 = vpow2.f32 %v6141_v55  ;;  %v9783_v0 = vld [vmem:[#allocation184_spill] sm:$0xff]  ;;  %v9793_v55 = vld [vmem:[#allocation187_spill] sm:$0xff] }
 0x320   : > { %9747 = vst [vmem:[#allocation78_spill] sm:$0xff] %v6420_v3  ;;  %v6425_v26 = vmul.f32 1.442695, %v9749_v45  ;;  %9753 = vst [vmem:[#allocation77_spill] sm:$0xff] %v6432_v57  ;;  %v6438_v21 = vmul.f32 1.442695, %v9755_v25  ;;  %v9758_v3 = vsub.f32 %v9757_v13, %v5076_v40  ;;  %v9764_v57 = vsub.f32 %v9763_v6, %v5084_v14 }
 0x321   : > { %v6430_v32 = vmul.f32 1.442695, %v9752_v49  ;;  %v9760_v45 = vld [vmem:[#allocation178_spill] sm:$0xff]  ;;  %v6450_v49 = vpop.eup %3637  ;;  %v9766_v25 = vld [vmem:[#allocation179_spill] sm:$0xff]  ;;  %3669 = vpow2.f32 %v6146_v42  ;;  %v9803_v42 = vld [vmem:[#allocation189_spill] sm:$0xff] }
 0x322   : > { %9750 = vst [vmem:[#allocation222_spill] sm:$0xff] %v6425_v26  ;;  %9756 = vst [vmem:[#allocation79_spill] sm:$0xff] %v6438_v21  ;;  %v6443_v39 = vmul.f32 1.442695, %v9758_v3  ;;  %v9761_v26 = vsub.f32 %v9760_v45, %v5080_v35  ;;  %v6456_v50 = vmul.f32 1.442695, %v9764_v57  ;;  %v9767_v21 = vsub.f32 %v9766_v25, %v5088_v9 }
 0x323   : > { %9762 = vst [vmem:[#allocation82_spill] sm:$0xff] %v6450_v49  ;;  %v9769_v3 = vld [vmem:[#allocation180_spill] sm:$0xff]  ;;  %v9774_v49 = vsub.f32 %v9773_v36, %v5080_v35  ;;  %v9776_v57 = vld [vmem:[#allocation181_spill] sm:$0xff] }
 0x324   : > { %9759 = vst [vmem:[#allocation227_spill] sm:$0xff] %v6443_v39  ;;  %v6448_v10 = vmul.f32 1.442695, %v9761_v26  ;;  %9765 = vst [vmem:[#allocation81_spill] sm:$0xff] %v6456_v50  ;;  %v6461_v13 = vmul.f32 1.442695, %v9767_v21  ;;  %v9770_v39 = vsub.f32 %v9769_v3, %v5076_v40  ;;  %v6468_v26 = vpop.eup %3639  ;;  %v9777_v50 = vsub.f32 %v9776_v57, %v5084_v14 }
 0x325   : > { %9772 = vst [vmem:[#allocation85_spill] sm:$0xff] %v6468_v26  ;;  %v6474_v6 = vmul.f32 1.442695, %v9774_v49  ;;  %v9779_v21 = vld [vmem:[#allocation183_spill] sm:$0xff]  ;;  %v9784_v26 = vsub.f32 %v9783_v0, %v5076_v40  ;;  %v9786_v49 = vld [vmem:[#allocation186_spill] sm:$0xff]  ;;  %3671 = vpow2.f32 %v6151_v44 }
 0x326   : > { %9768 = vst [vmem:[#allocation84_spill] sm:$0xff] %v6461_v13  ;;  %v6466_v45 = vmul.f32 1.442695, %v9770_v39  ;;  %v6479_v25 = vmul.f32 1.442695, %v9777_v50  ;;  %v9780_v13 = vsub.f32 %v9779_v21, %v5088_v9  ;;  %v6486_v39 = vpop.eup %3641  ;;  %v9789_v50 = vld [vmem:[#allocation185_spill] sm:$0xff]  ;;  %3673 = vpow2.f32 %v6158_v11 }
 0x327   : > { %9775 = vst [vmem:[#allocation235_spill] sm:$0xff] %v6474_v6  ;;  %9782 = vst [vmem:[#allocation239_spill] sm:$0xff] %v6486_v39  ;;  %v6492_v36 = vmul.f32 1.442695, %v9784_v26  ;;  %v9787_v6 = vsub.f32 %v9786_v49, %v5080_v35  ;;  %v9794_v39 = vsub.f32 %v9793_v55, %v5088_v9  ;;  %v9796_v26 = vld [vmem:[#allocation188_spill] sm:$0xff]  ;;  %v9813_v44 = vld [vmem:[#allocation194_spill] sm:$0xff] }
 0x328   : > { %9771 = vst [vmem:[#allocation86_spill] sm:$0xff] %v6466_v45  ;;  %9778 = vst [vmem:[#allocation87_spill] sm:$0xff] %v6479_v25  ;;  %v6484_v3 = vmul.f32 1.442695, %v9780_v13  ;;  %v9790_v25 = vsub.f32 %v9789_v50, %v5084_v14  ;;  %v6504_v13 = vpop.eup %3643  ;;  %3675 = vpow2.f32 %v6163_v7  ;;  %v9823_v11 = vld [vmem:[#allocation196_spill] sm:$0xff]  ;;  %v9834_v7 = vld [vmem:[#allocation197_spill] sm:$0xff] }
 0x329   : > { %9785 = vst [vmem:[#allocation89_spill] sm:$0xff] %v6492_v36  ;;  %v6497_v57 = vmul.f32 1.442695, %v9787_v6  ;;  %9792 = vst [vmem:[#allocation96_spill] sm:$0xff] %v6504_v13  ;;  %v6510_v0 = vmul.f32 1.442695, %v9794_v39  ;;  %v9797_v36 = vsub.f32 %v9796_v26, %v5076_v40 }
 0x32a   : > { %9781 = vst [vmem:[#allocation88_spill] sm:$0xff] %v6484_v3  ;;  %v6502_v21 = vmul.f32 1.442695, %v9790_v25  ;;  %v9799_v6 = vld [vmem:[#allocation190_spill] sm:$0xff]  ;;  %v6522_v25 = vpop.eup %3645  ;;  %v9806_v39 = vld [vmem:[#allocation191_spill] sm:$0xff]  ;;  %3677 = vpow2.f32 %v6168_v63 }
 0x32b   : > { %9788 = vst [vmem:[#allocation92_spill] sm:$0xff] %v6497_v57  ;;  %9795 = vst [vmem:[#allocation97_spill] sm:$0xff] %v6510_v0  ;;  %v6515_v49 = vmul.f32 1.442695, %v9797_v36  ;;  %v9800_v57 = vsub.f32 %v9799_v6, %v5080_v35  ;;  %v9807_v0 = vsub.f32 %v9806_v39, %v5088_v9  ;;  %v9809_v36 = vld [vmem:[#allocation192_spill] sm:$0xff]  ;;  %v10035_v13 = vld [vmem:[#allocation19_spill] sm:$0xff] }
 0x32c   : > { %9791 = vst [vmem:[#allocation93_spill] sm:$0xff] %v6502_v21  ;;  %9802 = vst [vmem:[#allocation104_spill] sm:$0xff] %v6522_v25  ;;  %v9804_v21 = vsub.f32 %v9803_v42, %v5084_v14 }
 0x32d   : > { %9798 = vst [vmem:[#allocation100_spill] sm:$0xff] %v6515_v49  ;;  %v6520_v50 = vmul.f32 1.442695, %v9800_v57  ;;  %v6533_v26 = vmul.f32 1.442695, %v9807_v0  ;;  %v9810_v49 = vsub.f32 %v9809_v36, %v5076_v40  ;;  %v6540_v57 = vpop.eup %3647  ;;  %v9819_v0 = vld [vmem:[#allocation195_spill] sm:$0xff]  ;;  %3679 = vpow2.f32 %v6175_v30 }
 0x32e   : > { %v6528_v55 = vmul.f32 1.442695, %v9804_v21  ;;  %9812 = vst [vmem:[#allocation112_spill] sm:$0xff] %v6540_v57  ;;  %v9816_v21 = vld [vmem:[#allocation193_spill] sm:$0xff]  ;;  %v9824_v57 = vsub.f32 %v9823_v11, %v5076_v40  ;;  %v9855_v30 = vld [vmem:[#allocation204_spill] sm:$0xff] }
 0x32f   : > { %9801 = vst [vmem:[#allocation101_spill] sm:$0xff] %v6520_v50  ;;  %9808 = vst [vmem:[#allocation108_spill] sm:$0xff] %v6533_v26  ;;  %v6538_v6 = vmul.f32 1.442695, %v9810_v49  ;;  %v9814_v50 = vsub.f32 %v9813_v44, %v5080_v35  ;;  %v9820_v26 = vsub.f32 %v9819_v0, %v5088_v9  ;;  %v6558_v49 = vpop.eup %3649  ;;  %v9835_v0 = vsub.f32 %v9834_v7, %v5084_v14  ;;  %v9845_v7 = vld [vmem:[#allocation202_spill] sm:$0xff] }
 0x330   : > { %9805 = vst [vmem:[#allocation105_spill] sm:$0xff] %v6528_v55  ;;  %v9817_v55 = vsub.f32 %v9816_v21, %v5084_v14  ;;  %9822 = vst [vmem:[#allocation120_spill] sm:$0xff] %v6558_v49  ;;  %v6564_v44 = vmul.f32 1.442695, %v9824_v57  ;;  %v9837_v57 = vld [vmem:[#allocation199_spill] sm:$0xff]  ;;  %3681 = vpow2.f32 %v6180_v54 }
 0x331   : > { %9811 = vst [vmem:[#allocation111_spill] sm:$0xff] %v6538_v6  ;;  %v6546_v42 = vmul.f32 1.442695, %v9814_v50  ;;  %v6556_v36 = vmul.f32 1.442695, %v9820_v26  ;;  %v9826_v50 = vld [vmem:[#allocation198_spill] sm:$0xff]  ;;  %v6576_v26 = vpop.eup %3651  ;;  %v9838_v49 = vsub.f32 %v9837_v57, %v5088_v9  ;;  %3683 = vpow2.f32 %v6185_v17 }
 0x332   : > { %v6551_v39 = vmul.f32 1.442695, %v9817_v55  ;;  %9825 = vst [vmem:[#allocation121_spill] sm:$0xff] %v6564_v44  ;;  %v9829_v55 = vlaneseq  ;;  %9833 = vst [vmem:[#allocation128_spill] sm:$0xff] %v6576_v26  ;;  %v6582_v11 = vmul.f32 1.442695, %v9835_v0  ;;  %v6597_v63 = vpop.eup %3653  ;;  %v9846_v0 = vsub.f32 %v9845_v7, %v5080_v35 }
 0x333   : > { %9815 = vst [vmem:[#allocation113_spill] sm:$0xff] %v6546_v42  ;;  %9821 = vst [vmem:[#allocation117_spill] sm:$0xff] %v6556_v36  ;;  %v9827_v42 = vsub.f32 %v9826_v50, %v5080_v35  ;;  %v6587_v50 = vmul.f32 1.442695, %v9838_v49  ;;  %v9843_v44 = vld [vmem:[#allocation266_spill] sm:$0xff]  ;;  %v9848_v49 = vld [vmem:[#allocation201_spill] sm:$0xff]  ;;  %3685 = vpow2.f32 %v6192_v61 }
 0x334   : > { %9818 = vst [vmem:[#allocation116_spill] sm:$0xff] %v6551_v39  ;;  %vm6572_vm3 = vcmp.lt.s32.totalorder %v9829_v55, 512  ;;  %v9830_v39 = vmov 0  ;;  %9836 = vst [vmem:[#allocation129_spill] sm:$0xff] %v6582_v11  ;;  %v6603_v11 = vmul.f32 1.442695, %v9846_v0  ;;  %v9849_v57 = vsub.f32 %v9848_v49, %v5084_v14 }
 0x335   : > { %v6569_v21 = vmul.f32 1.442695, %v9827_v42  ;;  %v9831_v39 = vsel %vm6572_vm3, 4294967295, %v9830_v39  ;;  %9839 = vst [vmem:[#allocation132_spill] sm:$0xff] %v6587_v50  ;;  %v9840_v42 = vld [vmem:[#allocation200_spill] sm:$0xff]  ;;  %9844 = vst [vmem:[#allocation136_spill] sm:$0xff] %v6597_v63 }
 0x336   : > { %9832 = vst [vmem:[#allocation125_spill] sm:$0xff] %v9831_v39  ;;  %v9841_v55 = vsub.f32 %v9840_v42, %v5076_v40  ;;  %2991 = vst.msk [vmem:[#allocation2] sm:$0xf] %vm6572_vm3, %v9843_v44  ;;  %v6608_v50 = vmul.f32 1.442695, %v9849_v57  ;;  %v9851_v42 = vld [vmem:[#allocation203_spill] sm:$0xff]  ;;  %v6615_v39 = vpop.eup %3655  ;;  %v9856_v44 = vsub.f32 %v9855_v30, %v5076_v40  ;;  %3687 = vpow2.f32 %v6197_v34 }
 0x337   : > { %9828 = vst [vmem:[#allocation124_spill] sm:$0xff] %v6569_v21  ;;  %9847 = vst [vmem:[#allocation137_spill] sm:$0xff] %v6603_v11  ;;  %v9858_v0 = vld [vmem:[#allocation206_spill] sm:$0xff]  ;;  %v9861_v57 = vld [vmem:[#allocation205_spill] sm:$0xff] }
 0x338   : > { %v6592_v21 = vmul.f32 1.442695, %v9841_v55  ;;  %9850 = vst [vmem:[#allocation140_spill] sm:$0xff] %v6608_v50  ;;  %v9852_v55 = vsub.f32 %v9851_v42, %v5088_v9  ;;  %9854 = vst [vmem:[#allocation144_spill] sm:$0xff] %v6615_v39  ;;  %v6621_v7 = vmul.f32 1.442695, %v9856_v44  ;;  %v9859_v11 = vsub.f32 %v9858_v0, %v5080_v35 }
 0x339   : > { %v9862_v50 = vsub.f32 %v9861_v57, %v5084_v14  ;;  %v9865_v54 = vld [vmem:[#allocation207_spill] sm:$0xff]  ;;  %v9868_v44 = vld [vmem:[#allocation208_spill] sm:$0xff]  ;;  %v9875_v17 = vld [vmem:[#allocation209_spill] sm:$0xff] }
 0x33a   : > { %9842 = vst [vmem:[#allocation133_spill] sm:$0xff] %v6592_v21  ;;  %v6613_v21 = vmul.f32 1.442695, %v9852_v55  ;;  %9857 = vst [vmem:[#allocation145_spill] sm:$0xff] %v6621_v7  ;;  %v6626_v49 = vmul.f32 1.442695, %v9859_v11  ;;  %v6633_v55 = vpop.eup %3657  ;;  %v9869_v7 = vsub.f32 %v9868_v44, %v5076_v40  ;;  %3689 = vpow2.f32 %v6202_v47 }
 0x33b   : > { %v6631_v42 = vmul.f32 1.442695, %v9862_v50  ;;  %9864 = vst [vmem:[#allocation160_spill] sm:$0xff] %v6633_v55  ;;  %v9871_v11 = vld [vmem:[#allocation210_spill] sm:$0xff]  ;;  %v6651_v50 = vpop.eup %3659  ;;  %v9894_v34 = vld [vmem:[#allocation216_spill] sm:$0xff]  ;;  %3691 = vpow2.f32 %v6209_v37  ;;  %v9913_v37 = vsub.f32 %v9503_v20, %v5080_v35  ;;  %v10025_v39 = vld [vmem:[#allocation115_spill] sm:$0xff] }
 0x33c   : > { %9853 = vst [vmem:[#allocation141_spill] sm:$0xff] %v6613_v21  ;;  %9860 = vst [vmem:[#allocation148_spill] sm:$0xff] %v6626_v49  ;;  %v9866_v21 = vsub.f32 %v9865_v54, %v5088_v9  ;;  %v6644_v0 = vmul.f32 1.442695, %v9869_v7  ;;  %v9872_v49 = vsub.f32 %v9871_v11, %v5080_v35  ;;  %v9881_v7 = vld [vmem:[#allocation212_spill] sm:$0xff]  ;;  %v9884_v61 = vld [vmem:[#allocation214_spill] sm:$0xff] }
 0x33d   : > { %9863 = vst [vmem:[#allocation159_spill] sm:$0xff] %v6631_v42  ;;  %9874 = vst [vmem:[#allocation164_spill] sm:$0xff] %v6651_v50  ;;  %v9876_v42 = vsub.f32 %v9875_v17, %v5084_v14  ;;  %v10028_v36 = vld [vmem:[#allocation44_spill] sm:$0xff] }
 0x33e   : > { %v6639_v30 = vmul.f32 1.442695, %v9866_v21  ;;  %9870 = vst [vmem:[#allocation161_spill] sm:$0xff] %v6644_v0  ;;  %v6649_v57 = vmul.f32 1.442695, %v9872_v49  ;;  %v9878_v21 = vld [vmem:[#allocation211_spill] sm:$0xff]  ;;  %v9882_v0 = vsub.f32 %v9881_v7, %v5076_v40  ;;  %v6669_v49 = vpop.eup %3661  ;;  %3693 = vpow2.f32 %v6214_v4 }
 0x33f   : > { %v6657_v54 = vmul.f32 1.442695, %v9876_v42  ;;  %v9887_v42 = vld [vmem:[#allocation213_spill] sm:$0xff] }
 0x340   : > { %9867 = vst [vmem:[#allocation162_spill] sm:$0xff] %v6639_v30  ;;  %9873 = vst [vmem:[#allocation163_spill] sm:$0xff] %v6649_v57  ;;  %v9879_v30 = vsub.f32 %v9878_v21, %v5088_v9  ;;  %v6667_v11 = vmul.f32 1.442695, %v9882_v0  ;;  %v9885_v57 = vsub.f32 %v9884_v61, %v5080_v35  ;;  %v6687_v0 = vpop.eup %3663  ;;  %3695 = vpow2.f32 %v6219_v16  ;;  %v9930_v16 = vld [vmem:[#allocation225_spill] sm:$0xff] }
 0x341   : > { %9877 = vst [vmem:[#allocation166_spill] sm:$0xff] %v6657_v54  ;;  %v9888_v54 = vsub.f32 %v9887_v42, %v5084_v14  ;;  %9893 = vst [vmem:[#allocation171_spill] sm:$0xff] %v6687_v0 }
 0x342   : > { %v6662_v44 = vmul.f32 1.442695, %v9879_v30  ;;  %9883 = vst [vmem:[#allocation167_spill] sm:$0xff] %v6667_v11  ;;  %v6675_v17 = vmul.f32 1.442695, %v9885_v57  ;;  %v9890_v30 = vld [vmem:[#allocation215_spill] sm:$0xff]  ;;  %v9895_v11 = vsub.f32 %v9894_v34, %v5076_v40 }
 0x343   : > { %v6680_v21 = vmul.f32 1.442695, %v9888_v54  ;;  %v9897_v57 = vld [vmem:[#allocation218_spill] sm:$0xff]  ;;  %v9900_v54 = vld [vmem:[#allocation8_spill] sm:$0xff]  ;;  %v9906_v34 = vld [vmem:[#allocation219_spill] sm:$0xff] }
 0x344   : > { %9880 = vst [vmem:[#allocation165_spill] sm:$0xff] %v6662_v44  ;;  %9886 = vst [vmem:[#allocation168_spill] sm:$0xff] %v6675_v17  ;;  %v9891_v44 = vsub.f32 %v9890_v30, %v5088_v9  ;;  %v6693_v61 = vmul.f32 1.442695, %v9895_v11  ;;  %v9898_v17 = vsub.f32 %v9897_v57, %v5080_v35  ;;  %v6702_v30 = vpop.eup %3665  ;;  %v9907_v11 = vsub.f32 %v9906_v34, %v5088_v9  ;;  %v9909_v57 = vld [vmem:[#allocation220_spill] sm:$0xff] }
 0x345   : > { %9889 = vst [vmem:[#allocation170_spill] sm:$0xff] %v6680_v21  ;;  %v9901_v21 = vld [vmem:[#allocation12_spill] sm:$0xff]  ;;  %9902 = vst [vmem:[#allocation173_spill] sm:$0xff] %v6702_v30  ;;  %v6720_v0 = vpop.eup %3667  ;;  %3697 = vpow2.f32 %v6226_v46 }
 0x346   : > { %v6685_v7 = vmul.f32 1.442695, %v9891_v44  ;;  %9896 = vst [vmem:[#allocation172_spill] sm:$0xff] %v6693_v61  ;;  %v6698_v42 = vmul.f32 1.442695, %v9898_v17  ;;  %v2307_v55 = vadd.f32 %v9901_v21, %v9900_v54  ;;  %v9903_v44 = vld [vmem:[#allocation217_spill] sm:$0xff]  ;;  %v9910_v17 = vsub.f32 %v9909_v57, %v5076_v40  ;;  %v6734_v30 = vpop.eup %3669 }
 0x347   : > { %v9904_v47 = vsub.f32 %v9903_v44, %v5084_v14  ;;  %v6713_v61 = vmul.f32 1.442695, %v9907_v11  ;;  %9912 = vst [vmem:[#allocation177_spill] sm:$0xff] %v6720_v0  ;;  %v6726_v44 = vmul.f32 1.442695, %v9913_v37  ;;  %v9918_v11 = vld [vmem:[#allocation16_spill] sm:$0xff]  ;;  %3699 = vpow2.f32 %v6231_v12 }
 0x348   : > { %9892 = vst [vmem:[#allocation169_spill] sm:$0xff] %v6685_v7  ;;  %9899 = vst [vmem:[#allocation174_spill] sm:$0xff] %v6698_v42  ;;  %v6718_v42 = vmul.f32 1.442695, %v9910_v17  ;;  %v9920_v57 = vld [vmem:[#allocation223_spill] sm:$0xff]  ;;  %3701 = vpow2.f32 %v6236_v38  ;;  %v9946_v12 = vld [vmem:[#allocation153_spill] sm:$0xff] }
 0x349   : > { %v6708_v7 = vmul.f32 1.442695, %v9904_v47  ;;  %9908 = vst [vmem:[#allocation176_spill] sm:$0xff] %v6713_v61  ;;  %9914 = vst [vmem:[#allocation179_spill] sm:$0xff] %v6726_v44  ;;  %v9915_v47 = vld [vmem:[#allocation221_spill] sm:$0xff]  ;;  %v2308_v61 = vadd.f32 %v9918_v11, %v2307_v55  ;;  %v9921_v17 = vsub.f32 %v9920_v57, %v5088_v9  ;;  %v9926_v44 = vld [vmem:[#allocation226_spill] sm:$0xff]  ;;  %v6752_v55 = vpop.eup %3671  ;;  %3703 = vpow2.f32 %v6243_v27 }
 0x34a   : > { %9911 = vst [vmem:[#allocation178_spill] sm:$0xff] %v6718_v42  ;;  %9919 = vst [vmem:[#allocation182_spill] sm:$0xff] %v6734_v30  ;;  %v9923_v42 = vld [vmem:[#allocation224_spill] sm:$0xff] }
 0x34b   : > { %9905 = vst [vmem:[#allocation175_spill] sm:$0xff] %v6708_v7  ;;  %v9916_v7 = vsub.f32 %v9915_v47, %v5084_v14  ;;  %v6740_v4 = vmul.f32 1.442695, %v9921_v17  ;;  %v9924_v20 = vsub.f32 %v9923_v42, %v5076_v40  ;;  %9929 = vst [vmem:[#allocation186_spill] sm:$0xff] %v6752_v55  ;;  %v9933_v17 = vsub.f32 %v9517_v43, %v5088_v9  ;;  %v9964_v27 = vld [vmem:[#allocation232_spill] sm:$0xff] }
 0x34d   : > { %v6731_v34 = vmul.f32 1.442695, %v9916_v7  ;;  %9922 = vst [vmem:[#allocation181_spill] sm:$0xff] %v6740_v4  ;;  %v6745_v37 = vmul.f32 1.442695, %v9924_v20  ;;  %v9927_v7 = vsub.f32 %v9926_v44, %v5080_v35  ;;  %v9935_v20 = vld [vmem:[#allocation20_spill] sm:$0xff]  ;;  %v6766_v4 = vpop.eup %3673  ;;  %3705 = vpow2.f32 %v6248_v22 }
 0x34e   : > { %v6763_v42 = vmul.f32 1.442695, %v9933_v17  ;;  %9936 = vst [vmem:[#allocation188_spill] sm:$0xff] %v6766_v4  ;;  %v9937_v44 = vld [vmem:[#allocation228_spill] sm:$0xff] }
 0x34f   : > { %9917 = vst [vmem:[#allocation180_spill] sm:$0xff] %v6731_v34  ;;  %9925 = vst [vmem:[#allocation183_spill] sm:$0xff] %v6745_v37  ;;  %v6750_v47 = vmul.f32 1.442695, %v9927_v7  ;;  %v9931_v34 = vsub.f32 %v9930_v16, %v5084_v14  ;;  %v2309_v37 = vadd.f32 %v9935_v20, %v2308_v61  ;;  %v9938_v7 = vsub.f32 %v9937_v44, %v5076_v40  ;;  %v6784_v61 = vpop.eup %3675 }
 0x350   : > { %9934 = vst [vmem:[#allocation187_spill] sm:$0xff] %v6763_v42  ;;  %v9947_v42 = vsub.f32 %v9946_v12, %v5088_v9  ;;  %v6798_v4 = vpop.eup %3677  ;;  %3707 = vpow2.f32 %v6253_v48  ;;  %v9980_v48 = vld [vmem:[#allocation238_spill] sm:$0xff] }
 0x351   : > { %9928 = vst [vmem:[#allocation184_spill] sm:$0xff] %v6750_v47  ;;  %v6758_v57 = vmul.f32 1.442695, %v9931_v34  ;;  %v6772_v46 = vmul.f32 1.442695, %v9938_v7  ;;  %v9940_v47 = vld [vmem:[#allocation152_spill] sm:$0xff]  ;;  %3709 = vpow2.f32 %v6260_v56 }
 0x352   : > { %v9941_v34 = vsub.f32 %v9940_v47, %v5080_v35  ;;  %v6790_v44 = vmul.f32 1.442695, %v9947_v42  ;;  %v9949_v7 = vld [vmem:[#allocation156_spill] sm:$0xff]  ;;  %9953 = vst [vmem:[#allocation193_spill] sm:$0xff] %v6798_v4 }
 0x353   : > { %9932 = vst [vmem:[#allocation185_spill] sm:$0xff] %v6758_v57  ;;  %9939 = vst [vmem:[#allocation190_spill] sm:$0xff] %v6772_v46  ;;  %v9943_v57 = vld [vmem:[#allocation229_spill] sm:$0xff]  ;;  %v9950_v46 = vsub.f32 %v9949_v7, %v5076_v40 }
 0x354   : > { %v6777_v16 = vmul.f32 1.442695, %v9941_v34  ;;  %v9944_v43 = vsub.f32 %v9943_v57, %v5084_v14  ;;  %9948 = vst [vmem:[#allocation192_spill] sm:$0xff] %v6790_v44  ;;  %v9952_v34 = vld [vmem:[#allocation24_spill] sm:$0xff]  ;;  %v9954_v57 = vld [vmem:[#allocation230_spill] sm:$0xff]  ;;  %v9960_v44 = vld [vmem:[#allocation231_spill] sm:$0xff] }
 0x355   : > { %v6795_v47 = vmul.f32 1.442695, %v9950_v46  ;;  %v9961_v46 = vsub.f32 %v9960_v44, %v5088_v9  ;;  %v9972_v44 = vld [vmem:[#allocation233_spill] sm:$0xff] }
 0x356   : > { %9942 = vst [vmem:[#allocation189_spill] sm:$0xff] %v6777_v16  ;;  %v6782_v17 = vmul.f32 1.442695, %v9944_v43  ;;  %v2310_v16 = vadd.f32 %v9952_v34, %v2309_v37  ;;  %v9955_v43 = vsub.f32 %v9954_v57, %v5080_v35  ;;  %v6816_v37 = vpop.eup %3679  ;;  %3711 = vpow2.f32 %v6265_v29  ;;  %v9997_v29 = vld [vmem:[#allocation241_spill] sm:$0xff] }
 0x357   : > { %9951 = vst [vmem:[#allocation194_spill] sm:$0xff] %v6795_v47  ;;  %v6814_v7 = vmul.f32 1.442695, %v9961_v46  ;;  %9963 = vst [vmem:[#allocation197_spill] sm:$0xff] %v6816_v37  ;;  %v9965_v47 = vsub.f32 %v9964_v27, %v5076_v40  ;;  %v6830_v55 = vpop.eup %3681  ;;  %v9973_v46 = vsub.f32 %v9972_v44, %v5084_v14  ;;  %3713 = vpow2.f32 %v6270_v33 }
 0x358   : > { %9945 = vst [vmem:[#allocation191_spill] sm:$0xff] %v6782_v17  ;;  %v6804_v38 = vmul.f32 1.442695, %v9955_v43  ;;  %v9957_v17 = vld [vmem:[#allocation157_spill] sm:$0xff]  ;;  %v9967_v43 = vld [vmem:[#allocation234_spill] sm:$0xff]  ;;  %9971 = vst [vmem:[#allocation202_spill] sm:$0xff] %v6830_v55 }
 0x359   : > { %v9958_v42 = vsub.f32 %v9957_v17, %v5084_v14  ;;  %9962 = vst [vmem:[#allocation198_spill] sm:$0xff] %v6814_v7  ;;  %v6822_v57 = vmul.f32 1.442695, %v9965_v47  ;;  %v6836_v22 = vmul.f32 1.442695, %v9973_v46  ;;  %v9975_v47 = vsub.f32 %v9546_v59, %v5088_v9  ;;  %v9983_v46 = vld [vmem:[#allocation237_spill] sm:$0xff] }
 0x35a   : > { %9956 = vst [vmem:[#allocation195_spill] sm:$0xff] %v6804_v38  ;;  %v9968_v38 = vsub.f32 %v9967_v43, %v5080_v35 }
 0x35b   : > { %v6809_v12 = vmul.f32 1.442695, %v9958_v42  ;;  %9966 = vst [vmem:[#allocation199_spill] sm:$0xff] %v6822_v57  ;;  %v9970_v42 = vld [vmem:[#allocation28_spill] sm:$0xff]  ;;  %9974 = vst [vmem:[#allocation201_spill] sm:$0xff] %v6836_v22  ;;  %v9984_v22 = vsub.f32 %v9983_v46, %v5084_v14 }
 0x35c   : > { %v6827_v17 = vmul.f32 1.442695, %v9968_v38  ;;  %v6841_v27 = vmul.f32 1.442695, %v9975_v47  ;;  %v9977_v57 = vld [vmem:[#allocation236_spill] sm:$0xff] }
 0x35d   : > { %9959 = vst [vmem:[#allocation196_spill] sm:$0xff] %v6809_v12  ;;  %v2311_v12 = vadd.f32 %v9970_v42, %v2310_v16  ;;  %v9978_v38 = vsub.f32 %v9977_v57, %v5076_v40  ;;  %v6848_v16 = vpop.eup %3683  ;;  %v6859_v59 = vmul.f32 1.442695, %v9984_v22  ;;  %v9986_v47 = vld [vmem:[#allocation32_spill] sm:$0xff]  ;;  %v9988_v57 = vsub.f32 %v9556_v24, %v5088_v9 }
 0x35e   : > { %9969 = vst [vmem:[#allocation200_spill] sm:$0xff] %v6827_v17  ;;  %9976 = vst [vmem:[#allocation203_spill] sm:$0xff] %v6841_v27  ;;  %v9981_v17 = vsub.f32 %v9980_v48, %v5080_v35  ;;  %v6862_v7 = vpop.eup %3685  ;;  %3715 = vpow2.f32 %v6277_v18  ;;  %v10015_v18 = vld [vmem:[#allocation40_spill] sm:$0xff] }
 0x35f   : > { %v6846_v43 = vmul.f32 1.442695, %v9978_v38  ;;  %9985 = vst [vmem:[#allocation205_spill] sm:$0xff] %v6859_v59  ;;  %v2312_v27 = vadd.f32 %v9986_v47, %v2311_v12  ;;  %9987 = vst [vmem:[#allocation207_spill] sm:$0xff] %v6862_v7  ;;  %v6868_v56 = vmul.f32 1.442695, %v9988_v57  ;;  %v6880_v12 = vpop.eup %3687  ;;  %v9998_v59 = vsub.f32 %v9997_v29, %v5084_v14 }
 0x360   : > { %v6854_v44 = vmul.f32 1.442695, %v9981_v17  ;;  %v9990_v38 = vld [vmem:[#allocation240_spill] sm:$0xff]  ;;  %9996 = vst [vmem:[#allocation211_spill] sm:$0xff] %v6880_v12  ;;  %v10000_v57 = vld [vmem:[#allocation243_spill] sm:$0xff]  ;;  %3717 = vpow2.f32 %v6282_v62  ;;  %v10019_v12 = vld [vmem:[#allocation13_spill] sm:$0xff] }
 0x361   : > { %9979 = vst [vmem:[#allocation204_spill] sm:$0xff] %v6846_v43  ;;  %9989 = vst [vmem:[#allocation208_spill] sm:$0xff] %v6868_v56  ;;  %v9991_v17 = vsub.f32 %v9990_v38, %v5076_v40  ;;  %v6886_v24 = vmul.f32 1.442695, %v9998_v59  ;;  %v10001_v56 = vsub.f32 %v10000_v57, %v5088_v9  ;;  %v6894_v43 = vpop.eup %3689  ;;  %3719 = vpow2.f32 %v6287_v2  ;;  %v10026_v62 = vld [vmem:[#allocation123_spill] sm:$0xff] }
 0x362   : > { %9982 = vst [vmem:[#allocation206_spill] sm:$0xff] %v6854_v44  ;;  %v9993_v44 = vld [vmem:[#allocation242_spill] sm:$0xff]  ;;  %10004 = vst [vmem:[#allocation213_spill] sm:$0xff] %v6894_v43  ;;  %3721 = vpow2.f32 %v6294_v8 }
 0x363   : > { %v6873_v48 = vmul.f32 1.442695, %v9991_v17  ;;  %v9994_v22 = vsub.f32 %v9993_v44, %v5080_v35  ;;  %9999 = vst [vmem:[#allocation212_spill] sm:$0xff] %v6886_v24  ;;  %v6891_v38 = vmul.f32 1.442695, %v10001_v56  ;;  %v10003_v17 = vld [vmem:[#allocation36_spill] sm:$0xff] }
 0x364   : > { %v10005_v44 = vld [vmem:[#allocation244_spill] sm:$0xff]  ;;  %v10011_v24 = vld [vmem:[#allocation245_spill] sm:$0xff]  ;;  %v10016_v43 = vld [vmem:[#allocation10_spill] sm:$0xff] }
 0x365   : > { %9992 = vst [vmem:[#allocation210_spill] sm:$0xff] %v6873_v48  ;;  %v6878_v46 = vmul.f32 1.442695, %v9994_v22  ;;  %10002 = vst [vmem:[#allocation214_spill] sm:$0xff] %v6891_v38  ;;  %v2313_v48 = vadd.f32 %v10003_v17, %v2312_v27  ;;  %v10006_v22 = vsub.f32 %v10005_v44, %v5076_v40  ;;  %v10012_v56 = vsub.f32 %v10011_v24, %v5084_v14  ;;  %v6912_v27 = vpop.eup %3691  ;;  %v10017_v44 = vld [vmem:[#allocation14_spill] sm:$0xff]  ;;  %v10022_v24 = vld [vmem:[#allocation15_spill] sm:$0xff] }
 0x366   : > { %10014 = vst [vmem:[#allocation8_spill] sm:$0xff] %v6912_v27  ;;  %v2683_v27 = vpack.c.bf16 %v10026_v62, %v10025_v39  ;;  %3723 = vpow2.f32 %v6299_v31  ;;  %v10037_v8 = vld [vmem:[#allocation110_spill] sm:$0xff]  ;;  %v10041_v31 = vld [vmem:[#allocation21_spill] sm:$0xff] }
 0x367   : > { %9995 = vst [vmem:[#allocation209_spill] sm:$0xff] %v6878_v46  ;;  %v6900_v33 = vmul.f32 1.442695, %v10006_v22  ;;  %v10008_v46 = vld [vmem:[#allocation246_spill] sm:$0xff]  ;;  %v6910_v57 = vmul.f32 1.442695, %v10012_v56  ;;  %v2314_v38 = vadd.f32 %v10015_v18, %v2313_v48  ;;  %v2376_v22 = vadd.f32 %v10017_v44, %v10016_v43 }
 0x368   : > { %v10009_v59 = vsub.f32 %v10008_v46, %v5080_v35  ;;  %v6920_v46 = vpop.eup %3693  ;;  %3725 = vpow2.f32 %v6304_v60  ;;  %v10047_v60 = vld [vmem:[#allocation99_spill] sm:$0xff] }
 0x369   : > { %10007 = vst [vmem:[#allocation215_spill] sm:$0xff] %v6900_v33  ;;  %10013 = vst [vmem:[#allocation218_spill] sm:$0xff] %v6910_v57  ;;  %v10018_v33 = vld [vmem:[#allocation9_spill] sm:$0xff]  ;;  %v10023_v57 = vld [vmem:[#allocation118_spill] sm:$0xff]  ;;  %v6929_v48 = vpop.eup %3695  ;;  %v2315_v6 = vadd.f32 %v10028_v36, %v2314_v38  ;;  %3727 = vpow2.f32 %v6312_v5 }
 0x36a   : > { %v6905_v29 = vmul.f32 1.442695, %v10009_v59  ;;  %v2445_v55 = vadd.f32 %v10019_v12, %v10018_v33  ;;  %10020 = vst [vmem:[#allocation12_spill] sm:$0xff] %v6920_v46  ;;  %v10021_v59 = vld [vmem:[#allocation11_spill] sm:$0xff]  ;;  %10027 = vst [vmem:[#allocation217_spill] sm:$0xff] %v6929_v48  ;;  %v10029_v12 = vld [vmem:[#allocation18_spill] sm:$0xff]  ;;  %v6935_v2 = vpop.eup %3697  ;;  %3729 = vpow2.f32 %v6317_v23 }
 0x36b   : > { %v2514_v56 = vadd.f32 %v10022_v24, %v10021_v59  ;;  %v2377_v33 = vadd.f32 %v10029_v12, %v2376_v22  ;;  %v10030_v46 = vld [vmem:[#allocation17_spill] sm:$0xff]  ;;  %10031 = vst [vmem:[#allocation219_spill] sm:$0xff] %v6935_v2  ;;  %v10032_v24 = vld [vmem:[#allocation247_spill] sm:$0xff]  ;;  %v10036_v48 = vld [vmem:[#allocation102_spill] sm:$0xff]  ;;  %v6946_v38 = vpop.eup %3699  ;;  %3731 = vpow2.f32 %v6322_v53 }
 0x36c   : > { %10010 = vst [vmem:[#allocation216_spill] sm:$0xff] %v6905_v29  ;;  %v10024_v29 = vld [vmem:[#allocation126_spill] sm:$0xff]  ;;  %v2446_v3 = vadd.f32 %v10030_v46, %v2445_v55  ;;  %v10033_v59 = vsub.f32 %v10032_v24, %v5088_v9  ;;  %v2680_v25 = vpack.c.bf16 %v10037_v8, %v10036_v48  ;;  %10038 = vst [vmem:[#allocation221_spill] sm:$0xff] %v6946_v38  ;;  %v10039_v55 = vld [vmem:[#allocation48_spill] sm:$0xff]  ;;  %v6952_v24 = vpop.eup %3701  ;;  %3733 = vpow2.f32 %v6330_v41 }
 0x36d   : > { %v2684_v37 = vpack.c.bf16 %v10024_v29, %v10023_v57  ;;  %v2515_v63 = vadd.f32 %v10035_v13, %v2514_v56  ;;  %v2316_v22 = vadd.f32 %v10039_v55, %v2315_v6  ;;  %v10040_v46 = vld [vmem:[#allocation22_spill] sm:$0xff]  ;;  %10042 = vst [vmem:[#allocation16_spill] sm:$0xff] %v6952_v24  ;;  %v10048_v38 = vld [vmem:[#allocation107_spill] sm:$0xff]  ;;  %v6963_v0 = vpop.eup %3703  ;;  %v10052_v5 = vld [vmem:[#allocation25_spill] sm:$0xff]  ;;  %3735 = vpow2.f32 %v6335_v19 }
 0x36e   : > { %v6941_v26 = vmul.f32 1.442695, %v10033_v59  ;;  %v2378_v2 = vadd.f32 %v10040_v46, %v2377_v33  ;;  %v2447_v45 = vadd.f32 %v10041_v31, %v2446_v3  ;;  %v10043_v59 = vld [vmem:[#allocation248_spill] sm:$0xff]  ;;  %v2679_v6 = vpack.c.bf16 %v10048_v38, %v10047_v60  ;;  %10049 = vst [vmem:[#allocation224_spill] sm:$0xff] %v6963_v0  ;;  %v10050_v3 = vld [vmem:[#allocation91_spill] sm:$0xff]  ;;  %v6969_v50 = vpop.eup %3705  ;;  %v10059_v0 = vld [vmem:[#allocation94_spill] sm:$0xff] }
 0x36f   : > { %2803 = vmatprep.subr.bf16.mxu0 %v2684_v37  ;;  %v10044_v37 = vsub.f32 %v10043_v59, %v5076_v40  ;;  %v2317_v33 = vadd.f32 %v10050_v3, %v2316_v22  ;;  %10053 = vst [vmem:[#allocation226_spill] sm:$0xff] %v6969_v50  ;;  %v10054_v59 = vld [vmem:[#allocation250_spill] sm:$0xff]  ;;  %v6980_v30 = vpop.eup %3707  ;;  %v2675_v41 = vpack.c.bf16 %v10050_v3, %v10039_v55  ;;  %3737 = vpow2.f32 %v6340_v28  ;;  %v10069_v19 = vld [vmem:[#allocation33_spill] sm:$0xff]  ;;  %v10074_v55 = vld [vmem:[#allocation35_spill] sm:$0xff] }
 0x370   : > { %10034 = vst [vmem:[#allocation220_spill] sm:$0xff] %v6941_v26  ;;  %2804 = vmatpush1.bf16.msra.mxu0 %v2683_v27  ;;  %v10046_v26 = vld [vmem:[#allocation23_spill] sm:$0xff]  ;;  %v10051_v27 = vld [vmem:[#allocation26_spill] sm:$0xff]  ;;  %v2448_v24 = vadd.f32 %v10052_v5, %v2447_v45  ;;  %v10061_v5 = vld [vmem:[#allocation29_spill] sm:$0xff]  ;;  %v6986_v50 = vpop.eup %3709  ;;  %3739 = vpow2.f32 %v6348_v15 }
 0x371   : > { %v6958_v56 = vmul.f32 1.442695, %v10044_v37  ;;  %v2516_v13 = vadd.f32 %v10046_v26, %v2515_v63  ;;  %2805 = vmatprep.subr.bf16.mxu0 %v2680_v25  ;;  %v2379_v31 = vadd.f32 %v10051_v27, %v2378_v2  ;;  %v10055_v25 = vsub.f32 %v10054_v59, %v5080_v35  ;;  %v10057_v37 = vld [vmem:[#allocation27_spill] sm:$0xff]  ;;  %v10058_v26 = vld [vmem:[#allocation80_spill] sm:$0xff]  ;;  %v10060_v2 = vld [vmem:[#allocation30_spill] sm:$0xff]  ;;  %10062 = vst [vmem:[#allocation20_spill] sm:$0xff] %v6986_v50 }
 0x372   : > { %v2676_v23 = vpack.c.bf16 %v10059_v0, %v10058_v26  ;;  %v2318_v45 = vadd.f32 %v10047_v60, %v2317_v33  ;;  %v2449_v53 = vadd.f32 %v10061_v5, %v2448_v24  ;;  %v10063_v59 = vld [vmem:[#allocation249_spill] sm:$0xff]  ;;  %v6997_v60 = vpop.eup %3711  ;;  %v10068_v24 = vld [vmem:[#allocation34_spill] sm:$0xff] }
 0x373   : > { %10045 = vst [vmem:[#allocation223_spill] sm:$0xff] %v6958_v56  ;;  %v6975_v63 = vmul.f32 1.442695, %v10055_v25  ;;  %v2517_v56 = vadd.f32 %v10057_v37, %v2516_v13  ;;  %v2380_v22 = vadd.f32 %v10060_v2, %v2379_v31  ;;  %v10064_v13 = vsub.f32 %v10063_v59, %v5084_v14  ;;  %10067 = vst [vmem:[#allocation152_spill] sm:$0xff] %v6997_v60  ;;  %v7003_v5 = vpop.eup %3713  ;;  %v10071_v59 = vld [vmem:[#allocation251_spill] sm:$0xff] }
 0x374   : > { %2806 = vmatpush1.bf16.msra.mxu0 %v2679_v6  ;;  %v2319_v31 = vadd.f32 %v10048_v38, %v2318_v45  ;;  %v2450_v33 = vadd.f32 %v10069_v19, %v2449_v53  ;;  %10070 = vst [vmem:[#allocation229_spill] sm:$0xff] %v7003_v5  ;;  %v10077_v38 = vld [vmem:[#allocation65_spill] sm:$0xff]  ;;  %v3434_v50 = vld [vmem:[%s4156_s29 + $0x1c] ss:$16 sps:$4 sm:$0xff]  }
 0x375   : > { %10056 = vst [vmem:[#allocation225_spill] sm:$0xff] %v6975_v63  ;;  %v6992_v25 = vmul.f32 1.442695, %v10064_v13  ;;  %v10066_v63 = vld [vmem:[#allocation31_spill] sm:$0xff]  ;;  %2807 = vmatprep.subr.bf16.mxu0 %v2676_v23  ;;  %v2381_v6 = vadd.f32 %v10068_v24, %v2380_v22  ;;  %v10075_v13 = vld [vmem:[#allocation42_spill] sm:$0xff]  ;;  %3741 = vpow2.f32 %v10077_v38  ;;  %v10079_v19 = vld [vmem:[#allocation37_spill] sm:$0xff]  ;;  %2878 = vmatprep.mubr.bf16.mxu1 %v3434_v50 }
 0x376   : > { %v2518_v37 = vadd.f32 %v10066_v63, %v2517_v56  ;;  %v10072_v56 = vsub.f32 %v10071_v59, %v5088_v9  ;;  %v7014_v63 = vpop.eup %3715  ;;  %v2320_v45 = vadd.f32 %v10025_v39, %v2319_v31  ;;  %v10078_v22 = vld [vmem:[#allocation38_spill] sm:$0xff]  ;;  %v2451_v15 = vadd.f32 %v10079_v19, %v2450_v33  ;;  %v10081_v59 = vld [vmem:[#allocation252_spill] sm:$0xff]  ;;  %v10187_v50 = vld [vmem:[#allocation55_spill] sm:$0xff] }
 0x377   : > { %10065 = vst [vmem:[#allocation228_spill] sm:$0xff] %v6992_v25  ;;  %v10076_v25 = vld [vmem:[#allocation46_spill] sm:$0xff]  ;;  %v2382_v53 = vadd.f32 %v10078_v22, %v2381_v6  ;;  %v7020_v5 = vpop.eup %3717  ;;  %3743 = vpow2.f32 %v6358_v52  ;;  %v2671_v39 = vpack.c.bf16 %v10028_v36, %v10015_v18  ;;  %v10086_v6 = vld [vmem:[#allocation68_spill] sm:$0xff]  ;;  %v10087_v52 = vld [vmem:[#allocation41_spill] sm:$0xff] }
 0x378   : > { %v7009_v23 = vmul.f32 1.442695, %v10072_v56  ;;  %v2519_v3 = vadd.f32 %v10074_v55, %v2518_v37  ;;  %v2672_v28 = vpack.c.bf16 %v10076_v25, %v10075_v13  ;;  %2808 = vmatpush1.bf16.msra.mxu0 %v2675_v41  ;;  %10080 = vst [vmem:[#allocation156_spill] sm:$0xff] %v7020_v5  ;;  %v10082_v37 = vsub.f32 %v10081_v59, %v5076_v40  ;;  %v7031_v31 = vpop.eup %3719  ;;  %v10089_v59 = vld [vmem:[#allocation70_spill] sm:$0xff]  ;;  %v10093_v36 = vld [vmem:[#allocation43_spill] sm:$0xff]  ;;  %v10167_v55 = vld [vmem:[#allocation69_spill] sm:$0xff] }
 0x379   : > { %10085 = vst [vmem:[#allocation230_spill] sm:$0xff] %v7031_v31  ;;  %3745 = vpow2.f32 %v10086_v6  ;;  %v2321_v41 = vadd.f32 %v10026_v62, %v2320_v45  ;;  %v2383_v33 = vadd.f32 %v10075_v13, %v2382_v53  ;;  %v2452_v38 = vadd.f32 %v10087_v52, %v2451_v15  ;;  %v7037_v19 = vpop.eup %3721  ;;  %v10094_v62 = vld [vmem:[#allocation131_spill] sm:$0xff]  ;;  %v10095_v53 = vld [vmem:[#allocation45_spill] sm:$0xff]  ;;  %v10155_v31 = vld [vmem:[#allocation104_spill] sm:$0xff] }
 0x37a   : > { %10073 = vst [vmem:[#allocation153_spill] sm:$0xff] %v7009_v23  ;;  %v7026_v56 = vmul.f32 1.442695, %v10082_v37  ;;  %v10084_v23 = vld [vmem:[#allocation39_spill] sm:$0xff]  ;;  %2809 = vmatprep.subr.bf16.mxu0 %v2672_v28  ;;  %10088 = vst [vmem:[#allocation157_spill] sm:$0xff] %v7037_v19  ;;  %3747 = vpow2.f32 %v10089_v59  ;;  %v10090_v37 = vld [vmem:[#allocation254_spill] sm:$0xff]  ;;  %v2668_v6 = vpack.c.bf16 %v10078_v22, %v10068_v24 }
 0x37b   : > { %v2520_v60 = vadd.f32 %v10084_v23, %v2519_v3  ;;  %v10091_v3 = vsub.f32 %v10090_v37, %v5080_v35  ;;  %3749 = vpow2.f32 %v6376_v1  ;;  %v2322_v13 = vadd.f32 %v10094_v62, %v2321_v41  ;;  %v10097_v37 = vld [vmem:[#allocation71_spill] sm:$0xff] }
 0x37c   : > { %10083 = vst [vmem:[#allocation24_spill] sm:$0xff] %v7026_v56  ;;  %v7048_v56 = vpop.eup %3723  ;;  %v2384_v45 = vadd.f32 %v10076_v25, %v2383_v33  ;;  %v2453_v15 = vadd.f32 %v10095_v53, %v2452_v38  ;;  %2810 = vmatpush1.bf16.msra.mxu0 %v2671_v39  ;;  %3751 = vpow2.f32 %v10097_v37  ;;  %v10101_v24 = vld [vmem:[#allocation47_spill] sm:$0xff]  ;;  %v2667_v1 = vpack.c.bf16 %v10003_v17, %v9986_v47  ;;  %v10103_v25 = vld [vmem:[#allocation72_spill] sm:$0xff]  ;;  %v10110_v47 = vld [vmem:[#allocation90_spill] sm:$0xff] }
 0x37d   : > { %v7043_v28 = vmul.f32 1.442695, %v10091_v3  ;;  %v2521_v18 = vadd.f32 %v10093_v36, %v2520_v60  ;;  %v7054_v59 = vpop.eup %3725  ;;  %v10098_v3 = vld [vmem:[#allocation253_spill] sm:$0xff]  ;;  %2811 = vmatprep.subr.bf16.mxu0 %v2668_v6  ;;  %3753 = vpow2.f32 %v10103_v25  ;;  %v10104_v39 = vld [vmem:[#allocation139_spill] sm:$0xff] }
 0x37e   : > { %10096 = vst [vmem:[#allocation232_spill] sm:$0xff] %v7054_v59  ;;  %v10099_v60 = vsub.f32 %v10098_v3, %v5084_v14  ;;  %v7065_v41 = vpop.eup %3727  ;;  %v2323_v33 = vadd.f32 %v10104_v39, %v2322_v13  ;;  %v2385_v38 = vadd.f32 %v10058_v26, %v2384_v45  ;;  %v10105_v37 = vld [vmem:[#allocation83_spill] sm:$0xff]  ;;  %3755 = vpow2.f32 %v6394_v58  ;;  %v10112_v13 = vld [vmem:[#allocation73_spill] sm:$0xff]  ;;  %v10154_v59 = vld [vmem:[#allocation138_spill] sm:$0xff] }
 0x37f   : > { %10092 = vst [vmem:[#allocation231_spill] sm:$0xff] %v7043_v28  ;;  %v2522_v22 = vadd.f32 %v10101_v24, %v2521_v18  ;;  %10102 = vst [vmem:[#allocation28_spill] sm:$0xff] %v7065_v41  ;;  %v2454_v35 = vadd.f32 %v10105_v37, %v2453_v15  ;;  %v7071_v40 = vpop.eup %3729  ;;  %v10107_v3 = vld [vmem:[#allocation255_spill] sm:$0xff]  ;;  %3757 = vpow2.f32 %v10112_v13  ;;  %v10143_v37 = vld [vmem:[#allocation182_spill] sm:$0xff] }
 0x380   : > { %v7060_v28 = vmul.f32 1.442695, %v10099_v60  ;;  %10106 = vst [vmem:[#allocation233_spill] sm:$0xff] %v7071_v40  ;;  %v10108_v18 = vsub.f32 %v10107_v3, %v5088_v9  ;;  %v2664_v60 = vpack.c.bf16 %v10060_v2, %v10051_v27  ;;  %v7082_v25 = vpop.eup %3731  ;;  %v10113_v26 = vld [vmem:[#allocation147_spill] sm:$0xff]  ;;  %v2386_v15 = vadd.f32 %v10059_v0, %v2385_v38  ;;  %2812 = vmatpush1.bf16.msra.mxu0 %v2667_v1  ;;  %v10119_v0 = vld [vmem:[#allocation154_spill] sm:$0xff] }
 0x381   : > { %v2523_v17 = vadd.f32 %v10110_v47, %v2522_v22  ;;  %10111 = vst [vmem:[#allocation238_spill] sm:$0xff] %v7082_v25  ;;  %v2324_v45 = vadd.f32 %v10113_v26, %v2323_v33  ;;  %v10114_v14 = vld [vmem:[#allocation95_spill] sm:$0xff]  ;;  %v2663_v27 = vpack.c.bf16 %v9970_v42, %v9952_v34  ;;  %v2660_v2 = vpack.c.bf16 %v10040_v46, %v10029_v12  ;;  %v10126_v46 = vld [vmem:[#allocation49_spill] sm:$0xff] }
 0x382   : > { %10100 = vst [vmem:[#allocation234_spill] sm:$0xff] %v7060_v28  ;;  %v7077_v6 = vmul.f32 1.442695, %v10108_v18  ;;  %v2455_v58 = vadd.f32 %v10114_v14, %v2454_v35  ;;  %v7088_v28 = vpop.eup %3733  ;;  %v10116_v3 = vld [vmem:[#allocation75_spill] sm:$0xff]  ;;  %v10117_v18 = vld [vmem:[#allocation98_spill] sm:$0xff]  ;;  %2813 = vmatprep.subr.bf16.mxu0 %v2664_v60  ;;  %v2387_v1 = vadd.f32 %v10036_v48, %v2386_v15  ;;  %v2659_v42 = vpack.c.bf16 %v9935_v20, %v9918_v11  ;;  %v10127_v15 = vld [vmem:[#allocation109_spill] sm:$0xff] }
 0x383   : > { %10115 = vst [vmem:[#allocation237_spill] sm:$0xff] %v7088_v28  ;;  %3759 = vpow2.f32 %v10116_v3  ;;  %v2524_v22 = vadd.f32 %v10117_v18, %v2523_v17  ;;  %v7096_v13 = vpop.eup %3735  ;;  %v2325_v35 = vadd.f32 %v10119_v0, %v2324_v45  ;;  %v10120_v33 = vld [vmem:[#allocation103_spill] sm:$0xff]  ;;  %v10122_v17 = vld [vmem:[#allocation78_spill] sm:$0xff]  ;;  %v2656_v11 = vpack.c.bf16 %v10017_v44, %v10016_v43  ;;  %v10138_v44 = vld [vmem:[#allocation57_spill] sm:$0xff] }
 0x384   : > { %10109 = vst [vmem:[#allocation236_spill] sm:$0xff] %v7077_v6  ;;  %10118 = vst [vmem:[#allocation32_spill] sm:$0xff] %v7096_v13  ;;  %3761 = vpow2.f32 %v6412_v51  ;;  %v2456_v38 = vadd.f32 %v10120_v33, %v2455_v58  ;;  %v7102_v3 = vpop.eup %3737  ;;  %v10123_v60 = vld [vmem:[#allocation106_spill] sm:$0xff]  ;;  %v2388_v45 = vadd.f32 %v10037_v8, %v2387_v1  ;;  %2814 = vmatpush1.bf16.msra.mxu0 %v2663_v27  ;;  %v10132_v8 = vld [vmem:[#allocation53_spill] sm:$0xff] }
 0x385   : > { %10121 = vst [vmem:[#allocation240_spill] sm:$0xff] %v7102_v3  ;;  %3763 = vpow2.f32 %v10122_v17  ;;  %v2525_v9 = vadd.f32 %v10123_v60, %v2524_v22  ;;  %v7110_v12 = vpop.eup %3739  ;;  %v10125_v51 = vld [vmem:[#allocation222_spill] sm:$0xff]  ;;  %v2326_v48 = vadd.f32 %v10126_v46, %v2325_v35  ;;  %2815 = vmatprep.subr.bf16.mxu0 %v2660_v2  ;;  %v2655_v20 = vpack.c.bf16 %v9901_v21, %v9900_v54  ;;  %v10131_v35 = vld [vmem:[#allocation79_spill] sm:$0xff]  ;;  %v10145_v28 = vld [vmem:[#allocation177_spill] sm:$0xff] }
 0x386   : > { %10124 = vst [vmem:[#allocation242_spill] sm:$0xff] %v7110_v12  ;;  %3765 = vpow2.f32 %v10125_v51  ;;  %v2457_v58 = vadd.f32 %v10127_v15, %v2456_v38  ;;  %v7116_v17 = vpop.eup %3741  ;;  %v10129_v22 = vld [vmem:[#allocation114_spill] sm:$0xff]  ;;  %v2389_v27 = vadd.f32 %v10023_v57, %v2388_v45  ;;  %v10133_v38 = vld [vmem:[#allocation119_spill] sm:$0xff]  ;;  %v2716_v43 = vpack.c.bf16 %v6862_v7, %v6798_v4  ;;  %v10156_v3 = vld [vmem:[#allocation136_spill] sm:$0xff] }
 0x387   : > { %10128 = vst [vmem:[#allocation241_spill] sm:$0xff] %v7116_v17  ;;  %3767 = vpow2.f32 %v6430_v32  ;;  %v2526_v34 = vadd.f32 %v10129_v22, %v2525_v9  ;;  %v7124_v51 = vpop.eup %3743  ;;  %v2327_v1 = vadd.f32 %v10132_v8, %v2326_v48  ;;  %v10135_v9 = vld [vmem:[#allocation227_spill] sm:$0xff]  ;;  %v10136_v2 = vld [vmem:[#allocation122_spill] sm:$0xff]  ;;  %v2715_v21 = vpack.c.bf16 %v6848_v16, %v6784_v61  ;;  %v10173_v12 = vld [vmem:[#allocation149_spill] sm:$0xff] }
 0x388   : > { %10130 = vst [vmem:[#allocation243_spill] sm:$0xff] %v7124_v51  ;;  %3769 = vpow2.f32 %v10131_v35  ;;  %v2458_v6 = vadd.f32 %v10133_v38, %v2457_v58  ;;  %v7130_v32 = vpop.eup %3745  ;;  %v2390_v48 = vadd.f32 %v10024_v29, %v2389_v27  ;;  %v10139_v45 = vld [vmem:[#allocation127_spill] sm:$0xff]  ;;  %2816 = vmatpush1.bf16.msra.mxu0 %v2659_v42  ;;  %v2712_v13 = vpack.c.bf16 %v10143_v37, %v6669_v49  ;;  %v10147_v29 = vld [vmem:[#allocation84_spill] sm:$0xff]  ;;  %v10149_v27 = vld [vmem:[#allocation134_spill] sm:$0xff] }
 0x389   : > { %10134 = vst [vmem:[#allocation36_spill] sm:$0xff] %v7130_v32  ;;  %3771 = vpow2.f32 %v10135_v9  ;;  %v2527_v17 = vadd.f32 %v10136_v2, %v2526_v34  ;;  %v7138_v54 = vpop.eup %3747  ;;  %v2328_v57 = vadd.f32 %v10138_v44, %v2327_v1  ;;  %v10141_v34 = vld [vmem:[#allocation81_spill] sm:$0xff]  ;;  %v10142_v9 = vld [vmem:[#allocation130_spill] sm:$0xff]  ;;  %2817 = vmatprep.subr.bf16.mxu0 %v2656_v11  ;;  %v10150_v40 = vld [vmem:[#allocation135_spill] sm:$0xff]  ;;  %v2708_v5 = vpack.c.bf16 %v10156_v3, %v10155_v31 }
 0x38a   : > { %10137 = vst [vmem:[#allocation244_spill] sm:$0xff] %v7138_v54  ;;  %3773 = vpow2.f32 %v6448_v10  ;;  %v2459_v58 = vadd.f32 %v10139_v45, %v2458_v6  ;;  %v7144_v35 = vpop.eup %3749  ;;  %v10144_v10 = vld [vmem:[#allocation164_spill] sm:$0xff]  ;;  %v10148_v6 = vld [vmem:[#allocation61_spill] sm:$0xff]  ;;  %v10153_v11 = vld [vmem:[#allocation86_spill] sm:$0xff] }
 0x38b   : > { %10140 = vst [vmem:[#allocation246_spill] sm:$0xff] %v7144_v35  ;;  %3775 = vpow2.f32 %v10141_v34  ;;  %v2528_v14 = vadd.f32 %v10142_v9, %v2527_v17  ;;  %v7152_v1 = vpop.eup %3751  ;;  %v2329_v42 = vadd.f32 %v10148_v6, %v2328_v57  ;;  %v2391_v35 = vadd.f32 %v10149_v27, %v2390_v48  ;;  %v7159_v41 = vld [vmem:[%s4156_s29 + $0x14] ss:$16 sps:$4 sm:$0xff]   ;;  %v10158_v51 = vld [vmem:[#allocation128_spill] sm:$0xff]  ;;  %v10162_v32 = vld [vmem:[#allocation142_spill] sm:$0xff] }
 0x38c   : > { %10146 = vst [vmem:[#allocation245_spill] sm:$0xff] %v7152_v1  ;;  %3777 = vpow2.f32 %v10147_v29  ;;  %v2460_v34 = vadd.f32 %v10150_v40, %v2459_v58  ;;  %10151 = vst [vmem:[#allocation40_spill] sm:$0xff] %v7159_v41  ;;  %v7161_v17 = vpop.eup %3753  ;;  %v10157_v1 = vld [vmem:[#allocation96_spill] sm:$0xff]  ;;  %v10160_v48 = vld [vmem:[#allocation235_spill] sm:$0xff]  ;;  %2818 = vmatpush1.bf16.msra.mxu0 %v2655_v20  ;;  %2835 = vmatprep.mubr.bf16.mxu0 %v7159_v41 }
 0x38d   : > { %10152 = vst [vmem:[#allocation10_spill] sm:$0xff] %v7161_v17  ;;  %3779 = vpow2.f32 %v10153_v11  ;;  %v2529_v19 = vadd.f32 %v10154_v59, %v2528_v14  ;;  %v7170_v57 = vpop.eup %3755  ;;  %v10161_v58 = vld [vmem:[#allocation67_spill] sm:$0xff]  ;;  %v2392_v54 = vadd.f32 %v10162_v32, %v2391_v35  ;;  %v10166_v59 = vld [vmem:[#allocation146_spill] sm:$0xff]  ;;  %2819 = vmatprep.subr.bf16.mxu0 %v2716_v43 }
 0x38e   : > { %10159 = vst [vmem:[#allocation14_spill] sm:$0xff] %v7170_v57  ;;  %3781 = vpow2.f32 %v10160_v48  ;;  %v2330_v40 = vadd.f32 %v10161_v58, %v2329_v42  ;;  %v10163_v17 = vld [vmem:[#allocation143_spill] sm:$0xff]  ;;  %v7177_v14 = vpop.eup %3757  ;;  %v10168_v57 = vld [vmem:[#allocation82_spill] sm:$0xff]  ;;  %v10169_v48 = vld [vmem:[#allocation77_spill] sm:$0xff] }
 0x38f   : > { %v2461_v23 = vadd.f32 %v10163_v17, %v2460_v34  ;;  %10164 = vst [vmem:[#allocation118_spill] sm:$0xff] %v7177_v14  ;;  %v10165_v11 = vld [vmem:[#allocation87_spill] sm:$0xff]  ;;  %v2530_v29 = vadd.f32 %v10166_v59, %v2529_v19  ;;  %v10171_v34 = vld [vmem:[#allocation88_spill] sm:$0xff]  ;;  %v10172_v17 = vld [vmem:[#allocation150_spill] sm:$0xff] }
 0x390   : > { %3783 = vpow2.f32 %v10165_v11  ;;  %v7185_v35 = vpop.eup %3759  ;;  %v2331_v20 = vadd.f32 %v10169_v48, %v2330_v40  ;;  %v2393_v41 = vadd.f32 %v10172_v17, %v2392_v54  ;;  %v10175_v19 = vld [vmem:[#allocation89_spill] sm:$0xff]  ;;  %v10176_v43 = vld [vmem:[#allocation151_spill] sm:$0xff]  ;;  %2820 = vmatpush2.bf16.msra.mxu0 %v2715_v21 }
 0x391   : > { %10170 = vst [vmem:[#allocation126_spill] sm:$0xff] %v7185_v35  ;;  %3785 = vpow2.f32 %v10171_v34  ;;  %v2462_v11 = vadd.f32 %v10173_v12, %v2461_v23  ;;  %v7191_v53 = vpop.eup %3761  ;;  %v2531_v7 = vadd.f32 %v10176_v43, %v2530_v29  ;;  %v10177_v59 = vld [vmem:[#allocation59_spill] sm:$0xff]  ;;  %v10180_v34 = vld [vmem:[#allocation92_spill] sm:$0xff]  ;;  %v10182_v12 = vld [vmem:[#allocation158_spill] sm:$0xff]  ;;  %2821 = vmatprep.subr.bf16.mxu0 %v2712_v13 }
 0x392   : > { %10174 = vst [vmem:[#allocation115_spill] sm:$0xff] %v7191_v53  ;;  %3787 = vpow2.f32 %v10175_v19  ;;  %v10178_v52 = vld [vmem:[#allocation63_spill] sm:$0xff]  ;;  %v7199_v35 = vpop.eup %3763  ;;  %v2332_v40 = vadd.f32 %v10157_v1, %v2331_v20  ;;  %v10184_v29 = vld [vmem:[#allocation93_spill] sm:$0xff]  ;;  %v10185_v43 = vld [vmem:[#allocation50_spill] sm:$0xff] }
 0x393   : > { %10179 = vst [vmem:[#allocation123_spill] sm:$0xff] %v7199_v35  ;;  %3789 = vpow2.f32 %v10180_v34  ;;  %v10181_v54 = vld [vmem:[#allocation155_spill] sm:$0xff]  ;;  %v2463_v4 = vadd.f32 %v10182_v12, %v2462_v11  ;;  %v7205_v19 = vpop.eup %3765  ;;  %v2532_v42 = vadd.f32 %v10185_v43, %v2531_v7  ;;  %v10189_v20 = vld [vmem:[#allocation97_spill] sm:$0xff]  ;;  %v10190_v11 = vld [vmem:[#allocation52_spill] sm:$0xff] }
 0x394   : > { %v2394_v23 = vadd.f32 %v10181_v54, %v2393_v41  ;;  %10183 = vst [vmem:[#allocation44_spill] sm:$0xff] %v7205_v19  ;;  %3791 = vpow2.f32 %v10184_v29  ;;  %v10186_v25 = vld [vmem:[#allocation51_spill] sm:$0xff]  ;;  %v7213_v35 = vpop.eup %3767  ;;  %v2333_v41 = vadd.f32 %v10158_v51, %v2332_v40  ;;  %v10192_v7 = vld [vmem:[#allocation100_spill] sm:$0xff]  ;;  %v10193_v13 = vld [vmem:[#allocation54_spill] sm:$0xff] }
 0x395   : > { %10188 = vst [vmem:[#allocation18_spill] sm:$0xff] %v7213_v35  ;;  %3793 = vpow2.f32 %v10189_v20  ;;  %v2464_v12 = vadd.f32 %v10190_v11, %v2463_v4  ;;  %v7219_v29 = vpop.eup %3769  ;;  %v2533_v43 = vadd.f32 %v10193_v13, %v2532_v42  ;;  %v10194_v20 = vld [vmem:[#allocation101_spill] sm:$0xff]  ;;  %v10198_v13 = vld [vmem:[#allocation58_spill] sm:$0xff] }
 0x396   : > { %v2395_v21 = vadd.f32 %v10186_v25, %v2394_v23  ;;  %10191 = vst [vmem:[#allocation247_spill] sm:$0xff] %v7219_v29  ;;  %3795 = vpow2.f32 %v10192_v7  ;;  %v7227_v35 = vpop.eup %3771  ;;  %v2334_v40 = vadd.f32 %v10144_v10, %v2333_v41  ;;  %v10195_v23 = vld [vmem:[#allocation56_spill] sm:$0xff]  ;;  %v10196_v7 = vpack.c.bf16 %v10145_v28, %v10144_v10  ;;  %v10197_v53 = vld [vmem:[#allocation105_spill] sm:$0xff] }
 0x397   : > { %3797 = vpow2.f32 %v10194_v20  ;;  %v2465_v11 = vadd.f32 %v10195_v23, %v2464_v12  ;;  %v7236_v42 = vpop.eup %3773  ;;  %v2534_v34 = vadd.f32 %v10198_v13, %v2533_v43  ;;  %v10200_v12 = vld [vmem:[#allocation108_spill] sm:$0xff]  ;;  %v10203_v43 = vld [vmem:[#allocation111_spill] sm:$0xff] }
 0x398   : > { %v2396_v4 = vadd.f32 %v10187_v50, %v2395_v21  ;;  %2822 = vmatpush2.bf16.msra.mxu0 %v10196_v7  ;;  %3799 = vpow2.f32 %v10197_v53  ;;  %v7244_v21 = vpop.eup %3775  ;;  %v2335_v10 = vadd.f32 %v10145_v28, %v2334_v40  ;;  %v10201_v23 = vld [vmem:[#allocation60_spill] sm:$0xff] }
 0x399   : > { %2823 = vmatprep.subr.bf16.mxu0 %v2708_v5  ;;  %10199 = vst [vmem:[#allocation102_spill] sm:$0xff] %v7244_v21  ;;  %3801 = vpow2.f32 %v10200_v12  ;;  %v2466_v14 = vadd.f32 %v10201_v23, %v2465_v11  ;;  %v7250_v53 = vpop.eup %3777  ;;  %v10204_v5 = vld [vmem:[#allocation62_spill] sm:$0xff]  ;;  %v10205_v12 = vld [vmem:[#allocation113_spill] sm:$0xff]  ;;  %v10206_v40 = vld [vmem:[#allocation64_spill] sm:$0xff] }
 0x39a   : > { %v2397_v7 = vadd.f32 %v10177_v59, %v2396_v4  ;;  %10202 = vst [vmem:[#allocation110_spill] sm:$0xff] %v7250_v53  ;;  %3803 = vpow2.f32 %v10203_v43  ;;  %v2535_v13 = vadd.f32 %v10204_v5, %v2534_v34  ;;  %v7258_v19 = vpop.eup %3779  ;;  %v2336_v28 = vadd.f32 %v6784_v61, %v2335_v10  ;;  %v10208_v20 = vld [vmem:[#allocation116_spill] sm:$0xff]  ;;  %v10209_v23 = vld [vmem:[#allocation66_spill] sm:$0xff] }
 0x39b   : > { %3805 = vpow2.f32 %v10205_v12  ;;  %v2467_v4 = vadd.f32 %v10206_v40, %v2466_v14  ;;  %v10207_v43 = vpack.c.bf16 %v10158_v51, %v10157_v1  ;;  %v7267_v34 = vpop.eup %3781  ;;  %v10210_v61 = vpack.c.bf16 %v10168_v57, %v10167_v55  ;;  %v10212_v51 = vld [vmem:[#allocation117_spill] sm:$0xff]  ;;  %v10216_v5 = vld [vmem:[#allocation76_spill] sm:$0xff] }
 0x39c   : > { %v2398_v11 = vadd.f32 %v10178_v52, %v2397_v7  ;;  %3807 = vpow2.f32 %v10208_v20  ;;  %v2536_v41 = vadd.f32 %v10209_v23, %v2535_v13  ;;  %v2337_v1 = vadd.f32 %v6848_v16, %v2336_v28  ;;  %v10213_v7 = vld [vmem:[#allocation74_spill] sm:$0xff]  ;;  %v10218_v16 = vld [vmem:[#allocation8_spill] sm:$0xff] }
 0x39d   : > { %2824 = vmatpush2.bf16.msra.mxu0 %v10207_v43  ;;  %v7278_v10 = vpop.eup %3783  ;;  %3809 = vpow2.f32 %v10212_v51  ;;  %v2468_v13 = vadd.f32 %v10213_v7, %v2467_v4  ;;  %v10215_v43 = vld [vmem:[#allocation121_spill] sm:$0xff]  ;;  %v10217_v51 = vld [vmem:[#allocation124_spill] sm:$0xff]  ;;  %v10223_v7 = vld [vmem:[#allocation239_spill] sm:$0xff] }
 0x39e   : > { %2825 = vmatprep.subr.bf16.mxu0 %v10210_v61  ;;  %10211 = vst [vmem:[#allocation48_spill] sm:$0xff] %v7278_v10  ;;  %v2399_v20 = vadd.f32 %v10167_v55, %v2398_v11  ;;  %v7284_v12 = vpop.eup %3785  ;;  %3811 = vpow2.f32 %v10215_v43  ;;  %v2537_v40 = vadd.f32 %v10216_v5, %v2536_v41  ;;  %v2338_v55 = vadd.f32 %v10218_v16, %v2337_v1  ;;  %v10219_v11 = vld [vmem:[#allocation85_spill] sm:$0xff]  ;;  %v10236_v1 = vld [vmem:[#allocation140_spill] sm:$0xff] }
 0x39f   : > { %10214 = vst [vmem:[#allocation22_spill] sm:$0xff] %v7284_v12  ;;  %v7292_v23 = vpop.eup %3787  ;;  %3813 = vpow2.f32 %v10217_v51  ;;  %v2469_v4 = vadd.f32 %v10219_v11, %v2468_v13  ;;  %v10220_v43 = vpack.c.bf16 %v10169_v48, %v10161_v58  ;;  %v10222_v61 = vld [vmem:[#allocation129_spill] sm:$0xff]  ;;  %v10224_v5 = vpack.c.bf16 %v10178_v52, %v10177_v59  ;;  %v10226_v58 = vld [vmem:[#allocation132_spill] sm:$0xff]  ;;  %v10283_v12 = vld [vmem:[#allocation219_spill] sm:$0xff] }
 0x3a0   : > { %v2400_v28 = vadd.f32 %v10168_v57, %v2399_v20  ;;  %v7301_v41 = vpop.eup %3789  ;;  %3815 = vpow2.f32 %v10222_v61  ;;  %v2538_v14 = vadd.f32 %v10223_v7, %v2537_v40  ;;  %v10227_v48 = vld [vmem:[#allocation221_spill] sm:$0xff]  ;;  %v10228_v51 = vld [vmem:[#allocation112_spill] sm:$0xff]  ;;  %v10264_v7 = vld [vmem:[#allocation18_spill] sm:$0xff] }
 0x3a1   : > { %2826 = vmatpush2.bf16.msra.mxu0 %v10220_v43  ;;  %10221 = vst [vmem:[#allocation248_spill] sm:$0xff] %v7301_v41  ;;  %v7312_v20 = vpop.eup %3791  ;;  %3817 = vpow2.f32 %v10226_v58  ;;  %v2339_v13 = vadd.f32 %v10227_v48, %v2338_v55  ;;  %v2470_v40 = vadd.f32 %v10228_v51, %v2469_v4  ;;  %v10230_v52 = vld [vmem:[#allocation133_spill] sm:$0xff]  ;;  %v10231_v59 = vld [vmem:[#allocation120_spill] sm:$0xff] }
 0x3a2   : > { %2827 = vmatprep.subr.bf16.mxu0 %v10224_v5  ;;  %10225 = vst [vmem:[#allocation99_spill] sm:$0xff] %v7312_v20  ;;  %v2401_v61 = vadd.f32 %v10155_v31, %v2400_v28  ;;  %v7318_v43 = vpop.eup %3793  ;;  %3819 = vpow2.f32 %v10230_v52  ;;  %v2539_v5 = vadd.f32 %v10231_v59, %v2538_v14  ;;  %v10232_v58 = vld [vmem:[#allocation137_spill] sm:$0xff]  ;;  %v10233_v28 = vld [vmem:[#allocation144_spill] sm:$0xff]  ;;  %v10234_v52 = vpack.c.bf16 %v10148_v6, %v10138_v44  ;;  %v10282_v20 = vld [vmem:[#allocation167_spill] sm:$0xff] }
 0x3a3   : > { %10229 = vst [vmem:[#allocation107_spill] sm:$0xff] %v7318_v43  ;;  %v7326_v11 = vpop.eup %3795  ;;  %3821 = vpow2.f32 %v10232_v58  ;;  %v2340_v31 = vadd.f32 %v6980_v30, %v2339_v13  ;;  %v2471_v4 = vadd.f32 %v10233_v28, %v2470_v40  ;;  %v10237_v51 = vld [vmem:[#allocation160_spill] sm:$0xff]  ;;  %v10238_v13 = vpack.c.bf16 %v10187_v50, %v10186_v25  ;;  %v10240_v44 = vld [vmem:[#allocation141_spill] sm:$0xff]  ;;  %v10241_v40 = vld [vmem:[#allocation171_spill] sm:$0xff] }
 0x3a4   : > { %v2402_v55 = vadd.f32 %v10156_v3, %v2401_v61  ;;  %v7335_v14 = vpop.eup %3797  ;;  %3823 = vpow2.f32 %v10236_v1  ;;  %v2540_v57 = vadd.f32 %v10237_v51, %v2539_v5  ;;  %v10244_v59 = vld [vmem:[#allocation173_spill] sm:$0xff]  ;;  %v10249_v50 = vld [vmem:[#allocation159_spill] sm:$0xff]  ;;  %v10250_v28 = vld [vmem:[#allocation188_spill] sm:$0xff]  ;;  %v10251_v51 = vpack.c.bf16 %v10181_v54, %v10172_v17 }
 0x3a5   : > { %2828 = vmatpush2.bf16.msra.mxu0 %v10234_v52  ;;  %10235 = vst [vmem:[#allocation91_spill] sm:$0xff] %v7335_v14  ;;  %v7346_v61 = vpop.eup %3799  ;;  %3825 = vpow2.f32 %v10240_v44  ;;  %v2341_v6 = vadd.f32 %v7014_v63, %v2340_v31  ;;  %v2472_v5 = vadd.f32 %v10241_v40, %v2471_v4  ;;  %v10243_v52 = vld [vmem:[#allocation145_spill] sm:$0xff]  ;;  %v10245_v44 = vld [vmem:[#allocation148_spill] sm:$0xff]  ;;  %v10260_v54 = vld [vmem:[#allocation202_spill] sm:$0xff] }
 0x3a6   : > { %2829 = vmatprep.subr.bf16.mxu0 %v10238_v13  ;;  %10239 = vst [vmem:[#allocation26_spill] sm:$0xff] %v7346_v61  ;;  %v2403_v1 = vadd.f32 %v6669_v49, %v2402_v55  ;;  %v7352_v58 = vpop.eup %3801  ;;  %3827 = vpow2.f32 %v10243_v52  ;;  %v2541_v25 = vadd.f32 %v10244_v59, %v2540_v57  ;;  %v10246_v55 = vld [vmem:[#allocation186_spill] sm:$0xff]  ;;  %v10247_v52 = vpack.c.bf16 %v10132_v8, %v10126_v46  ;;  %v10259_v17 = vld [vmem:[#allocation161_spill] sm:$0xff]  ;;  %v10279_v16 = vld [vmem:[#allocation12_spill] sm:$0xff] }
 0x3a7   : > { %10242 = vst [vmem:[#allocation250_spill] sm:$0xff] %v7352_v58  ;;  %v7360_v3 = vpop.eup %3803  ;;  %3829 = vpow2.f32 %v10245_v44  ;;  %v2342_v49 = vadd.f32 %v7048_v56, %v2341_v6  ;;  %v2473_v4 = vadd.f32 %v10246_v55, %v2472_v5  ;;  %v10254_v46 = vld [vmem:[#allocation162_spill] sm:$0xff]  ;;  %v10257_v55 = vld [vmem:[#allocation197_spill] sm:$0xff] }
 0x3a8   : > { %v2404_v31 = vadd.f32 %v10143_v37, %v2403_v1  ;;  %v7369_v57 = vpop.eup %3805  ;;  %3831 = vpow2.f32 %v10249_v50  ;;  %v2542_v13 = vadd.f32 %v10250_v28, %v2541_v25  ;;  %v10252_v37 = vld [vmem:[#allocation115_spill] sm:$0xff]  ;;  %v10255_v8 = vld [vmem:[#allocation238_spill] sm:$0xff]  ;;  %v10261_v6 = vld [vmem:[#allocation41_spill] sm:$0xff] }
 0x3a9   : > { %2830 = vmatpush2.bf16.msra.mxu0 %v10247_v52  ;;  %10248 = vst [vmem:[#allocation80_spill] sm:$0xff] %v7369_v57  ;;  %v7380_v5 = vpop.eup %3807  ;;  %3833 = vpow2.f32 %v10254_v46  ;;  %v2343_v44 = vadd.f32 %v10255_v8, %v2342_v49  ;;  %v10256_v52 = vld [vmem:[#allocation193_spill] sm:$0xff]  ;;  %v2474_v25 = vadd.f32 %v10257_v55, %v2473_v4  ;;  %v10263_v1 = vld [vmem:[#allocation126_spill] sm:$0xff]  ;;  %v10265_v46 = vld [vmem:[#allocation163_spill] sm:$0xff] }
 0x3aa   : > { %2831 = vmatprep.subr.bf16.mxu0 %v10251_v51  ;;  %10253 = vst [vmem:[#allocation94_spill] sm:$0xff] %v7380_v5  ;;  %v2405_v50 = vadd.f32 %v10256_v52, %v2404_v31  ;;  %v7386_v40 = vpop.eup %3809  ;;  %3835 = vpow2.f32 %v10259_v17  ;;  %v2543_v51 = vadd.f32 %v10260_v54, %v2542_v13  ;;  %v10262_v28 = vld [vmem:[#allocation45_spill] sm:$0xff]  ;;  %v10266_v49 = vld [vmem:[#allocation242_spill] sm:$0xff]  ;;  %v10267_v52 = vld [vmem:[#allocation207_spill] sm:$0xff]  ;;  %v10269_v17 = vpack.c.bf16 %v10119_v0, %v10113_v26 }
 0x3ab   : > { %10258 = vst [vmem:[#allocation30_spill] sm:$0xff] %v7386_v40  ;;  %v7394_v61 = vpop.eup %3811  ;;  %3837 = vpow2.f32 %v10265_v46  ;;  %v2344_v31 = vadd.f32 %v10266_v49, %v2343_v44  ;;  %v10268_v55 = vld [vmem:[#allocation211_spill] sm:$0xff]  ;;  %v10271_v59 = vld [vmem:[#allocation166_spill] sm:$0xff]  ;;  %v10272_v58 = vld [vmem:[#allocation213_spill] sm:$0xff]  ;;  %v10273_v44 = vpack.c.bf16 %v10162_v32, %v10149_v27 }
 0x3ac   : > { %v2406_v4 = vadd.f32 %v10267_v52, %v2405_v50  ;;  %v2475_v48 = vadd.f32 %v10268_v55, %v2474_v25  ;;  %v7403_v13 = vpop.eup %3813  ;;  %3839 = vpow2.f32 %v10271_v59  ;;  %v2544_v54 = vadd.f32 %v10272_v58, %v2543_v51  ;;  %v10274_v50 = vld [vmem:[#allocation35_spill] sm:$0xff]  ;;  %v10277_v26 = vld [vmem:[#allocation165_spill] sm:$0xff]  ;;  %v10278_v0 = vld [vmem:[#allocation244_spill] sm:$0xff] }
 0x3ad   : > { %2832 = vmatpush2.bf16.msra.mxu0 %v10269_v17  ;;  %10270 = vst [vmem:[#allocation249_spill] sm:$0xff] %v7403_v13  ;;  %v2747_v46 = vpack.c.bf16 %v7394_v61, %v7360_v3  ;;  %v10275_v25 = vld [vmem:[#allocation39_spill] sm:$0xff]  ;;  %v7414_v55 = vpop.eup %3815  ;;  %3841 = vpow2.f32 %v10277_v26  ;;  %v2345_v17 = vadd.f32 %v10278_v0, %v2344_v31  ;;  %v10280_v43 = vld [vmem:[#allocation217_spill] sm:$0xff]  ;;  %v2748_v27 = vpack.c.bf16 %v7403_v13, %v7369_v57  ;;  %v10286_v31 = vld [vmem:[#allocation168_spill] sm:$0xff] }
 0x3ae   : > { %2833 = vmatprep.subr.bf16.mxu0 %v10273_v44  ;;  %10276 = vst [vmem:[#allocation34_spill] sm:$0xff] %v7414_v55  ;;  %v2407_v59 = vadd.f32 %v10279_v16, %v2406_v4  ;;  %v2476_v51 = vadd.f32 %v10280_v43, %v2475_v48  ;;  %v7420_v58 = vpop.eup %3817  ;;  %3843 = vpow2.f32 %v10282_v20  ;;  %v2545_v32 = vadd.f32 %v10283_v12, %v2544_v54  ;;  %v7427_v44 = vld [vmem:[%s4156_s29 + $0x10] ss:$16 sps:$4 sm:$0xff]   ;;  %v10287_v4 = vld [vmem:[#allocation14_spill] sm:$0xff]  ;;  %v10288_v16 = vld [vmem:[#allocation16_spill] sm:$0xff] }
 0x3af   : > { %10281 = vst [vmem:[#allocation251_spill] sm:$0xff] %v7420_v58  ;;  %10284 = vst [vmem:[#allocation42_spill] sm:$0xff] %v7427_v44  ;;  %v7431_v52 = vpop.eup %3819  ;;  %3845 = vpow2.f32 %v10286_v31  ;;  %v2346_v48 = vadd.f32 %v10287_v4, %v2345_v17  ;;  %v10289_v43 = vld [vmem:[#allocation224_spill] sm:$0xff]  ;;  %v10290_v54 = vpack.c.bf16 %v10104_v39, %v10094_v62  ;;  %v10292_v57 = vld [vmem:[#allocation170_spill] sm:$0xff]  ;;  %2846 = vmatprep.subr.bf16.mxu1 %v2748_v27 }
 0x3b0   : > { %10285 = vst [vmem:[#allocation46_spill] sm:$0xff] %v7431_v52  ;;  %v2408_v10 = vadd.f32 %v10288_v16, %v2407_v59  ;;  %v2477_v20 = vadd.f32 %v10289_v43, %v2476_v51  ;;  %v7440_v13 = vpop.eup %3821  ;;  %3847 = vpow2.f32 %v10292_v57  ;;  %v10293_v8 = vld [vmem:[#allocation226_spill] sm:$0xff]  ;;  %v10294_v31 = vpack.c.bf16 %v10142_v9, %v10136_v2  ;;  %v10295_v59 = vld [vmem:[#allocation36_spill] sm:$0xff]  ;;  %v10298_v62 = vld [vmem:[#allocation169_spill] sm:$0xff]  ;;  %2847 = vmatpush1.bf16.msra.mxu1 %v2747_v46 }
 0x3b1   : > { %2834 = vmatpush2.bf16.msra.mxu0 %v10290_v54  ;;  %10291 = vst [vmem:[#allocation65_spill] sm:$0xff] %v7440_v13  ;;  %v2546_v26 = vadd.f32 %v10293_v8, %v2545_v32  ;;  %v10296_v51 = vld [vmem:[#allocation10_spill] sm:$0xff]  ;;  %v7451_v5 = vpop.eup %3823  ;;  %3849 = vpow2.f32 %v10298_v62  ;;  %v10299_v39 = vld [vmem:[#allocation123_spill] sm:$0xff]  ;;  %v10300_v57 = vld [vmem:[#allocation20_spill] sm:$0xff]  ;;  %v10305_v55 = vpack.c.bf16 %v7335_v14, %v7301_v41 }
 0x3b2   : > { %2889 = vmatprep.subr.bf16.mxu0 %v10294_v31  ;;  %10297 = vst [vmem:[#allocation38_spill] sm:$0xff] %v7451_v5  ;;  %v2347_v54 = vadd.f32 %v10299_v39, %v2346_v48  ;;  %v2409_v16 = vadd.f32 %v10300_v57, %v2408_v10  ;;  %v10301_v32 = vld [vmem:[#allocation152_spill] sm:$0xff]  ;;  %v7457_v43 = vpop.eup %3825  ;;  %v10304_v9 = vld [vmem:[#allocation229_spill] sm:$0xff]  ;;  %v10308_v5 = vld [vmem:[#allocation243_spill] sm:$0xff] }
 0x3b3   : > { %v2478_v27 = vadd.f32 %v10301_v32, %v2477_v20  ;;  %10302 = vst [vmem:[#allocation252_spill] sm:$0xff] %v7457_v43  ;;  %v10303_v2 = vld [vmem:[#allocation172_spill] sm:$0xff]  ;;  %v2547_v31 = vadd.f32 %v10304_v9, %v2546_v26  ;;  %2848 = vmatprep.subr.bf16.mxu1 %v10305_v55  ;;  %v10309_v10 = vld [vmem:[#allocation245_spill] sm:$0xff]  ;;  %v7469_v20 = vpop.eup %3827  ;;  %v10311_v46 = vld [vmem:[#allocation174_spill] sm:$0xff]  ;;  %v10314_v55 = vpack.c.bf16 %v10139_v45, %v10133_v38 }
 0x3b4   : > { %3851 = vpow2.f32 %v10303_v2  ;;  %2836 = vmatmul.mubr.bf16.vlgmr.msra.gmra.mxu0 %v7427_v44  ;;  %10310 = vst [vmem:[#allocation68_spill] sm:$0xff] %v7469_v20  ;;  %v2348_v2 = vadd.f32 %v7227_v35, %v2347_v54  ;;  %v10312_v43 = vld [vmem:[#allocation156_spill] sm:$0xff]  ;;  %v10313_v40 = vld [vmem:[#allocation230_spill] sm:$0xff]  ;;  %v7479_v48 = vpop.eup %3829  ;;  %v10317_v14 = vld [vmem:[#allocation175_spill] sm:$0xff] }
 0x3b5   : > { %3853 = vpow2.f32 %v10311_v46  ;;  %v2410_v26 = vadd.f32 %v10312_v43, %v2409_v16  ;;  %v2479_v57 = vadd.f32 %v10313_v40, %v2478_v27  ;;  %2890 = vmatpush1.bf16.msra.mxu0 %v10314_v55  ;;  %v10315_v44 = vld [vmem:[#allocation40_spill] sm:$0xff]  ;;  %10316 = vst [vmem:[#allocation70_spill] sm:$0xff] %v7479_v48  ;;  %v10318_v58 = vld [vmem:[#allocation157_spill] sm:$0xff]  ;;  %v10319_v16 = vpack.c.bf16 %v10129_v22, %v10123_v60  ;;  %v7490_v38 = vpop.eup %3831  ;;  %v10328_v60 = vld [vmem:[#allocation178_spill] sm:$0xff] }
 0x3b6   : > { %2921 = vmatprep.mubr.bf16.mxu0 %v10315_v44  ;;  %3855 = vpow2.f32 %v10317_v14  ;;  %v2548_v41 = vadd.f32 %v10318_v58, %v2547_v31  ;;  %10322 = vst [vmem:[#allocation254_spill] sm:$0xff] %v7490_v38  ;;  %v10323_v45 = vld [vmem:[#allocation176_spill] sm:$0xff]  ;;  %v2349_v44 = vadd.f32 %v7258_v19, %v2348_v2  ;;  %v10326_v46 = vpack.c.bf16 %v7326_v11, %v7292_v23  ;;  %v7499_v17 = vpop.eup %3833  ;;  %v10329_v22 = vld [vmem:[#allocation233_spill] sm:$0xff]  ;;  %v10332_v38 = vld [vmem:[#allocation179_spill] sm:$0xff] }
 0x3b7   : > { %2891 = vmatprep.subr.bf16.mxu0 %v10319_v16  ;;  %3857 = vpow2.f32 %v10323_v45  ;;  %v10324_v55 = vld [vmem:[#allocation232_spill] sm:$0xff]  ;;  %10327 = vst [vmem:[#allocation43_spill] sm:$0xff] %v7499_v17  ;;  %v10330_v43 = vpack.c.bf16 %v7267_v34, %v7236_v42  ;;  %v7510_v45 = vpop.eup %3835  ;;  %v10333_v17 = vld [vmem:[#allocation237_spill] sm:$0xff]  ;;  %v10335_v27 = vpack.c.bf16 %v10127_v15, %v10120_v33  ;;  %v10399_v8 = vld [vmem:[#allocation26_spill] sm:$0xff] }
 0x3b8   : > { %v2411_v14 = vadd.f32 %v10324_v55, %v2410_v26  ;;  %v10325_v62 = vld [vmem:[#allocation28_spill] sm:$0xff]  ;;  %2849 = vmatpush1.bf16.msra.mxu1 %v10326_v46  ;;  %3859 = vpow2.f32 %v10328_v60  ;;  %v2549_v16 = vadd.f32 %v10329_v22, %v2548_v41  ;;  %v2350_v46 = vadd.f32 %v7292_v23, %v2349_v44  ;;  %v10339_v23 = vld [vmem:[#allocation95_spill] sm:$0xff]  ;;  %v10341_v33 = vld [vmem:[#allocation181_spill] sm:$0xff] }
 0x3b9   : > { %v2480_v31 = vadd.f32 %v10325_v62, %v2479_v57  ;;  %2850 = vmatprep.subr.bf16.mxu1 %v10330_v43  ;;  %v10331_v26 = vld [vmem:[#allocation240_spill] sm:$0xff]  ;;  %3861 = vpow2.f32 %v10332_v38  ;;  %2892 = vmatpush1.bf16.msra.mxu0 %v10335_v27  ;;  %v7519_v43 = vpop.eup %3837  ;;  %v10337_v22 = vpack.c.bf16 %v10117_v18, %v10110_v47  ;;  %v10338_v38 = vld [vmem:[#allocation83_spill] sm:$0xff]  ;;  %v10342_v27 = vld [vmem:[#allocation241_spill] sm:$0xff]  ;;  %v10343_v47 = vpack.c.bf16 %v7258_v19, %v7227_v35 }
 0x3ba   : > { %v2412_v60 = vadd.f32 %v10333_v17, %v2411_v14  ;;  %v10334_v54 = vld [vmem:[#allocation32_spill] sm:$0xff]  ;;  %v2550_v57 = vadd.f32 %v10331_v26, %v2549_v16  ;;  %v2677_v44 = vpack.c.bf16 %v10339_v23, %v10338_v38  ;;  %v2351_v15 = vadd.f32 %v7326_v11, %v2350_v46  ;;  %v10347_v14 = vld [vmem:[#allocation118_spill] sm:$0xff]  ;;  %v10386_v46 = vld [vmem:[#allocation99_spill] sm:$0xff] }
 0x3bb   : > { %v2481_v41 = vadd.f32 %v10334_v54, %v2480_v31  ;;  %v10336_v2 = vld [vmem:[#allocation180_spill] sm:$0xff]  ;;  %2893 = vmatprep.subr.bf16.mxu0 %v10337_v22  ;;  %v7530_v31 = vpop.eup %3839  ;;  %v10345_v22 = vld [vmem:[#allocation183_spill] sm:$0xff]  ;;  %v2735_v11 = vpack.c.bf16 %v10299_v39, %v10287_v4  ;;  %v10415_v54 = vld [vmem:[#allocation202_spill] sm:$0xff] }
 0x3bc   : > { %3863 = vpow2.f32 %v10336_v2  ;;  %10340 = vst [vmem:[#allocation131_spill] sm:$0xff] %v7530_v31  ;;  %v2413_v2 = vadd.f32 %v10342_v27, %v2412_v60  ;;  %2851 = vmatpush1.bf16.msra.mxu1 %v10343_v47  ;;  %v7539_v18 = vpop.eup %3841  ;;  %v2551_v38 = vadd.f32 %v10295_v59, %v2550_v57  ;;  %v10346_v23 = vld [vmem:[#allocation44_spill] sm:$0xff]  ;;  %v2352_v19 = vadd.f32 %v7360_v3, %v2351_v15  ;;  %v10405_v40 = vld [vmem:[#allocation15_spill] sm:$0xff] }
 0x3bd   : > { %3865 = vpow2.f32 %v10341_v33  ;;  %v2482_v16 = vadd.f32 %v10308_v5, %v2481_v41  ;;  %10344 = vst [vmem:[#allocation71_spill] sm:$0xff] %v7539_v18  ;;  %v10348_v62 = vpack.c.bf16 %v10346_v23, %v10347_v14  ;;  %v7550_v60 = vpop.eup %3843  ;;  %v10350_v35 = vld [vmem:[#allocation184_spill] sm:$0xff]  ;;  %v10351_v41 = vld [vmem:[#allocation246_spill] sm:$0xff]  ;;  %2894 = vmatpush1.bf16.msra.mxu0 %v2677_v44  ;;  %v10353_v3 = vpack.c.bf16 %v10101_v24, %v10093_v36  ;;  %v10425_v59 = vld [vmem:[#allocation239_spill] sm:$0xff] }
 0x3be   : > { %3867 = vpow2.f32 %v10345_v22  ;;  %10349 = vst [vmem:[#allocation253_spill] sm:$0xff] %v7550_v60  ;;  %v2414_v33 = vadd.f32 %v10351_v41, %v2413_v2  ;;  %v7556_v47 = vpop.eup %3845  ;;  %v2552_v4 = vadd.f32 %v10296_v51, %v2551_v38  ;;  %v2732_v39 = vpack.c.bf16 %v10351_v41, %v10342_v27  ;;  %v10355_v2 = vld [vmem:[#allocation187_spill] sm:$0xff]  ;;  %v10357_v27 = vld [vmem:[#allocation190_spill] sm:$0xff] }
 0x3bf   : > { %2852 = vmatprep.subr.bf16.mxu1 %v10348_v62  ;;  %3869 = vpow2.f32 %v10350_v35  ;;  %v2483_v57 = vadd.f32 %v10309_v10, %v2482_v16  ;;  %v10352_v62 = vld [vmem:[#allocation185_spill] sm:$0xff]  ;;  %2895 = vmatprep.subr.bf16.mxu0 %v10353_v3  ;;  %v7567_v15 = vpop.eup %3847  ;;  %v2353_v44 = vadd.f32 %v7394_v61, %v2352_v19  ;;  %v2731_v36 = vpack.c.bf16 %v10278_v0, %v10266_v49  ;;  %v10360_v49 = vld [vmem:[#allocation191_spill] sm:$0xff]  ;;  %v10424_v10 = vld [vmem:[#allocation76_spill] sm:$0xff] }
 0x3c0   : > { %3871 = vpow2.f32 %v10352_v62  ;;  %10354 = vst [vmem:[#allocation47_spill] sm:$0xff] %v7567_v15  ;;  %v2415_v16 = vadd.f32 %v10347_v14, %v2414_v33  ;;  %2853 = vmatpush1.bf16.msra.mxu1 %v2735_v11  ;;  %v7573_v35 = vpop.eup %3849  ;;  %v2553_v41 = vadd.f32 %v10252_v37, %v2552_v4  ;;  %v10358_v61 = vld [vmem:[#allocation189_spill] sm:$0xff]  ;;  %v10359_v33 = vpack.c.bf16 %v10262_v28, %v10261_v6  ;;  %v10363_v28 = vld [vmem:[#allocation192_spill] sm:$0xff] }
 0x3c1   : > { %3873 = vpow2.f32 %v10355_v2  ;;  %v2484_v38 = vadd.f32 %v10263_v1, %v2483_v57  ;;  %10356 = vst [vmem:[#allocation72_spill] sm:$0xff] %v7573_v35  ;;  %2854 = vmatprep.subr.bf16.mxu1 %v2732_v39  ;;  %v7581_v62 = vpop.eup %3851  ;;  %v2354_v14 = vadd.f32 %v7431_v52, %v2353_v44  ;;  %v2728_v4 = vpack.c.bf16 %v10333_v17, %v10324_v55  ;;  %v10365_v17 = vld [vmem:[#allocation194_spill] sm:$0xff]  ;;  %v10431_v1 = vld [vmem:[#allocation188_spill] sm:$0xff]  ;;  %v10433_v37 = vld [vmem:[#allocation85_spill] sm:$0xff] }
 0x3c2   : > { %3875 = vpow2.f32 %v10357_v27  ;;  %v2416_v11 = vadd.f32 %v10346_v23, %v2415_v16  ;;  %2896 = vmatpush1.bf16.msra.mxu0 %v10359_v33  ;;  %v7590_v57 = vpop.eup %3853  ;;  %v2554_v0 = vadd.f32 %v7219_v29, %v2553_v41  ;;  %v10361_v39 = vpack.c.bf16 %v10275_v25, %v10274_v50  ;;  %v10366_v25 = vld [vmem:[#allocation238_spill] sm:$0xff]  ;;  %v10371_v33 = vld [vmem:[#allocation37_spill] sm:$0xff]  ;;  %v10379_v23 = vld [vmem:[#allocation27_spill] sm:$0xff] }
 0x3c3   : > { %3877 = vpow2.f32 %v10358_v61  ;;  %v2485_v19 = vadd.f32 %v10264_v7, %v2484_v38  ;;  %v7601_v3 = vpop.eup %3855  ;;  %v2355_v6 = vadd.f32 %v7469_v20, %v2354_v14  ;;  %v2727_v55 = vpack.c.bf16 %v10366_v25, %v7048_v56  ;;  %v10369_v14 = vld [vmem:[#allocation195_spill] sm:$0xff]  ;;  %v10374_v56 = vld [vmem:[#allocation196_spill] sm:$0xff]  ;;  %v10394_v38 = vld [vmem:[#allocation221_spill] sm:$0xff] }
 0x3c4   : > { %3879 = vpow2.f32 %v10360_v49  ;;  %2897 = vmatprep.subr.bf16.mxu0 %v10361_v39  ;;  %10362 = vst [vmem:[#allocation139_spill] sm:$0xff] %v7601_v3  ;;  %v2417_v2 = vadd.f32 %v7236_v42, %v2416_v11  ;;  %2855 = vmatpush1.bf16.msra.mxu1 %v2731_v36  ;;  %v7607_v16 = vpop.eup %3857  ;;  %v2555_v50 = vadd.f32 %v7250_v53, %v2554_v0  ;;  %v10370_v11 = vld [vmem:[#allocation48_spill] sm:$0xff]  ;;  %v10372_v49 = vld [vmem:[#allocation33_spill] sm:$0xff]  ;;  %v10375_v39 = vld [vmem:[#allocation22_spill] sm:$0xff] }
 0x3c5   : > { %3881 = vpow2.f32 %v10363_v28  ;;  %v2486_v44 = vadd.f32 %v7244_v21, %v2485_v19  ;;  %10364 = vst [vmem:[#allocation255_spill] sm:$0xff] %v7607_v16  ;;  %2856 = vmatprep.subr.bf16.mxu1 %v2728_v4  ;;  %v7615_v61 = vpop.eup %3859  ;;  %v2356_v42 = vadd.f32 %v7510_v45, %v2355_v6  ;;  %v10373_v0 = vpack.c.bf16 %v10371_v33, %v10372_v49  ;;  %v10377_v25 = vld [vmem:[#allocation16_spill] sm:$0xff]  ;;  %v10384_v33 = vld [vmem:[#allocation198_spill] sm:$0xff]  ;;  %v10395_v27 = vld [vmem:[#allocation19_spill] sm:$0xff] }
 0x3c6   : > { %3883 = vpow2.f32 %v10365_v17  ;;  %v2418_v36 = vadd.f32 %v7267_v34, %v2417_v2  ;;  %v7624_v4 = vpop.eup %3861  ;;  %v2556_v28 = vadd.f32 %v10375_v39, %v2555_v50  ;;  %v10376_v17 = vld [vmem:[#allocation12_spill] sm:$0xff]  ;;  %v10381_v34 = vld [vmem:[#allocation25_spill] sm:$0xff]  ;;  %v10432_v7 = vld [vmem:[#allocation74_spill] sm:$0xff] }
 0x3c7   : > { %3885 = vpow2.f32 %v10369_v14  ;;  %v2487_v19 = vadd.f32 %v10370_v11, %v2486_v44  ;;  %2898 = vmatpush1.bf16.msra.mxu0 %v10373_v0  ;;  %v2720_v41 = vpack.c.bf16 %v10377_v25, %v10376_v17  ;;  %v10378_v14 = vld [vmem:[#allocation31_spill] sm:$0xff]  ;;  %v10382_v2 = vld [vmem:[#allocation29_spill] sm:$0xff]  ;;  %v2357_v49 = vadd.f32 %v7550_v60, %v2356_v42  ;;  %v10385_v0 = vld [vmem:[#allocation248_spill] sm:$0xff] }
 0x3c8   : > { %3887 = vpow2.f32 %v10374_v56  ;;  %v10380_v6 = vpack.c.bf16 %v10378_v14, %v10379_v23  ;;  %v2665_v44 = vpack.c.bf16 %v10382_v2, %v10381_v34  ;;  %v2419_v56 = vadd.f32 %v10385_v0, %v2418_v36  ;;  %2857 = vmatpush1.bf16.msra.mxu1 %v2727_v55  ;;  %v10388_v17 = vld [vmem:[#allocation199_spill] sm:$0xff]  ;;  %v10390_v14 = vld [vmem:[#allocation156_spill] sm:$0xff]  ;;  %v10436_v21 = vld [vmem:[#allocation62_spill] sm:$0xff] }
 0x3c9   : > { %v7635_v24 = vpop.eup %3863  ;;  %3889 = vpow2.f32 %v10384_v33  ;;  %v2488_v50 = vadd.f32 %v10386_v46, %v2487_v19  ;;  %v10389_v23 = vld [vmem:[#allocation107_spill] sm:$0xff]  ;;  %v10393_v2 = vld [vmem:[#allocation8_spill] sm:$0xff]  ;;  %v2358_v55 = vadd.f32 %v7581_v62, %v2357_v49  ;;  %v10437_v11 = vld [vmem:[#allocation66_spill] sm:$0xff] }
 0x3ca   : > { %2899 = vmatprep.subr.bf16.mxu0 %v10380_v6  ;;  %10383 = vst [vmem:[#allocation90_spill] sm:$0xff] %v7635_v24  ;;  %v7641_v22 = vpop.eup %3865  ;;  %3891 = vpow2.f32 %v10388_v17  ;;  %v2557_v25 = vadd.f32 %v10389_v23, %v2556_v28  ;;  %v10391_v6 = vld [vmem:[#allocation20_spill] sm:$0xff]  ;;  %v2719_v33 = vpack.c.bf16 %v10394_v38, %v10393_v2  ;;  %v10396_v42 = vld [vmem:[#allocation23_spill] sm:$0xff]  ;;  %v10445_v23 = vld [vmem:[#allocation58_spill] sm:$0xff] }
 0x3cb   : > { %10387 = vst [vmem:[#allocation73_spill] sm:$0xff] %v7641_v22  ;;  %v10392_v34 = vpack.c.bf16 %v10390_v14, %v10391_v6  ;;  %v2662_v12 = vpack.c.bf16 %v10396_v42, %v10395_v27  ;;  %v7652_v36 = vpop.eup %3867  ;;  %v10397_v19 = vld [vmem:[#allocation200_spill] sm:$0xff]  ;;  %v10398_v0 = vld [vmem:[#allocation91_spill] sm:$0xff]  ;;  %v2489_v28 = vadd.f32 %v10399_v8, %v2488_v50  ;;  %2900 = vmatpush1.bf16.msra.mxu0 %v2665_v44  ;;  %v10400_v14 = vld [vmem:[#allocation201_spill] sm:$0xff] }
 0x3cc   : > { %3893 = vpow2.f32 %v10397_v19  ;;  %v2420_v17 = vadd.f32 %v10398_v0, %v2419_v56  ;;  %v7658_v32 = vpop.eup %3869  ;;  %v10401_v6 = vld [vmem:[#allocation250_spill] sm:$0xff]  ;;  %v10403_v27 = vld [vmem:[#allocation21_spill] sm:$0xff]  ;;  %v10404_v42 = vld [vmem:[#allocation11_spill] sm:$0xff]  ;;  %v2359_v56 = vadd.f32 %v7615_v61, %v2358_v55 }
 0x3cd   : > { %2858 = vmatprep.subr.bf16.mxu1 %v10392_v34  ;;  %3895 = vpow2.f32 %v10400_v14  ;;  %v2558_v38 = vadd.f32 %v10401_v6, %v2557_v25  ;;  %2901 = vmatprep.subr.bf16.mxu0 %v2662_v12  ;;  %v10402_v34 = vld [vmem:[#allocation17_spill] sm:$0xff]  ;;  %v2658_v19 = vpack.c.bf16 %v10405_v40, %v10404_v42  ;;  %v7666_v9 = vpop.eup %3871  ;;  %v10407_v49 = vld [vmem:[#allocation203_spill] sm:$0xff]  ;;  %v10408_v44 = vld [vmem:[#allocation80_spill] sm:$0xff]  ;;  %v10410_v25 = vpack.c.bf16 %v7014_v63, %v6980_v30 }
 0x3ce   : > { %v2661_v2 = vpack.c.bf16 %v10403_v27, %v10402_v34  ;;  %10406 = vst [vmem:[#allocation147_spill] sm:$0xff] %v7666_v9  ;;  %3897 = vpow2.f32 %v10407_v49  ;;  %v2421_v50 = vadd.f32 %v10408_v44, %v2420_v17  ;;  %v10409_v0 = vld [vmem:[#allocation94_spill] sm:$0xff]  ;;  %v7675_v12 = vpop.eup %3873  ;;  %v10411_v14 = vld [vmem:[#allocation204_spill] sm:$0xff]  ;;  %v10413_v27 = vld [vmem:[#allocation9_spill] sm:$0xff]  ;;  %v2360_v30 = vadd.f32 %v7652_v36, %v2359_v56 }
 0x3cf   : > { %v2490_v58 = vadd.f32 %v10409_v0, %v2489_v28  ;;  %2859 = vmatpush1.bf16.msra.mxu1 %v10410_v25  ;;  %3899 = vpow2.f32 %v10411_v14  ;;  %v10412_v34 = vld [vmem:[#allocation30_spill] sm:$0xff]  ;;  %v10414_v42 = vld [vmem:[#allocation13_spill] sm:$0xff]  ;;  %v7683_v17 = vpop.eup %3875  ;;  %v10426_v56 = vld [vmem:[#allocation208_spill] sm:$0xff] }
 0x3d0   : > { %v2559_v40 = vadd.f32 %v10412_v34, %v2558_v38  ;;  %2860 = vmatprep.subr.bf16.mxu1 %v2720_v41  ;;  %v2657_v49 = vpack.c.bf16 %v10414_v42, %v10413_v27  ;;  %v10416_v55 = vld [vmem:[#allocation213_spill] sm:$0xff]  ;;  %v10417_v28 = vld [vmem:[#allocation206_spill] sm:$0xff]  ;;  %2902 = vmatpush1.bf16.msra.mxu0 %v2661_v2  ;;  %v7689_v14 = vpop.eup %3877  ;;  %v10421_v38 = vld [vmem:[#allocation251_spill] sm:$0xff] }
 0x3d1   : > { %v2718_v26 = vpack.c.bf16 %v10416_v55, %v10415_v54  ;;  %3901 = vpow2.f32 %v10417_v28  ;;  %v10418_v63 = vld [vmem:[#allocation249_spill] sm:$0xff]  ;;  %v10419_v25 = vld [vmem:[#allocation34_spill] sm:$0xff]  ;;  %2903 = vmatprep.subr.bf16.mxu0 %v2658_v19  ;;  %v10423_v54 = vld [vmem:[#allocation211_spill] sm:$0xff]  ;;  %v7697_v51 = vpop.eup %3879 }
 0x3d2   : > { %v2422_v44 = vadd.f32 %v10418_v63, %v2421_v50  ;;  %v2491_v5 = vadd.f32 %v10419_v25, %v2490_v58  ;;  %v10420_v41 = vld [vmem:[#allocation205_spill] sm:$0xff]  ;;  %v2560_v27 = vadd.f32 %v10421_v38, %v2559_v40  ;;  %v2361_v58 = vadd.f32 %v7683_v17, %v2360_v30  ;;  %v10427_v50 = vld [vmem:[#allocation38_spill] sm:$0xff]  ;;  %v10429_v40 = vld [vmem:[#allocation252_spill] sm:$0xff] }
 0x3d3   : > { %3903 = vpow2.f32 %v10420_v41  ;;  %v10422_v42 = vld [vmem:[#allocation197_spill] sm:$0xff]  ;;  %2861 = vmatpush1.bf16.msra.mxu1 %v2719_v33  ;;  %v7703_v41 = vpop.eup %3881  ;;  %v10428_v19 = vld [vmem:[#allocation210_spill] sm:$0xff]  ;;  %v10442_v46 = vld [vmem:[#allocation64_spill] sm:$0xff] }
 0x3d4   : > { %v2717_v55 = vpack.c.bf16 %v10423_v54, %v10422_v42  ;;  %3905 = vpow2.f32 %v10426_v56  ;;  %v2423_v2 = vadd.f32 %v7440_v13, %v2422_v44  ;;  %v2492_v63 = vadd.f32 %v10427_v50, %v2491_v5  ;;  %v10430_v54 = vld [vmem:[#allocation173_spill] sm:$0xff]  ;;  %v7711_v56 = vpop.eup %3883  ;;  %v10435_v5 = vld [vmem:[#allocation254_spill] sm:$0xff]  ;;  %2904 = vmatpush1.bf16.msra.mxu0 %v2657_v49  ;;  %v10449_v25 = vld [vmem:[#allocation267_spill] sm:$0xff] }
 0x3d5   : > { %3907 = vpow2.f32 %v10428_v19  ;;  %v2561_v42 = vadd.f32 %v10429_v40, %v2560_v27  ;;  %v2714_v28 = vpack.c.bf16 %v10431_v1, %v10430_v54  ;;  %v10434_v30 = vld [vmem:[#allocation209_spill] sm:$0xff]  ;;  %v7718_v53 = vpop.eup %3885  ;;  %v10438_v27 = vld [vmem:[#allocation212_spill] sm:$0xff]  ;;  %v2362_v1 = vadd.f32 %v7711_v56, %v2361_v58  ;;  %v10439_v54 = vld [vmem:[#allocation43_spill] sm:$0xff]  ;;  %2905 = vmatprep.subr.bf16.mxu0 %v2718_v26 }
 0x3d6   : > { %3909 = vpow2.f32 %v10434_v30  ;;  %v2424_v44 = vadd.f32 %v7479_v48, %v2423_v2  ;;  %v2493_v33 = vadd.f32 %v10435_v5, %v2492_v63  ;;  %v7725_v39 = vpop.eup %3887  ;;  %v10440_v2 = vld [vmem:[#allocation214_spill] sm:$0xff]  ;;  %v10441_v19 = vld [vmem:[#allocation60_spill] sm:$0xff]  ;;  %v10443_v58 = vld [vmem:[#allocation215_spill] sm:$0xff] }
 0x3d7   : > { %3911 = vpow2.f32 %v10438_v27  ;;  %v2562_v29 = vadd.f32 %v10439_v54, %v2561_v42  ;;  %v7732_v27 = vpop.eup %3889  ;;  %v10444_v30 = vld [vmem:[#allocation54_spill] sm:$0xff]  ;;  %v10448_v42 = vld [vmem:[#allocation256_spill] sm:$0xff]  ;;  %v10452_v52 = vld [vmem:[#allocation171_spill] sm:$0xff] }
 0x3d8   : > { %3913 = vpow2.f32 %v10440_v2  ;;  %v2425_v49 = vadd.f32 %v7519_v43, %v2424_v44  ;;  %v2494_v63 = vadd.f32 %v7530_v31, %v2493_v33  ;;  %v7740_v2 = vpop.eup %3891  ;;  %v10446_v44 = vld [vmem:[#allocation216_spill] sm:$0xff]  ;;  %2906 = vmatpush2.bf16.msra.mxu0 %v2717_v55  ;;  %v10450_v34 = vsub.f32 %v10448_v42, %v10449_v25  ;;  %v10453_v20 = vld [vmem:[#allocation186_spill] sm:$0xff]  ;;  %v10454_v25 = vld [vmem:[#allocation223_spill] sm:$0xff] }
 0x3d9   : > { %3915 = vpow2.f32 %v10443_v58  ;;  %v2563_v26 = vadd.f32 %v7539_v18, %v2562_v29  ;;  %v7747_v0 = vpop.eup %3893  ;;  %v10447_v29 = vld [vmem:[#allocation218_spill] sm:$0xff]  ;;  %v2363_v38 = vadd.f32 %v7740_v2, %v2362_v1  ;;  %2907 = vmatprep.subr.bf16.mxu0 %v2714_v28  ;;  %v10455_v1 = vld [vmem:[#allocation120_spill] sm:$0xff] }
 0x3da   : > { %3917 = vpow2.f32 %v10446_v44  ;;  %v2426_v33 = vadd.f32 %v7556_v47, %v2425_v49  ;;  %v2495_v8 = vadd.f32 %v7567_v15, %v2494_v63  ;;  %v2297_v6 = vmul.f32 1.442695, %v10450_v34  ;;  %v7755_v49 = vpop.eup %3895  ;;  %v10451_v63 = vld [vmem:[#allocation220_spill] sm:$0xff]  ;;  %v10474_v31 = vld [vmem:[#allocation270_spill] sm:$0xff] }
 0x3db   : > { %3919 = vpow2.f32 %v10447_v29  ;;  %v2564_v44 = vadd.f32 %v7573_v35, %v2563_v26  ;;  %v2713_v29 = vpack.c.bf16 %v10453_v20, %v10452_v52  ;;  %v7762_v13 = vpop.eup %3897  ;;  %v10456_v26 = vld [vmem:[#allocation160_spill] sm:$0xff] }
 0x3dc   : > { %3921 = vpow2.f32 %v10451_v63  ;;  %v2427_v55 = vadd.f32 %v7590_v57, %v2426_v33  ;;  %v2496_v58 = vadd.f32 %v7601_v3, %v2495_v8  ;;  %v2710_v28 = vpack.c.bf16 %v10456_v26, %v10455_v1  ;;  %v7770_v63 = vpop.eup %3899  ;;  %v10457_v33 = vld [vmem:[#allocation225_spill] sm:$0xff]  ;;  %v10460_v20 = vld [vmem:[#allocation112_spill] sm:$0xff] }
 0x3dd   : > { %3923 = vpow2.f32 %v10454_v25  ;;  %v2565_v34 = vadd.f32 %v7607_v16, %v2564_v44  ;;  %2908 = vmatpush2.bf16.msra.mxu0 %v2713_v29  ;;  %v10458_v44 = vld [vmem:[#allocation228_spill] sm:$0xff]  ;;  %v2364_v1 = vadd.f32 %v7770_v63, %v2363_v38 }
 0x3de   : > { %3925 = vpow2.f32 %v10457_v33  ;;  %v2428_v8 = vadd.f32 %v7624_v4, %v2427_v55  ;;  %v2497_v52 = vadd.f32 %v7635_v24, %v2496_v58  ;;  %v7777_v25 = vpop.eup %3901  ;;  %2909 = vmatprep.subr.bf16.mxu0 %v2710_v28  ;;  %v10459_v55 = vld [vmem:[#allocation153_spill] sm:$0xff]  ;;  %v10461_v16 = vld [vmem:[#allocation144_spill] sm:$0xff] }
 0x3df   : > { %3927 = vpow2.f32 %v10458_v44  ;;  %v2566_v26 = vadd.f32 %v7641_v22, %v2565_v34  ;;  %v2709_v48 = vpack.c.bf16 %v10461_v16, %v10460_v20  ;;  %v10462_v38 = vld [vmem:[#allocation24_spill] sm:$0xff]  ;;  %v10463_v34 = vld [vmem:[#allocation258_spill] sm:$0xff]  ;;  %v10473_v20 = vld [vmem:[#allocation259_spill] sm:$0xff] }
 0x3e0   : > { %v7784_v42 = vpop.eup %3903  ;;  %3929 = vpow2.f32 %v10459_v55  ;;  %v2429_v58 = vadd.f32 %v7658_v32, %v2428_v8  ;;  %v2498_v29 = vadd.f32 %v7666_v9, %v2497_v52  ;;  %v10464_v28 = vld [vmem:[#allocation268_spill] sm:$0xff]  ;;  %v10466_v8 = vld [vmem:[#allocation231_spill] sm:$0xff]  ;;  %v10475_v15 = vsub.f32 %v10473_v20, %v10474_v31 }
 0x3e1   : > { %v7791_v44 = vpop.eup %3905  ;;  %3931 = vpow2.f32 %v10462_v38  ;;  %v10465_v22 = vsub.f32 %v10463_v34, %v10464_v28  ;;  %v2567_v33 = vadd.f32 %v7675_v12, %v2566_v26  ;;  %2910 = vmatpush2.bf16.msra.mxu0 %v2709_v48  ;;  %v10468_v26 = vld [vmem:[#allocation257_spill] sm:$0xff] }
 0x3e2   : > { %v7800_v3 = vpop.eup %3907  ;;  %3933 = vpow2.f32 %v10466_v8  ;;  %v2430_v52 = vadd.f32 %v7689_v14, %v2429_v58  ;;  %v2499_v16 = vadd.f32 %v7697_v51, %v2498_v29  ;;  %v10469_v34 = vld [vmem:[#allocation269_spill] sm:$0xff]  ;;  %v10471_v58 = vpack.c.bf16 %v10425_v59, %v10424_v10  ;;  %v10472_v29 = vld [vmem:[#allocation236_spill] sm:$0xff] }
 0x3e3   : > { %v2299_v60 = vmul.f32 1.442695, %v10465_v22  ;;  %v7807_v38 = vpop.eup %3909  ;;  %v10467_v22 = vld [vmem:[#allocation234_spill] sm:$0xff]  ;;  %v10470_v28 = vsub.f32 %v10468_v26, %v10469_v34  ;;  %v2365_v18 = vadd.f32 %v7800_v3, %v2364_v1  ;;  %v2568_v8 = vadd.f32 %v7703_v41, %v2567_v33  ;;  %v10485_v59 = vld [vmem:[#allocation261_spill] sm:$0xff] }
 0x3e4   : > { %3935 = vpow2.f32 %v10467_v22  ;;  %2911 = vmatprep.subr.bf16.mxu0 %v10471_v58  ;;  %v7818_v48 = vpop.eup %3911  ;;  %v2303_v22 = vmul.f32 1.442695, %v10475_v15  ;;  %v2431_v35 = vadd.f32 %v7718_v53, %v2430_v52  ;;  %v2500_v26 = vadd.f32 %v7725_v39, %v2499_v16 }
 0x3e5   : > { %v2301_v55 = vmul.f32 1.442695, %v10470_v28  ;;  %3937 = vpow2.f32 %v10472_v29  ;;  %v7826_v34 = vpop.eup %3913  ;;  %v2569_v1 = vadd.f32 %v7732_v27, %v2568_v8  ;;  %v10476_v52 = vpack.c.bf16 %v10433_v37, %v10432_v7 }
 0x3e6   : > { %3939 = vpow2.f32 %v2297_v6  ;;  %v7831_v10 = vpop.eup %3915  ;;  %v2432_v33 = vadd.f32 %v7747_v0, %v2431_v35  ;;  %v2501_v31 = vadd.f32 %v7755_v49, %v2500_v26  ;;  %v10478_v29 = vpack.c.bf16 %v10442_v46, %v10441_v19  ;;  %v10484_v35 = vld [vmem:[#allocation266_spill] sm:$0xff] }
 0x3e7   : > { %3941 = vpow2.f32 %v2299_v60  ;;  %2912 = vmatpush2.bf16.msra.mxu0 %v10476_v52  ;;  %v7840_v6 = vpop.eup %3917  ;;  %v2366_v16 = vadd.f32 %v7831_v10, %v2365_v18  ;;  %v2570_v20 = vadd.f32 %v7762_v13, %v2569_v1  ;;  %v10477_v60 = vpack.c.bf16 %v10437_v11, %v10436_v21 }
 0x3e8   : > { %3943 = vpow2.f32 %v2301_v55  ;;  %v7849_v28 = vpop.eup %3919  ;;  %v2433_v7 = vadd.f32 %v7777_v25, %v2432_v33  ;;  %v2502_v37 = vadd.f32 %v7784_v42, %v2501_v31  ;;  %v10479_v33 = vpack.c.bf16 %v10445_v23, %v10444_v30 }
 0x3e9   : > { %2913 = vmatprep.subr.bf16.mxu0 %v10477_v60  ;;  %3945 = vpow2.f32 %v2303_v22  ;;  %v7853_v8 = vpop.eup %3921  ;;  %v2571_v18 = vadd.f32 %v7791_v44, %v2570_v20  ;;  %v10480_v60 = vld [vmem:[#allocation52_spill] sm:$0xff]  ;;  %v1513_v15 = vsub.f32 %v10485_v59, %v10484_v35 }
 0x3ea   : > { %v7858_v58 = vpop.eup %3923  ;;  %v2434_v21 = vadd.f32 %v7807_v38, %v2433_v7  ;;  %v2503_v11 = vadd.f32 %v7818_v48, %v2502_v37  ;;  %v10481_v7 = vld [vmem:[#allocation56_spill] sm:$0xff] }
 0x3eb   : > { %2914 = vmatpush2.bf16.msra.mxu0 %v10478_v29  ;;  %v3926_v22 = vpop.eup %3925  ;;  %v2367_v26 = vadd.f32 %v7858_v58, %v2366_v16  ;;  %v2572_v1 = vadd.f32 %v7826_v34, %v2571_v18  ;;  %v2697_v37 = vpack.c.bf16 %v10481_v7, %v10480_v60  ;;  %v10482_v18 = vld [vmem:[#allocation151_spill] sm:$0xff]  ;;  %v10483_v29 = vld [vmem:[#allocation50_spill] sm:$0xff]  ;;  %v1514_v59 = vmul.f32 1.442695, %v1513_v15 }
 0x3ec   : > { %2915 = vmatprep.subr.bf16.mxu0 %v10479_v33  ;;  %v7870_v31 = vpop.eup %3927  ;;  %v2435_v52 = vadd.f32 %v7840_v6, %v2434_v21  ;;  %v2504_v20 = vadd.f32 %v7849_v28, %v2503_v11  ;;  %v2694_v23 = vpack.c.bf16 %v10483_v29, %v10482_v18  ;;  %v10486_v18 = vld [vmem:[#allocation149_spill] sm:$0xff]  ;;  %v10487_v29 = vld [vmem:[#allocation158_spill] sm:$0xff]  ;;  %v2776_v15 = vpack.c.bf16 %v3926_v22, %v7840_v6 }
 0x3ed   : > { %v7876_v46 = vpop.eup %3929  ;;  %v2573_v19 = vadd.f32 %v7853_v8, %v2572_v1  ;;  %v10488_v21 = vld [vmem:[#allocation138_spill] sm:$0xff]  ;;  %3947 = vpow2.f32 %v1514_v59  ;;  %v2768_v59 = vpack.c.bf16 %v7747_v0, %v7718_v53  ;;  %v2763_v53 = vpack.c.bf16 %v7683_v17, %v7652_v36 }
 0x3ee   : > { %v3932_v30 = vpop.eup %3931  ;;  %v2436_v33 = vadd.f32 %v3926_v22, %v2435_v52  ;;  %v2505_v55 = vadd.f32 %v7870_v31, %v2504_v20  ;;  %v2693_v52 = vpack.c.bf16 %v10487_v29, %v10486_v18  ;;  %v10490_v18 = vld [vmem:[#allocation135_spill] sm:$0xff]  ;;  %v2772_v22 = vpack.c.bf16 %v7807_v38, %v7777_v25 }
 0x3ef   : > { %2916 = vmatpush2.bf16.msra.mxu0 %v2697_v37  ;;  %v3934_v11 = vpop.eup %3933  ;;  %v2368_v60 = vadd.f32 %v3932_v30, %v2367_v26  ;;  %v2574_v7 = vadd.f32 %v7876_v46, %v2573_v19  ;;  %v10489_v37 = vld [vmem:[#allocation146_spill] sm:$0xff]  ;;  %v10491_v29 = vld [vmem:[#allocation143_spill] sm:$0xff]  ;;  %v2756_v17 = vpack.c.bf16 %v7556_v47, %v7519_v43 }
 0x3f0   : > { %2917 = vmatprep.subr.bf16.mxu0 %v2694_v23  ;;  %v2437_v16 = vadd.f32 %v3934_v11, %v2436_v33  ;;  %v2690_v5 = vpack.c.bf16 %v10489_v37, %v10488_v21  ;;  %v2689_v24 = vpack.c.bf16 %v10491_v29, %v10490_v18  ;;  %v10492_v29 = vld [vmem:[#allocation42_spill] sm:$0xff]  ;;  %v10502_v43 = vld [vmem:[#allocation251_spill] sm:$0xff] }
 0x3f1   : > { %v7887_v1 = vpop.eup %3935  ;;  %v10503_v47 = vld [vmem:[#allocation30_spill] sm:$0xff] }
 0x3f2   : > { %v7893_v50 = vpop.eup %3937  ;;  %v2506_v20 = vadd.f32 %v7887_v1, %v2505_v55 }
 0x3f3   : > { %v3940_v26 = vpop.eup %3939  ;;  %v2575_v19 = vadd.f32 %v7893_v50, %v2574_v7  ;;  %2918 = vmatpush2.bf16.msra.mxu0 %v2693_v52 }
 0x3f4   : > { %v3942_v23 = vpop.eup %3941  ;;  %v2369_v40 = vadd.f32 %v3940_v26, %v2368_v60  ;;  %2919 = vmatprep.subr.bf16.mxu0 %v2690_v5  ;;  %v2779_v37 = vpack.c.bf16 %v3940_v26, %v3932_v30  ;;  %v2775_v26 = vpack.c.bf16 %v7858_v58, %v7831_v10 }
 0x3f5   : > { %v7899_v54 = vpop.eup %3943  ;;  %v2438_v35 = vadd.f32 %v3942_v23, %v2437_v16  ;;  %v2780_v33 = vpack.c.bf16 %v3942_v23, %v3934_v11 }
 0x3f6   : > { %v7903_v9 = vpop.eup %3945  ;;  %v2370_v55 = vrot.slane %v2369_v40, 4  ;;  %v2507_v21 = vadd.f32 %v7899_v54, %v2506_v20  ;;  %v2781_v7 = vpack.c.bf16 %v7899_v54, %v7887_v1  ;;  %v10555_v54 = vpack.c.bf16 %v7755_v49, %v7725_v39  ;;  %v10566_v1 = vld [vmem:[#allocation71_spill] sm:$0xff] }
 0x3f7   : > { %v2439_v52 = vrot.slane %v2438_v35, 4  ;;  %v2576_v5 = vadd.f32 %v7903_v9, %v2575_v19  ;;  %2862 = vmatprep.subr.bf16.mxu1 %v2780_v33  ;;  %v2782_v16 = vpack.c.bf16 %v7903_v9, %v7893_v50  ;;  %2920 = vmatpush2.bf16.msra.mxu0 %v2689_v24  ;;  %v10553_v9 = vpack.c.bf16 %v7818_v48, %v7784_v42  ;;  %v10562_v48 = vld [vmem:[#allocation90_spill] sm:$0xff]  ;;  %v10568_v49 = vld [vmem:[#allocation47_spill] sm:$0xff] }
 0x3f8   : > { %v2371_v11 = vadd.f32 %v2370_v55, %v2369_v40  ;;  %v2508_v60 = vrot.slane %v2507_v21, 4  ;;  %2863 = vmatpush2.bf16.msra.mxu1 %v2779_v37  ;;  %v10554_v50 = vpack.c.bf16 %v7762_v13, %v7732_v27  ;;  %v10565_v27 = vld [vmem:[#allocation72_spill] sm:$0xff] }
 0x3f9   : > { %v2440_v23 = vadd.f32 %v2439_v52, %v2438_v35  ;;  %v2577_v18 = vrot.slane %v2576_v5, 4  ;;  %2864 = vmatprep.subr.bf16.mxu1 %v2776_v15  ;;  %v10567_v39 = vpack.c.bf16 %v10565_v27, %v10566_v1 }
 0x3fa   : > { %v2372_v30 = vrot.slane %v2371_v11, 2  ;;  %v2509_v20 = vadd.f32 %v2508_v60, %v2507_v21  ;;  %2922 = vmatmul.mubr.bf16.vlgmr.msra.gmra.mxu0 %v10492_v29  ;;  %v2771_v21 = vpack.c.bf16 %v7800_v3, %v7770_v63  ;;  %v2764_v3 = vpack.c.bf16 %v7689_v14, %v7658_v32 }
 0x3fb   : > { %v2441_v19 = vrot.slane %v2440_v23, 2  ;;  %v2578_v6 = vadd.f32 %v2577_v18, %v2576_v5  ;;  %v10493_v18 = vld [vmem:[#allocation260_spill] sm:$0xff]  ;;  %v2759_v32 = vpack.c.bf16 %v7615_v61, %v7581_v62  ;;  %v10497_v62 = vld [vmem:[#allocation65_spill] sm:$0xff] }
 0x3fc   : > { %v2373_v24 = vadd.f32 %v2372_v30, %v2371_v11  ;;  %v2510_v40 = vrot.slane %v2509_v20, 2  ;;  %2865 = vmatpush2.bf16.msra.mxu1 %v2775_v26  ;;  %v2767_v11 = vpack.c.bf16 %v7740_v2, %v7711_v56  ;;  %v7931_v26 = vpop.eup %3947  ;;  %v2305_v56 = vld [vmem:[#allocation3] sm:$0xf] }
 0x3fd   : > { %v2442_v33 = vadd.f32 %v2441_v19, %v2440_v23  ;;  %v2579_v35 = vrot.slane %v2578_v6, 2  ;;  %2866 = vmatprep.subr.bf16.mxu1 %v2772_v22  ;;  %v2306_v14 = vmul.f32 %v7931_v26, %v2305_v56  ;;  %v3432_v22 = vld [vmem:[%s4156_s29 + $0x18] ss:$16 sps:$4 sm:$0xff]  }
 0x3fe   : > { %v2374_v55 = vrot.slane %v2373_v24, 1  ;;  %v2511_v37 = vadd.f32 %v2510_v40, %v2509_v20  ;;  %v2760_v20 = vpack.c.bf16 %v7624_v4, %v7590_v57  ;;  %v10494_v4 = vld [vmem:[#allocation253_spill] sm:$0xff]  ;;  %v10500_v40 = vld [vmem:[#allocation46_spill] sm:$0xff]  ;;  %v10535_v19 = vld [vmem:[#allocation32_spill] sm:$0xff] }
 0x3ff   : > { %v2443_v10 = vrot.slane %v2442_v33, 1  ;;  %v2580_v58 = vadd.f32 %v2579_v35, %v2578_v6  ;;  %v2755_v29 = vpack.c.bf16 %v10494_v4, %v7510_v45  ;;  %v10496_v6 = vld [vmem:[#allocation70_spill] sm:$0xff]  ;;  %v10504_v35 = vpack.c.bf16 %v10502_v43, %v10503_v47  ;;  %v10533_v4 = vld [vmem:[#allocation233_spill] sm:$0xff]  ;;  %v10542_v43 = vld [vmem:[#allocation152_spill] sm:$0xff] }
 0x400   : > { %v2375_v52 = vadd.f32 %v2374_v55, %v2373_v24  ;;  %v2512_v5 = vrot.slane %v2511_v37, 1  ;;  %2867 = vmatpush2.bf16.msra.mxu1 %v2771_v21  ;;  %v10498_v61 = vpack.c.bf16 %v10496_v6, %v10497_v62  ;;  %v10499_v24 = vld [vmem:[#allocation68_spill] sm:$0xff]  ;;  %v10505_v55 = vld [vmem:[#allocation34_spill] sm:$0xff] }
 0x401   : > { %v2444_v25 = vadd.f32 %v2443_v10, %v2442_v33  ;;  %v2581_v38 = vrot.slane %v2580_v58, 1  ;;  %2868 = vmatprep.subr.bf16.mxu1 %v2768_v59  ;;  %v10501_v33 = vpack.c.bf16 %v10499_v24, %v10500_v40  ;;  %v10506_v45 = vld [vmem:[#allocation94_spill] sm:$0xff]  ;;  %v10536_v6 = vld [vmem:[#allocation28_spill] sm:$0xff]  ;;  %v10539_v24 = vld [vmem:[#allocation229_spill] sm:$0xff] }
 0x402   : > { %v2513_v15 = vadd.f32 %v2512_v5, %v2511_v37  ;;  %v10507_v37 = vpack.c.bf16 %v10505_v55, %v10506_v45  ;;  %v3949_v21 = vld [vmem:[%s4156_s29 + $0x1c] ss:$16 sps:$4 sm:$0xff]   ;;  %v10512_v5 = vld [vmem:[#allocation99_spill] sm:$0xff]  ;;  %v10537_v62 = vpack.c.bf16 %v10535_v19, %v10536_v6 }
 0x403   : > { %v2582_v60 = vadd.f32 %v2581_v38, %v2580_v58  ;;  %v2587_v23 = vcombine.low %v2375_v52, %v2444_v25  ;;  %v10508_v10 = vld [vmem:[#allocation250_spill] sm:$0xff]  ;;  %v10509_v58 = vld [vmem:[#allocation107_spill] sm:$0xff] }
 0x404   : > { %2869 = vmatpush2.bf16.msra.mxu1 %v2767_v11  ;;  %v10510_v59 = vpack.c.bf16 %v10508_v10, %v10509_v58  ;;  %v10511_v52 = vld [vmem:[#allocation26_spill] sm:$0xff]  ;;  %v10545_v55 = vld [vmem:[#allocation219_spill] sm:$0xff]  ;;  %v10550_v58 = vpack.c.bf16 %v7876_v46, %v7853_v8 }
 0x405   : > { %v2588_v63 = vcombine.low %v2513_v15, %v2582_v60  ;;  %v2595_v30 = vrot.slane %v2587_v23, %v10493_v18  ;;  %2870 = vmatprep.subr.bf16.mxu1 %v2764_v3  ;;  %v10513_v25 = vpack.c.bf16 %v10511_v52, %v10512_v5  ;;  %v10514_v38 = vld [vmem:[#allocation22_spill] sm:$0xff]  ;;  %v10517_v60 = vld [vmem:[#allocation48_spill] sm:$0xff]  ;;  %v10552_v52 = vpack.c.bf16 %v7826_v34, %v7791_v44  ;;  %v10557_v8 = vld [vmem:[#allocation147_spill] sm:$0xff] }
 0x406   : > { %v10515_v15 = vld [vmem:[#allocation110_spill] sm:$0xff]  ;;  %v10558_v44 = vpack.c.bf16 %v7697_v51, %v10557_v8  ;;  %v10559_v34 = vld [vmem:[#allocation73_spill] sm:$0xff]  ;;  %v10563_v46 = vld [vmem:[#allocation139_spill] sm:$0xff] }
 0x407   : > { %v2602_v0 = vrot.slane %v2588_v63, %v10493_v18  ;;  %v10516_v11 = vpack.c.bf16 %v10514_v38, %v10515_v15  ;;  %v10518_v23 = vld [vmem:[#allocation102_spill] sm:$0xff]  ;;  %v10520_v63 = vld [vmem:[#allocation247_spill] sm:$0xff]  ;;  %v10564_v13 = vpack.c.bf16 %v10562_v48, %v10563_v46 }
 0x408   : > { %2871 = vmatpush2.bf16.msra.mxu1 %v2763_v53  ;;  %v10519_v3 = vpack.c.bf16 %v10517_v60, %v10518_v23  ;;  %v10523_v53 = vld [vmem:[#allocation18_spill] sm:$0xff] }
 0x409   : > { %v2603_v2 = vcombine.low %v2595_v30, %v2602_v0  ;;  %2872 = vmatprep.subr.bf16.mxu1 %v2760_v20  ;;  %v10524_v0 = vld [vmem:[#allocation126_spill] sm:$0xff] }
 0x40a   : > { %v10525_v20 = vpack.c.bf16 %v10523_v53, %v10524_v0  ;;  %v10526_v56 = vld [vmem:[#allocation10_spill] sm:$0xff]  ;;  %v2619_v53 = vld [vmem:[#allocation4] sm:$0xff] }
 0x40b   : > { %v2610_v36 = vrot.slane %v2603_v2, %v10493_v18  ;;  %v10521_v18 = vld [vmem:[#allocation115_spill] sm:$0xff]  ;;  %v10527_v2 = vld [vmem:[#allocation36_spill] sm:$0xff]  ;;  %v10574_v5 = vld [vmem:[#allocation254_spill] sm:$0xff] }
 0x40c   : > { %2873 = vmatpush2.bf16.msra.mxu1 %v2759_v32  ;;  %v10522_v30 = vpack.c.bf16 %v10520_v63, %v10521_v18  ;;  %v10528_v32 = vpack.c.bf16 %v10526_v56, %v10527_v2  ;;  %v10577_v60 = vld [vmem:[#allocation262_spill] sm:$0xff]  ;;  %v10578_v63 = vld [vmem:[#allocation263_spill] sm:$0xff] }
 0x40d   : > { %v2612_v57 = vadd.f32 %v2610_v36, %v2306_v14  ;;  %2874 = vmatprep.subr.bf16.mxu1 %v2756_v17  ;;  %v10529_v14 = vld [vmem:[#allocation245_spill] sm:$0xff]  ;;  %v10530_v36 = vld [vmem:[#allocation243_spill] sm:$0xff]  ;;  %v2630_v23 = vrot.slane %v7931_v26, %v10577_v60  ;;  %v2634_v18 = vrot.slane %v7931_v26, %v10578_v63 }
 0x40e   : > { %v10531_v17 = vpack.c.bf16 %v10529_v14, %v10530_v36 }
 0x40f   : > { %2617 = vst.msk [vmem:[#allocation3] sm:$0xf] %vm6572_vm3, %v2612_v57  ;;  %v10532_v57 = vld [vmem:[#allocation240_spill] sm:$0xff]  ;;  %v2648_v36 = vmul.f32 %v2634_v18, %v2619_v53 }
 0x410   : > { %2875 = vmatpush2.bf16.msra.mxu1 %v2755_v29  ;;  %v10534_v29 = vpack.c.bf16 %v10532_v57, %v10533_v4  ;;  %v2623_v4 = vld [vmem:[#allocation4 + $0x20] sm:$0xff] }
 0x411   : > { %2876 = vmatprep.subr.bf16.mxu1 %v10498_v61  ;;  %v10538_v61 = vld [vmem:[#allocation157_spill] sm:$0xff] }
 0x412   : > { %v10540_v40 = vpack.c.bf16 %v10538_v61, %v10539_v24  ;;  %v2652_v24 = vmul.f32 %v2634_v18, %v2623_v4 }
 0x414   : > { %2877 = vmatpush2.bf16.msra.mxu1 %v10501_v33  ;;  %v10541_v33 = vld [vmem:[#allocation230_spill] sm:$0xff] }
 0x415   : > { %2932 = vmatprep.subr.bf16.mxu1 %v10504_v35  ;;  %v10543_v47 = vpack.c.bf16 %v10541_v33, %v10542_v43  ;;  %v10544_v35 = vld [vmem:[#allocation226_spill] sm:$0xff] }
 0x416   : > { %v10546_v45 = vpack.c.bf16 %v10544_v35, %v10545_v55  ;;  %v10579_v35 = vld [vmem:[#allocation264_spill] sm:$0xff] }
 0x417   : > { %2879 = vmatmul.mubr.bf16.vlgmr.msra.gmra.mxu1 %v3432_v22  ;;  %v2638_v55 = vrot.slane %v7931_v26, %v10579_v35 }
 0x418   : > { %2933 = vmatpush1.bf16.msra.mxu1 %v10507_v37  ;;  %2964 = vmatprep.mubr.bf16.mxu1 %v3949_v21  ;;  %v10547_v37 = vld [vmem:[#allocation224_spill] sm:$0xff]  ;;  %v10548_v21 = vld [vmem:[#allocation217_spill] sm:$0xff] }
 0x419   : > { %2934 = vmatprep.subr.bf16.mxu1 %v10510_v59  ;;  %v10549_v10 = vpack.c.bf16 %v10547_v37, %v10548_v21  ;;  %v10551_v59 = vpack.c.bf16 %v7870_v31, %v7849_v28  ;;  %v10556_v28 = vpack.c.bf16 %v7703_v41, %v7675_v12  ;;  %v10560_v31 = vld [vmem:[#allocation255_spill] sm:$0xff]  ;;  %v10580_v37 = vld [vmem:[#allocation265_spill] sm:$0xff] }
 0x41a   : > { %v10561_v42 = vpack.c.bf16 %v10559_v34, %v10560_v31  ;;  %v10571_v41 = vld [vmem:[#allocation43_spill] sm:$0xff]  ;;  %v2642_v21 = vrot.slane %v7931_v26, %v10580_v37 }
 0x41c   : > { %2935 = vmatpush1.bf16.msra.mxu1 %v10513_v25  ;;  %v10575_v25 = vld [vmem:[#allocation38_spill] sm:$0xff] }
 0x41d   : > { %2936 = vmatprep.subr.bf16.mxu1 %v10516_v11  ;;  %v10576_v38 = vpack.c.bf16 %v10574_v5, %v10575_v25 }
 0x420   : > { %2937 = vmatpush1.bf16.msra.mxu1 %v10519_v3  ;;  %v2618_v3 = vld [vmem:[#allocation4 + $0x30] sm:$0xff] }
 0x421   : > { %2938 = vmatprep.subr.bf16.mxu1 %v10522_v30 }
 0x424   : > { %2939 = vmatpush1.bf16.msra.mxu1 %v10525_v20  ;;  %v2647_v20 = vmul.f32 %v2630_v23, %v2618_v3 }
 0x425   : > { %2940 = vmatprep.subr.bf16.mxu1 %v10528_v32  ;;  %v2622_v32 = vld [vmem:[#allocation4 + $0x8] sm:$0xff] }
 0x426   : > { %v2651_v19 = vmul.f32 %v2630_v23, %v2622_v32 }
 0x428   : > { %2941 = vmatpush1.bf16.msra.mxu1 %v10531_v17 }
 0x429   : > { %2942 = vmatprep.subr.bf16.mxu1 %v10534_v29 }
 0x42c   : > { %2943 = vmatpush1.bf16.msra.mxu1 %v10537_v62 }
 0x42d   : > { %2944 = vmatprep.subr.bf16.mxu1 %v10540_v40 }
 0x430   : > { %2945 = vmatpush1.bf16.msra.mxu1 %v10543_v47 }
 0x431   : > { %2946 = vmatprep.subr.bf16.mxu1 %v10546_v45  ;;  %v2620_v45 = vld [vmem:[#allocation4 + $0x18] sm:$0xff] }
 0x434   : > { %2947 = vmatpush1.bf16.msra.mxu1 %v10549_v10 }
 0x435   : > { %2948 = vmatprep.subr.bf16.mxu1 %v2782_v16  ;;  %v10572_v16 = vld [vmem:[#allocation252_spill] sm:$0xff] }
 0x436   : > { %v10573_v51 = vpack.c.bf16 %v10571_v41, %v10572_v16 }
 0x438   : > { %2949 = vmatpush2.bf16.msra.mxu1 %v2781_v7  ;;  %v10569_v7 = vld [vmem:[#allocation131_spill] sm:$0xff] }
 0x439   : > { %2950 = vmatprep.subr.bf16.mxu1 %v10550_v58  ;;  %v10570_v12 = vpack.c.bf16 %v10568_v49, %v10569_v7  ;;  %v2621_v58 = vld [vmem:[#allocation4 + $0x10] sm:$0xff] }
 0x43a   : > { %v2650_v8 = vmul.f32 %v2642_v21, %v2621_v58 }
 0x43c   : > { %2951 = vmatpush2.bf16.msra.mxu1 %v10551_v59 }
 0x43d   : > { %2952 = vmatprep.subr.bf16.mxu1 %v10552_v52  ;;  %v2649_v52 = vmul.f32 %v2638_v55, %v2620_v45 }
 0x440   : > { %2953 = vmatpush2.bf16.msra.mxu1 %v10553_v9 }
 0x441   : > { %2954 = vmatprep.subr.bf16.mxu1 %v10554_v50 }
 0x444   : > { %2955 = vmatpush2.bf16.msra.mxu1 %v10555_v54  ;;  %v2624_v54 = vld [vmem:[#allocation4 + $0x28] sm:$0xff] }
 0x445   : > { %2956 = vmatprep.subr.bf16.mxu1 %v10556_v28  ;;  %v2653_v46 = vmul.f32 %v2638_v55, %v2624_v54 }
 0x448   : > { %2957 = vmatpush2.bf16.msra.mxu1 %v10558_v44 }
 0x449   : > { %2958 = vmatprep.subr.bf16.mxu1 %v10561_v42  ;;  %v2625_v42 = vld [vmem:[#allocation4 + $0x38] sm:$0xff] }
 0x44a   : > { %v2654_v1 = vmul.f32 %v2642_v21, %v2625_v42 }
 0x44c   : > { %2959 = vmatpush2.bf16.msra.mxu1 %v10564_v13 }
 0x44d   : > { %2960 = vmatprep.subr.bf16.mxu1 %v10567_v39 }
 0x450   : > { %2961 = vmatpush2.bf16.msra.mxu1 %v10570_v12 }
 0x451   : > { %2962 = vmatprep.subr.bf16.mxu1 %v10573_v51 }
 0x454   : > { %2963 = vmatpush2.bf16.msra.mxu1 %v10576_v38 }
 0x457   : > { %2965 = vmatmul.mubr.bf16.vlgmr.msra.gmra.mxu1 %v3432_v22 }
 0x474   : > { %v2837_v15 = vpop.f32.mrf.mxu0 }
 0x476   : > { %v2839_v11 = vpop.f32.mrf.mxu0 }
 0x478   : > { %v2841_v0 = vpop.f32.mrf.mxu0 }
 0x47a   : > { %v2843_v57 = vpop.f32.mrf.mxu0 }
 0x4ba   : > { %v2923_v43 = vpop.f32.mrf.mxu0 }
 0x4bc   : > { %v2925_v47 = vpop.f32.mrf.mxu0 }
 0x4be   : > { %v2927_v59 = vpop.f32.mrf.mxu0 }
 0x4c0   : > { %v2929_v31 = vpop.f32.mrf.mxu0 }
 0x4d7   : > { %v2880_v30 = vpop.f32.mrf.mxu1 }
 0x4d8   : > { %v2881_v56 = vadd.f32 %v2880_v30, %v2837_v15 }
 0x4d9   : > { %v2882_v2 = vpop.f32.mrf.mxu1 }
 0x4da   : > { %v2975_v14 = vadd.f32 %v2881_v56, %v2647_v20  ;;  %v2883_v17 = vadd.f32 %v2882_v2, %v2839_v11 }
 0x4db   : > { %v2884_v22 = vpop.f32.mrf.mxu1 }
 0x4dc   : > { %2983 = vst [vmem:[#allocation4 + $0x30] sm:$0xff] %v2975_v14  ;;  %v2976_v29 = vadd.f32 %v2883_v17, %v2648_v36  ;;  %v2885_v6 = vadd.f32 %v2884_v22, %v2841_v0 }
 0x4dd   : > { %v2886_v62 = vpop.f32.mrf.mxu1 }
 0x4de   : > { %2984 = vst [vmem:[#allocation4] sm:$0xff] %v2976_v29  ;;  %v2979_v61 = vadd.f32 %v2885_v6, %v2651_v19  ;;  %v2887_v40 = vadd.f32 %v2886_v62, %v2843_v57 }
 0x4e0   : > { %2987 = vst [vmem:[#allocation4 + $0x8] sm:$0xff] %v2979_v61  ;;  %v2980_v33 = vadd.f32 %v2887_v40, %v2652_v24 }
 0x4e2   : > { %2988 = vst [vmem:[#allocation4 + $0x20] sm:$0xff] %v2980_v33 }
 0x517   : > { %v2966_v10 = vpop.f32.mrf.mxu1 }
 0x518   : > { %v2967_v9 = vadd.f32 %v2966_v10, %v2923_v43 }
 0x519   : > { %v2968_v50 = vpop.f32.mrf.mxu1 }
 0x51a   : > { %v2977_v28 = vadd.f32 %v2967_v9, %v2649_v52  ;;  %v2969_v44 = vadd.f32 %v2968_v50, %v2925_v47 }
 0x51b   : > { %v2970_v34 = vpop.f32.mrf.mxu1 }
 0x51c   : > { %2985 = vst [vmem:[#allocation4 + $0x18] sm:$0xff] %v2977_v28  ;;  %v2978_v48 = vadd.f32 %v2969_v44, %v2650_v8  ;;  %v2971_v13 = vadd.f32 %v2970_v34, %v2927_v59 }
 0x51d   : > { %v2972_v27 = vpop.f32.mrf.mxu1 }
 0x51e   : > { %2986 = vst [vmem:[#allocation4 + $0x10] sm:$0xff] %v2978_v48  ;;  %v2981_v26 = vadd.f32 %v2971_v13, %v2653_v46  ;;  %v2973_v39 = vadd.f32 %v2972_v27, %v2929_v31  ;;  %2995 = sbr.rel (%p3328_p2) target bundleno = 1340 (0x53c), region = 63 }
 0x520   : > { %2989 = vst [vmem:[#allocation4 + $0x28] sm:$0xff] %v2981_v26  ;;  %v2982_v49 = vadd.f32 %v2973_v39, %v2654_v1 }
 0x522   : > { %2990 = vst [vmem:[#allocation4 + $0x38] sm:$0xff] %v2982_v49 }
 0x523   : > { %v2996_v7 = vld [vmem:[#allocation3] sm:$0xf]  ;;  %v3035_v12 = vld [vmem:[%s4148_s12] sm:$0xff]  ;;  %v3036_v41 = vld [vmem:[%s4148_s12 + $0x8] sm:$0xff] }
 0x524   : > { %3950 = vrcp.f32 %v2996_v7  ;;  %v2998_v16 = vld [vmem:[#allocation4 + $0x30] sm:$0xff]  ;;  %v2999_v51 = vld [vmem:[#allocation4] sm:$0xff]  ;;  %v3038_v25 = vld [vmem:[%s4148_s12 + $0x18] sm:$0xff]  ;;  %v3039_v15 = vunpack.c.l.bf16 %v3035_v12  ;;  %v3040_v11 = vunpack.c.h.bf16 %v3035_v12  ;;  %v3041_v3 = vunpack.c.l.bf16 %v3036_v41 }
 0x525   : > { %v3037_v5 = vld [vmem:[%s4148_s12 + $0x10] sm:$0xff]  ;;  %v3000_v60 = vld [vmem:[#allocation4 + $0x18] sm:$0xff]  ;;  %v3042_v63 = vunpack.c.h.bf16 %v3036_v41  ;;  %v3002_v18 = vld [vmem:[#allocation4 + $0x8] sm:$0xff]  ;;  %v3045_v29 = vunpack.c.l.bf16 %v3038_v25  ;;  %v3046_v19 = vunpack.c.h.bf16 %v3038_v25 }
 0x526   : > { %v3001_v23 = vld [vmem:[#allocation4 + $0x10] sm:$0xff]  ;;  %v10582_v0 = vld [vmem:[#allocation263_spill] sm:$0xff]  ;;  %v10583_v56 = vld [vmem:[#allocation264_spill] sm:$0xff]  ;;  %v3043_v57 = vunpack.c.l.bf16 %v3037_v5  ;;  %v3044_v4 = vunpack.c.h.bf16 %v3037_v5 }
 0x527   : > { %v10581_v30 = vld [vmem:[#allocation262_spill] sm:$0xff]  ;;  %v10584_v32 = vld [vmem:[#allocation265_spill] sm:$0xff]  ;;  %v3003_v36 = vld [vmem:[#allocation4 + $0x20] sm:$0xff] }
 0x528   : > { %v3004_v17 = vld [vmem:[#allocation4 + $0x28] sm:$0xff] }
 0x529   : > { %v3005_v22 = vld [vmem:[#allocation4 + $0x38] sm:$0xff] }
 0x531   : > { %v3951_v38 = vpop.eup %3950 }
 0x532   : > { %v3010_v53 = vrot.slane %v3951_v38, %v10581_v30  ;;  %v3014_v20 = vrot.slane %v3951_v38, %v10582_v0  ;;  %v3018_v2 = vrot.slane %v3951_v38, %v10583_v56  ;;  %v3022_v14 = vrot.slane %v3951_v38, %v10584_v32 }
 0x534   : > { %v3027_v6 = vmul.f32 %v3010_v53, %v2998_v16  ;;  %v3028_v62 = vmul.f32 %v3014_v20, %v2999_v51  ;;  %v3029_v61 = vmul.f32 %v3018_v2, %v3000_v60  ;;  %v3030_v24 = vmul.f32 %v3022_v14, %v3001_v23 }
 0x535   : > { %v3031_v40 = vmul.f32 %v3010_v53, %v3002_v18  ;;  %v3032_v33 = vmul.f32 %v3014_v20, %v3003_v36  ;;  %v3033_v43 = vmul.f32 %v3018_v2, %v3004_v17  ;;  %v3034_v47 = vmul.f32 %v3022_v14, %v3005_v22 }
 0x536   : > { %v3047_v35 = vadd.f32 %v3039_v15, %v3027_v6  ;;  %v3048_v55 = vadd.f32 %v3040_v11, %v3028_v62  ;;  %v3049_v45 = vadd.f32 %v3041_v3, %v3029_v61  ;;  %v3050_v37 = vadd.f32 %v3042_v63, %v3030_v24 }
 0x537   : > { %v3051_v21 = vadd.f32 %v3043_v57, %v3031_v40  ;;  %v3052_v10 = vadd.f32 %v3044_v4, %v3032_v33  ;;  %v3053_v58 = vadd.f32 %v3045_v29, %v3033_v43  ;;  %v3054_v59 = vadd.f32 %v3046_v19, %v3034_v47 }
 0x538   : > { %v3340_v52 = vpack.c.bf16 %v3048_v55, %v3047_v35  ;;  %v3341_v9 = vpack.c.bf16 %v3050_v37, %v3049_v45 }
 0x539   : > { %v3342_v50 = vpack.c.bf16 %v3052_v10, %v3051_v21  ;;  %v3343_v54 = vpack.c.bf16 %v3054_v59, %v3053_v58 }
 0x53a   : > { %3079 = vst [vmem:[%s4150_s25] sm:$0xff] %v3340_v52  ;;  %3080 = vst [vmem:[%s4150_s25 + $0x8] sm:$0xff] %v3341_v9 }
 0x53b   : > { %3081 = vst [vmem:[%s4150_s25 + $0x10] sm:$0xff] %v3342_v50  ;;  %3082 = vst [vmem:[%s4150_s25 + $0x18] sm:$0xff] %v3343_v54 }
 0x53c PF: > { %3089 = sbr.rel (!%p4110_p6) target bundleno = 1348 (0x544), region = 67  ;;  %s3334_s14 = sshll.u32 (%p4110_p6), %s4002_s15, 2 }
 0x53d   : > { %s3335_s24 = sshll.u32 (%p4110_p6), %s4006_s16, 4 }
 0x53e   : > { %s3092_s30 = sadd.s32 (%p4110_p6), %s3335_s24, %s3334_s14 }
 0x53f   : > { %s3336_s5 = sshll.u32 (%p4110_p6), %s3092_s30, 2 }
 0x540   : > { %s3094_s8 = scalar_lea.vmem (%p4110_p6), %s8109_s3, %s3336_s5 }
 0x541   : > { %v3107_v28 = vld [vmem:[%s4150_s25] sm:$0xff]  ;;  %v3109_v8 = vld [vmem:[%s4150_s25 + $0x8] sm:$0xff] }
 0x542   : > { %v3111_v44 = vld [vmem:[%s4150_s25 + $0x10] sm:$0xff]  ;;  %v3113_v34 = vld [vmem:[%s4150_s25 + $0x18] sm:$0xff]  ;;  %3108 = vst [vmem:[%s3094_s8] sm:$0xff] %v3107_v28  ;;  %3110 = vst [vmem:[%s3094_s8 + $0x8] sm:$0xff] %v3109_v8 }
 0x543   : > { %3112 = vst [vmem:[%s3094_s8 + $0x20] sm:$0xff] %v3111_v44  ;;  %3114 = vst [vmem:[%s3094_s8 + $0x28] sm:$0xff] %v3113_v34 }
 0x544 PF: > { %s13_s20 = sadd.s32 1, %s4022_s20   ;;  %s10585_s26 = sld [smem:[#allocation7_spill]] }
 0x545   : > { %p10_p3 = scmp.ge.s32.totalorder %s13_s20, 10   ;;  %s10586_s12 = smov %s3994_s13 }
 0x546   : > { %s10587_s13 = smov %s4122_s4  ;;  %s10588_s14 = smov %s4010_s17 }
 0x547   : > { %s10589_s15 = smov %s4014_s18  ;;  %s10590_s16 = smov %s4018_s19 }
 0x548   : > { %s10591_s17 = smov %s10595_s21  ;;  %s10592_s18 = smov %s10599_s22 }
 0x549   :  { %12 = sbr.rel (!%p10_p3) target bundleno = 7 (0x7), region = 128 }
 0x54a   : > { %s10593_s19 = smov %s10585_s26 }

// kernel: attention_decoder_forward.5
= control target key start
LH: loop header
LB: loop body
LE: loop exit
PB: predicated region body
PF: predicated region fallthrough
CT: control target
= control target key end

     0   :  { %s1846_s12 = smov 0   ;;  %s1848_s13 = smov 0   ;;  %s2185_s0 = inlined_call_operand.vmem [shape: bf16[2,2,16,578], index: 0, kind: input, shape index: {}]   ;;  %s2186_s1 = inlined_call_operand.vmem [shape: bf16[9,8,16], index: 1, kind: input, shape index: {}]   ;;  %s2187_s2 = inlined_call_operand.vmem [shape: f32[8,1], index: 2, kind: input, shape index: {}]   ;;  %s2188_s3 = inlined_call_operand.vmem [shape: f32[2,8,1024], index: 3, kind: output, shape index: {}]  }
   0x1   :  { %s1850_s14 = smov 0   ;;  %s1852_s15 = smov 0  }
   0x2   :  { %s1854_s16 = smov 0  }
   0x3 LB: > { %s22_s17 = sadd.s32 1, %s1803_s14  ;;  %s25_s18 = sadd.s32 1, %s1807_s15  ;;  %s1811_s16 = sphi %s1854_s16, %s13_s16   ;;  %s1807_s15 = sphi %s1852_s15, %s2200_s15   ;;  %s1803_s14 = sphi %s1850_s14, %s2199_s14   ;;  %s1799_s13 = sphi %s1848_s13, %s2198_s13   ;;  %s1795_s12 = sphi %s1846_s12, %s2197_s12  }
   0x4   : > { %p23_p0 = scmp.ge.s32.totalorder %s22_s17, 2  ;;  %p1645_p1 = scmp.ge.s32.totalorder %s1811_s16, 1 }
   0x5   : > { %p157_p2 = scmp.lt.s32.totalorder %s1811_s16, 5 }
   0x6   : > { %s2202_s17 = smov (%p23_p0, %s22_s17), 0  ;;  %s2204_s18 = smov (!%p23_p0, %s25_s18), %s1807_s15 }
   0x7   : > { %p158_p3 = pnand %p1645_p1, %p157_p2  ;;  %p27_p4 = scmp.ge.s32.totalorder %s2204_s18, 2 }
   0x8   : > { %p189_p5 = scmp.lt.s32.totalorder (!%p158_p3), %s1799_s13, 1  ;;  %p191_p6 = scmp.lt.s32.totalorder (!%p158_p3), %s1795_s12, 1 }
   0x9   : > { %s2206_s18 = smov (%p27_p4, %s2204_s18), 0  ;;  %161 = sbr.rel (%p158_p3) target bundleno = 536 (0x218), region = 32 }
   0xa   : > { %s1814_s21 = smov (!%p158_p3), 2   ;;  %s1815_s23 = smov (!%p158_p3), 32  }
   0xb   : > { %s1816_s26 = smov (!%p158_p3), 34   ;;  %s1817_s30 = smov (!%p158_p3), 64  }
   0xc   : > { %s1818_s4 = smov (!%p158_p3), 66   ;;  %s1819_s5 = smov (!%p158_p3), 127  }
   0xd   : > { %s1820_s6 = smov (!%p158_p3), 95   ;;  %s1821_s7 = smov (!%p158_p3), 126  }
   0xe   : > { %v217_v0 = vlaneseq  ;;  %v1813_v1 = vmov 0   ;;  %s2208_s13 = smov (!%p189_p5, %s1799_s13), 1  ;;  %vm721_vm12 = vcmask 261120   ;;  %vm568_vm13 = vcmask 15360   ;;  %s1822_s8 = smov 96  }
   0xf   : > { %379 = vmatprep.mubr.bf16.mxu0 %v1813_v1  ;;  %420 = vmatprep.mubr.bf16.mxu1 %v1813_v1  ;;  %s192_s19 = scalar_select %p191_p6, %s1795_s12, 1  ;;  %vm570_vm14 = vcmask 1043456  }
  0x10   : > { %v218_v2 = vand.u32 127, %v217_v0  ;;  %1767 = vset.pattern.permute.xlu0 %v1813_v1  ;;  %s1713_s20 = smul.u32 20, %s2208_s13  ;;  %s1823_s11 = smov 94  }
  0x11   : > { %s1712_s22 = smul.u32 10, %s192_s19  ;;  %s1647_s19 = sshll.u32 %s1795_s12, 2 }
  0x12   : > { %v219_v3 = vadd.s32 128, %v218_v2  ;;  %v226_v4 = vand.u32 31, %v218_v2  ;;  %v220_v5 = vadd.s32 256, %v218_v2  ;;  %v221_v6 = vadd.s32 384, %v218_v2  ;;  %p201_p7 = scmp.lt.s32.totalorder %s1647_s19, 7 }
  0x13   : > { %s195_s24 = sadd.s32 %s1713_s20, %s1712_s22  ;;  %s1825_s22 = smov 62  }
  0x14   : > { %v233_v7 = vand.u32 31, %v219_v3  ;;  %v534_v8 = vadd.s32 1, %v226_v4  ;;  %v270_v9 = vadd.s32 4294967295, %v226_v4  ;;  %v240_v10 = vand.u32 31, %v220_v5  ;;  %s1646_s25 = sshll.u32 %s195_s24, 2  ;;  %s2210_s19 = smov (!%p201_p7, %s1647_s19), 7 }
  0x15   : > { %v247_v11 = vand.u32 31, %v221_v6  ;;  %s197_s29 = scalar_lea.vmem %s2185_s0, %s1646_s25  ;;  %s1648_s20 = sshll.u32 %s2208_s13, 3 }
  0x16   : > { %v535_v12 = vadd.s32 1, %v233_v7  ;;  %vm542_vm0 = vcmp.lt.s32.totalorder %v534_v8, 32  ;;  %v271_v13 = vadd.s32 4294967295, %v233_v7  ;;  %vm274_vm1 = vcmp.ge.s32.totalorder %v270_v9, 0  ;;  %v1914_v24 = vld [vmem:[%s197_s29] sm:$0xff]  ;;  %v1916_v25 = vld [vmem:[%s197_s29 + $0x14] sm:$0xff]  ;;  %s204_s12 = sadd.s32 %s1648_s20, %s2210_s19 }
  0x17   : > { %v536_v14 = vadd.s32 1, %v240_v10  ;;  %v537_v15 = vadd.s32 1, %v247_v11  ;;  %v272_v16 = vadd.s32 4294967295, %v240_v10  ;;  %v273_v17 = vadd.s32 4294967295, %v247_v11  ;;  %v1918_v26 = vld [vmem:[%s197_s29 + $0x8] sm:$0xff]  ;;  %v1920_v27 = vld [vmem:[%s197_s29 + $0x1c] sm:$0xff] }
  0x18   : > { %vm543_vm2 = vcmp.lt.s32.totalorder %v535_v12, 32  ;;  %vm275_vm3 = vcmp.ge.s32.totalorder %v271_v13, 0  ;;  %v1924_v28 = vcombine.high %v1914_v24, %v1916_v25  ;;  %v1928_v29 = vcombine.low %v1918_v26, %v1920_v27  ;;  %v1930_v30 = vld [vmem:[%s197_s29 + $0x10] sm:$0xf]  ;;  %v1932_v31 = vld [vmem:[%s197_s29 + $0x24] sm:$0xf] }
  0x19   : > { %vm558_vm4 = vmpackc.low %vm543_vm2, %vm542_vm0  ;;  %vm544_vm5 = vcmp.lt.s32.totalorder %v536_v14, 32  ;;  %vm545_vm6 = vcmp.lt.s32.totalorder %v537_v15, 32  ;;  %vm276_vm7 = vcmp.ge.s32.totalorder %v272_v16, 0  ;;  %vm277_vm8 = vcmp.ge.s32.totalorder %v273_v17, 0  ;;  %s1649_s13 = sshll.u32 %s204_s12, 3 }
  0x1a   : > { %v560_v18 = vsel %vm558_vm4, 65537, %v1813_v1  ;;  %vm1893_vm9 = vmpackc.low %vm275_vm3, %vm274_vm1  ;;  %v1937_v32 = vcombine.high %v1918_v26, %v1920_v27  ;;  %v1942_v33 = vcombine.low %v1930_v30, %v1932_v31  ;;  %v1947_v34 = vcombine.low %v1914_v24, %v1916_v25 }
  0x1b   : > { %562 = vrot.lane.b32.xlu0 %v560_v18, %s1814_s21  ;;  %v713_v20 = vsel %vm1893_vm9, 65537, %v1813_v1  ;;  %vm559_vm10 = vmpackc.low %vm545_vm6, %vm544_vm5  ;;  %vm981_vm4 = vcmask 277504   ;;  %vm334_vm5 = vcmask 1039360  }
  0x1c   : > { %715 = vrot.lane.b32.xlu1 %v713_v20, %s1815_s23  ;;  %v561_v21 = vsel %vm559_vm10, 65537, %v1813_v1  ;;  %vm1902_vm11 = vmpackc.low %vm277_vm8, %vm276_vm7  ;;  %vm343_vm8 = vcmask 130048   ;;  %vm1131_vm10 = vcmask 523264  }
  0x1d   : > { %v714_v23 = vsel %vm1902_vm11, 65537, %v1813_v1  ;;  %v297_v14 = vsel %vm1902_vm11, %v1918_v26, 0  ;;  %v299_v17 = vsel %vm1902_vm11, %v1920_v27, 0 }
  0x1e   : > { %v1661_v22 = vcombine.high %v297_v14, %v299_v17 }
  0x1f   : > { %564 = vrot.lane.b32.xlu0 %v561_v21, %s1814_s21  ;;  %s1824_s21 = smov 63  }
  0x20   : > { %717 = vrot.lane.b32.xlu1 %v714_v23, %s1815_s23  ;;  %s206_s23 = scalar_lea.vmem %s2188_s3, %s1649_s13 }
  0x23   : > { %975 = vrot.lane.b32.xlu0 %v560_v18, %s1816_s26 }
  0x24   : > { %977 = vrot.lane.b32.xlu1 %v561_v21, %s1816_s26 }
  0x27   : > { %1125 = vrot.lane.b32.xlu0 %v713_v20, %s1817_s30  ;;  %v298_v20 = vsel %vm1893_vm9, %v1916_v25, 0 }
  0x28   : > { %1127 = vrot.lane.b32.xlu1 %v714_v23, %s1817_s30 }
  0x2b   : > { %1384 = vrot.lane.b32.xlu0 %v560_v18, %s1818_s4  ;;  %v296_v18 = vsel %vm1893_vm9, %v1914_v24, 0 }
  0x2c   : > { %1386 = vrot.lane.b32.xlu1 %v561_v21, %s1818_s4 }
  0x2f   : > { %326 = vrot.lane.b32.xlu0 %v1924_v28, %s1819_s5 }
  0x30   : > { %328 = vrot.lane.b32.xlu1 %v1928_v29, %s1819_s5 }
  0x33   : > { %330 = vrot.lane.b32.xlu0 %v1937_v32, %s1819_s5 }
  0x34   : > { %332 = vrot.lane.b32.xlu1 %v1942_v33, %s1819_s5 }
  0x37   : > { %324 = vrot.lane.b32.xlu0 %v1947_v34, %s1819_s5 }
  0x38   : > { %869 = vrot.lane.b32.xlu1 %v1924_v28, %s1820_s6 }
  0x3b   : > { %871 = vrot.lane.b32.xlu0 %v1928_v29, %s1820_s6 }
  0x8d   : > { %v563_v35 = vpop.permute.xlu0 %562 }
  0x8e   : > { %v716_v36 = vpop.permute.xlu1 %715  ;;  %v566_v38 = vrot.slane %v563_v35, 4 }
  0x8f   : > { %v719_v37 = vrot.slane %v716_v36, 4 }
  0x90   : > { %v569_v44 = vsel %vm568_vm13, %v566_v38, %v563_v35 }
  0x91   : > { %v722_v39 = vsel %vm721_vm12, %v719_v37, %v716_v36  ;;  %v565_v40 = vpop.permute.xlu0 %564  ;;  %vm573_vm2 = vcmp.ne.s16.totalorder %v569_v44, 0  ;;  %v1659_v36 = vcombine.high %v296_v18, %v298_v20 }
  0x92   : > { %v567_v41 = vrot.slane %v565_v40, 4  ;;  %v718_v42 = vpop.permute.xlu1 %717  ;;  %vm725_vm15 = vcmp.ne.s16.totalorder %v722_v39, 0  ;;  %v576_v58 = vsel %vm573_vm2, %v1914_v24, 0  ;;  %v579_v59 = vsel %vm573_vm2, %v1916_v25, 0 }
  0x93   : > { %v720_v43 = vrot.slane %v718_v42, 4  ;;  %v728_v51 = vsel %vm725_vm15, %v1914_v24, 0  ;;  %v731_v52 = vsel %vm725_vm15, %v1916_v25, 0  ;;  %v1666_v63 = vcombine.high %v576_v58, %v579_v59 }
  0x94   : > { %vm575_vm0 = vcmp.ne.s16.totalorder %v567_v41, 0  ;;  %v571_v48 = vsel %vm570_vm14, %v566_v38, %v567_v41  ;;  %v1674_v60 = vcombine.high %v728_v51, %v731_v52  ;;  %v1673_v2 = vcombine.low %v728_v51, %v731_v52 }
  0x95   : > { %v578_v45 = vsel %vm575_vm0, %v1930_v30, 0  ;;  %v581_v46 = vsel %vm575_vm0, %v1932_v31, 0  ;;  %v1959_v47 = vpop.permute.xlu0 %975  ;;  %vm727_vm1 = vcmp.ne.s16.totalorder %v720_v43, 0  ;;  %v572_v55 = vsel %vm568_vm13, %v571_v48, %v565_v40 }
  0x96   : > { %v1669_v49 = vcombine.low %v578_v45, %v581_v46  ;;  %v1962_v50 = vpop.permute.xlu1 %977  ;;  %v730_v53 = vsel %vm727_vm1, %v1930_v30, 0  ;;  %v733_v54 = vsel %vm727_vm1, %v1932_v31, 0  ;;  %vm574_vm3 = vcmp.ne.s16.totalorder %v572_v55, 0  ;;  %v1650_v45 = vld [vmem:[%s2186_s1 + $0x4] sm:$0xf] }
  0x97   : > { %v1677_v56 = vcombine.low %v730_v53, %v733_v54  ;;  %v723_v62 = vsel %vm570_vm14, %v719_v37, %v720_v43  ;;  %v577_v4 = vsel %vm574_vm3, %v1918_v26, 0  ;;  %v580_v5 = vsel %vm574_vm3, %v1920_v27, 0 }
  0x98   : > { %613 = vrot.lane.b32.xlu0 %v1669_v49, %s1821_s7  ;;  %v979_v6 = vrot.slane %v1959_v47, 4  ;;  %v724_v7 = vsel %vm721_vm12, %v723_v62, %v718_v42  ;;  %v1665_v8 = vcombine.low %v576_v58, %v579_v59  ;;  %v1667_v10 = vcombine.low %v577_v4, %v580_v5 }
  0x99   : > { %v1970_v57 = vpop.permute.xlu0 %1125  ;;  %765 = vrot.lane.b32.xlu1 %v1677_v56, %s1822_s8  ;;  %vm726_vm6 = vcmp.ne.s16.totalorder %v724_v7, 0  ;;  %v1668_v15 = vcombine.high %v577_v4, %v580_v5  ;;  %v980_v19 = vrot.slane %v1962_v50, 4  ;;  %v1658_v46 = vcombine.low %v296_v18, %v298_v20 }
  0x9a   : > { %v1974_v61 = vpop.permute.xlu1 %1127  ;;  %v982_v12 = vsel %vm981_vm4, %v979_v6, %v1959_v47  ;;  %v729_v21 = vsel %vm726_vm6, %v1918_v26, 0  ;;  %v732_v23 = vsel %vm726_vm6, %v1920_v27, 0  ;;  %v1129_v47 = vrot.slane %v1970_v57, 4 }
  0x9b   : > { %vm985_vm7 = vcmp.ne.s16.totalorder %v982_v12, 0  ;;  %v1676_v39 = vcombine.high %v729_v21, %v732_v23  ;;  %v1130_v41 = vrot.slane %v1974_v61, 4  ;;  %vm2025_vm9 = vcmp.ne.s16.totalorder %v980_v19, 0 }
  0x9c   : > { %759 = vrot.lane.b32.xlu0 %v1674_v60, %s1822_s8  ;;  %v988_v37 = vsel %vm985_vm7, %v1914_v24, 0  ;;  %v991_v38 = vsel %vm985_vm7, %v1916_v25, 0  ;;  %v1675_v51 = vcombine.low %v729_v21, %v732_v23  ;;  %v1660_v52 = vcombine.low %v297_v14, %v299_v17 }
  0x9d   : > { %v1979_v0 = vpop.permute.xlu0 %1384  ;;  %607 = vrot.lane.b32.xlu1 %v1666_v63, %s1821_s7  ;;  %v1685_v48 = vcombine.high %v988_v37, %v991_v38  ;;  %v983_v53 = vsel %vm570_vm14, %v979_v6, %v980_v19  ;;  %vm2030_vm11 = vcmp.ne.s16.totalorder %v1130_v41, 0  ;;  %v990_v55 = vsel %vm2025_vm9, %v1930_v30, 0 }
  0x9e   : > { %v1981_v3 = vpop.permute.xlu1 %1386  ;;  %v993_v56 = vsel %vm2025_vm9, %v1932_v31, 0  ;;  %v1132_v58 = vsel %vm1131_vm10, %v1129_v47, %v1970_v57  ;;  %v984_v59 = vsel %vm981_vm4, %v983_v53, %v1962_v50  ;;  %v1140_v60 = vsel %vm2030_vm11, %v1930_v30, 0  ;;  %v300_v50 = vld [vmem:[%s2186_s1] sm:$0xf] }
  0x9f   : > { %v1143_v62 = vsel %vm2030_vm11, %v1932_v31, 0  ;;  %v1684_v57 = vcombine.low %v988_v37, %v991_v38  ;;  %vm1135_vm12 = vcmp.ne.s16.totalorder %v1132_v58, 0  ;;  %v1688_v63 = vcombine.low %v990_v55, %v993_v56 }
  0xa0   : > { %757 = vrot.lane.b32.xlu0 %v1673_v2, %s1822_s8  ;;  %vm986_vm13 = vcmp.ne.s16.totalorder %v984_v59, 0  ;;  %v1696_v2 = vcombine.low %v1140_v60, %v1143_v62  ;;  %v1138_v4 = vsel %vm1135_vm12, %v1914_v24, 0  ;;  %v1141_v5 = vsel %vm1135_vm12, %v1916_v25, 0  ;;  %v1672_v60 = vld [vmem:[%s2186_s1 + $0xc] sm:$0xf] }
  0xa1   : > { %v327_v9 = vpop.permute.xlu0 %326  ;;  %605 = vrot.lane.b32.xlu1 %v1665_v8, %s1821_s7  ;;  %v1133_v6 = vsel %vm570_vm14, %v1129_v47, %v1130_v41  ;;  %v989_v7 = vsel %vm986_vm13, %v1918_v26, 0  ;;  %v992_v8 = vsel %vm986_vm13, %v1920_v27, 0  ;;  %v1388_v12 = vrot.slane %v1979_v0, 4 }
  0xa2   : > { %v329_v11 = vpop.permute.xlu1 %328  ;;  %v1686_v14 = vcombine.low %v989_v7, %v992_v8  ;;  %v1692_v17 = vcombine.low %v1138_v4, %v1141_v5  ;;  %vm1390_vm0 = vcmask 539648   ;;  %vm615_vm3 = vcmask 1031168  }
  0xa3   : > { %v336_v13 = vsel %vm334_vm5, %v327_v9, %v329_v11  ;;  %v1391_v23 = vsel %vm1390_vm0, %v1388_v12, %v1979_v0  ;;  %vm767_vm4 = vcmask 785408   ;;  %vm1027_vm6 = vcmask 769024  }
  0xa4   : > { %609 = vrot.lane.b32.xlu0 %v1667_v10, %s1821_s7  ;;  %361 = vmatprep.subr.bf16.mxu0 %v336_v13  ;;  %v1693_v10 = vcombine.high %v1138_v4, %v1141_v5  ;;  %v1389_v13 = vrot.slane %v1981_v3, 4  ;;  %v1680_v5 = vld [vmem:[%s2186_s1 + $0x10] sm:$0xf]  ;;  %vm1286_vm7 = vcmask 515072   ;;  %vm1436_vm9 = vcmask 506880  }
  0xa5   : > { %v331_v16 = vpop.permute.xlu0 %330  ;;  %611 = vrot.lane.b32.xlu1 %v1668_v15, %s1821_s7 }
  0xa6   : > { %v333_v35 = vpop.permute.xlu1 %332  ;;  %v337_v44 = vsel %vm334_vm5, %v329_v11, %v331_v16  ;;  %v1687_v11 = vcombine.high %v989_v7, %v992_v8  ;;  %vm1396_vm2 = vcmp.ne.s16.totalorder %v1389_v13, 0 }
  0xa7   : > { %v338_v43 = vsel %vm334_vm5, %v331_v16, %v333_v35  ;;  %v1399_v37 = vsel %vm1396_vm2, %v1930_v30, 0  ;;  %v1402_v0 = vsel %vm1396_vm2, %v1932_v31, 0 }
  0xa8   : > { %875 = vrot.lane.b32.xlu0 %v1942_v33, %s1820_s6  ;;  %402 = vmatprep.subr.bf16.mxu1 %v338_v43 }
  0xa9   : > { %v325_v40 = vpop.permute.xlu0 %324  ;;  %873 = vrot.lane.b32.xlu1 %v1937_v32, %s1820_s6  ;;  %403 = vmatpush1.bf16.msra.mxu1 %v337_v44  ;;  %v1664_v44 = vld [vmem:[%s2186_s1 + $0x8] sm:$0xf] }
  0xaa   : > { %v335_v42 = vsel %vm334_vm5, %v325_v40, %v327_v9  ;;  %507 = vmatprep.subr.bf16.mxu1 %v1661_v22  ;;  %v1134_v9 = vsel %vm1131_vm10, %v1133_v6, %v1974_v61  ;;  %v1392_v61 = vsel %vm570_vm14, %v1388_v12, %v1389_v13  ;;  %vm1394_vm14 = vcmp.ne.s16.totalorder %v1391_v23, 0  ;;  %v870_v30 = vpop.permute.xlu1 %869 }
  0xab   : > { %362 = vmatpush1.bf16.msra.mxu0 %v335_v42  ;;  %vm1136_vm15 = vcmp.ne.s16.totalorder %v1134_v9, 0  ;;  %v1393_v20 = vsel %vm1390_vm0, %v1392_v61, %v1981_v3  ;;  %v1397_v22 = vsel %vm1394_vm14, %v1914_v24, 0  ;;  %vm877_vm5 = vcmask 777216  }
  0xac   : > { %763 = vrot.lane.b32.xlu0 %v1676_v39, %s1822_s8  ;;  %466 = vmatprep.subr.bf16.mxu0 %v1659_v36  ;;  %v1139_v15 = vsel %vm1136_vm15, %v1918_v26, 0  ;;  %v1142_v16 = vsel %vm1136_vm15, %v1920_v27, 0  ;;  %vm1395_vm1 = vcmp.ne.s16.totalorder %v1393_v20, 0  ;;  %v1400_v36 = vsel %vm1394_vm14, %v1916_v25, 0 }
  0xad   : > { %761 = vrot.lane.b32.xlu1 %v1675_v51, %s1822_s8  ;;  %1657 = vmatmul.mubr.msk.bf16.vlgmr.msra.gmra.mxu1 %vm343_vm8, %v1650_v45  ;;  %v1694_v18 = vcombine.low %v1139_v15, %v1142_v16  ;;  %v1695_v21 = vcombine.high %v1139_v15, %v1142_v16  ;;  %v1401_v35 = vsel %vm1395_vm1, %v1920_v27, 0  ;;  %v1707_v27 = vcombine.low %v1399_v37, %v1402_v0  ;;  %v872_v25 = vpop.permute.xlu0 %871 }
  0xae   : > { %1656 = vmatmul.mubr.msk.bf16.vlgmr.msra.gmra.mxu0 %vm343_vm8, %v1650_v45  ;;  %508 = vmatpush1.bf16.msra.mxu1 %v1660_v52  ;;  %v1703_v24 = vcombine.low %v1397_v22, %v1400_v36  ;;  %v879_v59 = vsel %vm877_vm5, %v870_v30, %v872_v25 }
  0xaf   : > { %467 = vmatpush1.bf16.msra.mxu0 %v1658_v46  ;;  %484 = vmatprep.mubr.bf16.mxu0 %v1813_v1 }
  0xb0   : > { %1019 = vrot.lane.b32.xlu0 %v1685_v48, %s1823_s11  ;;  %525 = vmatprep.mubr.bf16.mxu1 %v1813_v1 }
  0xb1   : > { %867 = vrot.lane.b32.xlu1 %v1947_v34, %s1820_s6 }
  0xb4   : > { %1017 = vrot.lane.b32.xlu0 %v1684_v57, %s1823_s11 }
  0xb5   : > { %1025 = vrot.lane.b32.xlu1 %v1688_v63, %s1823_s11  ;;  %1663 = vmatmul.mubr.msk.bf16.vlgmr.msra.gmra.mxu1 %vm343_vm8, %v300_v50 }
  0xb6   : > { %1662 = vmatmul.mubr.msk.bf16.vlgmr.msra.gmra.mxu0 %vm343_vm8, %v300_v50  ;;  %700 = vmatprep.mubr.bf16.mxu1 %v1813_v1 }
  0xb7   : > { %659 = vmatprep.mubr.bf16.mxu0 %v1813_v1 }
  0xb8   : > { %1175 = vrot.lane.b32.xlu0 %v1696_v2, %s1817_s30 }
  0xb9   : > { %1169 = vrot.lane.b32.xlu1 %v1693_v10, %s1817_s30 }
  0xbc   : > { %1023 = vrot.lane.b32.xlu0 %v1687_v11, %s1823_s11 }
  0xbd   : > { %1021 = vrot.lane.b32.xlu1 %v1686_v14, %s1823_s11  ;;  %v1683_v14 = vld [vmem:[%s2186_s1 + $0x14] sm:$0xf] }
  0xc0   : > { %1278 = vrot.lane.b32.xlu0 %v1924_v28, %s1824_s21  ;;  %v1398_v28 = vsel %vm1395_vm1, %v1918_v26, 0  ;;  %v1704_v26 = vcombine.high %v1397_v22, %v1400_v36 }
  0xc1   : > { %1167 = vrot.lane.b32.xlu1 %v1692_v17, %s1817_s30  ;;  %v1705_v3 = vcombine.low %v1398_v28, %v1401_v35 }
  0xc4   : > { %1171 = vrot.lane.b32.xlu0 %v1694_v18, %s1817_s30 }
  0xc5   : > { %1173 = vrot.lane.b32.xlu1 %v1695_v21, %s1817_s30 }
  0xc8   : > { %1282 = vrot.lane.b32.xlu0 %v1937_v32, %s1824_s21  ;;  %v1534_v32 = vld [vmem:[%s2187_s2] sm:$0xff] }
  0xc9   : > { %1280 = vrot.lane.b32.xlu1 %v1928_v29, %s1824_s21  ;;  %v1706_v29 = vcombine.high %v1398_v28, %v1401_v35  ;;  %v1691_v28 = vld [vmem:[%s2186_s1 + $0x18] sm:$0xf] }
  0xcc   : > { %1276 = vrot.lane.b32.xlu0 %v1947_v34, %s1824_s21 }
  0xcd   : > { %1284 = vrot.lane.b32.xlu1 %v1942_v33, %s1824_s21 }
  0xd0   : > { %1430 = vrot.lane.b32.xlu0 %v1705_v3, %s1825_s22 }
  0xd1   : > { %1428 = vrot.lane.b32.xlu1 %v1704_v26, %s1825_s22 }
  0xd4   : > { %1434 = vrot.lane.b32.xlu0 %v1707_v27, %s1825_s22 }
  0xd5   : > { %1432 = vrot.lane.b32.xlu1 %v1706_v29, %s1825_s22  ;;  %v1699_v29 = vld [vmem:[%s2186_s1 + $0x1c] sm:$0xf] }
  0xd8   : > { %1537 = vperm.xlu0 %1767, %v1534_v32  }
  0xd9   : > { %1426 = vrot.lane.b32.xlu1 %v1703_v24, %s1825_s22 }
 0x10a   : > { %v614_v31 = vpop.permute.xlu0 %613 }
 0x10b   : > { %v766_v34 = vpop.permute.xlu1 %765 }
 0x10e   : > { %v760_v33 = vpop.permute.xlu0 %759 }
 0x10f   : > { %v608_v38 = vpop.permute.xlu1 %607 }
 0x112   : > { %v758_v19 = vpop.permute.xlu0 %757 }
 0x113   : > { %v606_v39 = vpop.permute.xlu1 %605  ;;  %v768_v56 = vsel %vm767_vm4, %v758_v19, %v760_v33 }
 0x114   : > { %v616_v42 = vsel %vm615_vm3, %v606_v39, %v608_v38 }
 0x116   : > { %v610_v40 = vpop.permute.xlu0 %609 }
 0x117   : > { %v617_v41 = vsel %vm615_vm3, %v608_v38, %v610_v40  ;;  %v612_v43 = vpop.permute.xlu1 %611 }
 0x118   : > { %641 = vmatprep.subr.bf16.mxu0 %v617_v41  ;;  %v618_v45 = vsel %vm615_vm3, %v610_v40, %v612_v43  ;;  %v619_v46 = vsel %vm615_vm3, %v612_v43, %v614_v31 }
 0x119   : > { %642 = vmatpush1.bf16.msra.mxu0 %v616_v42  ;;  %682 = vmatprep.subr.bf16.mxu1 %v619_v46 }
 0x11a   : > { %v876_v47 = vpop.permute.xlu0 %875  ;;  %683 = vmatpush1.bf16.msra.mxu1 %v618_v45 }
 0x11b   : > { %v874_v48 = vpop.permute.xlu1 %873 }
 0x11c   : > { %1670 = vmatmul.mubr.msk.bf16.vlgmr.msra.gmra.mxu0 %vm343_vm8, %v1664_v44  ;;  %v881_v58 = vsel %vm877_vm5, %v874_v48, %v876_v47  ;;  %v880_v50 = vsel %vm877_vm5, %v872_v25, %v874_v48 }
 0x11d   : > { %811 = vmatprep.mubr.bf16.mxu0 %v1813_v1  ;;  %1671 = vmatmul.mubr.msk.bf16.vlgmr.msra.gmra.mxu1 %vm343_vm8, %v1664_v44 }
 0x11e   : > { %v764_v49 = vpop.permute.xlu0 %763  ;;  %852 = vmatprep.mubr.bf16.mxu1 %v1813_v1 }
 0x11f   : > { %v771_v51 = vsel %vm767_vm4, %v764_v49, %v766_v34  ;;  %v762_v52 = vpop.permute.xlu1 %761 }
 0x120   : > { %834 = vmatprep.subr.bf16.mxu1 %v771_v51  ;;  %v770_v53 = vsel %vm767_vm4, %v762_v52, %v764_v49  ;;  %v769_v54 = vsel %vm767_vm4, %v760_v33, %v762_v52  ;;  %v1702_v33 = vld [vmem:[%s2186_s1 + $0x20] sm:$0xf] }
 0x121   : > { %793 = vmatprep.subr.bf16.mxu0 %v769_v54  ;;  %835 = vmatpush1.bf16.msra.mxu1 %v770_v53 }
 0x122   : > { %v1020_v55 = vpop.permute.xlu0 %1019  ;;  %794 = vmatpush1.bf16.msra.mxu0 %v768_v56  ;;  %944 = vmatprep.subr.bf16.mxu1 %v881_v58 }
 0x123   : > { %v868_v62 = vpop.permute.xlu1 %867  ;;  %903 = vmatprep.subr.bf16.mxu0 %v879_v59 }
 0x124   : > { %v878_v57 = vsel %vm877_vm5, %v868_v62, %v870_v30 }
 0x125   : > { %1678 = vmatmul.mubr.msk.bf16.vlgmr.msra.gmra.mxu0 %vm343_vm8, %v1672_v60  ;;  %1679 = vmatmul.mubr.msk.bf16.vlgmr.msra.gmra.mxu1 %vm343_vm8, %v1672_v60 }
 0x126   : > { %v1018_v63 = vpop.permute.xlu0 %1017  ;;  %904 = vmatpush1.bf16.msra.mxu0 %v878_v57  ;;  %945 = vmatpush1.bf16.msra.mxu1 %v880_v50 }
 0x127   : > { %v1026_v2 = vpop.permute.xlu1 %1025  ;;  %921 = vmatprep.mubr.bf16.mxu0 %v1813_v1  ;;  %962 = vmatprep.mubr.bf16.mxu1 %v1813_v1  ;;  %v1028_v13 = vsel %vm1027_vm6, %v1018_v63, %v1020_v55 }
 0x12a   : > { %v1176_v4 = vpop.permute.xlu0 %1175 }
 0x12b   : > { %v1170_v6 = vpop.permute.xlu1 %1169 }
 0x12d   : > { %1681 = vmatmul.mubr.msk.bf16.vlgmr.msra.gmra.mxu0 %vm343_vm8, %v1680_v5  ;;  %1682 = vmatmul.mubr.msk.bf16.vlgmr.msra.gmra.mxu1 %vm343_vm8, %v1680_v5 }
 0x12e   : > { %v1024_v7 = vpop.permute.xlu0 %1023  ;;  %1071 = vmatprep.mubr.bf16.mxu0 %v1813_v1  ;;  %1112 = vmatprep.mubr.bf16.mxu1 %v1813_v1 }
 0x12f   : > { %v1031_v8 = vsel %vm1027_vm6, %v1024_v7, %v1026_v2  ;;  %v1022_v9 = vpop.permute.xlu1 %1021 }
 0x130   : > { %1094 = vmatprep.subr.bf16.mxu1 %v1031_v8  ;;  %v1030_v10 = vsel %vm1027_vm6, %v1022_v9, %v1024_v7  ;;  %v1029_v11 = vsel %vm1027_vm6, %v1020_v55, %v1022_v9 }
 0x131   : > { %1053 = vmatprep.subr.bf16.mxu0 %v1029_v11  ;;  %1095 = vmatpush1.bf16.msra.mxu1 %v1030_v10 }
 0x132   : > { %v1279_v12 = vpop.permute.xlu0 %1278  ;;  %1054 = vmatpush1.bf16.msra.mxu0 %v1028_v13 }
 0x133   : > { %v1168_v15 = vpop.permute.xlu1 %1167 }
 0x134   : > { %v1177_v17 = vsel %vm1131_vm10, %v1168_v15, %v1170_v6 }
 0x135   : > { %1689 = vmatmul.mubr.msk.bf16.vlgmr.msra.gmra.mxu0 %vm343_vm8, %v1683_v14  ;;  %1690 = vmatmul.mubr.msk.bf16.vlgmr.msra.gmra.mxu1 %vm343_vm8, %v1683_v14 }
 0x136   : > { %v1172_v16 = vpop.permute.xlu0 %1171  ;;  %1220 = vmatprep.mubr.bf16.mxu0 %v1813_v1  ;;  %1261 = vmatprep.mubr.bf16.mxu1 %v1813_v1 }
 0x137   : > { %v1178_v61 = vsel %vm1131_vm10, %v1170_v6, %v1172_v16  ;;  %v1174_v18 = vpop.permute.xlu1 %1173 }
 0x138   : > { %1202 = vmatprep.subr.bf16.mxu0 %v1178_v61  ;;  %v1179_v20 = vsel %vm1131_vm10, %v1172_v16, %v1174_v18  ;;  %v1180_v21 = vsel %vm1131_vm10, %v1174_v18, %v1176_v4 }
 0x139   : > { %1203 = vmatpush1.bf16.msra.mxu0 %v1177_v17  ;;  %1243 = vmatprep.subr.bf16.mxu1 %v1180_v21 }
 0x13a   : > { %v1283_v23 = vpop.permute.xlu0 %1282  ;;  %1244 = vmatpush1.bf16.msra.mxu1 %v1179_v20 }
 0x13b   : > { %v1281_v35 = vpop.permute.xlu1 %1280 }
 0x13c   : > { %v1288_v3 = vsel %vm1286_vm7, %v1279_v12, %v1281_v35  ;;  %v1289_v27 = vsel %vm1286_vm7, %v1281_v35, %v1283_v23 }
 0x13d   : > { %1697 = vmatmul.mubr.msk.bf16.vlgmr.msra.gmra.mxu0 %vm343_vm8, %v1691_v28  ;;  %1698 = vmatmul.mubr.msk.bf16.vlgmr.msra.gmra.mxu1 %vm343_vm8, %v1691_v28 }
 0x13e   : > { %v1277_v22 = vpop.permute.xlu0 %1276  ;;  %1312 = vmatprep.subr.bf16.mxu0 %v1288_v3  ;;  %1330 = vmatprep.mubr.bf16.mxu0 %v1813_v1 }
 0x13f   : > { %v1287_v36 = vsel %vm1286_vm7, %v1277_v22, %v1279_v12  ;;  %v1285_v37 = vpop.permute.xlu1 %1284  ;;  %1371 = vmatprep.mubr.bf16.mxu1 %v1813_v1 }
 0x140   : > { %1313 = vmatpush1.bf16.msra.mxu0 %v1287_v36  ;;  %v1290_v0 = vsel %vm1286_vm7, %v1283_v23, %v1285_v37 }
 0x141   : > { %1353 = vmatprep.subr.bf16.mxu1 %v1290_v0 }
 0x142   : > { %v1431_v26 = vpop.permute.xlu0 %1430  ;;  %1354 = vmatpush1.bf16.msra.mxu1 %v1289_v27 }
 0x143   : > { %v1429_v32 = vpop.permute.xlu1 %1428 }
 0x144   : > { %v1438_v24 = vsel %vm1436_vm9, %v1429_v32, %v1431_v26 }
 0x145   : > { %1700 = vmatmul.mubr.msk.bf16.vlgmr.msra.gmra.mxu0 %vm343_vm8, %v1699_v29  ;;  %1701 = vmatmul.mubr.msk.bf16.vlgmr.msra.gmra.mxu1 %vm343_vm8, %v1699_v29 }
 0x146   : > { %v1435_v25 = vpop.permute.xlu0 %1434  ;;  %1462 = vmatprep.subr.bf16.mxu0 %v1438_v24  ;;  %1521 = vmatprep.mubr.bf16.mxu1 %v1813_v1 }
 0x147   : > { %v1433_v30 = vpop.permute.xlu1 %1432  ;;  %1480 = vmatprep.mubr.bf16.mxu0 %v1813_v1 }
 0x148   : > { %v1439_v31 = vsel %vm1436_vm9, %v1431_v26, %v1433_v30  ;;  %v1440_v34 = vsel %vm1436_vm9, %v1433_v30, %v1435_v25 }
 0x149   : > { %1503 = vmatprep.subr.bf16.mxu1 %v1440_v34 }
 0x14a   : > { %1504 = vmatpush1.bf16.msra.mxu1 %v1439_v31 }
 0x14b   : > { %v1427_v38 = vpop.permute.xlu1 %1426 }
 0x14c   : > { %v1437_v19 = vsel %vm1436_vm9, %v1427_v38, %v1429_v32 }
 0x14d   : > { %1463 = vmatpush1.bf16.msra.mxu0 %v1437_v19  ;;  %1709 = vmatmul.mubr.msk.bf16.vlgmr.msra.gmra.mxu1 %vm343_vm8, %v1702_v33 }
 0x150   : > { %1708 = vmatmul.mubr.msk.bf16.vlgmr.msra.gmra.mxu0 %vm343_vm8, %v1702_v33 }
 0x16d   : > { %v422_v1 = vpop.f32.mrf.mxu1 }
 0x16e   : > { %v381_v39 = vpop.f32.mrf.mxu0 }
 0x16f   : > { %v424_v41 = vpop.f32.mrf.mxu1 }
 0x170   : > { %v383_v40 = vpop.f32.mrf.mxu0 }
 0x171   : > { %v426_v43 = vpop.f32.mrf.mxu1 }
 0x172   : > { %v385_v42 = vpop.f32.mrf.mxu0 }
 0x173   : > { %v427_v45 = vpop.f32.mrf.mxu1 }
 0x174   : > { %v386_v44 = vpop.f32.mrf.mxu0 }
 0x175   : > { %v527_v48 = vpop.f32.mrf.mxu1 }
 0x176   : > { %v486_v46 = vpop.f32.mrf.mxu0  ;;  %v528_v51 = vadd.f32 %v527_v48, %v422_v1 }
 0x177   : > { %v487_v47 = vadd.f32 %v486_v46, %v381_v39  ;;  %v529_v53 = vpop.f32.mrf.mxu1 }
 0x178   : > { %v488_v49 = vpop.f32.mrf.mxu0  ;;  %v530_v55 = vadd.f32 %v529_v53, %v424_v41 }
 0x179   : > { %v489_v52 = vadd.f32 %v488_v49, %v383_v40  ;;  %v531_v56 = vpop.f32.mrf.mxu1 }
 0x17a   : > { %v490_v54 = vpop.f32.mrf.mxu0 }
 0x17b   : > { %v532_v59 = vpop.f32.mrf.mxu1 }
 0x17c   : > { %v491_v58 = vpop.f32.mrf.mxu0 }
 0x1dc   : > { %v661_v60 = vpop.f32.mrf.mxu0 }
 0x1dd   : > { %v702_v57 = vpop.f32.mrf.mxu1  ;;  %v709_v19 = vadd.f32 %v661_v60, %v487_v47 }
 0x1de   : > { %v663_v62 = vpop.f32.mrf.mxu0  ;;  %v711_v30 = vadd.f32 %v702_v57, %v528_v51 }
 0x1df   : > { %v704_v50 = vpop.f32.mrf.mxu1  ;;  %v710_v42 = vadd.f32 %v663_v62, %v489_v52 }
 0x1e0   : > { %v665_v63 = vpop.f32.mrf.mxu0  ;;  %v712_v33 = vadd.f32 %v704_v50, %v530_v55 }
 0x1e1   : > { %v706_v4 = vpop.f32.mrf.mxu1 }
 0x1e2   : > { %v666_v2 = vpop.f32.mrf.mxu0 }
 0x1e3   : > { %v707_v5 = vpop.f32.mrf.mxu1  ;;  %v1538_v2 = vpop.permute.xlu0 %1537 }
 0x1e5   : > { %v813_v6 = vpop.f32.mrf.mxu0  ;;  %v854_v7 = vpop.f32.mrf.mxu1 }
 0x1e6   : > { %v863_v38 = vadd.f32 %v854_v7, %v711_v30  ;;  %v861_v43 = vadd.f32 %v813_v6, %v709_v19 }
 0x1e7   : > { %v815_v8 = vpop.f32.mrf.mxu0  ;;  %v856_v9 = vpop.f32.mrf.mxu1 }
 0x1e8   : > { %v864_v40 = vadd.f32 %v856_v9, %v712_v33  ;;  %v862_v49 = vadd.f32 %v815_v8, %v710_v42 }
 0x1e9   : > { %v817_v10 = vpop.f32.mrf.mxu0  ;;  %v858_v11 = vpop.f32.mrf.mxu1 }
 0x1eb   : > { %v818_v12 = vpop.f32.mrf.mxu0  ;;  %v859_v13 = vpop.f32.mrf.mxu1 }
 0x1ed   : > { %v923_v14 = vpop.f32.mrf.mxu0  ;;  %v964_v15 = vpop.f32.mrf.mxu1 }
 0x1ee   : > { %v973_v41 = vadd.f32 %v964_v15, %v863_v38  ;;  %v971_v53 = vadd.f32 %v923_v14, %v861_v43 }
 0x1ef   : > { %v925_v16 = vpop.f32.mrf.mxu0  ;;  %v966_v61 = vpop.f32.mrf.mxu1 }
 0x1f0   : > { %v974_v46 = vadd.f32 %v966_v61, %v864_v40  ;;  %v972_v47 = vadd.f32 %v925_v16, %v862_v49 }
 0x1f1   : > { %v927_v17 = vpop.f32.mrf.mxu0  ;;  %v968_v18 = vpop.f32.mrf.mxu1 }
 0x1f3   : > { %v928_v20 = vpop.f32.mrf.mxu0  ;;  %v969_v21 = vpop.f32.mrf.mxu1 }
 0x1f5   : > { %v1073_v23 = vpop.f32.mrf.mxu0  ;;  %v1114_v28 = vpop.f32.mrf.mxu1 }
 0x1f6   : > { %v1123_v48 = vadd.f32 %v1114_v28, %v973_v41  ;;  %v1121_v58 = vadd.f32 %v1073_v23, %v971_v53 }
 0x1f7   : > { %v1075_v35 = vpop.f32.mrf.mxu0  ;;  %v1116_v3 = vpop.f32.mrf.mxu1 }
 0x1f8   : > { %v1124_v55 = vadd.f32 %v1116_v3, %v974_v46  ;;  %v1122_v52 = vadd.f32 %v1075_v35, %v972_v47 }
 0x1f9   : > { %v1077_v22 = vpop.f32.mrf.mxu0  ;;  %v1118_v36 = vpop.f32.mrf.mxu1 }
 0x1fb   : > { %v1078_v37 = vpop.f32.mrf.mxu0  ;;  %v1119_v0 = vpop.f32.mrf.mxu1 }
 0x1fd   : > { %v1222_v26 = vpop.f32.mrf.mxu0  ;;  %v1263_v27 = vpop.f32.mrf.mxu1 }
 0x1fe   : > { %v1272_v56 = vadd.f32 %v1263_v27, %v1123_v48  ;;  %v1270_v62 = vadd.f32 %v1222_v26, %v1121_v58 }
 0x1ff   : > { %v1224_v29 = vpop.f32.mrf.mxu0  ;;  %v1265_v32 = vpop.f32.mrf.mxu1 }
 0x200   : > { %v1273_v57 = vadd.f32 %v1265_v32, %v1124_v55  ;;  %v1271_v6 = vadd.f32 %v1224_v29, %v1122_v52 }
 0x201   : > { %v1226_v24 = vpop.f32.mrf.mxu0  ;;  %v1267_v25 = vpop.f32.mrf.mxu1 }
 0x203   : > { %v1227_v31 = vpop.f32.mrf.mxu0  ;;  %v1268_v34 = vpop.f32.mrf.mxu1 }
 0x205   : > { %v1332_v39 = vpop.f32.mrf.mxu0  ;;  %v1373_v1 = vpop.f32.mrf.mxu1 }
 0x206   : > { %v1382_v63 = vadd.f32 %v1373_v1, %v1272_v56  ;;  %v1380_v7 = vadd.f32 %v1332_v39, %v1270_v62 }
 0x207   : > { %v1334_v44 = vpop.f32.mrf.mxu0  ;;  %v1375_v45 = vpop.f32.mrf.mxu1 }
 0x208   : > { %v1383_v4 = vadd.f32 %v1375_v45, %v1273_v57  ;;  %v1381_v12 = vadd.f32 %v1334_v44, %v1271_v6 }
 0x209   : > { %v1377_v51 = vpop.f32.mrf.mxu1  ;;  %v1336_v54 = vpop.f32.mrf.mxu0 }
 0x20b   : > { %v1378_v59 = vpop.f32.mrf.mxu1  ;;  %v1337_v60 = vpop.f32.mrf.mxu0 }
 0x20d   : > { %v1523_v50 = vpop.f32.mrf.mxu1 }
 0x20e   : > { %v1532_v5 = vadd.f32 %v1523_v50, %v1382_v63 }
 0x20f   : > { %v1525_v8 = vpop.f32.mrf.mxu1 }
 0x210   : > { %v1533_v9 = vadd.f32 %v1525_v8, %v1383_v4  ;;  %v1542_v10 = vadd.f32 %v1538_v2, %v1532_v5  ;;  %v1482_v11 = vpop.f32.mrf.mxu0 }
 0x211   : > { %v1530_v13 = vadd.f32 %v1482_v11, %v1380_v7  ;;  %v1527_v14 = vpop.f32.mrf.mxu1 }
 0x212   : > { %v1543_v15 = vadd.f32 %v1538_v2, %v1533_v9  ;;  %1546 = vst [vmem:[%s206_s23 + $0x10] sm:$0xff] %v1542_v10  ;;  %v1484_v16 = vpop.f32.mrf.mxu0 }
 0x213   : > { %v1540_v61 = vadd.f32 %v1538_v2, %v1530_v13  ;;  %v1531_v17 = vadd.f32 %v1484_v16, %v1381_v12  ;;  %v1528_v18 = vpop.f32.mrf.mxu1 }
 0x214   : > { %1547 = vst [vmem:[%s206_s23 + $0x18] sm:$0xff] %v1543_v15  ;;  %v1486_v20 = vpop.f32.mrf.mxu0 }
 0x215   : > { %1544 = vst [vmem:[%s206_s23] sm:$0xff] %v1540_v61  ;;  %v1541_v21 = vadd.f32 %v1538_v2, %v1531_v17 }
 0x216   : > { %v1487_v23 = vpop.f32.mrf.mxu0 }
 0x217   : > { %1545 = vst [vmem:[%s206_s23 + $0x8] sm:$0xff] %v1541_v21 }
 0x218 PF: > { %s13_s16 = sadd.s32 1, %s1811_s16   ;;  %s2197_s12 = smov %s1803_s14 }
 0x219   : > { %p10_p8 = scmp.ge.s32.totalorder %s13_s16, 6   ;;  %s2198_s13 = smov %s1807_s15 }
 0x21a   : > { %s2199_s14 = smov %s2202_s17  ;;  %s2200_s15 = smov %s2206_s18 }
 0x21b   :  { %12 = sbr.rel (!%p10_p8) target bundleno = 3 (0x3), region = 70 }

</bundles_post_ra>
